<compile_context>
chip_gen: v5e
topology: v5e:2x2
jax: 0.10.0
libtpu: 0.0.40
codegen_flags: <defaults>
</compile_context>

<pallas_src>
import jax
import jax.numpy as jnp
from jax.experimental import pallas as pl
from jax.experimental.pallas import tpu as pltpu

NEG_SLOPE = 0.01   # default negative_slope of F.leaky_relu / nn.LeakyReLU
HIDP = 128         # edge-MLP hidden width padded to one full lane group
LANE = 128         # lane-dense output width


def _leaky(v):
    return jnp.where(v > 0, v, NEG_SLOPE * v)


def _round_up(a, m):
    return (a + m - 1) // m * m


# ----------------------------------------------------------------------------
# Host-side parameter packing
# ----------------------------------------------------------------------------
def _prep_layer_params(layer_params, foutp):
    """Pad the edge-MLP hidden width to 128 lanes, fold b2 into the bilinear weights via a
    constant-1 marker column in h, and reshape w2 so the per-edge bilinear contraction is
    ONE matmul with K = fin*128 (slab column i*128+k  <->  w2r row i*128+k)."""
    w1, b1, w2, b2, root, bias = (a.astype(jnp.float32) for a in layer_params)
    de, hid = w1.shape
    fin, fout = root.shape

    w1p = jnp.zeros((de, HIDP), jnp.float32).at[:, :hid].set(w1)
    b1p = jnp.zeros((1, HIDP), jnp.float32).at[:, :hid].set(b1)
    b1p = b1p.at[0, hid].set(1.0)            # h[:, hid] == leaky_relu(1) == 1 -> carries b2

    # w2rp[i*128 + k,   o] = w2[k, i*fout + o]   (k < hid)
    # w2rp[i*128 + hid, o] = b2[i*fout + o]
    w2r3 = w2.reshape(hid, fin, fout).transpose(1, 0, 2)            # [fin, hid, fout]
    b2r3 = b2.reshape(1, fin, fout).transpose(1, 0, 2)              # [fin, 1,   fout]
    zpad = jnp.zeros((fin, HIDP - hid - 1, fout), jnp.float32)
    w2rp = jnp.concatenate([w2r3, b2r3, zpad], axis=1).reshape(fin * HIDP, fout)
    w2rp = jnp.pad(w2rp, ((0, 0), (0, foutp - fout)))

    rb = jnp.concatenate([root, bias], axis=0)                      # rows 0..fin-1 root, row fin bias
    rb = jnp.pad(rb, ((0, _round_up(fin + 1, 8) - (fin + 1)), (0, foutp - fout)))
    return w1p, b1p, w2rp, rb


# ----------------------------------------------------------------------------
# Fused forward: conv1 -> lrelu -> conv2 -> lrelu -> conv3 -> lrelu -> gumbel(hard)
# ----------------------------------------------------------------------------
def graph_ecc_forward(x, edge_index, edge_attr, params, gumbel_uniform):
    N, F0 = x.shape
    E, De = edge_attr.shape
    ncls = gumbel_uniform.shape[1]
    assert ncls == F0, "conv3 output width must equal the gumbel width (node_dims)"
    FOUTP = 64                       # conv1/conv2 width; conv3's node_dims cols are zero-padded
    assert F0 <= FOUTP

    Np = pl.cdiv(N, 8) * 8
    Ep = pl.cdiv(E, 8) * 8
    fins = (F0, 64 + F0, 64 + F0)

    # -------- host-side packing (7 dense DMAs instead of ~24 narrow ones) --------
    x_p = jnp.pad(x.astype(jnp.float32), ((0, Np - N), (0, 0)))
    u_p = jnp.pad(gumbel_uniform.astype(jnp.float32), ((0, Np - N), (0, 0)),
                  constant_values=0.5)
    xu_pack = jnp.concatenate([x_p, u_p], axis=1)                            # [Np, F0+ncls]
    ea_p = jnp.pad(edge_attr.astype(jnp.float32), ((0, Ep - E), (0, 0)))     # [Ep, De]
    # padded edges point at node Np (out of range) -> all-zero one-hot rows/cols
    src_col = jnp.pad(edge_index[0].astype(jnp.int32), (0, Ep - E),
                      constant_values=Np)[:, None]                           # [Ep, 1]
    dst_row = jnp.pad(edge_index[1].astype(jnp.int32), (0, Ep - E),
                      constant_values=Np)[None, :]                           # [1, Ep]

    MB = _round_up(De + 1, 8)                   # per-layer rows in the edge-MLP pack
    mlp_blocks, w2_blocks, rb_blocks = [], [], []
    for name in ("conv1", "conv2", "conv3"):
        w1p, b1p, w2rp, rb = _prep_layer_params(params[name], FOUTP)
        blk = jnp.zeros((MB, HIDP), jnp.float32)
        blk = blk.at[:De, :].set(w1p).at[De:De + 1, :].set(b1p)
        mlp_blocks.append(blk)
        w2_blocks.append(w2rp)
        rb_blocks.append(rb)
    mlp_pack = jnp.concatenate(mlp_blocks, axis=0)                           # [3*MB, 128]
    w2r_pack = jnp.concatenate(w2_blocks, axis=0)                            # [sum fin*128, 64]
    rb_pack = jnp.concatenate(rb_blocks, axis=0)                             # [sum rup(fin+1,8), 64]

    w2_off = (0, fins[0] * HIDP, (fins[0] + fins[1]) * HIDP)
    rb_rows = tuple(_round_up(f + 1, 8) for f in fins)
    rb_off = (0, rb_rows[0], rb_rows[0] + rb_rows[1])

    # -------- fused kernel --------
    def kernel(src_ref, dst_ref, ea_ref, xu_ref, mlp_ref, w2r_ref, rb_ref, o_ref):
        ea = ea_ref[...]                                     # [Ep, De]
        xuv = xu_ref[...]                                    # [Np, F0+ncls]
        x0 = xuv[:, :F0]
        u = xuv[:, F0:F0 + ncls]

        # one-hot gather/scatter + inverse degree built in-VMEM from int ids (exact).
        node_lane = jax.lax.broadcasted_iota(jnp.int32, (Ep, Np), 1)
        gsrc = (src_ref[...] == node_lane).astype(jnp.float32)               # [Ep, Np]
        node_sub = jax.lax.broadcasted_iota(jnp.int32, (Np, Ep), 0)
        sdst = (dst_ref[...] == node_sub).astype(jnp.float32)                # [Np, Ep]
        deg = jnp.sum(sdst, axis=1, keepdims=True)
        invdeg = 1.0 / jnp.maximum(deg, 1.0)                                 # aggr='mean'

        x0_src = jnp.dot(gsrc, x0, preferred_element_type=jnp.float32)       # [Ep, F0], reused

        def nnconv(layer, parts):
            # parts = [(node feats [Np,f], per-edge source feats [Ep,f]), ...] in the same
            # order as the PyTorch concat([d, x0]); fin = sum f.
            fin = sum(p[1].shape[1] for p in parts)
            blk = mlp_ref[layer * MB:(layer + 1) * MB, :]
            # edge MLP Linear1 + LeakyReLU; column `hid` of b1p is 1 so h carries b2
            # through the bilinear matmul below.
            h = _leaky(jnp.dot(ea, blk[:De, :], preferred_element_type=jnp.float32)
                       + blk[De:De + 1, :])                                  # [Ep, 128]
            # slab[:, i*128 + k] = x_src[:, i] * h[:, k]; every chunk is a full 128-lane
            # block -> aligned concat, no relayout / masked stores.
            chunks = []
            for _, src_f in parts:
                for i in range(src_f.shape[1]):
                    chunks.append(h * src_f[:, i:i + 1])
            slab = jnp.concatenate(chunks, axis=1)                           # [Ep, fin*128]
            # ONE large-K MXU matmul per layer (b2 folded in via the marker column).
            w2r = w2r_ref[w2_off[layer]:w2_off[layer] + fin * HIDP, :]
            msg = jnp.dot(slab, w2r, preferred_element_type=jnp.float32)     # [Ep, 64]
            # scatter-mean at target nodes; everything stays f32 (no bf16 drift on msg).
            agg = jnp.dot(sdst, msg, preferred_element_type=jnp.float32) * invdeg
            rb = rb_ref[rb_off[layer]:rb_off[layer] + rb_rows[layer], :]
            out = agg + rb[fin:fin + 1, :]                                   # + bias
            r0 = 0
            for node_f, _ in parts:                                          # + x @ W_root
                f = node_f.shape[1]
                out = out + jnp.dot(node_f, rb[r0:r0 + f, :],
                                    preferred_element_type=jnp.float32)
                r0 += f
            return _leaky(out)                                               # [Np, 64]

        # [d_i, x0] concats are never materialized: d and x0 stay separate blocks.
        d1 = nnconv(0, [(x0, x0_src)])
        d1_src = jnp.dot(gsrc, d1, preferred_element_type=jnp.float32)
        d2 = nnconv(1, [(d1, d1_src), (x0, x0_src)])
        d2_src = jnp.dot(gsrc, d2, preferred_element_type=jnp.float32)
        d3 = nnconv(2, [(d2, d2_src), (x0, x0_src)])                         # cols >= ncls are 0

        # F.gumbel_softmax(logits, tau=-1, hard=True) forward: one-hot at
        # argmax((logits + g) / tau), first index wins ties.
        g = -jnp.log(-jnp.log(u))
        z = -(d3[:, :ncls] + g)                                              # tau = -1
        m = jnp.max(z, axis=1, keepdims=True)
        col = jax.lax.broadcasted_iota(jnp.int32, (Np, ncls), 1)
        first = jnp.min(jnp.where(z == m, col, ncls), axis=1, keepdims=True)
        col_pad = jax.lax.broadcasted_iota(jnp.int32, (Np, LANE), 1)
        o_ref[...] = (col_pad == first).astype(jnp.float32)                  # lane-dense one-hot

    args = (src_col, dst_row, ea_p, xu_pack, mlp_pack, w2r_pack, rb_pack)

    def _spec(a):
        nd = a.ndim
        # grid=(1,): nothing to overlap, so single-buffer every window (halves VMEM).
        return pl.BlockSpec(a.shape, lambda i: (0,) * nd,
                            pipeline_mode=pl.Buffered(1))

    out_padded = pl.pallas_call(
        kernel,
        grid=(1,),
        in_specs=[_spec(a) for a in args],
        out_specs=pl.BlockSpec((Np, LANE), lambda i: (0, 0),
                               pipeline_mode=pl.Buffered(1)),
        out_shape=jax.ShapeDtypeStruct((Np, LANE), jnp.float32),
        compiler_params=pltpu.CompilerParams(
            dimension_semantics=("arbitrary",),
            # 32 MiB is safe on v7x (64 MiB physical); raise toward ~96-112 MiB on
            # v5e/v6e (128 MiB) to keep larger graphs fully VMEM-resident.
            vmem_limit_bytes=32 * 1024 * 1024),
    )(*args)
    return out_padded[:N, :ncls]


# ----------------------------------------------------------------------------
# Parameter construction (deterministic, PyTorch-Linear-style uniform init)
# ----------------------------------------------------------------------------
def _init_linear(key, fan_in, fan_out):
    k1, k2 = jax.random.split(key)
    bound = 1.0 / jnp.sqrt(jnp.float32(fan_in))
    w = jax.random.uniform(k1, (fan_in, fan_out), jnp.float32, -bound, bound)
    b = jax.random.uniform(k2, (1, fan_out), jnp.float32, -bound, bound)
    return w, b


def make_nnconv_params(key, fin, fout, hidden, edge_dims):
    k1, k2, k3, k4 = jax.random.split(key, 4)
    w1, b1 = _init_linear(k1, edge_dims, hidden)          # Linear(edge_dims, hidden)
    w2, b2 = _init_linear(k2, hidden, fin * fout)         # Linear(hidden, fin*fout)
    bound = 1.0 / jnp.sqrt(jnp.float32(fin))
    root = jax.random.uniform(k3, (fin, fout), jnp.float32, -bound, bound)
    bias = jax.random.uniform(k4, (1, fout), jnp.float32, -bound, bound)
    return (w1, b1, w2, b2, root, bias)


def make_graph_ecc_params(key, node_dims, edge_dims):
    k1, k2, k3 = jax.random.split(key, 3)
    return {
        "conv1": make_nnconv_params(k1, node_dims, 64, 32, edge_dims),
        "conv2": make_nnconv_params(k2, 64 + node_dims, 64, 48, edge_dims),
        "conv3": make_nnconv_params(k3, 64 + node_dims, node_dims, 64, edge_dims),
    }


if __name__ == "__main__":
    node_dims = 4
    edge_dims = 6
    N = 8      # nodes
    E = 16     # edges

    key = jax.random.PRNGKey(0)
    kx, kei, kea, kg, kp = jax.random.split(key, 5)

    x = jax.random.normal(kx, (N, node_dims), jnp.float32)
    edge_index = jax.random.randint(kei, (2, E), 0, N, jnp.int32)       # [2, E] (src, dst)
    edge_attr = jax.random.normal(kea, (E, edge_dims), jnp.float32)
    gumbel_u = jax.random.uniform(kg, (N, node_dims), jnp.float32,
                                  minval=1e-10, maxval=1.0)

    params = make_graph_ecc_params(kp, node_dims, edge_dims)

    out = graph_ecc_forward(x, edge_index, edge_attr, params, gumbel_u)
    out = jax.block_until_ready(out)

    assert out.shape == (N, node_dims)
    # hard gumbel-softmax output must be one-hot per row
    assert bool(jnp.all(jnp.sum(out, axis=-1) == 1.0))
    print("KERNEL_OK")
</pallas_src>

<mosaic_0001>
module attributes {stable_mosaic.version = 11 : i64} {
  func.func @kernel(%arg0: i32, %arg1: memref<16x1xi32, #tpu.memory_space<vmem>>, %arg2: memref<1x16xi32, #tpu.memory_space<vmem>>, %arg3: memref<16x6xf32, #tpu.memory_space<vmem>>, %arg4: memref<8x8xf32, #tpu.memory_space<vmem>>, %arg5: memref<24x128xf32, #tpu.memory_space<vmem>>, %arg6: memref<17920x64xf32, #tpu.memory_space<vmem>>, %arg7: memref<152x64xf32, #tpu.memory_space<vmem>>, %arg8: memref<8x128xf32, #tpu.memory_space<vmem>>) attributes {dimension_semantics = [#tpu.dimension_semantics<arbitrary>], iteration_bounds = array<i64: 1>, scalar_prefetch = 0 : i64, scratch_operands = 0 : i64, tpu.core_type = #tpu.core_type<tc>, window_params = [{pipeline_mode = #tpu.pipeline_mode<synchronous>, transform_indices = @transform_0, window_bounds = array<i64: 16, 1>}, {pipeline_mode = #tpu.pipeline_mode<synchronous>, transform_indices = @transform_1, window_bounds = array<i64: 1, 16>}, {pipeline_mode = #tpu.pipeline_mode<synchronous>, transform_indices = @transform_2, window_bounds = array<i64: 16, 6>}, {pipeline_mode = #tpu.pipeline_mode<synchronous>, transform_indices = @transform_3, window_bounds = array<i64: 8, 8>}, {pipeline_mode = #tpu.pipeline_mode<synchronous>, transform_indices = @transform_4, window_bounds = array<i64: 24, 128>}, {pipeline_mode = #tpu.pipeline_mode<synchronous>, transform_indices = @transform_5, window_bounds = array<i64: 17920, 64>}, {pipeline_mode = #tpu.pipeline_mode<synchronous>, transform_indices = @transform_6, window_bounds = array<i64: 152, 64>}, {pipeline_mode = #tpu.pipeline_mode<synchronous>, transform_indices = @transform_7, window_bounds = array<i64: 8, 128>}]} {
    %c0 = arith.constant 0 : index
    %c0_0 = arith.constant 0 : index
    %0 = vector.load %arg3[%c0, %c0_0] : memref<16x6xf32, #tpu.memory_space<vmem>>, vector<16x6xf32>
    %c0_1 = arith.constant 0 : index
    %c0_2 = arith.constant 0 : index
    %1 = vector.load %arg4[%c0_1, %c0_2] : memref<8x8xf32, #tpu.memory_space<vmem>>, vector<8x8xf32>
    %2 = vector.extract_strided_slice %1 {offsets = [0, 0], sizes = [8, 4], strides = [1, 1]} : vector<8x8xf32> to vector<8x4xf32>
    %3 = vector.extract_strided_slice %1 {offsets = [0, 4], sizes = [8, 4], strides = [1, 1]} : vector<8x8xf32> to vector<8x4xf32>
    %4 = tpu.iota {dimensions = array<i32: 1>} : vector<16x8xi32>
    %c0_3 = arith.constant 0 : index
    %c0_4 = arith.constant 0 : index
    %5 = vector.load %arg1[%c0_3, %c0_4] : memref<16x1xi32, #tpu.memory_space<vmem>>, vector<16x1xi32>
    %6 = vector.broadcast %5 : vector<16x1xi32> to vector<16x8xi32>
    %7 = arith.cmpi eq, %6, %4 : vector<16x8xi32>
    %8 = arith.extui %7 : vector<16x8xi1> to vector<16x8xi32>
    %9 = arith.sitofp %8 : vector<16x8xi32> to vector<16x8xf32>
    %10 = tpu.iota {dimensions = array<i32: 0>} : vector<8x16xi32>
    %c0_5 = arith.constant 0 : index
    %c0_6 = arith.constant 0 : index
    %11 = vector.load %arg2[%c0_5, %c0_6] : memref<1x16xi32, #tpu.memory_space<vmem>>, vector<1x16xi32>
    %12 = vector.broadcast %11 : vector<1x16xi32> to vector<8x16xi32>
    %13 = arith.cmpi eq, %12, %10 : vector<8x16xi32>
    %14 = arith.extui %13 : vector<8x16xi1> to vector<8x16xi32>
    %15 = arith.sitofp %14 : vector<8x16xi32> to vector<8x16xf32>
    %cst = arith.constant dense<0.000000e+00> : vector<8xf32>
    %16 = vector.multi_reduction <add>, %15, %cst [1] : vector<8x16xf32> to vector<8xf32>
    %17 = vector.shape_cast %16 : vector<8xf32> to vector<8x1xf32>
    %cst_7 = arith.constant 1.000000e+00 : f32
    %18 = vector.broadcast %cst_7 : f32 to vector<8x1xf32>
    %19 = arith.maximumf %17, %18 : vector<8x1xf32>
    %cst_8 = arith.constant 1.000000e+00 : f32
    %20 = vector.broadcast %cst_8 : f32 to vector<8x1xf32>
    %21 = arith.divf %20, %19 : vector<8x1xf32>
    %cst_9 = arith.constant dense<0.000000e+00> : vector<16x4xf32>
    %22 = tpu.matmul %9, %2, %cst_9 {dimension_numbers = #tpu.dot_dimension_numbers<[1], [0], [0], [1], [0, 0, 1, 1], [], []>} : vector<16x8xf32>, vector<8x4xf32>, vector<16x4xf32> -> vector<16x4xf32>
    %c0_10 = arith.constant 0 : index
    %c0_11 = arith.constant 0 : index
    %23 = vector.load %arg5[%c0_10, %c0_11] : memref<24x128xf32, #tpu.memory_space<vmem>>, vector<8x128xf32>
    %24 = vector.extract_strided_slice %23 {offsets = [0, 0], sizes = [6, 128], strides = [1, 1]} : vector<8x128xf32> to vector<6x128xf32>
    %cst_12 = arith.constant dense<0.000000e+00> : vector<16x128xf32>
    %25 = tpu.matmul %0, %24, %cst_12 {dimension_numbers = #tpu.dot_dimension_numbers<[1], [0], [0], [1], [0, 0, 1, 1], [], []>} : vector<16x6xf32>, vector<6x128xf32>, vector<16x128xf32> -> vector<16x128xf32>
    %26 = vector.extract_strided_slice %23 {offsets = [6, 0], sizes = [1, 128], strides = [1, 1]} : vector<8x128xf32> to vector<1x128xf32>
    %27 = vector.broadcast %26 : vector<1x128xf32> to vector<16x128xf32>
    %28 = arith.addf %25, %27 : vector<16x128xf32>
    %cst_13 = arith.constant 0.000000e+00 : f32
    %29 = vector.broadcast %cst_13 : f32 to vector<16x128xf32>
    %30 = arith.cmpf ogt, %28, %29 : vector<16x128xf32>
    %cst_14 = arith.constant 0.00999999977 : f32
    %31 = vector.broadcast %cst_14 : f32 to vector<16x128xf32>
    %32 = arith.mulf %31, %28 : vector<16x128xf32>
    %33 = arith.select %30, %28, %32 : vector<16x128xi1>, vector<16x128xf32>
    %34 = vector.extract_strided_slice %22 {offsets = [0, 0], sizes = [16, 1], strides = [1, 1]} : vector<16x4xf32> to vector<16x1xf32>
    %35 = vector.broadcast %34 : vector<16x1xf32> to vector<16x128xf32>
    %36 = arith.mulf %33, %35 : vector<16x128xf32>
    %37 = vector.extract_strided_slice %22 {offsets = [0, 1], sizes = [16, 1], strides = [1, 1]} : vector<16x4xf32> to vector<16x1xf32>
    %38 = vector.broadcast %37 : vector<16x1xf32> to vector<16x128xf32>
    %39 = arith.mulf %33, %38 : vector<16x128xf32>
    %40 = vector.extract_strided_slice %22 {offsets = [0, 2], sizes = [16, 1], strides = [1, 1]} : vector<16x4xf32> to vector<16x1xf32>
    %41 = vector.broadcast %40 : vector<16x1xf32> to vector<16x128xf32>
    %42 = arith.mulf %33, %41 : vector<16x128xf32>
    %43 = vector.extract_strided_slice %22 {offsets = [0, 3], sizes = [16, 1], strides = [1, 1]} : vector<16x4xf32> to vector<16x1xf32>
    %44 = vector.broadcast %43 : vector<16x1xf32> to vector<16x128xf32>
    %45 = arith.mulf %33, %44 : vector<16x128xf32>
    %46 = tpu.concatenate %36, %39, %42, %45 in 1 : vector<16x128xf32>, vector<16x128xf32>, vector<16x128xf32>, vector<16x128xf32> -> vector<16x512xf32>
    %c0_15 = arith.constant 0 : index
    %c0_16 = arith.constant 0 : index
    %47 = vector.load %arg6[%c0_15, %c0_16] : memref<17920x64xf32, #tpu.memory_space<vmem>>, vector<512x64xf32>
    %cst_17 = arith.constant dense<0.000000e+00> : vector<16x64xf32>
    %48 = tpu.matmul %46, %47, %cst_17 {dimension_numbers = #tpu.dot_dimension_numbers<[1], [0], [0], [1], [0, 0, 1, 1], [], []>} : vector<16x512xf32>, vector<512x64xf32>, vector<16x64xf32> -> vector<16x64xf32>
    %cst_18 = arith.constant dense<0.000000e+00> : vector<8x64xf32>
    %49 = tpu.matmul %15, %48, %cst_18 {dimension_numbers = #tpu.dot_dimension_numbers<[1], [0], [0], [1], [0, 0, 1, 1], [], []>} : vector<8x16xf32>, vector<16x64xf32>, vector<8x64xf32> -> vector<8x64xf32>
    %50 = vector.broadcast %21 : vector<8x1xf32> to vector<8x64xf32>
    %51 = arith.mulf %49, %50 : vector<8x64xf32>
    %c0_19 = arith.constant 0 : index
    %c0_20 = arith.constant 0 : index
    %52 = vector.load %arg7[%c0_19, %c0_20] : memref<152x64xf32, #tpu.memory_space<vmem>>, vector<8x64xf32>
    %53 = vector.extract_strided_slice %52 {offsets = [4, 0], sizes = [1, 64], strides = [1, 1]} : vector<8x64xf32> to vector<1x64xf32>
    %54 = vector.broadcast %53 : vector<1x64xf32> to vector<8x64xf32>
    %55 = arith.addf %51, %54 : vector<8x64xf32>
    %56 = vector.extract_strided_slice %52 {offsets = [0, 0], sizes = [4, 64], strides = [1, 1]} : vector<8x64xf32> to vector<4x64xf32>
    %cst_21 = arith.constant dense<0.000000e+00> : vector<8x64xf32>
    %57 = tpu.matmul %2, %56, %cst_21 {dimension_numbers = #tpu.dot_dimension_numbers<[1], [0], [0], [1], [0, 0, 1, 1], [], []>} : vector<8x4xf32>, vector<4x64xf32>, vector<8x64xf32> -> vector<8x64xf32>
    %58 = arith.addf %55, %57 : vector<8x64xf32>
    %cst_22 = arith.constant 0.000000e+00 : f32
    %59 = vector.broadcast %cst_22 : f32 to vector<8x64xf32>
    %60 = arith.cmpf ogt, %58, %59 : vector<8x64xf32>
    %cst_23 = arith.constant 0.00999999977 : f32
    %61 = vector.broadcast %cst_23 : f32 to vector<8x64xf32>
    %62 = arith.mulf %61, %58 : vector<8x64xf32>
    %63 = arith.select %60, %58, %62 : vector<8x64xi1>, vector<8x64xf32>
    %cst_24 = arith.constant dense<0.000000e+00> : vector<16x64xf32>
    %64 = tpu.matmul %9, %63, %cst_24 {dimension_numbers = #tpu.dot_dimension_numbers<[1], [0], [0], [1], [0, 0, 1, 1], [], []>} : vector<16x8xf32>, vector<8x64xf32>, vector<16x64xf32> -> vector<16x64xf32>
    %c8 = arith.constant 8 : index
    %c0_25 = arith.constant 0 : index
    %65 = vector.load %arg5[%c8, %c0_25] : memref<24x128xf32, #tpu.memory_space<vmem>>, vector<8x128xf32>
    %66 = vector.extract_strided_slice %65 {offsets = [0, 0], sizes = [6, 128], strides = [1, 1]} : vector<8x128xf32> to vector<6x128xf32>
    %cst_26 = arith.constant dense<0.000000e+00> : vector<16x128xf32>
    %67 = tpu.matmul %0, %66, %cst_26 {dimension_numbers = #tpu.dot_dimension_numbers<[1], [0], [0], [1], [0, 0, 1, 1], [], []>} : vector<16x6xf32>, vector<6x128xf32>, vector<16x128xf32> -> vector<16x128xf32>
    %68 = vector.extract_strided_slice %65 {offsets = [6, 0], sizes = [1, 128], strides = [1, 1]} : vector<8x128xf32> to vector<1x128xf32>
    %69 = vector.broadcast %68 : vector<1x128xf32> to vector<16x128xf32>
    %70 = arith.addf %67, %69 : vector<16x128xf32>
    %cst_27 = arith.constant 0.000000e+00 : f32
    %71 = vector.broadcast %cst_27 : f32 to vector<16x128xf32>
    %72 = arith.cmpf ogt, %70, %71 : vector<16x128xf32>
    %cst_28 = arith.constant 0.00999999977 : f32
    %73 = vector.broadcast %cst_28 : f32 to vector<16x128xf32>
    %74 = arith.mulf %73, %70 : vector<16x128xf32>
    %75 = arith.select %72, %70, %74 : vector<16x128xi1>, vector<16x128xf32>
    %76 = vector.extract_strided_slice %64 {offsets = [0, 0], sizes = [16, 1], strides = [1, 1]} : vector<16x64xf32> to vector<16x1xf32>
    %77 = vector.broadcast %76 : vector<16x1xf32> to vector<16x128xf32>
    %78 = arith.mulf %75, %77 : vector<16x128xf32>
    %79 = vector.extract_strided_slice %64 {offsets = [0, 1], sizes = [16, 1], strides = [1, 1]} : vector<16x64xf32> to vector<16x1xf32>
    %80 = vector.broadcast %79 : vector<16x1xf32> to vector<16x128xf32>
    %81 = arith.mulf %75, %80 : vector<16x128xf32>
    %82 = vector.extract_strided_slice %64 {offsets = [0, 2], sizes = [16, 1], strides = [1, 1]} : vector<16x64xf32> to vector<16x1xf32>
    %83 = vector.broadcast %82 : vector<16x1xf32> to vector<16x128xf32>
    %84 = arith.mulf %75, %83 : vector<16x128xf32>
    %85 = vector.extract_strided_slice %64 {offsets = [0, 3], sizes = [16, 1], strides = [1, 1]} : vector<16x64xf32> to vector<16x1xf32>
    %86 = vector.broadcast %85 : vector<16x1xf32> to vector<16x128xf32>
    %87 = arith.mulf %75, %86 : vector<16x128xf32>
    %88 = vector.extract_strided_slice %64 {offsets = [0, 4], sizes = [16, 1], strides = [1, 1]} : vector<16x64xf32> to vector<16x1xf32>
    %89 = vector.broadcast %88 : vector<16x1xf32> to vector<16x128xf32>
    %90 = arith.mulf %75, %89 : vector<16x128xf32>
    %91 = vector.extract_strided_slice %64 {offsets = [0, 5], sizes = [16, 1], strides = [1, 1]} : vector<16x64xf32> to vector<16x1xf32>
    %92 = vector.broadcast %91 : vector<16x1xf32> to vector<16x128xf32>
    %93 = arith.mulf %75, %92 : vector<16x128xf32>
    %94 = vector.extract_strided_slice %64 {offsets = [0, 6], sizes = [16, 1], strides = [1, 1]} : vector<16x64xf32> to vector<16x1xf32>
    %95 = vector.broadcast %94 : vector<16x1xf32> to vector<16x128xf32>
    %96 = arith.mulf %75, %95 : vector<16x128xf32>
    %97 = vector.extract_strided_slice %64 {offsets = [0, 7], sizes = [16, 1], strides = [1, 1]} : vector<16x64xf32> to vector<16x1xf32>
    %98 = vector.broadcast %97 : vector<16x1xf32> to vector<16x128xf32>
    %99 = arith.mulf %75, %98 : vector<16x128xf32>
    %100 = vector.extract_strided_slice %64 {offsets = [0, 8], sizes = [16, 1], strides = [1, 1]} : vector<16x64xf32> to vector<16x1xf32>
    %101 = vector.broadcast %100 : vector<16x1xf32> to vector<16x128xf32>
    %102 = arith.mulf %75, %101 : vector<16x128xf32>
    %103 = vector.extract_strided_slice %64 {offsets = [0, 9], sizes = [16, 1], strides = [1, 1]} : vector<16x64xf32> to vector<16x1xf32>
    %104 = vector.broadcast %103 : vector<16x1xf32> to vector<16x128xf32>
    %105 = arith.mulf %75, %104 : vector<16x128xf32>
    %106 = vector.extract_strided_slice %64 {offsets = [0, 10], sizes = [16, 1], strides = [1, 1]} : vector<16x64xf32> to vector<16x1xf32>
    %107 = vector.broadcast %106 : vector<16x1xf32> to vector<16x128xf32>
    %108 = arith.mulf %75, %107 : vector<16x128xf32>
    %109 = vector.extract_strided_slice %64 {offsets = [0, 11], sizes = [16, 1], strides = [1, 1]} : vector<16x64xf32> to vector<16x1xf32>
    %110 = vector.broadcast %109 : vector<16x1xf32> to vector<16x128xf32>
    %111 = arith.mulf %75, %110 : vector<16x128xf32>
    %112 = vector.extract_strided_slice %64 {offsets = [0, 12], sizes = [16, 1], strides = [1, 1]} : vector<16x64xf32> to vector<16x1xf32>
    %113 = vector.broadcast %112 : vector<16x1xf32> to vector<16x128xf32>
    %114 = arith.mulf %75, %113 : vector<16x128xf32>
    %115 = vector.extract_strided_slice %64 {offsets = [0, 13], sizes = [16, 1], strides = [1, 1]} : vector<16x64xf32> to vector<16x1xf32>
    %116 = vector.broadcast %115 : vector<16x1xf32> to vector<16x128xf32>
    %117 = arith.mulf %75, %116 : vector<16x128xf32>
    %118 = vector.extract_strided_slice %64 {offsets = [0, 14], sizes = [16, 1], strides = [1, 1]} : vector<16x64xf32> to vector<16x1xf32>
    %119 = vector.broadcast %118 : vector<16x1xf32> to vector<16x128xf32>
    %120 = arith.mulf %75, %119 : vector<16x128xf32>
    %121 = vector.extract_strided_slice %64 {offsets = [0, 15], sizes = [16, 1], strides = [1, 1]} : vector<16x64xf32> to vector<16x1xf32>
    %122 = vector.broadcast %121 : vector<16x1xf32> to vector<16x128xf32>
    %123 = arith.mulf %75, %122 : vector<16x128xf32>
    %124 = vector.extract_strided_slice %64 {offsets = [0, 16], sizes = [16, 1], strides = [1, 1]} : vector<16x64xf32> to vector<16x1xf32>
    %125 = vector.broadcast %124 : vector<16x1xf32> to vector<16x128xf32>
    %126 = arith.mulf %75, %125 : vector<16x128xf32>
    %127 = vector.extract_strided_slice %64 {offsets = [0, 17], sizes = [16, 1], strides = [1, 1]} : vector<16x64xf32> to vector<16x1xf32>
    %128 = vector.broadcast %127 : vector<16x1xf32> to vector<16x128xf32>
    %129 = arith.mulf %75, %128 : vector<16x128xf32>
    %130 = vector.extract_strided_slice %64 {offsets = [0, 18], sizes = [16, 1], strides = [1, 1]} : vector<16x64xf32> to vector<16x1xf32>
    %131 = vector.broadcast %130 : vector<16x1xf32> to vector<16x128xf32>
    %132 = arith.mulf %75, %131 : vector<16x128xf32>
    %133 = vector.extract_strided_slice %64 {offsets = [0, 19], sizes = [16, 1], strides = [1, 1]} : vector<16x64xf32> to vector<16x1xf32>
    %134 = vector.broadcast %133 : vector<16x1xf32> to vector<16x128xf32>
    %135 = arith.mulf %75, %134 : vector<16x128xf32>
    %136 = vector.extract_strided_slice %64 {offsets = [0, 20], sizes = [16, 1], strides = [1, 1]} : vector<16x64xf32> to vector<16x1xf32>
    %137 = vector.broadcast %136 : vector<16x1xf32> to vector<16x128xf32>
    %138 = arith.mulf %75, %137 : vector<16x128xf32>
    %139 = vector.extract_strided_slice %64 {offsets = [0, 21], sizes = [16, 1], strides = [1, 1]} : vector<16x64xf32> to vector<16x1xf32>
    %140 = vector.broadcast %139 : vector<16x1xf32> to vector<16x128xf32>
    %141 = arith.mulf %75, %140 : vector<16x128xf32>
    %142 = vector.extract_strided_slice %64 {offsets = [0, 22], sizes = [16, 1], strides = [1, 1]} : vector<16x64xf32> to vector<16x1xf32>
    %143 = vector.broadcast %142 : vector<16x1xf32> to vector<16x128xf32>
    %144 = arith.mulf %75, %143 : vector<16x128xf32>
    %145 = vector.extract_strided_slice %64 {offsets = [0, 23], sizes = [16, 1], strides = [1, 1]} : vector<16x64xf32> to vector<16x1xf32>
    %146 = vector.broadcast %145 : vector<16x1xf32> to vector<16x128xf32>
    %147 = arith.mulf %75, %146 : vector<16x128xf32>
    %148 = vector.extract_strided_slice %64 {offsets = [0, 24], sizes = [16, 1], strides = [1, 1]} : vector<16x64xf32> to vector<16x1xf32>
    %149 = vector.broadcast %148 : vector<16x1xf32> to vector<16x128xf32>
    %150 = arith.mulf %75, %149 : vector<16x128xf32>
    %151 = vector.extract_strided_slice %64 {offsets = [0, 25], sizes = [16, 1], strides = [1, 1]} : vector<16x64xf32> to vector<16x1xf32>
    %152 = vector.broadcast %151 : vector<16x1xf32> to vector<16x128xf32>
    %153 = arith.mulf %75, %152 : vector<16x128xf32>
    %154 = vector.extract_strided_slice %64 {offsets = [0, 26], sizes = [16, 1], strides = [1, 1]} : vector<16x64xf32> to vector<16x1xf32>
    %155 = vector.broadcast %154 : vector<16x1xf32> to vector<16x128xf32>
    %156 = arith.mulf %75, %155 : vector<16x128xf32>
    %157 = vector.extract_strided_slice %64 {offsets = [0, 27], sizes = [16, 1], strides = [1, 1]} : vector<16x64xf32> to vector<16x1xf32>
    %158 = vector.broadcast %157 : vector<16x1xf32> to vector<16x128xf32>
    %159 = arith.mulf %75, %158 : vector<16x128xf32>
    %160 = vector.extract_strided_slice %64 {offsets = [0, 28], sizes = [16, 1], strides = [1, 1]} : vector<16x64xf32> to vector<16x1xf32>
    %161 = vector.broadcast %160 : vector<16x1xf32> to vector<16x128xf32>
    %162 = arith.mulf %75, %161 : vector<16x128xf32>
    %163 = vector.extract_strided_slice %64 {offsets = [0, 29], sizes = [16, 1], strides = [1, 1]} : vector<16x64xf32> to vector<16x1xf32>
    %164 = vector.broadcast %163 : vector<16x1xf32> to vector<16x128xf32>
    %165 = arith.mulf %75, %164 : vector<16x128xf32>
    %166 = vector.extract_strided_slice %64 {offsets = [0, 30], sizes = [16, 1], strides = [1, 1]} : vector<16x64xf32> to vector<16x1xf32>
    %167 = vector.broadcast %166 : vector<16x1xf32> to vector<16x128xf32>
    %168 = arith.mulf %75, %167 : vector<16x128xf32>
    %169 = vector.extract_strided_slice %64 {offsets = [0, 31], sizes = [16, 1], strides = [1, 1]} : vector<16x64xf32> to vector<16x1xf32>
    %170 = vector.broadcast %169 : vector<16x1xf32> to vector<16x128xf32>
    %171 = arith.mulf %75, %170 : vector<16x128xf32>
    %172 = vector.extract_strided_slice %64 {offsets = [0, 32], sizes = [16, 1], strides = [1, 1]} : vector<16x64xf32> to vector<16x1xf32>
    %173 = vector.broadcast %172 : vector<16x1xf32> to vector<16x128xf32>
    %174 = arith.mulf %75, %173 : vector<16x128xf32>
    %175 = vector.extract_strided_slice %64 {offsets = [0, 33], sizes = [16, 1], strides = [1, 1]} : vector<16x64xf32> to vector<16x1xf32>
    %176 = vector.broadcast %175 : vector<16x1xf32> to vector<16x128xf32>
    %177 = arith.mulf %75, %176 : vector<16x128xf32>
    %178 = vector.extract_strided_slice %64 {offsets = [0, 34], sizes = [16, 1], strides = [1, 1]} : vector<16x64xf32> to vector<16x1xf32>
    %179 = vector.broadcast %178 : vector<16x1xf32> to vector<16x128xf32>
    %180 = arith.mulf %75, %179 : vector<16x128xf32>
    %181 = vector.extract_strided_slice %64 {offsets = [0, 35], sizes = [16, 1], strides = [1, 1]} : vector<16x64xf32> to vector<16x1xf32>
    %182 = vector.broadcast %181 : vector<16x1xf32> to vector<16x128xf32>
    %183 = arith.mulf %75, %182 : vector<16x128xf32>
    %184 = vector.extract_strided_slice %64 {offsets = [0, 36], sizes = [16, 1], strides = [1, 1]} : vector<16x64xf32> to vector<16x1xf32>
    %185 = vector.broadcast %184 : vector<16x1xf32> to vector<16x128xf32>
    %186 = arith.mulf %75, %185 : vector<16x128xf32>
    %187 = vector.extract_strided_slice %64 {offsets = [0, 37], sizes = [16, 1], strides = [1, 1]} : vector<16x64xf32> to vector<16x1xf32>
    %188 = vector.broadcast %187 : vector<16x1xf32> to vector<16x128xf32>
    %189 = arith.mulf %75, %188 : vector<16x128xf32>
    %190 = vector.extract_strided_slice %64 {offsets = [0, 38], sizes = [16, 1], strides = [1, 1]} : vector<16x64xf32> to vector<16x1xf32>
    %191 = vector.broadcast %190 : vector<16x1xf32> to vector<16x128xf32>
    %192 = arith.mulf %75, %191 : vector<16x128xf32>
    %193 = vector.extract_strided_slice %64 {offsets = [0, 39], sizes = [16, 1], strides = [1, 1]} : vector<16x64xf32> to vector<16x1xf32>
    %194 = vector.broadcast %193 : vector<16x1xf32> to vector<16x128xf32>
    %195 = arith.mulf %75, %194 : vector<16x128xf32>
    %196 = vector.extract_strided_slice %64 {offsets = [0, 40], sizes = [16, 1], strides = [1, 1]} : vector<16x64xf32> to vector<16x1xf32>
    %197 = vector.broadcast %196 : vector<16x1xf32> to vector<16x128xf32>
    %198 = arith.mulf %75, %197 : vector<16x128xf32>
    %199 = vector.extract_strided_slice %64 {offsets = [0, 41], sizes = [16, 1], strides = [1, 1]} : vector<16x64xf32> to vector<16x1xf32>
    %200 = vector.broadcast %199 : vector<16x1xf32> to vector<16x128xf32>
    %201 = arith.mulf %75, %200 : vector<16x128xf32>
    %202 = vector.extract_strided_slice %64 {offsets = [0, 42], sizes = [16, 1], strides = [1, 1]} : vector<16x64xf32> to vector<16x1xf32>
    %203 = vector.broadcast %202 : vector<16x1xf32> to vector<16x128xf32>
    %204 = arith.mulf %75, %203 : vector<16x128xf32>
    %205 = vector.extract_strided_slice %64 {offsets = [0, 43], sizes = [16, 1], strides = [1, 1]} : vector<16x64xf32> to vector<16x1xf32>
    %206 = vector.broadcast %205 : vector<16x1xf32> to vector<16x128xf32>
    %207 = arith.mulf %75, %206 : vector<16x128xf32>
    %208 = vector.extract_strided_slice %64 {offsets = [0, 44], sizes = [16, 1], strides = [1, 1]} : vector<16x64xf32> to vector<16x1xf32>
    %209 = vector.broadcast %208 : vector<16x1xf32> to vector<16x128xf32>
    %210 = arith.mulf %75, %209 : vector<16x128xf32>
    %211 = vector.extract_strided_slice %64 {offsets = [0, 45], sizes = [16, 1], strides = [1, 1]} : vector<16x64xf32> to vector<16x1xf32>
    %212 = vector.broadcast %211 : vector<16x1xf32> to vector<16x128xf32>
    %213 = arith.mulf %75, %212 : vector<16x128xf32>
    %214 = vector.extract_strided_slice %64 {offsets = [0, 46], sizes = [16, 1], strides = [1, 1]} : vector<16x64xf32> to vector<16x1xf32>
    %215 = vector.broadcast %214 : vector<16x1xf32> to vector<16x128xf32>
    %216 = arith.mulf %75, %215 : vector<16x128xf32>
    %217 = vector.extract_strided_slice %64 {offsets = [0, 47], sizes = [16, 1], strides = [1, 1]} : vector<16x64xf32> to vector<16x1xf32>
    %218 = vector.broadcast %217 : vector<16x1xf32> to vector<16x128xf32>
    %219 = arith.mulf %75, %218 : vector<16x128xf32>
    %220 = vector.extract_strided_slice %64 {offsets = [0, 48], sizes = [16, 1], strides = [1, 1]} : vector<16x64xf32> to vector<16x1xf32>
    %221 = vector.broadcast %220 : vector<16x1xf32> to vector<16x128xf32>
    %222 = arith.mulf %75, %221 : vector<16x128xf32>
    %223 = vector.extract_strided_slice %64 {offsets = [0, 49], sizes = [16, 1], strides = [1, 1]} : vector<16x64xf32> to vector<16x1xf32>
    %224 = vector.broadcast %223 : vector<16x1xf32> to vector<16x128xf32>
    %225 = arith.mulf %75, %224 : vector<16x128xf32>
    %226 = vector.extract_strided_slice %64 {offsets = [0, 50], sizes = [16, 1], strides = [1, 1]} : vector<16x64xf32> to vector<16x1xf32>
    %227 = vector.broadcast %226 : vector<16x1xf32> to vector<16x128xf32>
    %228 = arith.mulf %75, %227 : vector<16x128xf32>
    %229 = vector.extract_strided_slice %64 {offsets = [0, 51], sizes = [16, 1], strides = [1, 1]} : vector<16x64xf32> to vector<16x1xf32>
    %230 = vector.broadcast %229 : vector<16x1xf32> to vector<16x128xf32>
    %231 = arith.mulf %75, %230 : vector<16x128xf32>
    %232 = vector.extract_strided_slice %64 {offsets = [0, 52], sizes = [16, 1], strides = [1, 1]} : vector<16x64xf32> to vector<16x1xf32>
    %233 = vector.broadcast %232 : vector<16x1xf32> to vector<16x128xf32>
    %234 = arith.mulf %75, %233 : vector<16x128xf32>
    %235 = vector.extract_strided_slice %64 {offsets = [0, 53], sizes = [16, 1], strides = [1, 1]} : vector<16x64xf32> to vector<16x1xf32>
    %236 = vector.broadcast %235 : vector<16x1xf32> to vector<16x128xf32>
    %237 = arith.mulf %75, %236 : vector<16x128xf32>
    %238 = vector.extract_strided_slice %64 {offsets = [0, 54], sizes = [16, 1], strides = [1, 1]} : vector<16x64xf32> to vector<16x1xf32>
    %239 = vector.broadcast %238 : vector<16x1xf32> to vector<16x128xf32>
    %240 = arith.mulf %75, %239 : vector<16x128xf32>
    %241 = vector.extract_strided_slice %64 {offsets = [0, 55], sizes = [16, 1], strides = [1, 1]} : vector<16x64xf32> to vector<16x1xf32>
    %242 = vector.broadcast %241 : vector<16x1xf32> to vector<16x128xf32>
    %243 = arith.mulf %75, %242 : vector<16x128xf32>
    %244 = vector.extract_strided_slice %64 {offsets = [0, 56], sizes = [16, 1], strides = [1, 1]} : vector<16x64xf32> to vector<16x1xf32>
    %245 = vector.broadcast %244 : vector<16x1xf32> to vector<16x128xf32>
    %246 = arith.mulf %75, %245 : vector<16x128xf32>
    %247 = vector.extract_strided_slice %64 {offsets = [0, 57], sizes = [16, 1], strides = [1, 1]} : vector<16x64xf32> to vector<16x1xf32>
    %248 = vector.broadcast %247 : vector<16x1xf32> to vector<16x128xf32>
    %249 = arith.mulf %75, %248 : vector<16x128xf32>
    %250 = vector.extract_strided_slice %64 {offsets = [0, 58], sizes = [16, 1], strides = [1, 1]} : vector<16x64xf32> to vector<16x1xf32>
    %251 = vector.broadcast %250 : vector<16x1xf32> to vector<16x128xf32>
    %252 = arith.mulf %75, %251 : vector<16x128xf32>
    %253 = vector.extract_strided_slice %64 {offsets = [0, 59], sizes = [16, 1], strides = [1, 1]} : vector<16x64xf32> to vector<16x1xf32>
    %254 = vector.broadcast %253 : vector<16x1xf32> to vector<16x128xf32>
    %255 = arith.mulf %75, %254 : vector<16x128xf32>
    %256 = vector.extract_strided_slice %64 {offsets = [0, 60], sizes = [16, 1], strides = [1, 1]} : vector<16x64xf32> to vector<16x1xf32>
    %257 = vector.broadcast %256 : vector<16x1xf32> to vector<16x128xf32>
    %258 = arith.mulf %75, %257 : vector<16x128xf32>
    %259 = vector.extract_strided_slice %64 {offsets = [0, 61], sizes = [16, 1], strides = [1, 1]} : vector<16x64xf32> to vector<16x1xf32>
    %260 = vector.broadcast %259 : vector<16x1xf32> to vector<16x128xf32>
    %261 = arith.mulf %75, %260 : vector<16x128xf32>
    %262 = vector.extract_strided_slice %64 {offsets = [0, 62], sizes = [16, 1], strides = [1, 1]} : vector<16x64xf32> to vector<16x1xf32>
    %263 = vector.broadcast %262 : vector<16x1xf32> to vector<16x128xf32>
    %264 = arith.mulf %75, %263 : vector<16x128xf32>
    %265 = vector.extract_strided_slice %64 {offsets = [0, 63], sizes = [16, 1], strides = [1, 1]} : vector<16x64xf32> to vector<16x1xf32>
    %266 = vector.broadcast %265 : vector<16x1xf32> to vector<16x128xf32>
    %267 = arith.mulf %75, %266 : vector<16x128xf32>
    %268 = vector.extract_strided_slice %22 {offsets = [0, 0], sizes = [16, 1], strides = [1, 1]} : vector<16x4xf32> to vector<16x1xf32>
    %269 = vector.broadcast %268 : vector<16x1xf32> to vector<16x128xf32>
    %270 = arith.mulf %75, %269 : vector<16x128xf32>
    %271 = vector.extract_strided_slice %22 {offsets = [0, 1], sizes = [16, 1], strides = [1, 1]} : vector<16x4xf32> to vector<16x1xf32>
    %272 = vector.broadcast %271 : vector<16x1xf32> to vector<16x128xf32>
    %273 = arith.mulf %75, %272 : vector<16x128xf32>
    %274 = vector.extract_strided_slice %22 {offsets = [0, 2], sizes = [16, 1], strides = [1, 1]} : vector<16x4xf32> to vector<16x1xf32>
    %275 = vector.broadcast %274 : vector<16x1xf32> to vector<16x128xf32>
    %276 = arith.mulf %75, %275 : vector<16x128xf32>
    %277 = vector.extract_strided_slice %22 {offsets = [0, 3], sizes = [16, 1], strides = [1, 1]} : vector<16x4xf32> to vector<16x1xf32>
    %278 = vector.broadcast %277 : vector<16x1xf32> to vector<16x128xf32>
    %279 = arith.mulf %75, %278 : vector<16x128xf32>
    %280 = tpu.concatenate %78, %81, %84, %87, %90, %93, %96, %99, %102, %105, %108, %111, %114, %117, %120, %123 in 1 : vector<16x128xf32>, vector<16x128xf32>, vector<16x128xf32>, vector<16x128xf32>, vector<16x128xf32>, vector<16x128xf32>, vector<16x128xf32>, vector<16x128xf32>, vector<16x128xf32>, vector<16x128xf32>, vector<16x128xf32>, vector<16x128xf32>, vector<16x128xf32>, vector<16x128xf32>, vector<16x128xf32>, vector<16x128xf32> -> vector<16x2048xf32>
    %281 = tpu.concatenate %126, %129, %132, %135, %138, %141, %144, %147, %150, %153, %156, %159, %162, %165, %168, %171 in 1 : vector<16x128xf32>, vector<16x128xf32>, vector<16x128xf32>, vector<16x128xf32>, vector<16x128xf32>, vector<16x128xf32>, vector<16x128xf32>, vector<16x128xf32>, vector<16x128xf32>, vector<16x128xf32>, vector<16x128xf32>, vector<16x128xf32>, vector<16x128xf32>, vector<16x128xf32>, vector<16x128xf32>, vector<16x128xf32> -> vector<16x2048xf32>
    %282 = tpu.concatenate %174, %177, %180, %183, %186, %189, %192, %195, %198, %201, %204, %207, %210, %213, %216, %219 in 1 : vector<16x128xf32>, vector<16x128xf32>, vector<16x128xf32>, vector<16x128xf32>, vector<16x128xf32>, vector<16x128xf32>, vector<16x128xf32>, vector<16x128xf32>, vector<16x128xf32>, vector<16x128xf32>, vector<16x128xf32>, vector<16x128xf32>, vector<16x128xf32>, vector<16x128xf32>, vector<16x128xf32>, vector<16x128xf32> -> vector<16x2048xf32>
    %283 = tpu.concatenate %222, %225, %228, %231, %234, %237, %240, %243, %246, %249, %252, %255, %258, %261, %264, %267 in 1 : vector<16x128xf32>, vector<16x128xf32>, vector<16x128xf32>, vector<16x128xf32>, vector<16x128xf32>, vector<16x128xf32>, vector<16x128xf32>, vector<16x128xf32>, vector<16x128xf32>, vector<16x128xf32>, vector<16x128xf32>, vector<16x128xf32>, vector<16x128xf32>, vector<16x128xf32>, vector<16x128xf32>, vector<16x128xf32> -> vector<16x2048xf32>
    %284 = tpu.concatenate %270, %273, %276, %279 in 1 : vector<16x128xf32>, vector<16x128xf32>, vector<16x128xf32>, vector<16x128xf32> -> vector<16x512xf32>
    %285 = tpu.concatenate %280, %281, %282, %283, %284 in 1 : vector<16x2048xf32>, vector<16x2048xf32>, vector<16x2048xf32>, vector<16x2048xf32>, vector<16x512xf32> -> vector<16x8704xf32>
    %c512 = arith.constant 512 : index
    %c0_29 = arith.constant 0 : index
    %286 = vector.load %arg6[%c512, %c0_29] : memref<17920x64xf32, #tpu.memory_space<vmem>>, vector<8704x64xf32>
    %cst_30 = arith.constant dense<0.000000e+00> : vector<16x64xf32>
    %287 = tpu.matmul %285, %286, %cst_30 {dimension_numbers = #tpu.dot_dimension_numbers<[1], [0], [0], [1], [0, 0, 1, 1], [], []>} : vector<16x8704xf32>, vector<8704x64xf32>, vector<16x64xf32> -> vector<16x64xf32>
    %cst_31 = arith.constant dense<0.000000e+00> : vector<8x64xf32>
    %288 = tpu.matmul %15, %287, %cst_31 {dimension_numbers = #tpu.dot_dimension_numbers<[1], [0], [0], [1], [0, 0, 1, 1], [], []>} : vector<8x16xf32>, vector<16x64xf32>, vector<8x64xf32> -> vector<8x64xf32>
    %289 = vector.broadcast %21 : vector<8x1xf32> to vector<8x64xf32>
    %290 = arith.mulf %288, %289 : vector<8x64xf32>
    %c8_32 = arith.constant 8 : index
    %c0_33 = arith.constant 0 : index
    %291 = vector.load %arg7[%c8_32, %c0_33] : memref<152x64xf32, #tpu.memory_space<vmem>>, vector<72x64xf32>
    %292 = vector.extract_strided_slice %291 {offsets = [68, 0], sizes = [1, 64], strides = [1, 1]} : vector<72x64xf32> to vector<1x64xf32>
    %293 = vector.broadcast %292 : vector<1x64xf32> to vector<8x64xf32>
    %294 = arith.addf %290, %293 : vector<8x64xf32>
    %295 = vector.extract_strided_slice %291 {offsets = [0, 0], sizes = [64, 64], strides = [1, 1]} : vector<72x64xf32> to vector<64x64xf32>
    %cst_34 = arith.constant dense<0.000000e+00> : vector<8x64xf32>
    %296 = tpu.matmul %63, %295, %cst_34 {dimension_numbers = #tpu.dot_dimension_numbers<[1], [0], [0], [1], [0, 0, 1, 1], [], []>} : vector<8x64xf32>, vector<64x64xf32>, vector<8x64xf32> -> vector<8x64xf32>
    %297 = arith.addf %294, %296 : vector<8x64xf32>
    %298 = vector.extract_strided_slice %291 {offsets = [64, 0], sizes = [4, 64], strides = [1, 1]} : vector<72x64xf32> to vector<4x64xf32>
    %cst_35 = arith.constant dense<0.000000e+00> : vector<8x64xf32>
    %299 = tpu.matmul %2, %298, %cst_35 {dimension_numbers = #tpu.dot_dimension_numbers<[1], [0], [0], [1], [0, 0, 1, 1], [], []>} : vector<8x4xf32>, vector<4x64xf32>, vector<8x64xf32> -> vector<8x64xf32>
    %300 = arith.addf %297, %299 : vector<8x64xf32>
    %cst_36 = arith.constant 0.000000e+00 : f32
    %301 = vector.broadcast %cst_36 : f32 to vector<8x64xf32>
    %302 = arith.cmpf ogt, %300, %301 : vector<8x64xf32>
    %cst_37 = arith.constant 0.00999999977 : f32
    %303 = vector.broadcast %cst_37 : f32 to vector<8x64xf32>
    %304 = arith.mulf %303, %300 : vector<8x64xf32>
    %305 = arith.select %302, %300, %304 : vector<8x64xi1>, vector<8x64xf32>
    %cst_38 = arith.constant dense<0.000000e+00> : vector<16x64xf32>
    %306 = tpu.matmul %9, %305, %cst_38 {dimension_numbers = #tpu.dot_dimension_numbers<[1], [0], [0], [1], [0, 0, 1, 1], [], []>} : vector<16x8xf32>, vector<8x64xf32>, vector<16x64xf32> -> vector<16x64xf32>
    %c16 = arith.constant 16 : index
    %c0_39 = arith.constant 0 : index
    %307 = vector.load %arg5[%c16, %c0_39] : memref<24x128xf32, #tpu.memory_space<vmem>>, vector<8x128xf32>
    %308 = vector.extract_strided_slice %307 {offsets = [0, 0], sizes = [6, 128], strides = [1, 1]} : vector<8x128xf32> to vector<6x128xf32>
    %cst_40 = arith.constant dense<0.000000e+00> : vector<16x128xf32>
    %309 = tpu.matmul %0, %308, %cst_40 {dimension_numbers = #tpu.dot_dimension_numbers<[1], [0], [0], [1], [0, 0, 1, 1], [], []>} : vector<16x6xf32>, vector<6x128xf32>, vector<16x128xf32> -> vector<16x128xf32>
    %310 = vector.extract_strided_slice %307 {offsets = [6, 0], sizes = [1, 128], strides = [1, 1]} : vector<8x128xf32> to vector<1x128xf32>
    %311 = vector.broadcast %310 : vector<1x128xf32> to vector<16x128xf32>
    %312 = arith.addf %309, %311 : vector<16x128xf32>
    %cst_41 = arith.constant 0.000000e+00 : f32
    %313 = vector.broadcast %cst_41 : f32 to vector<16x128xf32>
    %314 = arith.cmpf ogt, %312, %313 : vector<16x128xf32>
    %cst_42 = arith.constant 0.00999999977 : f32
    %315 = vector.broadcast %cst_42 : f32 to vector<16x128xf32>
    %316 = arith.mulf %315, %312 : vector<16x128xf32>
    %317 = arith.select %314, %312, %316 : vector<16x128xi1>, vector<16x128xf32>
    %318 = vector.extract_strided_slice %306 {offsets = [0, 0], sizes = [16, 1], strides = [1, 1]} : vector<16x64xf32> to vector<16x1xf32>
    %319 = vector.broadcast %318 : vector<16x1xf32> to vector<16x128xf32>
    %320 = arith.mulf %317, %319 : vector<16x128xf32>
    %321 = vector.extract_strided_slice %306 {offsets = [0, 1], sizes = [16, 1], strides = [1, 1]} : vector<16x64xf32> to vector<16x1xf32>
    %322 = vector.broadcast %321 : vector<16x1xf32> to vector<16x128xf32>
    %323 = arith.mulf %317, %322 : vector<16x128xf32>
    %324 = vector.extract_strided_slice %306 {offsets = [0, 2], sizes = [16, 1], strides = [1, 1]} : vector<16x64xf32> to vector<16x1xf32>
    %325 = vector.broadcast %324 : vector<16x1xf32> to vector<16x128xf32>
    %326 = arith.mulf %317, %325 : vector<16x128xf32>
    %327 = vector.extract_strided_slice %306 {offsets = [0, 3], sizes = [16, 1], strides = [1, 1]} : vector<16x64xf32> to vector<16x1xf32>
    %328 = vector.broadcast %327 : vector<16x1xf32> to vector<16x128xf32>
    %329 = arith.mulf %317, %328 : vector<16x128xf32>
    %330 = vector.extract_strided_slice %306 {offsets = [0, 4], sizes = [16, 1], strides = [1, 1]} : vector<16x64xf32> to vector<16x1xf32>
    %331 = vector.broadcast %330 : vector<16x1xf32> to vector<16x128xf32>
    %332 = arith.mulf %317, %331 : vector<16x128xf32>
    %333 = vector.extract_strided_slice %306 {offsets = [0, 5], sizes = [16, 1], strides = [1, 1]} : vector<16x64xf32> to vector<16x1xf32>
    %334 = vector.broadcast %333 : vector<16x1xf32> to vector<16x128xf32>
    %335 = arith.mulf %317, %334 : vector<16x128xf32>
    %336 = vector.extract_strided_slice %306 {offsets = [0, 6], sizes = [16, 1], strides = [1, 1]} : vector<16x64xf32> to vector<16x1xf32>
    %337 = vector.broadcast %336 : vector<16x1xf32> to vector<16x128xf32>
    %338 = arith.mulf %317, %337 : vector<16x128xf32>
    %339 = vector.extract_strided_slice %306 {offsets = [0, 7], sizes = [16, 1], strides = [1, 1]} : vector<16x64xf32> to vector<16x1xf32>
    %340 = vector.broadcast %339 : vector<16x1xf32> to vector<16x128xf32>
    %341 = arith.mulf %317, %340 : vector<16x128xf32>
    %342 = vector.extract_strided_slice %306 {offsets = [0, 8], sizes = [16, 1], strides = [1, 1]} : vector<16x64xf32> to vector<16x1xf32>
    %343 = vector.broadcast %342 : vector<16x1xf32> to vector<16x128xf32>
    %344 = arith.mulf %317, %343 : vector<16x128xf32>
    %345 = vector.extract_strided_slice %306 {offsets = [0, 9], sizes = [16, 1], strides = [1, 1]} : vector<16x64xf32> to vector<16x1xf32>
    %346 = vector.broadcast %345 : vector<16x1xf32> to vector<16x128xf32>
    %347 = arith.mulf %317, %346 : vector<16x128xf32>
    %348 = vector.extract_strided_slice %306 {offsets = [0, 10], sizes = [16, 1], strides = [1, 1]} : vector<16x64xf32> to vector<16x1xf32>
    %349 = vector.broadcast %348 : vector<16x1xf32> to vector<16x128xf32>
    %350 = arith.mulf %317, %349 : vector<16x128xf32>
    %351 = vector.extract_strided_slice %306 {offsets = [0, 11], sizes = [16, 1], strides = [1, 1]} : vector<16x64xf32> to vector<16x1xf32>
    %352 = vector.broadcast %351 : vector<16x1xf32> to vector<16x128xf32>
    %353 = arith.mulf %317, %352 : vector<16x128xf32>
    %354 = vector.extract_strided_slice %306 {offsets = [0, 12], sizes = [16, 1], strides = [1, 1]} : vector<16x64xf32> to vector<16x1xf32>
    %355 = vector.broadcast %354 : vector<16x1xf32> to vector<16x128xf32>
    %356 = arith.mulf %317, %355 : vector<16x128xf32>
    %357 = vector.extract_strided_slice %306 {offsets = [0, 13], sizes = [16, 1], strides = [1, 1]} : vector<16x64xf32> to vector<16x1xf32>
    %358 = vector.broadcast %357 : vector<16x1xf32> to vector<16x128xf32>
    %359 = arith.mulf %317, %358 : vector<16x128xf32>
    %360 = vector.extract_strided_slice %306 {offsets = [0, 14], sizes = [16, 1], strides = [1, 1]} : vector<16x64xf32> to vector<16x1xf32>
    %361 = vector.broadcast %360 : vector<16x1xf32> to vector<16x128xf32>
    %362 = arith.mulf %317, %361 : vector<16x128xf32>
    %363 = vector.extract_strided_slice %306 {offsets = [0, 15], sizes = [16, 1], strides = [1, 1]} : vector<16x64xf32> to vector<16x1xf32>
    %364 = vector.broadcast %363 : vector<16x1xf32> to vector<16x128xf32>
    %365 = arith.mulf %317, %364 : vector<16x128xf32>
    %366 = vector.extract_strided_slice %306 {offsets = [0, 16], sizes = [16, 1], strides = [1, 1]} : vector<16x64xf32> to vector<16x1xf32>
    %367 = vector.broadcast %366 : vector<16x1xf32> to vector<16x128xf32>
    %368 = arith.mulf %317, %367 : vector<16x128xf32>
    %369 = vector.extract_strided_slice %306 {offsets = [0, 17], sizes = [16, 1], strides = [1, 1]} : vector<16x64xf32> to vector<16x1xf32>
    %370 = vector.broadcast %369 : vector<16x1xf32> to vector<16x128xf32>
    %371 = arith.mulf %317, %370 : vector<16x128xf32>
    %372 = vector.extract_strided_slice %306 {offsets = [0, 18], sizes = [16, 1], strides = [1, 1]} : vector<16x64xf32> to vector<16x1xf32>
    %373 = vector.broadcast %372 : vector<16x1xf32> to vector<16x128xf32>
    %374 = arith.mulf %317, %373 : vector<16x128xf32>
    %375 = vector.extract_strided_slice %306 {offsets = [0, 19], sizes = [16, 1], strides = [1, 1]} : vector<16x64xf32> to vector<16x1xf32>
    %376 = vector.broadcast %375 : vector<16x1xf32> to vector<16x128xf32>
    %377 = arith.mulf %317, %376 : vector<16x128xf32>
    %378 = vector.extract_strided_slice %306 {offsets = [0, 20], sizes = [16, 1], strides = [1, 1]} : vector<16x64xf32> to vector<16x1xf32>
    %379 = vector.broadcast %378 : vector<16x1xf32> to vector<16x128xf32>
    %380 = arith.mulf %317, %379 : vector<16x128xf32>
    %381 = vector.extract_strided_slice %306 {offsets = [0, 21], sizes = [16, 1], strides = [1, 1]} : vector<16x64xf32> to vector<16x1xf32>
    %382 = vector.broadcast %381 : vector<16x1xf32> to vector<16x128xf32>
    %383 = arith.mulf %317, %382 : vector<16x128xf32>
    %384 = vector.extract_strided_slice %306 {offsets = [0, 22], sizes = [16, 1], strides = [1, 1]} : vector<16x64xf32> to vector<16x1xf32>
    %385 = vector.broadcast %384 : vector<16x1xf32> to vector<16x128xf32>
    %386 = arith.mulf %317, %385 : vector<16x128xf32>
    %387 = vector.extract_strided_slice %306 {offsets = [0, 23], sizes = [16, 1], strides = [1, 1]} : vector<16x64xf32> to vector<16x1xf32>
    %388 = vector.broadcast %387 : vector<16x1xf32> to vector<16x128xf32>
    %389 = arith.mulf %317, %388 : vector<16x128xf32>
    %390 = vector.extract_strided_slice %306 {offsets = [0, 24], sizes = [16, 1], strides = [1, 1]} : vector<16x64xf32> to vector<16x1xf32>
    %391 = vector.broadcast %390 : vector<16x1xf32> to vector<16x128xf32>
    %392 = arith.mulf %317, %391 : vector<16x128xf32>
    %393 = vector.extract_strided_slice %306 {offsets = [0, 25], sizes = [16, 1], strides = [1, 1]} : vector<16x64xf32> to vector<16x1xf32>
    %394 = vector.broadcast %393 : vector<16x1xf32> to vector<16x128xf32>
    %395 = arith.mulf %317, %394 : vector<16x128xf32>
    %396 = vector.extract_strided_slice %306 {offsets = [0, 26], sizes = [16, 1], strides = [1, 1]} : vector<16x64xf32> to vector<16x1xf32>
    %397 = vector.broadcast %396 : vector<16x1xf32> to vector<16x128xf32>
    %398 = arith.mulf %317, %397 : vector<16x128xf32>
    %399 = vector.extract_strided_slice %306 {offsets = [0, 27], sizes = [16, 1], strides = [1, 1]} : vector<16x64xf32> to vector<16x1xf32>
    %400 = vector.broadcast %399 : vector<16x1xf32> to vector<16x128xf32>
    %401 = arith.mulf %317, %400 : vector<16x128xf32>
    %402 = vector.extract_strided_slice %306 {offsets = [0, 28], sizes = [16, 1], strides = [1, 1]} : vector<16x64xf32> to vector<16x1xf32>
    %403 = vector.broadcast %402 : vector<16x1xf32> to vector<16x128xf32>
    %404 = arith.mulf %317, %403 : vector<16x128xf32>
    %405 = vector.extract_strided_slice %306 {offsets = [0, 29], sizes = [16, 1], strides = [1, 1]} : vector<16x64xf32> to vector<16x1xf32>
    %406 = vector.broadcast %405 : vector<16x1xf32> to vector<16x128xf32>
    %407 = arith.mulf %317, %406 : vector<16x128xf32>
    %408 = vector.extract_strided_slice %306 {offsets = [0, 30], sizes = [16, 1], strides = [1, 1]} : vector<16x64xf32> to vector<16x1xf32>
    %409 = vector.broadcast %408 : vector<16x1xf32> to vector<16x128xf32>
    %410 = arith.mulf %317, %409 : vector<16x128xf32>
    %411 = vector.extract_strided_slice %306 {offsets = [0, 31], sizes = [16, 1], strides = [1, 1]} : vector<16x64xf32> to vector<16x1xf32>
    %412 = vector.broadcast %411 : vector<16x1xf32> to vector<16x128xf32>
    %413 = arith.mulf %317, %412 : vector<16x128xf32>
    %414 = vector.extract_strided_slice %306 {offsets = [0, 32], sizes = [16, 1], strides = [1, 1]} : vector<16x64xf32> to vector<16x1xf32>
    %415 = vector.broadcast %414 : vector<16x1xf32> to vector<16x128xf32>
    %416 = arith.mulf %317, %415 : vector<16x128xf32>
    %417 = vector.extract_strided_slice %306 {offsets = [0, 33], sizes = [16, 1], strides = [1, 1]} : vector<16x64xf32> to vector<16x1xf32>
    %418 = vector.broadcast %417 : vector<16x1xf32> to vector<16x128xf32>
    %419 = arith.mulf %317, %418 : vector<16x128xf32>
    %420 = vector.extract_strided_slice %306 {offsets = [0, 34], sizes = [16, 1], strides = [1, 1]} : vector<16x64xf32> to vector<16x1xf32>
    %421 = vector.broadcast %420 : vector<16x1xf32> to vector<16x128xf32>
    %422 = arith.mulf %317, %421 : vector<16x128xf32>
    %423 = vector.extract_strided_slice %306 {offsets = [0, 35], sizes = [16, 1], strides = [1, 1]} : vector<16x64xf32> to vector<16x1xf32>
    %424 = vector.broadcast %423 : vector<16x1xf32> to vector<16x128xf32>
    %425 = arith.mulf %317, %424 : vector<16x128xf32>
    %426 = vector.extract_strided_slice %306 {offsets = [0, 36], sizes = [16, 1], strides = [1, 1]} : vector<16x64xf32> to vector<16x1xf32>
    %427 = vector.broadcast %426 : vector<16x1xf32> to vector<16x128xf32>
    %428 = arith.mulf %317, %427 : vector<16x128xf32>
    %429 = vector.extract_strided_slice %306 {offsets = [0, 37], sizes = [16, 1], strides = [1, 1]} : vector<16x64xf32> to vector<16x1xf32>
    %430 = vector.broadcast %429 : vector<16x1xf32> to vector<16x128xf32>
    %431 = arith.mulf %317, %430 : vector<16x128xf32>
    %432 = vector.extract_strided_slice %306 {offsets = [0, 38], sizes = [16, 1], strides = [1, 1]} : vector<16x64xf32> to vector<16x1xf32>
    %433 = vector.broadcast %432 : vector<16x1xf32> to vector<16x128xf32>
    %434 = arith.mulf %317, %433 : vector<16x128xf32>
    %435 = vector.extract_strided_slice %306 {offsets = [0, 39], sizes = [16, 1], strides = [1, 1]} : vector<16x64xf32> to vector<16x1xf32>
    %436 = vector.broadcast %435 : vector<16x1xf32> to vector<16x128xf32>
    %437 = arith.mulf %317, %436 : vector<16x128xf32>
    %438 = vector.extract_strided_slice %306 {offsets = [0, 40], sizes = [16, 1], strides = [1, 1]} : vector<16x64xf32> to vector<16x1xf32>
    %439 = vector.broadcast %438 : vector<16x1xf32> to vector<16x128xf32>
    %440 = arith.mulf %317, %439 : vector<16x128xf32>
    %441 = vector.extract_strided_slice %306 {offsets = [0, 41], sizes = [16, 1], strides = [1, 1]} : vector<16x64xf32> to vector<16x1xf32>
    %442 = vector.broadcast %441 : vector<16x1xf32> to vector<16x128xf32>
    %443 = arith.mulf %317, %442 : vector<16x128xf32>
    %444 = vector.extract_strided_slice %306 {offsets = [0, 42], sizes = [16, 1], strides = [1, 1]} : vector<16x64xf32> to vector<16x1xf32>
    %445 = vector.broadcast %444 : vector<16x1xf32> to vector<16x128xf32>
    %446 = arith.mulf %317, %445 : vector<16x128xf32>
    %447 = vector.extract_strided_slice %306 {offsets = [0, 43], sizes = [16, 1], strides = [1, 1]} : vector<16x64xf32> to vector<16x1xf32>
    %448 = vector.broadcast %447 : vector<16x1xf32> to vector<16x128xf32>
    %449 = arith.mulf %317, %448 : vector<16x128xf32>
    %450 = vector.extract_strided_slice %306 {offsets = [0, 44], sizes = [16, 1], strides = [1, 1]} : vector<16x64xf32> to vector<16x1xf32>
    %451 = vector.broadcast %450 : vector<16x1xf32> to vector<16x128xf32>
    %452 = arith.mulf %317, %451 : vector<16x128xf32>
    %453 = vector.extract_strided_slice %306 {offsets = [0, 45], sizes = [16, 1], strides = [1, 1]} : vector<16x64xf32> to vector<16x1xf32>
    %454 = vector.broadcast %453 : vector<16x1xf32> to vector<16x128xf32>
    %455 = arith.mulf %317, %454 : vector<16x128xf32>
    %456 = vector.extract_strided_slice %306 {offsets = [0, 46], sizes = [16, 1], strides = [1, 1]} : vector<16x64xf32> to vector<16x1xf32>
    %457 = vector.broadcast %456 : vector<16x1xf32> to vector<16x128xf32>
    %458 = arith.mulf %317, %457 : vector<16x128xf32>
    %459 = vector.extract_strided_slice %306 {offsets = [0, 47], sizes = [16, 1], strides = [1, 1]} : vector<16x64xf32> to vector<16x1xf32>
    %460 = vector.broadcast %459 : vector<16x1xf32> to vector<16x128xf32>
    %461 = arith.mulf %317, %460 : vector<16x128xf32>
    %462 = vector.extract_strided_slice %306 {offsets = [0, 48], sizes = [16, 1], strides = [1, 1]} : vector<16x64xf32> to vector<16x1xf32>
    %463 = vector.broadcast %462 : vector<16x1xf32> to vector<16x128xf32>
    %464 = arith.mulf %317, %463 : vector<16x128xf32>
    %465 = vector.extract_strided_slice %306 {offsets = [0, 49], sizes = [16, 1], strides = [1, 1]} : vector<16x64xf32> to vector<16x1xf32>
    %466 = vector.broadcast %465 : vector<16x1xf32> to vector<16x128xf32>
    %467 = arith.mulf %317, %466 : vector<16x128xf32>
    %468 = vector.extract_strided_slice %306 {offsets = [0, 50], sizes = [16, 1], strides = [1, 1]} : vector<16x64xf32> to vector<16x1xf32>
    %469 = vector.broadcast %468 : vector<16x1xf32> to vector<16x128xf32>
    %470 = arith.mulf %317, %469 : vector<16x128xf32>
    %471 = vector.extract_strided_slice %306 {offsets = [0, 51], sizes = [16, 1], strides = [1, 1]} : vector<16x64xf32> to vector<16x1xf32>
    %472 = vector.broadcast %471 : vector<16x1xf32> to vector<16x128xf32>
    %473 = arith.mulf %317, %472 : vector<16x128xf32>
    %474 = vector.extract_strided_slice %306 {offsets = [0, 52], sizes = [16, 1], strides = [1, 1]} : vector<16x64xf32> to vector<16x1xf32>
    %475 = vector.broadcast %474 : vector<16x1xf32> to vector<16x128xf32>
    %476 = arith.mulf %317, %475 : vector<16x128xf32>
    %477 = vector.extract_strided_slice %306 {offsets = [0, 53], sizes = [16, 1], strides = [1, 1]} : vector<16x64xf32> to vector<16x1xf32>
    %478 = vector.broadcast %477 : vector<16x1xf32> to vector<16x128xf32>
    %479 = arith.mulf %317, %478 : vector<16x128xf32>
    %480 = vector.extract_strided_slice %306 {offsets = [0, 54], sizes = [16, 1], strides = [1, 1]} : vector<16x64xf32> to vector<16x1xf32>
    %481 = vector.broadcast %480 : vector<16x1xf32> to vector<16x128xf32>
    %482 = arith.mulf %317, %481 : vector<16x128xf32>
    %483 = vector.extract_strided_slice %306 {offsets = [0, 55], sizes = [16, 1], strides = [1, 1]} : vector<16x64xf32> to vector<16x1xf32>
    %484 = vector.broadcast %483 : vector<16x1xf32> to vector<16x128xf32>
    %485 = arith.mulf %317, %484 : vector<16x128xf32>
    %486 = vector.extract_strided_slice %306 {offsets = [0, 56], sizes = [16, 1], strides = [1, 1]} : vector<16x64xf32> to vector<16x1xf32>
    %487 = vector.broadcast %486 : vector<16x1xf32> to vector<16x128xf32>
    %488 = arith.mulf %317, %487 : vector<16x128xf32>
    %489 = vector.extract_strided_slice %306 {offsets = [0, 57], sizes = [16, 1], strides = [1, 1]} : vector<16x64xf32> to vector<16x1xf32>
    %490 = vector.broadcast %489 : vector<16x1xf32> to vector<16x128xf32>
    %491 = arith.mulf %317, %490 : vector<16x128xf32>
    %492 = vector.extract_strided_slice %306 {offsets = [0, 58], sizes = [16, 1], strides = [1, 1]} : vector<16x64xf32> to vector<16x1xf32>
    %493 = vector.broadcast %492 : vector<16x1xf32> to vector<16x128xf32>
    %494 = arith.mulf %317, %493 : vector<16x128xf32>
    %495 = vector.extract_strided_slice %306 {offsets = [0, 59], sizes = [16, 1], strides = [1, 1]} : vector<16x64xf32> to vector<16x1xf32>
    %496 = vector.broadcast %495 : vector<16x1xf32> to vector<16x128xf32>
    %497 = arith.mulf %317, %496 : vector<16x128xf32>
    %498 = vector.extract_strided_slice %306 {offsets = [0, 60], sizes = [16, 1], strides = [1, 1]} : vector<16x64xf32> to vector<16x1xf32>
    %499 = vector.broadcast %498 : vector<16x1xf32> to vector<16x128xf32>
    %500 = arith.mulf %317, %499 : vector<16x128xf32>
    %501 = vector.extract_strided_slice %306 {offsets = [0, 61], sizes = [16, 1], strides = [1, 1]} : vector<16x64xf32> to vector<16x1xf32>
    %502 = vector.broadcast %501 : vector<16x1xf32> to vector<16x128xf32>
    %503 = arith.mulf %317, %502 : vector<16x128xf32>
    %504 = vector.extract_strided_slice %306 {offsets = [0, 62], sizes = [16, 1], strides = [1, 1]} : vector<16x64xf32> to vector<16x1xf32>
    %505 = vector.broadcast %504 : vector<16x1xf32> to vector<16x128xf32>
    %506 = arith.mulf %317, %505 : vector<16x128xf32>
    %507 = vector.extract_strided_slice %306 {offsets = [0, 63], sizes = [16, 1], strides = [1, 1]} : vector<16x64xf32> to vector<16x1xf32>
    %508 = vector.broadcast %507 : vector<16x1xf32> to vector<16x128xf32>
    %509 = arith.mulf %317, %508 : vector<16x128xf32>
    %510 = vector.extract_strided_slice %22 {offsets = [0, 0], sizes = [16, 1], strides = [1, 1]} : vector<16x4xf32> to vector<16x1xf32>
    %511 = vector.broadcast %510 : vector<16x1xf32> to vector<16x128xf32>
    %512 = arith.mulf %317, %511 : vector<16x128xf32>
    %513 = vector.extract_strided_slice %22 {offsets = [0, 1], sizes = [16, 1], strides = [1, 1]} : vector<16x4xf32> to vector<16x1xf32>
    %514 = vector.broadcast %513 : vector<16x1xf32> to vector<16x128xf32>
    %515 = arith.mulf %317, %514 : vector<16x128xf32>
    %516 = vector.extract_strided_slice %22 {offsets = [0, 2], sizes = [16, 1], strides = [1, 1]} : vector<16x4xf32> to vector<16x1xf32>
    %517 = vector.broadcast %516 : vector<16x1xf32> to vector<16x128xf32>
    %518 = arith.mulf %317, %517 : vector<16x128xf32>
    %519 = vector.extract_strided_slice %22 {offsets = [0, 3], sizes = [16, 1], strides = [1, 1]} : vector<16x4xf32> to vector<16x1xf32>
    %520 = vector.broadcast %519 : vector<16x1xf32> to vector<16x128xf32>
    %521 = arith.mulf %317, %520 : vector<16x128xf32>
    %522 = tpu.concatenate %320, %323, %326, %329, %332, %335, %338, %341, %344, %347, %350, %353, %356, %359, %362, %365 in 1 : vector<16x128xf32>, vector<16x128xf32>, vector<16x128xf32>, vector<16x128xf32>, vector<16x128xf32>, vector<16x128xf32>, vector<16x128xf32>, vector<16x128xf32>, vector<16x128xf32>, vector<16x128xf32>, vector<16x128xf32>, vector<16x128xf32>, vector<16x128xf32>, vector<16x128xf32>, vector<16x128xf32>, vector<16x128xf32> -> vector<16x2048xf32>
    %523 = tpu.concatenate %368, %371, %374, %377, %380, %383, %386, %389, %392, %395, %398, %401, %404, %407, %410, %413 in 1 : vector<16x128xf32>, vector<16x128xf32>, vector<16x128xf32>, vector<16x128xf32>, vector<16x128xf32>, vector<16x128xf32>, vector<16x128xf32>, vector<16x128xf32>, vector<16x128xf32>, vector<16x128xf32>, vector<16x128xf32>, vector<16x128xf32>, vector<16x128xf32>, vector<16x128xf32>, vector<16x128xf32>, vector<16x128xf32> -> vector<16x2048xf32>
    %524 = tpu.concatenate %416, %419, %422, %425, %428, %431, %434, %437, %440, %443, %446, %449, %452, %455, %458, %461 in 1 : vector<16x128xf32>, vector<16x128xf32>, vector<16x128xf32>, vector<16x128xf32>, vector<16x128xf32>, vector<16x128xf32>, vector<16x128xf32>, vector<16x128xf32>, vector<16x128xf32>, vector<16x128xf32>, vector<16x128xf32>, vector<16x128xf32>, vector<16x128xf32>, vector<16x128xf32>, vector<16x128xf32>, vector<16x128xf32> -> vector<16x2048xf32>
    %525 = tpu.concatenate %464, %467, %470, %473, %476, %479, %482, %485, %488, %491, %494, %497, %500, %503, %506, %509 in 1 : vector<16x128xf32>, vector<16x128xf32>, vector<16x128xf32>, vector<16x128xf32>, vector<16x128xf32>, vector<16x128xf32>, vector<16x128xf32>, vector<16x128xf32>, vector<16x128xf32>, vector<16x128xf32>, vector<16x128xf32>, vector<16x128xf32>, vector<16x128xf32>, vector<16x128xf32>, vector<16x128xf32>, vector<16x128xf32> -> vector<16x2048xf32>
    %526 = tpu.concatenate %512, %515, %518, %521 in 1 : vector<16x128xf32>, vector<16x128xf32>, vector<16x128xf32>, vector<16x128xf32> -> vector<16x512xf32>
    %527 = tpu.concatenate %522, %523, %524, %525, %526 in 1 : vector<16x2048xf32>, vector<16x2048xf32>, vector<16x2048xf32>, vector<16x2048xf32>, vector<16x512xf32> -> vector<16x8704xf32>
    %c9216 = arith.constant 9216 : index
    %c0_43 = arith.constant 0 : index
    %528 = vector.load %arg6[%c9216, %c0_43] : memref<17920x64xf32, #tpu.memory_space<vmem>>, vector<8704x64xf32>
    %cst_44 = arith.constant dense<0.000000e+00> : vector<16x64xf32>
    %529 = tpu.matmul %527, %528, %cst_44 {dimension_numbers = #tpu.dot_dimension_numbers<[1], [0], [0], [1], [0, 0, 1, 1], [], []>} : vector<16x8704xf32>, vector<8704x64xf32>, vector<16x64xf32> -> vector<16x64xf32>
    %cst_45 = arith.constant dense<0.000000e+00> : vector<8x64xf32>
    %530 = tpu.matmul %15, %529, %cst_45 {dimension_numbers = #tpu.dot_dimension_numbers<[1], [0], [0], [1], [0, 0, 1, 1], [], []>} : vector<8x16xf32>, vector<16x64xf32>, vector<8x64xf32> -> vector<8x64xf32>
    %531 = vector.broadcast %21 : vector<8x1xf32> to vector<8x64xf32>
    %532 = arith.mulf %530, %531 : vector<8x64xf32>
    %c80 = arith.constant 80 : index
    %c0_46 = arith.constant 0 : index
    %533 = vector.load %arg7[%c80, %c0_46] : memref<152x64xf32, #tpu.memory_space<vmem>>, vector<72x64xf32>
    %534 = vector.extract_strided_slice %533 {offsets = [68, 0], sizes = [1, 64], strides = [1, 1]} : vector<72x64xf32> to vector<1x64xf32>
    %535 = vector.broadcast %534 : vector<1x64xf32> to vector<8x64xf32>
    %536 = arith.addf %532, %535 : vector<8x64xf32>
    %537 = vector.extract_strided_slice %533 {offsets = [0, 0], sizes = [64, 64], strides = [1, 1]} : vector<72x64xf32> to vector<64x64xf32>
    %cst_47 = arith.constant dense<0.000000e+00> : vector<8x64xf32>
    %538 = tpu.matmul %305, %537, %cst_47 {dimension_numbers = #tpu.dot_dimension_numbers<[1], [0], [0], [1], [0, 0, 1, 1], [], []>} : vector<8x64xf32>, vector<64x64xf32>, vector<8x64xf32> -> vector<8x64xf32>
    %539 = arith.addf %536, %538 : vector<8x64xf32>
    %540 = vector.extract_strided_slice %533 {offsets = [64, 0], sizes = [4, 64], strides = [1, 1]} : vector<72x64xf32> to vector<4x64xf32>
    %cst_48 = arith.constant dense<0.000000e+00> : vector<8x64xf32>
    %541 = tpu.matmul %2, %540, %cst_48 {dimension_numbers = #tpu.dot_dimension_numbers<[1], [0], [0], [1], [0, 0, 1, 1], [], []>} : vector<8x4xf32>, vector<4x64xf32>, vector<8x64xf32> -> vector<8x64xf32>
    %542 = arith.addf %539, %541 : vector<8x64xf32>
    %cst_49 = arith.constant 0.000000e+00 : f32
    %543 = vector.broadcast %cst_49 : f32 to vector<8x64xf32>
    %544 = arith.cmpf ogt, %542, %543 : vector<8x64xf32>
    %cst_50 = arith.constant 0.00999999977 : f32
    %545 = vector.broadcast %cst_50 : f32 to vector<8x64xf32>
    %546 = arith.mulf %545, %542 : vector<8x64xf32>
    %547 = arith.select %544, %542, %546 : vector<8x64xi1>, vector<8x64xf32>
    %548 = math.log %3 : vector<8x4xf32>
    %cst_51 = arith.constant 0.000000e+00 : f32
    %549 = vector.broadcast %cst_51 : f32 to vector<8x4xf32>
    %550 = arith.subf %549, %548 : vector<8x4xf32>
    %551 = math.log %550 : vector<8x4xf32>
    %cst_52 = arith.constant 0.000000e+00 : f32
    %552 = vector.broadcast %cst_52 : f32 to vector<8x4xf32>
    %553 = arith.subf %552, %551 : vector<8x4xf32>
    %554 = vector.extract_strided_slice %547 {offsets = [0, 0], sizes = [8, 4], strides = [1, 1]} : vector<8x64xf32> to vector<8x4xf32>
    %555 = arith.addf %554, %553 : vector<8x4xf32>
    %cst_53 = arith.constant 0.000000e+00 : f32
    %556 = vector.broadcast %cst_53 : f32 to vector<8x4xf32>
    %557 = arith.subf %556, %555 : vector<8x4xf32>
    %cst_54 = arith.constant dense<0xFF800000> : vector<8xf32>
    %558 = vector.multi_reduction <maximumf>, %557, %cst_54 [1] : vector<8x4xf32> to vector<8xf32>
    %559 = vector.shape_cast %558 : vector<8xf32> to vector<8x1xf32>
    %560 = tpu.iota {dimensions = array<i32: 1>} : vector<8x4xi32>
    %561 = vector.broadcast %559 : vector<8x1xf32> to vector<8x4xf32>
    %562 = arith.cmpf oeq, %557, %561 : vector<8x4xf32>
    %c4_i32 = arith.constant 4 : i32
    %563 = vector.broadcast %c4_i32 : i32 to vector<8x4xi32>
    %564 = arith.select %562, %560, %563 : vector<8x4xi1>, vector<8x4xi32>
    %cst_55 = arith.constant dense<2147483647> : vector<8xi32>
    %565 = vector.multi_reduction <minsi>, %564, %cst_55 [1] : vector<8x4xi32> to vector<8xi32>
    %566 = vector.shape_cast %565 : vector<8xi32> to vector<8x1xi32>
    %567 = tpu.iota {dimensions = array<i32: 1>} : vector<8x128xi32>
    %568 = vector.broadcast %566 : vector<8x1xi32> to vector<8x128xi32>
    %569 = arith.cmpi eq, %567, %568 : vector<8x128xi32>
    %570 = arith.extui %569 : vector<8x128xi1> to vector<8x128xi32>
    %571 = arith.sitofp %570 : vector<8x128xi32> to vector<8x128xf32>
    %c0_56 = arith.constant 0 : index
    %c0_57 = arith.constant 0 : index
    %572 = vector.load %arg8[%c0_56, %c0_57] : memref<8x128xf32, #tpu.memory_space<vmem>>, vector<8x128xf32>
    tpu.vector_store %arg8[%c0_56, %c0_57], %571 {strides = array<i32>} : memref<8x128xf32, #tpu.memory_space<vmem>>, vector<8x128xf32>,
    return
  }
  func.func @transform_0(%arg0: i32) -> (i32, i32) {
    %c0_i32 = arith.constant 0 : i32
    %c0_i32_0 = arith.constant 0 : i32
    %c0_i32_1 = arith.constant 0 : i32
    return %c0_i32, %c0_i32_0 : i32, i32
  }
  func.func @transform_1(%arg0: i32) -> (i32, i32) {
    %c0_i32 = arith.constant 0 : i32
    %c0_i32_0 = arith.constant 0 : i32
    %c0_i32_1 = arith.constant 0 : i32
    return %c0_i32, %c0_i32_0 : i32, i32
  }
  func.func @transform_2(%arg0: i32) -> (i32, i32) {
    %c0_i32 = arith.constant 0 : i32
    %c0_i32_0 = arith.constant 0 : i32
    %c0_i32_1 = arith.constant 0 : i32
    return %c0_i32, %c0_i32_0 : i32, i32
  }
  func.func @transform_3(%arg0: i32) -> (i32, i32) {
    %c0_i32 = arith.constant 0 : i32
    %c0_i32_0 = arith.constant 0 : i32
    %c0_i32_1 = arith.constant 0 : i32
    return %c0_i32, %c0_i32_0 : i32, i32
  }
  func.func @transform_4(%arg0: i32) -> (i32, i32) {
    %c0_i32 = arith.constant 0 : i32
    %c0_i32_0 = arith.constant 0 : i32
    %c0_i32_1 = arith.constant 0 : i32
    return %c0_i32, %c0_i32_0 : i32, i32
  }
  func.func @transform_5(%arg0: i32) -> (i32, i32) {
    %c0_i32 = arith.constant 0 : i32
    %c0_i32_0 = arith.constant 0 : i32
    %c0_i32_1 = arith.constant 0 : i32
    return %c0_i32, %c0_i32_0 : i32, i32
  }
  func.func @transform_6(%arg0: i32) -> (i32, i32) {
    %c0_i32 = arith.constant 0 : i32
    %c0_i32_0 = arith.constant 0 : i32
    %c0_i32_1 = arith.constant 0 : i32
    return %c0_i32, %c0_i32_0 : i32, i32
  }
  func.func @transform_7(%arg0: i32) -> (i32, i32) {
    %c0_i32 = arith.constant 0 : i32
    %c0_i32_0 = arith.constant 0 : i32
    %c0_i32_1 = arith.constant 0 : i32
    return %c0_i32, %c0_i32_0 : i32, i32
  }
}

</mosaic_0001>

<bundles_post_ra>
// kernel: tpu_custom_call.1
= control target key start
LH: loop header
LB: loop body
LE: loop exit
PB: predicated region body
PF: predicated region fallthrough
CT: control target
= control target key end

     0   :  { %v16445_v1 = vmov 0   ;;  %s16388_s0 = inlined_call_operand.vmem [shape: s32[16,1], index: 0, kind: input, shape index: {}]   ;;  %s16389_s1 = inlined_call_operand.vmem [shape: s32[1,16], index: 1, kind: input, shape index: {}]   ;;  %s16390_s2 = inlined_call_operand.vmem [shape: f32[16,6], index: 2, kind: input, shape index: {}]   ;;  %s16391_s3 = inlined_call_operand.vmem [shape: f32[8,8], index: 3, kind: input, shape index: {}]   ;;  %s16392_s4 = inlined_call_operand.vmem [shape: f32[24,128], index: 4, kind: input, shape index: {}]   ;;  %s16393_s5 = inlined_call_operand.vmem [shape: f32[17920,64], index: 5, kind: input, shape index: {}]   ;;  %s16394_s6 = inlined_call_operand.vmem [shape: f32[152,64], index: 6, kind: input, shape index: {}]   ;;  %s16395_s7 = inlined_call_operand.hbm [shape: f32[8,128], index: 7, kind: output, shape index: {}]  }
   0x1   :  { %v32_v0 = vld [vmem:[%s16388_s0] sm:$0xff]  ;;  %7436 = vset.pattern.permute.xlu0 %v16445_v1  ;;  %7437 = vset.pattern.permute.xlu1 %v16445_v1 }
   0x2   :  { %12 = vsyncpa [#allocation3], 0  ;;  %35 = vperm.xlu0 %7436, %v32_v0   ;;  %7441 = vset.pattern.permute.xlu2 %v16445_v1  ;;  %v33_v2 = vld [vmem:[%s16388_s0 + $0x8] sm:$0xff]  ;;  %v7855_v3 = vld [vmem:[%s16391_s3] sm:$0xff]  ;;  %vm112_vm0 = vcmask 1045504   ;;  %vm105_vm1 = vcmask 48128   ;;  %v30_v8 = vlaneseq }
   0x3   :  { %95 = vmatpush.msra.mxu0 %v7855_v3  ;;  %v7861_v4 = vld [vmem:[%s16392_s4] sm:$0xff]  ;;  %v16461_v6 = vmov 2   ;;  %v7876_v7 = vld [vmem:[%s16390_s2 + $0x8] sm:$0xff]  ;;  %vm73_vm2 = vcmask 64512   ;;  %v16396_v11 = vmov 0.0   ;;  %v202_v15 = vld [vmem:[%s16393_s5 + $0x78] sm:$0xff] }
   0x4   :  { %v7866_v5 = vld [vmem:[%s16390_s2] sm:$0xff]  ;;  %7344 = vmatpush.msk.msra.mxu1 %vm112_vm0, %v7861_v4  ;;  %v7881_v9 = vand.u32 127, %v30_v8  ;;  %v234_v16 = vld [vmem:[%s16393_s5 + $0x178] sm:$0xff]  ;;  %v201_v17 = vld [vmem:[%s16393_s5 + $0x70] sm:$0xff]  ;;  %251 = vmatpush.msra.mxu2 %v202_v15  ;;  %v16397_v33 = vmov 1   ;;  %v16463_v34 = vmov 3  }
   0x5   :  { %7345 = vmatmul.msk.f32.vlgmr.msra.gmra.mxu1 %vm105_vm1, %v7866_v5  ;;  %297 = vmatpush.msrb.mxu0 %v234_v16  ;;  %v233_v18 = vld [vmem:[%s16393_s5 + $0x170] sm:$0xff]  ;;  %v200_v19 = vld [vmem:[%s16393_s5 + $0x68] sm:$0xff]  ;;  %v218_v21 = vld [vmem:[%s16393_s5 + $0xf8] sm:$0xff]  ;;  %vm53_vm8 = vcmask 130048   ;;  %vm374_vm9 = vcmask 1043456   ;;  %vm370_vm10 = vcmask 31744  }
   0x6   :  { %16545 = vst [vmem:[#allocation5_spill] sm:$0xff] %v7881_v9  ;;  %v232_v20 = vld [vmem:[%s16393_s5 + $0x168] sm:$0xff]  ;;  %252 = vmatpush.msra.mxu2 %v201_v17  ;;  %v199_v22 = vld [vmem:[%s16393_s5 + $0x60] sm:$0xff]  ;;  %274 = vmatpush.msra.mxu3 %v218_v21  ;;  %v217_v25 = vld [vmem:[%s16393_s5 + $0xf0] sm:$0xff]  ;;  %s7330_s12 = sshll.u32 %s16395_s7, 4  ;;  %s7331_s12 = int_to_ptr.hbm [resolvable:$true] %s7330_s12 }
   0x7   :  { %298 = vmatpush.msrb.mxu0 %v233_v18  ;;  %v231_v23 = vld [vmem:[%s16393_s5 + $0x160] sm:$0xff]  ;;  %v198_v26 = vld [vmem:[%s16393_s5 + $0x58] sm:$0xff]  ;;  %v197_v28 = vld [vmem:[%s16393_s5 + $0x50] sm:$0xff] }
   0x8   :  { %253 = vmatpush.msra.mxu2 %v200_v19  ;;  %v230_v27 = vld [vmem:[%s16393_s5 + $0x158] sm:$0xff]  ;;  %v229_v29 = vld [vmem:[%s16393_s5 + $0x150] sm:$0xff]  ;;  %275 = vmatpush.msra.mxu3 %v217_v25  ;;  %v196_v30 = vld [vmem:[%s16393_s5 + $0x48] sm:$0xff] }
   0x9   :  { %299 = vmatpush.msrb.mxu0 %v232_v20  ;;  %v228_v31 = vld [vmem:[%s16393_s5 + $0x148] sm:$0xff]  ;;  %v195_v36 = vld [vmem:[%s16393_s5 + $0x40] sm:$0xff]  ;;  %v194_v39 = vld [vmem:[%s16393_s5 + $0x38] sm:$0xff] }
   0xa   :  { %38 = vperm.xlu0 %7436, %v33_v2   ;;  %254 = vmatpush.msra.mxu2 %v199_v22  ;;  %v216_v35 = vld [vmem:[%s16393_s5 + $0xe8] sm:$0xff]  ;;  %v227_v37 = vld [vmem:[%s16393_s5 + $0x140] sm:$0xff]  ;;  %v226_v40 = vld [vmem:[%s16393_s5 + $0x138] sm:$0xff] }
   0xb   :  { %300 = vmatpush.msrb.mxu0 %v231_v23  ;;  %276 = vmatpush.msra.mxu3 %v216_v35  ;;  %v215_v38 = vld [vmem:[%s16393_s5 + $0xe0] sm:$0xff]  ;;  %v214_v41 = vld [vmem:[%s16393_s5 + $0xd8] sm:$0xff]  ;;  %v193_v42 = vld [vmem:[%s16393_s5 + $0x30] sm:$0xff] }
   0xc   :  { %255 = vmatpush.msra.mxu2 %v198_v26  ;;  %v225_v43 = vld [vmem:[%s16393_s5 + $0x130] sm:$0xff]  ;;  %v250_v44 = vld [vmem:[%s16393_s5 + $0x1f8] sm:$0xff]  ;;  %v192_v46 = vld [vmem:[%s16393_s5 + $0x28] sm:$0xff] }
   0xd   :  { %7346 = vmatmul.msk.f32.gmra.mxu1 %vm105_vm1, %v7876_v7  ;;  %301 = vmatpush.msrb.mxu0 %v230_v27  ;;  %v213_v45 = vld [vmem:[%s16393_s5 + $0xd0] sm:$0xff]  ;;  %v224_v48 = vld [vmem:[%s16393_s5 + $0x128] sm:$0xff]  ;;  %v191_v50 = vld [vmem:[%s16393_s5 + $0x20] sm:$0xff] }
   0xe   :  { %256 = vmatpush.msra.mxu2 %v197_v28  ;;  %277 = vmatpush.msra.mxu3 %v215_v38  ;;  %v249_v47 = vld [vmem:[%s16393_s5 + $0x1f0] sm:$0xff]  ;;  %v212_v49 = vld [vmem:[%s16393_s5 + $0xc8] sm:$0xff]  ;;  %v223_v51 = vld [vmem:[%s16393_s5 + $0x120] sm:$0xff] }
   0xf   :  { %302 = vmatpush.msrb.mxu0 %v229_v29  ;;  %320 = vmatpush.msrb.mxu1 %v250_v44  ;;  %v248_v52 = vld [vmem:[%s16393_s5 + $0x1e8] sm:$0xff]  ;;  %v211_v53 = vld [vmem:[%s16393_s5 + $0xc0] sm:$0xff]  ;;  %v190_v54 = vld [vmem:[%s16393_s5 + $0x18] sm:$0xff] }
  0x10   :  { %257 = vmatpush.msra.mxu2 %v196_v30  ;;  %278 = vmatpush.msra.mxu3 %v214_v41  ;;  %v222_v55 = vld [vmem:[%s16393_s5 + $0x118] sm:$0xff]  ;;  %v247_v56 = vld [vmem:[%s16393_s5 + $0x1e0] sm:$0xff]  ;;  %v189_v58 = vld [vmem:[%s16393_s5 + $0x10] sm:$0xff] }
  0x11   :  { %303 = vmatpush.msrb.mxu0 %v228_v31  ;;  %321 = vmatpush.msrb.mxu1 %v249_v47  ;;  %v210_v57 = vld [vmem:[%s16393_s5 + $0xb8] sm:$0xff]  ;;  %v221_v59 = vld [vmem:[%s16393_s5 + $0x110] sm:$0xff]  ;;  %v188_v62 = vld [vmem:[%s16393_s5 + $0x8] sm:$0xff] }
  0x12   :  { %7439 = vset.pattern.permute.xlu0 %v16461_v6  ;;  %258 = vmatpush.msra.mxu2 %v195_v36  ;;  %v246_v60 = vld [vmem:[%s16393_s5 + $0x1d8] sm:$0xff]  ;;  %v209_v61 = vld [vmem:[%s16393_s5 + $0xb0] sm:$0xff]  ;;  %v220_v63 = vld [vmem:[%s16393_s5 + $0x108] sm:$0xff] }
  0x13   :  { %304 = vmatpush.msrb.mxu0 %v227_v37  ;;  %279 = vmatpush.msra.mxu3 %v213_v45  ;;  %v245_v0 = vld [vmem:[%s16393_s5 + $0x1d0] sm:$0xff]  ;;  %v208_v2 = vld [vmem:[%s16393_s5 + $0xa8] sm:$0xff]  ;;  %v207_v16 = vld [vmem:[%s16393_s5 + $0xa0] sm:$0xff] }
  0x14   :  { %259 = vmatpush.msra.mxu2 %v194_v39  ;;  %322 = vmatpush.msrb.mxu1 %v248_v52  ;;  %v244_v15 = vld [vmem:[%s16393_s5 + $0x1c8] sm:$0xff]  ;;  %v243_v17 = vld [vmem:[%s16393_s5 + $0x1c0] sm:$0xff]  ;;  %v206_v18 = vld [vmem:[%s16393_s5 + $0x98] sm:$0xff] }
  0x15   :  { %305 = vmatpush.msrb.mxu0 %v226_v40  ;;  %280 = vmatpush.msra.mxu3 %v212_v49  ;;  %v242_v19 = vld [vmem:[%s16393_s5 + $0x1b8] sm:$0xff]  ;;  %v205_v20 = vld [vmem:[%s16393_s5 + $0x90] sm:$0xff]  ;;  %v204_v22 = vld [vmem:[%s16393_s5 + $0x88] sm:$0xff] }
  0x16   :  { %260 = vmatpush.msra.mxu2 %v193_v42  ;;  %323 = vmatpush.msrb.mxu1 %v247_v56  ;;  %v241_v21 = vld [vmem:[%s16393_s5 + $0x1b0] sm:$0xff]  ;;  %v240_v23 = vld [vmem:[%s16393_s5 + $0x1a8] sm:$0xff]  ;;  %v239_v25 = vld [vmem:[%s16393_s5 + $0x1a0] sm:$0xff] }
  0x17   :  { %306 = vmatpush.msrb.mxu0 %v225_v43  ;;  %281 = vmatpush.msra.mxu3 %v211_v53  ;;  %v238_v26 = vld [vmem:[%s16393_s5 + $0x198] sm:$0xff]  ;;  %v237_v27 = vld [vmem:[%s16393_s5 + $0x190] sm:$0xff]  ;;  %v236_v28 = vld [vmem:[%s16393_s5 + $0x188] sm:$0xff] }
  0x18   :  { %261 = vmatpush.msra.mxu2 %v192_v46  ;;  %324 = vmatpush.msrb.mxu1 %v246_v60  ;;  %v235_v31 = vld [vmem:[%s16393_s5 + $0x180] sm:$0xff]  ;;  %v8101_v39 = vld [vmem:[%s16392_s4 + $0x8] sm:$0xff] }
  0x19   :  { %307 = vmatpush.msrb.mxu0 %v224_v48  ;;  %282 = vmatpush.msra.mxu3 %v210_v57  ;;  %v47_v57 = vshrl.u32 %v30_v8, 7 }
  0x1a   :  { %262 = vmatpush.msra.mxu2 %v191_v50  ;;  %325 = vmatpush.msrb.mxu1 %v245_v0 }
  0x1b   :  { %308 = vmatpush.msrb.mxu0 %v223_v51  ;;  %283 = vmatpush.msra.mxu3 %v209_v61 }
  0x1c   :  { %263 = vmatpush.msra.mxu2 %v190_v54  ;;  %326 = vmatpush.msrb.mxu1 %v244_v15 }
  0x1d   :  { %309 = vmatpush.msrb.mxu0 %v222_v55  ;;  %284 = vmatpush.msra.mxu3 %v208_v2 }
  0x1e   :  { %264 = vmatpush.msra.mxu2 %v189_v58  ;;  %327 = vmatpush.msrb.mxu1 %v243_v17  ;;  %v7699_v58 = vld [vmem:[%s16389_s1] ss:$0 sm:$0xff] }
  0x1f   :  { %310 = vmatpush.msrb.mxu0 %v221_v59  ;;  %285 = vmatpush.msra.mxu3 %v207_v16  ;;  %vm50_vm7 = vcmp.eq.s32.totalorder %v7699_v58, %v47_v57  ;;  %v16481_v57 = vmov 7   ;;  %v16459_v58 = vmov 14  }
  0x20   :  { %265 = vmatpush.msra.mxu2 %v188_v62  ;;  %328 = vmatpush.msrb.mxu1 %v242_v19  ;;  %v8134_v59 = vsel %vm50_vm7, 1.0, %v16396_v11 }
  0x21   :  { %311 = vmatpush.msrb.mxu0 %v220_v63  ;;  %286 = vmatpush.msra.mxu3 %v206_v18  ;;  %16556 = vst [vmem:[#allocation16_spill] sm:$0xff] %v8134_v59  ;;  %v54_v60 = vsel %vm53_vm8, %v8134_v59, 0.0 }
  0x22   :  { %329 = vmatpush.msrb.mxu1 %v241_v21 }
  0x23   :  { %287 = vmatpush.msra.mxu3 %v205_v20 }
  0x24   :  { %330 = vmatpush.msrb.mxu1 %v240_v23 }
  0x25   :  { %288 = vmatpush.msra.mxu3 %v204_v22 }
  0x26   :  { %331 = vmatpush.msrb.mxu1 %v239_v25 }
  0x28   :  { %332 = vmatpush.msrb.mxu1 %v238_v26 }
  0x2a   :  { %333 = vmatpush.msrb.mxu1 %v237_v27 }
  0x2c   :  { %334 = vmatpush.msrb.mxu1 %v236_v28 }
  0x2e   :  { %335 = vmatpush.msrb.mxu1 %v235_v31 }
  0x30   :  { %7352 = vmatpush.msk.msra.mxu1 %vm112_vm0, %v8101_v39 }
  0x74   :  { %v36_v10 = vpop.permute.xlu0 %35 }
  0x75   :  { %vm40_vm3 = vcmp.eq.s32.totalorder %v36_v10, %v7881_v9  ;;  %v187_v10 = vld [vmem:[%s16393_s5] sm:$0xff] }
  0x76   :  { %v7885_v12 = vsel %vm40_vm3, 1.0, %v16396_v11  ;;  %266 = vmatpush.msra.mxu2 %v187_v10 }
  0x77   :  { %16546 = vst [vmem:[#allocation6_spill] sm:$0xff] %v7885_v12  ;;  %7342 = vmatmul.msk.f32.vlgmr.msra.gmra.mxu0 %vm73_vm2, %v7885_v12 }
  0x7c   :  { %v39_v13 = vpop.permute.xlu0 %38 }
  0x7d   :  { %vm41_vm4 = vcmp.eq.s32.totalorder %v39_v13, %v7881_v9  ;;  %v219_v13 = vld [vmem:[%s16393_s5 + $0x100] sm:$0xff] }
  0x7e   :  { %v7891_v14 = vsel %vm41_vm4, 1.0, %v16396_v11  ;;  %312 = vmatpush.msrb.mxu0 %v219_v13  ;;  %v1245_v9 = vld [vmem:[%s16393_s5 + $0x640] sm:$0xff] }
  0x7f   :  { %16547 = vst [vmem:[#allocation7_spill] sm:$0xff] %v7891_v14  ;;  %7343 = vmatmul.msk.f32.gmra.mxu0 %vm73_vm2, %v7891_v14 }
  0x82   :  { %v133_v29 = vpop.f32.mrf.mxu1 }
  0x8a   :  { %v136_v37 = vpop.f32.mrf.mxu1 }
  0xf4   :  { %v97_v24 = vpop.f32.mrf.mxu0 }
  0xf5   :  { %168 = vperm.xlu0 %7439, %v97_v24   ;;  %147 = vperm.xlu1 %7437, %v97_v24  }
  0xfc   :  { %v100_v32 = vpop.f32.mrf.mxu0 }
  0xfd   :  { %7438 = vset.pattern.permute.xlu1 %v16397_v33  ;;  %152 = vperm.xlu2 %7441, %v100_v32  }
  0xfe   :  { %158 = vperm.xlu1 %7438, %v97_v24   ;;  %7444 = vset.pattern.permute.xlu0 %v16445_v1 }
 0x105   :  { %7442 = vset.pattern.permute.xlu2 %v16397_v33 }
 0x106   :  { %7440 = vset.pattern.permute.xlu1 %v16463_v34  ;;  %162 = vperm.xlu2 %7442, %v100_v32  }
 0x107   :  { %178 = vperm.xlu1 %7440, %v97_v24   ;;  %v203_v24 = vld [vmem:[%s16393_s5 + $0x80] sm:$0xff] }
 0x108   :  { %289 = vmatpush.msra.mxu3 %v203_v24  ;;  %v16469_v24 = vmov 4  }
 0x10e   :  { %7443 = vset.pattern.permute.xlu2 %v16461_v6 }
 0x10f   :  { %182 = vperm.xlu1 %7440, %v100_v32   ;;  %172 = vperm.xlu2 %7443, %v100_v32   ;;  %v104_v32 = vperm.slane %v7861_v4, 6 }
 0x111   :  { %v134_v35 = vadd.f32 %v133_v29, %v104_v32  ;;  %v137_v40 = vadd.f32 %v136_v37, %v104_v32 }
 0x113   :  { %v141_v36 = vmul.f32 0.01, %v134_v35  ;;  %vm139_vm5 = vcmp.gt.f32.partialorder %v134_v35, 0.0  ;;  %v142_v45 = vmul.f32 0.01, %v137_v40  ;;  %vm140_vm6 = vcmp.gt.f32.partialorder %v137_v40, 0.0 }
 0x115   :  { %v143_v41 = vsel %vm139_vm5, %v134_v35, %v141_v36  ;;  %v144_v47 = vsel %vm140_vm6, %v137_v40, %v142_v45  ;;  %vm3793_vm5 = vcmask 523264  }
 0x117   :  { %7445 = vset.pattern.permute.xlu1 %v16397_v33  ;;  %7448 = vset.pattern.permute.xlu2 %v16469_v24 }
 0x138   :  { %55 = vadd.xlane.f32.xlu2 %v54_v60  ;;  %v16455_v60 = vmov 11  }
 0x157   :  { %v8090_v30 = vpop.permute.xlu2 %152 }
 0x158   :  { %16548 = vst [vmem:[#allocation8_spill] sm:$0xff] %v8090_v30  ;;  %v156_v49 = vmul.f32 %v8090_v30, %v144_v47 }
 0x160   :  { %v8096_v38 = vpop.permute.xlu2 %162 }
 0x161   :  { %16549 = vst [vmem:[#allocation9_spill] sm:$0xff] %v8096_v38  ;;  %v166_v53 = vmul.f32 %v8096_v38, %v144_v47 }
 0x167   :  { %v8105_v42 = vpop.permute.xlu0 %168  ;;  %v8107_v4 = vpop.permute.xlu1 %147 }
 0x168   :  { %16550 = vst [vmem:[#allocation10_spill] sm:$0xff] %v8105_v42  ;;  %v155_v43 = vmul.f32 %v8107_v4, %v143_v41  ;;  %v175_v44 = vmul.f32 %v8105_v42, %v143_v41 }
 0x169   :  { %16551 = vst [vmem:[#allocation11_spill] sm:$0xff] %v8107_v4  ;;  %v8111_v46 = vpop.permute.xlu2 %172 }
 0x16a   :  { %267 = vmatmul.f32.vlgmr.msra.gmra.mxu2 %v155_v43  ;;  %313 = vmatmul.f32.vlgmr.msrb.gmra.mxu0 %v175_v44  ;;  %16552 = vst [vmem:[#allocation12_spill] sm:$0xff] %v8111_v46  ;;  %v176_v50 = vmul.f32 %v8111_v46, %v144_v47 }
 0x170   :  { %v8113_v48 = vpop.permute.xlu1 %158 }
 0x171   :  { %16553 = vst [vmem:[#allocation13_spill] sm:$0xff] %v8113_v48  ;;  %v165_v51 = vmul.f32 %v8113_v48, %v143_v41 }
 0x172   :  { %270 = vmatmul.f32.gmra.mxu2 %v156_v49  ;;  %316 = vmatmul.f32.gmra.mxu0 %v176_v50  ;;  %v16485_v49 = vmov 8   ;;  %v16399_v50 = vmov 9  }
 0x173   :  { %290 = vmatmul.f32.vlgmr.msra.gmra.mxu3 %v165_v51  ;;  %v16437_v51 = vmov 6  }
 0x179   :  { %v8118_v52 = vpop.permute.xlu1 %178 }
 0x17a   :  { %16554 = vst [vmem:[#allocation14_spill] sm:$0xff] %v8118_v52  ;;  %v185_v54 = vmul.f32 %v8118_v52, %v143_v41 }
 0x17b   :  { %293 = vmatmul.f32.gmra.mxu3 %v166_v53  ;;  %v16477_v53 = vmov 5  }
 0x17c   :  { %336 = vmatmul.f32.vlgmr.msrb.gmra.mxu1 %v185_v54  ;;  %v16499_v54 = vmov 13  }
 0x181   :  { %v8122_v55 = vpop.permute.xlu1 %182 }
 0x182   :  { %16555 = vst [vmem:[#allocation15_spill] sm:$0xff] %v8122_v55  ;;  %v186_v56 = vmul.f32 %v8122_v55, %v144_v47  ;;  %v16564_v55 = vmov 3  }
 0x184   :  { %339 = vmatmul.f32.gmra.mxu1 %v186_v56  ;;  %v16443_v56 = vmov 10  }
 0x18c   :  { %7353 = vmatmul.msk.f32.vlgmr.msra.gmra.mxu1 %vm105_vm1, %v7866_v5  ;;  %v367_v5 = vld [vmem:[%s16394_s6] sm:$0xff] }
 0x18d   :  { %7348 = vmatpush.msk.msrb.mxu3 %vm374_vm9, %v367_v5  ;;  %v368_v32 = vperm.slane %v367_v5, 4  ;;  %v16491_v5 = vmov 12  }
 0x18e   :  { %7349 = vmatmul.msk.f32.vlgmr.msrb.gmra.mxu3 %vm370_vm10, %v7855_v3 }
 0x194   :  { %7354 = vmatmul.msk.f32.gmra.mxu1 %vm105_vm1, %v7876_v7 }
 0x1ab   :  { %v56_v3 = vpop.xlane.xlu2 %55 }
 0x1ac   :  { %v57_v20 = vmax.f32 %v56_v3, 1.0  ;;  %v1121_v3 = vld [vmem:[%s16393_s5 + $0x260] sm:$0xff] }
 0x1ae   :  { %7700 = vrcp.f32 %v57_v20  ;;  %vm63_vm11 = vweird.f32 %v57_v20  ;;  %v69_v26 = vand.u32 2147483648, %v57_v20  ;;  %v67_v28 = vand.u32 2147483647, %v57_v20 }
 0x1b0   :  { %v70_v29 = vor.u32 1.1754944e-38, %v69_v26  ;;  %vm68_vm14 = vcmp.eq.f32.partialorder %v67_v28, 8.507059e+37  ;;  %v1136_v26 = vld [vmem:[%s16393_s5 + $0x2d8] sm:$0xff]  ;;  %v1171_v28 = vld [vmem:[%s16393_s5 + $0x3f0] sm:$0xff] }
 0x1b4   :  { %v7701_v21 = vpop.eup %7700 }
 0x1b5   :  { %v59_v22 = vmul.f32 %v7701_v21, %v57_v20  ;;  %vm64_vm12 = vweird.f32 %v7701_v21  ;;  %v1137_v20 = vld [vmem:[%s16393_s5 + $0x2e0] sm:$0xff] }
 0x1b6   :  { %vm65_vm13 = vmor %vm63_vm11, %vm64_vm12 }
 0x1b7   :  { %v60_v23 = vsub.f32 1.0, %v59_v22  ;;  %v1156_v22 = vld [vmem:[%s16393_s5 + $0x378] sm:$0xff] }
 0x1b9   :  { %v61_v25 = vmul.f32 %v7701_v21, %v60_v23  ;;  %v1172_v23 = vld [vmem:[%s16393_s5 + $0x3f8] sm:$0xff] }
 0x1ba   :  { %2266 = vmatpush.msrb.mxu1 %v1172_v23  ;;  %v1151_v23 = vld [vmem:[%s16393_s5 + $0x350] sm:$0xff] }
 0x1bb   :  { %v62_v27 = vadd.f32 %v7701_v21, %v61_v25  ;;  %v1120_v25 = vld [vmem:[%s16393_s5 + $0x258] sm:$0xff] }
 0x1bc   :  { %2267 = vmatpush.msrb.mxu1 %v1171_v28  ;;  %v16423_v28 = vmov 23  }
 0x1bd   :  { %v66_v31 = vsel %vm65_vm13, %v7701_v21, %v62_v27  ;;  %v16507_v21 = vmov 28   ;;  %v1155_v27 = vld [vmem:[%s16393_s5 + $0x370] sm:$0xff] }
 0x1be   :  { %v8147_v35 = vsel %vm68_vm14, %v70_v29, %v66_v31  ;;  %v1119_v29 = vld [vmem:[%s16393_s5 + $0x250] sm:$0xff] }
 0x1bf   :  { %16557 = vst [vmem:[#allocation17_spill] sm:$0xff] %v8147_v35  ;;  %v1135_v31 = vld [vmem:[%s16393_s5 + $0x2d0] sm:$0xff] }
 0x1e7   :  { %v314_v8 = vpop.f32.mrf.mxu0 }
 0x1ed   :  { %v268_v7 = vpop.f32.mrf.mxu2 }
 0x1ef   :  { %v317_v13 = vpop.f32.mrf.mxu0 }
 0x1f5   :  { %v271_v0 = vpop.f32.mrf.mxu2 }
 0x1f6   :  { %v291_v61 = vpop.f32.mrf.mxu3 }
 0x1f7   :  { %v292_v63 = vadd.f32 %v291_v61, %v268_v7  ;;  %v16411_v7 = vmov 18   ;;  %v16467_v61 = vmov 15  }
 0x1f9   :  { %v337_v62 = vpop.f32.mrf.mxu1  ;;  %v315_v17 = vadd.f32 %v314_v8, %v292_v63  ;;  %v16401_v8 = vmov 16   ;;  %v16473_v63 = vmov 20  }
 0x1fb   :  { %v338_v19 = vadd.f32 %v337_v62, %v315_v17  ;;  %v1124_v62 = vld [vmem:[%s16393_s5 + $0x278] sm:$0xff]  ;;  %v1138_v17 = vld [vmem:[%s16393_s5 + $0x2e8] sm:$0xff] }
 0x1fe   :  { %v294_v2 = vpop.f32.mrf.mxu3 }
 0x1ff   :  { %v295_v10 = vadd.f32 %v294_v2, %v271_v0  ;;  %v1140_v0 = vld [vmem:[%s16393_s5 + $0x2f8] sm:$0xff]  ;;  %v16503_v2 = vmov 17  }
 0x200   :  { %2220 = vmatpush.msra.mxu3 %v1140_v0  ;;  %v1153_v0 = vld [vmem:[%s16393_s5 + $0x360] sm:$0xff] }
 0x201   :  { %v340_v15 = vpop.f32.mrf.mxu1  ;;  %v318_v16 = vadd.f32 %v317_v13, %v295_v10  ;;  %v16439_v10 = vmov 22   ;;  %v1123_v13 = vld [vmem:[%s16393_s5 + $0x270] sm:$0xff] }
 0x203   :  { %v341_v18 = vadd.f32 %v340_v15, %v318_v16  ;;  %v1139_v15 = vld [vmem:[%s16393_s5 + $0x2f0] sm:$0xff]  ;;  %v1122_v16 = vld [vmem:[%s16393_s5 + $0x268] sm:$0xff] }
 0x204   :  { %2221 = vmatpush.msra.mxu3 %v1139_v15  ;;  %v1169_v15 = vld [vmem:[%s16393_s5 + $0x3e0] sm:$0xff] }
 0x205   :  { %360 = vmatpush.msrb.mxu2 %v341_v18  ;;  %v16435_v18 = vmov 24  }
 0x206   :  { %2222 = vmatpush.msra.mxu3 %v1138_v17  ;;  %v1152_v17 = vld [vmem:[%s16393_s5 + $0x358] sm:$0xff] }
 0x207   :  { %361 = vmatpush.msrb.mxu2 %v338_v19  ;;  %v16479_v19 = vmov 19  }
 0x208   :  { %7347 = vmatmul.msk.f32.vlgmr.msrb.gmra.mxu2 %vm53_vm8, %v8134_v59  ;;  %2223 = vmatpush.msra.mxu3 %v1137_v20  ;;  %v1168_v20 = vld [vmem:[%s16393_s5 + $0x3d8] sm:$0xff] }
 0x209   :  { %2197 = vmatpush.msra.mxu2 %v1124_v62  ;;  %v1117_v62 = vld [vmem:[%s16393_s5 + $0x240] sm:$0xff] }
 0x20a   :  { %2224 = vmatpush.msra.mxu3 %v1136_v26  ;;  %v1167_v26 = vld [vmem:[%s16393_s5 + $0x3d0] sm:$0xff] }
 0x20b   :  { %2198 = vmatpush.msra.mxu2 %v1123_v13  ;;  %v1133_v13 = vld [vmem:[%s16393_s5 + $0x2c0] sm:$0xff] }
 0x20c   :  { %2225 = vmatpush.msra.mxu3 %v1135_v31  ;;  %v1130_v31 = vld [vmem:[%s16393_s5 + $0x2a8] sm:$0xff] }
 0x20d   :  { %2199 = vmatpush.msra.mxu2 %v1122_v16  ;;  %v1116_v16 = vld [vmem:[%s16393_s5 + $0x238] sm:$0xff] }
 0x20f   :  { %2200 = vmatpush.msra.mxu2 %v1121_v3  ;;  %v1132_v3 = vld [vmem:[%s16393_s5 + $0x2b8] sm:$0xff] }
 0x211   :  { %v395_v40 = vpop.f32.mrf.mxu3  ;;  %2201 = vmatpush.msra.mxu2 %v1120_v25  ;;  %v1131_v25 = vld [vmem:[%s16393_s5 + $0x2b0] sm:$0xff] }
 0x213   :  { %2202 = vmatpush.msra.mxu2 %v1119_v29  ;;  %v1114_v29 = vld [vmem:[%s16393_s5 + $0x228] sm:$0xff] }
 0x28b   :  { %v363_v36 = vpop.f32.mrf.mxu2 }
 0x28c   :  { %v366_v37 = vmul.f32 %v363_v36, %v8147_v35  ;;  %v1154_v36 = vld [vmem:[%s16393_s5 + $0x368] sm:$0xff]  ;;  %v1275_v35 = vld [vmem:[%s16393_s5 + $0x730] sm:$0xff] }
 0x28e   :  { %v369_v41 = vadd.f32 %v368_v32, %v366_v37  ;;  %v1118_v32 = vld [vmem:[%s16393_s5 + $0x248] sm:$0xff] }
 0x28f   :  { %v1170_v37 = vld [vmem:[%s16393_s5 + $0x3e8] sm:$0xff]  ;;  %2203 = vmatpush.msra.mxu2 %v1118_v32  ;;  %v16451_v32 = vmov 35  }
 0x290   :  { %v398_v43 = vadd.f32 %v395_v40, %v369_v41  ;;  %2268 = vmatpush.msrb.mxu1 %v1170_v37  ;;  %v16501_v40 = vmov 25   ;;  %v1134_v41 = vld [vmem:[%s16393_s5 + $0x2c8] sm:$0xff] }
 0x291   :  { %2226 = vmatpush.msra.mxu3 %v1134_v41  ;;  %2204 = vmatpush.msra.mxu2 %v1117_v62  ;;  %v1166_v37 = vld [vmem:[%s16393_s5 + $0x3c8] sm:$0xff]  ;;  %v1113_v41 = vld [vmem:[%s16393_s5 + $0x220] sm:$0xff] }
 0x292   :  { %v400_v44 = vmul.f32 0.01, %v398_v43  ;;  %vm399_vm15 = vcmp.gt.f32.partialorder %v398_v43, 0.0  ;;  %2269 = vmatpush.msrb.mxu1 %v1169_v15  ;;  %v1129_v62 = vld [vmem:[%s16393_s5 + $0x2a0] sm:$0xff]  ;;  %v1112_v15 = vld [vmem:[%s16393_s5 + $0x218] sm:$0xff] }
 0x293   :  { %2227 = vmatpush.msra.mxu3 %v1133_v13  ;;  %2205 = vmatpush.msra.mxu2 %v1116_v16  ;;  %v1165_v13 = vld [vmem:[%s16393_s5 + $0x3c0] sm:$0xff]  ;;  %v1128_v16 = vld [vmem:[%s16393_s5 + $0x298] sm:$0xff] }
 0x294   :  { %v8150_v45 = vsel %vm399_vm15, %v398_v43, %v400_v44  ;;  %v16483_v43 = vmov 21   ;;  %v16415_v44 = vmov 33   ;;  %2270 = vmatpush.msrb.mxu1 %v1168_v20  ;;  %v1111_v20 = vld [vmem:[%s16393_s5 + $0x210] sm:$0xff] }
 0x295   :  { %16558 = vst [vmem:[#allocation18_spill] sm:$0xff] %v8150_v45  ;;  %417 = vmatpush.msra.mxu0 %v8150_v45  ;;  %2228 = vmatpush.msra.mxu3 %v1132_v3  ;;  %v1164_v3 = vld [vmem:[%s16393_s5 + $0x3b8] sm:$0xff] }
 0x296   :  { %7350 = vmatmul.msk.f32.vlgmr.msra.gmra.mxu0 %vm73_vm2, %v7885_v12  ;;  %2271 = vmatpush.msrb.mxu1 %v1167_v26  ;;  %v16403_v26 = vmov 42  }
 0x297   :  { %2243 = vmatpush.msrb.mxu0 %v1156_v22  ;;  %v1115_v22 = vld [vmem:[%s16393_s5 + $0x230] sm:$0xff]  ;;  %2229 = vmatpush.msra.mxu3 %v1131_v25  ;;  %v16429_v25 = vmov 26  }
 0x298   :  { %2206 = vmatpush.msra.mxu2 %v1115_v22  ;;  %2272 = vmatpush.msrb.mxu1 %v1166_v37  ;;  %v16441_v22 = vmov 29   ;;  %v1126_v37 = vld [vmem:[%s16393_s5 + $0x288] sm:$0xff] }
 0x299   :  { %2244 = vmatpush.msrb.mxu0 %v1155_v27  ;;  %v16421_v27 = vmov 27   ;;  %2230 = vmatpush.msra.mxu3 %v1130_v31  ;;  %v1163_v31 = vld [vmem:[%s16393_s5 + $0x3b0] sm:$0xff] }
 0x29a   :  { %2207 = vmatpush.msra.mxu2 %v1114_v29  ;;  %2273 = vmatpush.msrb.mxu1 %v1165_v13  ;;  %v1147_v29 = vld [vmem:[%s16393_s5 + $0x330] sm:$0xff]  ;;  %v1125_v13 = vld [vmem:[%s16393_s5 + $0x280] sm:$0xff] }
 0x29b   :  { %2245 = vmatpush.msrb.mxu0 %v1154_v36  ;;  %v1150_v36 = vld [vmem:[%s16393_s5 + $0x348] sm:$0xff]  ;;  %2231 = vmatpush.msra.mxu3 %v1129_v62 }
 0x29c   :  { %2208 = vmatpush.msra.mxu2 %v1113_v41  ;;  %2274 = vmatpush.msrb.mxu1 %v1164_v3  ;;  %v1146_v41 = vld [vmem:[%s16393_s5 + $0x328] sm:$0xff]  ;;  %v447_v3 = vpop.f32.mrf.mxu1 }
 0x29d   :  { %2246 = vmatpush.msrb.mxu0 %v1153_v0  ;;  %v1149_v0 = vld [vmem:[%s16393_s5 + $0x340] sm:$0xff]  ;;  %2232 = vmatpush.msra.mxu3 %v1128_v16  ;;  %v1162_v62 = vld [vmem:[%s16393_s5 + $0x3a8] sm:$0xff] }
 0x29e   :  { %7351 = vmatmul.msk.f32.gmra.mxu0 %vm73_vm2, %v7891_v14  ;;  %2209 = vmatpush.msra.mxu2 %v1112_v15  ;;  %v1145_v15 = vld [vmem:[%s16393_s5 + $0x320] sm:$0xff]  ;;  %v1242_v14 = vld [vmem:[%s16393_s5 + $0x628] sm:$0xff] }
 0x29f   :  { %2247 = vmatpush.msrb.mxu0 %v1152_v17  ;;  %v1148_v17 = vld [vmem:[%s16393_s5 + $0x338] sm:$0xff]  ;;  %2275 = vmatpush.msrb.mxu1 %v1163_v31  ;;  %v1161_v16 = vld [vmem:[%s16393_s5 + $0x3a0] sm:$0xff] }
 0x2a0   :  { %2210 = vmatpush.msra.mxu2 %v1111_v20  ;;  %v16417_v20 = vmov 31   ;;  %v1160_v31 = vld [vmem:[%s16393_s5 + $0x398] sm:$0xff] }
 0x2a1   :  { %2248 = vmatpush.msrb.mxu0 %v1151_v23  ;;  %v1127_v23 = vld [vmem:[%s16393_s5 + $0x290] sm:$0xff]  ;;  %2276 = vmatpush.msrb.mxu1 %v1162_v62 }
 0x2a2   :  { %2233 = vmatpush.msra.mxu3 %v1127_v23  ;;  %v16505_v23 = vmov 30  }
 0x2a3   :  { %2249 = vmatpush.msrb.mxu0 %v1150_v36  ;;  %v1110_v36 = vld [vmem:[%s16393_s5 + $0x208] sm:$0xff]  ;;  %2277 = vmatpush.msrb.mxu1 %v1161_v16 }
 0x2a4   :  { %2211 = vmatpush.msra.mxu2 %v1110_v36  ;;  %2234 = vmatpush.msra.mxu3 %v1126_v37  ;;  %v1143_v37 = vld [vmem:[%s16393_s5 + $0x310] sm:$0xff] }
 0x2a5   :  { %2250 = vmatpush.msrb.mxu0 %v1149_v0  ;;  %v1109_v0 = vld [vmem:[%s16393_s5 + $0x200] sm:$0xff]  ;;  %2278 = vmatpush.msrb.mxu1 %v1160_v31  ;;  %v16497_v31 = vmov 32  }
 0x2a6   :  { %2212 = vmatpush.msra.mxu2 %v1109_v0  ;;  %2235 = vmatpush.msra.mxu3 %v1125_v13  ;;  %v1142_v0 = vld [vmem:[%s16393_s5 + $0x308] sm:$0xff] }
 0x2a7   :  { %2251 = vmatpush.msrb.mxu0 %v1148_v17  ;;  %v426_v17 = vperm.slane %v8101_v39, 6  ;;  %v1158_v13 = vld [vmem:[%s16393_s5 + $0x388] sm:$0xff] }
 0x2a9   :  { %2252 = vmatpush.msrb.mxu0 %v1147_v29  ;;  %v1144_v29 = vld [vmem:[%s16393_s5 + $0x318] sm:$0xff]  ;;  %v448_v62 = vadd.f32 %v447_v3, %v426_v17  ;;  %v16465_v3 = vmov 34  }
 0x2ab   :  { %2253 = vmatpush.msrb.mxu0 %v1146_v41  ;;  %v1159_v41 = vld [vmem:[%s16393_s5 + $0x390] sm:$0xff]  ;;  %v455_v16 = vmul.f32 0.01, %v448_v62  ;;  %vm453_vm3 = vcmp.gt.f32.partialorder %v448_v62, 0.0 }
 0x2ac   :  { %2279 = vmatpush.msrb.mxu1 %v1159_v41 }
 0x2ad   :  { %2254 = vmatpush.msrb.mxu0 %v1145_v15  ;;  %v1141_v15 = vld [vmem:[%s16393_s5 + $0x300] sm:$0xff]  ;;  %v8428_v41 = vsel %vm453_vm3, %v448_v62, %v455_v16  ;;  %v16447_v62 = vmov 36  }
 0x2ae   :  { %2280 = vmatpush.msrb.mxu1 %v1158_v13 }
 0x2af   :  { %2255 = vmatpush.msrb.mxu0 %v1144_v29  ;;  %v1157_v29 = vld [vmem:[%s16393_s5 + $0x380] sm:$0xff] }
 0x2b0   :  { %2281 = vmatpush.msrb.mxu1 %v1157_v29 }
 0x2b1   :  { %2256 = vmatpush.msrb.mxu0 %v1143_v37  ;;  %v16413_v37 = vmov 48  }
 0x2b3   :  { %2257 = vmatpush.msrb.mxu0 %v1142_v0 }
 0x2b5   :  { %2258 = vmatpush.msrb.mxu0 %v1141_v15 }
 0x313   :  { %v8157_v47 = vpop.f32.mrf.mxu0 }
 0x314   :  { %502 = vperm.xlu2 %7448, %v8157_v47   ;;  %472 = vperm.xlu1 %7445, %v8157_v47  }
 0x315   :  { %461 = vperm.xlu0 %7444, %v8157_v47  }
 0x31b   :  { %v8399_v36 = vpop.f32.mrf.mxu0 }
 0x31c   :  { %7452 = vset.pattern.permute.xlu2 %v16485_v49  ;;  %7446 = vset.pattern.permute.xlu1 %v16461_v6 }
 0x31d   :  { %7447 = vset.pattern.permute.xlu0 %v16463_v34  ;;  %542 = vperm.xlu2 %7452, %v8157_v47  }
 0x31e   :  { %482 = vperm.xlu1 %7446, %v8157_v47   ;;  %492 = vperm.xlu0 %7447, %v8157_v47  }
 0x325   :  { %7453 = vset.pattern.permute.xlu2 %v16399_v50 }
 0x326   :  { %7450 = vset.pattern.permute.xlu1 %v16437_v51  ;;  %7449 = vset.pattern.permute.xlu0 %v16477_v53 }
 0x327   :  { %552 = vperm.xlu2 %7453, %v8157_v47   ;;  %522 = vperm.xlu1 %7450, %v8157_v47  }
 0x328   :  { %512 = vperm.xlu0 %7449, %v8157_v47  }
 0x32f   :  { %7457 = vset.pattern.permute.xlu2 %v16499_v54  ;;  %7454 = vset.pattern.permute.xlu1 %v16443_v56 }
 0x330   :  { %7451 = vset.pattern.permute.xlu0 %v16481_v57  ;;  %592 = vperm.xlu2 %7457, %v8157_v47  }
 0x331   :  { %562 = vperm.xlu1 %7454, %v8157_v47   ;;  %532 = vperm.xlu0 %7451, %v8157_v47  }
 0x338   :  { %7458 = vset.pattern.permute.xlu2 %v16459_v58 }
 0x339   :  { %7455 = vset.pattern.permute.xlu1 %v16455_v60  ;;  %7456 = vset.pattern.permute.xlu0 %v16491_v5 }
 0x33a   :  { %602 = vperm.xlu2 %7458, %v8157_v47   ;;  %572 = vperm.xlu1 %7455, %v8157_v47  }
 0x33b   :  { %582 = vperm.xlu0 %7456, %v8157_v47  }
 0x342   :  { %7462 = vset.pattern.permute.xlu2 %v16411_v7  ;;  %7460 = vset.pattern.permute.xlu1 %v16401_v8 }
 0x343   :  { %7459 = vset.pattern.permute.xlu0 %v16467_v61  ;;  %642 = vperm.xlu2 %7462, %v8157_v47  }
 0x344   :  { %622 = vperm.xlu1 %7460, %v8157_v47   ;;  %612 = vperm.xlu0 %7459, %v8157_v47  }
 0x34b   :  { %7464 = vset.pattern.permute.xlu2 %v16473_v63  ;;  %v1187_v63 = vld [vmem:[%s16393_s5 + $0x470] sm:$0xff] }
 0x34c   :  { %7461 = vset.pattern.permute.xlu1 %v16503_v2  ;;  %7466 = vset.pattern.permute.xlu0 %v16439_v10  ;;  %v1206_v2 = vld [vmem:[%s16393_s5 + $0x508] sm:$0xff] }
 0x34d   :  { %662 = vperm.xlu2 %7464, %v8157_v47   ;;  %632 = vperm.xlu1 %7461, %v8157_v47  }
 0x34e   :  { %682 = vperm.xlu0 %7466, %v8157_v47  }
 0x355   :  { %7468 = vset.pattern.permute.xlu2 %v16435_v18  ;;  %7463 = vset.pattern.permute.xlu1 %v16479_v19 }
 0x356   :  { %7472 = vset.pattern.permute.xlu0 %v16507_v21  ;;  %702 = vperm.xlu2 %7468, %v8157_v47  }
 0x357   :  { %652 = vperm.xlu1 %7463, %v8157_v47   ;;  %742 = vperm.xlu0 %7472, %v8157_v47  }
 0x35e   :  { %7469 = vset.pattern.permute.xlu2 %v16501_v40 }
 0x35f   :  { %7465 = vset.pattern.permute.xlu1 %v16483_v43  ;;  %7477 = vset.pattern.permute.xlu0 %v16415_v44 }
 0x360   :  { %712 = vperm.xlu2 %7469, %v8157_v47   ;;  %672 = vperm.xlu1 %7465, %v8157_v47  }
 0x361   :  { %792 = vperm.xlu0 %7477, %v8157_v47  }
 0x368   :  { %7471 = vset.pattern.permute.xlu2 %v16421_v27  ;;  %7467 = vset.pattern.permute.xlu1 %v16423_v28  ;;  %v16431_v27 = vmov 53  }
 0x369   :  { %7479 = vset.pattern.permute.xlu0 %v16451_v32  ;;  %732 = vperm.xlu2 %7471, %v8157_v47  }
 0x36a   :  { %692 = vperm.xlu1 %7467, %v8157_v47   ;;  %812 = vperm.xlu0 %7479, %v8157_v47  }
 0x371   :  { %7473 = vset.pattern.permute.xlu2 %v16441_v22 }
 0x372   :  { %7470 = vset.pattern.permute.xlu1 %v16429_v25  ;;  %7486 = vset.pattern.permute.xlu0 %v16403_v26 }
 0x373   :  { %752 = vperm.xlu2 %7473, %v8157_v47   ;;  %722 = vperm.xlu1 %7470, %v8157_v47  }
 0x374   :  { %882 = vperm.xlu0 %7486, %v8157_v47  }
 0x37b   :  { %7475 = vset.pattern.permute.xlu2 %v16417_v20  ;;  %7474 = vset.pattern.permute.xlu1 %v16505_v23  ;;  %v16427_v20 = vmov 47   ;;  %v1226_v23 = vld [vmem:[%s16393_s5 + $0x5a8] sm:$0xff] }
 0x37c   :  { %7493 = vset.pattern.permute.xlu0 %v16397_v33  ;;  %772 = vperm.xlu2 %7475, %v8157_v47   ;;  %v16453_v33 = vmov 38  }
 0x37d   :  { %762 = vperm.xlu1 %7474, %v8157_v47   ;;  %476 = vperm.xlu0 %7493, %v8399_v36  }
 0x384   :  { %7478 = vset.pattern.permute.xlu2 %v16465_v3  ;;  %v16471_v3 = vmov 55  }
 0x385   :  { %7476 = vset.pattern.permute.xlu1 %v16497_v31  ;;  %7494 = vset.pattern.permute.xlu0 %v16413_v37  ;;  %v1230_v31 = vld [vmem:[%s16393_s5 + $0x5c8] sm:$0xff] }
 0x386   :  { %802 = vperm.xlu2 %7478, %v8157_v47   ;;  %782 = vperm.xlu1 %7476, %v8157_v47   ;;  %v473_v0 = vpop.permute.xlu1 %472 }
 0x387   :  { %942 = vperm.xlu0 %7494, %v8157_v47   ;;  %v479_v13 = vmul.f32 %v473_v0, %v8428_v41  ;;  %v462_v15 = vpop.permute.xlu0 %461 }
 0x388   :  { %v469_v11 = vmul.f32 %v462_v15, %v8428_v41  ;;  %v16407_v15 = vmov 37  }
 0x389   :  { %2236 = vmatmul.f32.vlgmr.msra.gmra.mxu3 %v479_v13  ;;  %v16405_v13 = vmov 40  }
 0x38a   :  { %2213 = vmatmul.f32.vlgmr.msra.gmra.mxu2 %v469_v11 }
 0x38e   :  { %7482 = vset.pattern.permute.xlu2 %v16453_v33  ;;  %7480 = vset.pattern.permute.xlu1 %v16447_v62 }
 0x38f   :  { %7502 = vset.pattern.permute.xlu0 %v16399_v50  ;;  %842 = vperm.xlu2 %7482, %v8157_v47  }
 0x390   :  { %822 = vperm.xlu1 %7480, %v8157_v47   ;;  %556 = vperm.xlu0 %7502, %v8399_v36   ;;  %v483_v16 = vpop.permute.xlu1 %482  ;;  %v493_v29 = vpop.permute.xlu0 %492 }
 0x391   :  { %v489_v0 = vmul.f32 %v483_v16, %v8428_v41  ;;  %v499_v11 = vmul.f32 %v493_v29, %v8428_v41  ;;  %v8453_v29 = vpop.permute.xlu2 %502 }
 0x393   :  { %2259 = vmatmul.f32.vlgmr.msrb.gmra.mxu0 %v489_v0  ;;  %2282 = vmatmul.f32.vlgmr.msrb.gmra.mxu1 %v499_v11  ;;  %v16409_v0 = vmov 44   ;;  %v16433_v11 = vmov 39  }
 0x397   :  { %7484 = vset.pattern.permute.xlu2 %v16405_v13 }
 0x398   :  { %7481 = vset.pattern.permute.xlu1 %v16407_v15  ;;  %7511 = vset.pattern.permute.xlu0 %v16401_v8  ;;  %v16419_v15 = vmov 45  }
 0x399   :  { %862 = vperm.xlu2 %7484, %v8157_v47   ;;  %832 = vperm.xlu1 %7481, %v8157_v47   ;;  %v8448_v50 = vpop.permute.xlu1 %522  ;;  %v8465_v13 = vpop.permute.xlu2 %542 }
 0x39a   :  { %626 = vperm.xlu0 %7511, %v8399_v36   ;;  %v8451_v16 = vpop.permute.xlu0 %512 }
 0x3a1   :  { %7488 = vset.pattern.permute.xlu2 %v16409_v0  ;;  %7483 = vset.pattern.permute.xlu1 %v16433_v11  ;;  %v16425_v0 = vmov 41   ;;  %v8477_v44 = vpop.permute.xlu2 %552  ;;  %v16449_v11 = vmov 46  }
 0x3a2   :  { %7513 = vset.pattern.permute.xlu0 %v16411_v7  ;;  %902 = vperm.xlu2 %7488, %v8157_v47  }
 0x3a3   :  { %852 = vperm.xlu1 %7483, %v8157_v47   ;;  %646 = vperm.xlu0 %7513, %v8399_v36   ;;  %v8461_v8 = vpop.permute.xlu1 %562  ;;  %v8463_v26 = vpop.permute.xlu0 %532 }
 0x3a9   :  { %v8492_v25 = vpop.permute.xlu2 %592 }
 0x3aa   :  { %7489 = vset.pattern.permute.xlu2 %v16419_v15  ;;  %v16457_v15 = vmov 43  }
 0x3ab   :  { %7485 = vset.pattern.permute.xlu1 %v16425_v0  ;;  %7520 = vset.pattern.permute.xlu0 %v16423_v28 }
 0x3ac   :  { %912 = vperm.xlu2 %7489, %v8157_v47   ;;  %872 = vperm.xlu1 %7485, %v8157_v47   ;;  %v8472_v7 = vpop.permute.xlu1 %572 }
 0x3ad   :  { %696 = vperm.xlu0 %7520, %v8399_v36   ;;  %v8475_v37 = vpop.permute.xlu0 %582 }
 0x3b1   :  { %v8510_v10 = vpop.permute.xlu2 %602 }
 0x3b4   :  { %7491 = vset.pattern.permute.xlu2 %v16427_v20  ;;  %7487 = vset.pattern.permute.xlu1 %v16457_v15  ;;  %v1204_v20 = vld [vmem:[%s16393_s5 + $0x4f8] sm:$0xff] }
 0x3b5   :  { %7521 = vset.pattern.permute.xlu0 %v16431_v27  ;;  %932 = vperm.xlu2 %7491, %v8157_v47   ;;  %v1203_v27 = vld [vmem:[%s16393_s5 + $0x4f0] sm:$0xff] }
 0x3b6   :  { %892 = vperm.xlu1 %7487, %v8157_v47   ;;  %992 = vperm.xlu0 %7521, %v8157_v47   ;;  %v8485_v28 = vpop.permute.xlu1 %622  ;;  %v8487_v0 = vpop.permute.xlu0 %612 }
 0x3b7   :  { %2312 = vmatpush.msrb.mxu3 %v1204_v20 }
 0x3b9   :  { %2313 = vmatpush.msrb.mxu3 %v1203_v27  ;;  %v8538_v32 = vpop.permute.xlu2 %642 }
 0x3bd   :  { %7499 = vset.pattern.permute.xlu2 %v16437_v51  ;;  %v1202_v51 = vld [vmem:[%s16393_s5 + $0x4e8] sm:$0xff] }
 0x3be   :  { %7490 = vset.pattern.permute.xlu1 %v16449_v11  ;;  %7527 = vset.pattern.permute.xlu0 %v16441_v22  ;;  %v1201_v22 = vld [vmem:[%s16393_s5 + $0x4e0] sm:$0xff] }
 0x3bf   :  { %922 = vperm.xlu1 %7490, %v8157_v47   ;;  %526 = vperm.xlu2 %7499, %v8399_v36   ;;  %v8502_v18 = vpop.permute.xlu1 %632  ;;  %v1197_v11 = vld [vmem:[%s16393_s5 + $0x4c0] sm:$0xff] }
 0x3c0   :  { %756 = vperm.xlu0 %7527, %v8399_v36   ;;  %v8508_v20 = vpop.permute.xlu0 %682  ;;  %2314 = vmatpush.msrb.mxu3 %v1202_v51 }
 0x3c2   :  { %2315 = vmatpush.msrb.mxu3 %v1201_v22 }
 0x3c7   :  { %7492 = vset.pattern.permute.xlu1 %v16445_v1  ;;  %7503 = vset.pattern.permute.xlu2 %v16443_v56  ;;  %v1200_v56 = vld [vmem:[%s16393_s5 + $0x4d8] sm:$0xff]  ;;  %v1199_v1 = vld [vmem:[%s16393_s5 + $0x4d0] sm:$0xff] }
 0x3c8   :  { %7535 = vset.pattern.permute.xlu0 %v16447_v62  ;;  %566 = vperm.xlu2 %7503, %v8399_v36   ;;  %v1198_v62 = vld [vmem:[%s16393_s5 + $0x4c8] sm:$0xff] }
 0x3c9   :  { %826 = vperm.xlu0 %7535, %v8399_v36   ;;  %466 = vperm.xlu1 %7492, %v8399_v36   ;;  %v8521_v27 = vpop.permute.xlu1 %652  ;;  %v8523_v51 = vpop.permute.xlu0 %742 }
 0x3ca   :  { %2316 = vmatpush.msrb.mxu3 %v1200_v56 }
 0x3cc   :  { %2317 = vmatpush.msrb.mxu3 %v1199_v1  ;;  %v1196_v1 = vld [vmem:[%s16393_s5 + $0x4b8] sm:$0xff] }
 0x3ce   :  { %2318 = vmatpush.msrb.mxu3 %v1198_v62  ;;  %v1195_v62 = vld [vmem:[%s16393_s5 + $0x4b0] sm:$0xff] }
 0x3d0   :  { %7504 = vset.pattern.permute.xlu2 %v16455_v60  ;;  %2319 = vmatpush.msrb.mxu3 %v1197_v11  ;;  %v1193_v60 = vld [vmem:[%s16393_s5 + $0x4a0] sm:$0xff]  ;;  %v8563_v11 = vpop.permute.xlu2 %662 }
 0x3d1   :  { %7537 = vset.pattern.permute.xlu0 %v16453_v33  ;;  %7495 = vset.pattern.permute.xlu1 %v16461_v6  ;;  %v1194_v33 = vld [vmem:[%s16393_s5 + $0x4a8] sm:$0xff]  ;;  %v1189_v6 = vld [vmem:[%s16393_s5 + $0x480] sm:$0xff] }
 0x3d2   :  { %576 = vperm.xlu2 %7504, %v8399_v36   ;;  %846 = vperm.xlu0 %7537, %v8399_v36   ;;  %v8544_v56 = vpop.permute.xlu1 %672 }
 0x3d3   :  { %486 = vperm.xlu1 %7495, %v8399_v36   ;;  %v8550_v22 = vpop.permute.xlu0 %792  ;;  %2320 = vmatpush.msrb.mxu3 %v1196_v1 }
 0x3d5   :  { %2321 = vmatpush.msrb.mxu3 %v1195_v62  ;;  %v1192_v62 = vld [vmem:[%s16393_s5 + $0x498] sm:$0xff] }
 0x3d7   :  { %2322 = vmatpush.msrb.mxu3 %v1194_v33 }
 0x3d9   :  { %2323 = vmatpush.msrb.mxu3 %v1193_v60 }
 0x3da   :  { %7507 = vset.pattern.permute.xlu2 %v16459_v58  ;;  %7542 = vset.pattern.permute.xlu0 %v16457_v15  ;;  %v1191_v15 = vld [vmem:[%s16393_s5 + $0x490] sm:$0xff]  ;;  %v1190_v58 = vld [vmem:[%s16393_s5 + $0x488] sm:$0xff] }
 0x3db   :  { %7496 = vset.pattern.permute.xlu1 %v16463_v34  ;;  %606 = vperm.xlu2 %7507, %v8399_v36   ;;  %v450_v34 = vpop.f32.mrf.mxu1 }
 0x3dc   :  { %896 = vperm.xlu0 %7542, %v8399_v36   ;;  %496 = vperm.xlu1 %7496, %v8399_v36   ;;  %v8569_v1 = vpop.permute.xlu1 %692  ;;  %v8571_v33 = vpop.permute.xlu0 %812 }
 0x3dd   :  { %2324 = vmatpush.msrb.mxu3 %v1192_v62  ;;  %v451_v62 = vadd.f32 %v450_v34, %v426_v17 }
 0x3df   :  { %2325 = vmatpush.msrb.mxu3 %v1191_v15  ;;  %v8592_v15 = vpop.permute.xlu2 %702  ;;  %vm454_vm4 = vcmp.gt.f32.partialorder %v451_v62, 0.0 }
 0x3e1   :  { %2326 = vmatpush.msrb.mxu3 %v1190_v58 }
 0x3e3   :  { %7508 = vset.pattern.permute.xlu2 %v16467_v61  ;;  %2327 = vmatpush.msrb.mxu3 %v1189_v6  ;;  %v1188_v61 = vld [vmem:[%s16393_s5 + $0x478] sm:$0xff] }
 0x3e4   :  { %7543 = vset.pattern.permute.xlu0 %v16471_v3  ;;  %7497 = vset.pattern.permute.xlu1 %v16469_v24  ;;  %v456_v24 = vmul.f32 0.01, %v451_v62  ;;  %v16475_v3 = vmov 49  }
 0x3e5   :  { %616 = vperm.xlu2 %7508, %v8399_v36   ;;  %1012 = vperm.xlu0 %7543, %v8157_v47   ;;  %v8590_v60 = vpop.permute.xlu1 %722 }
 0x3e6   :  { %506 = vperm.xlu1 %7497, %v8399_v36   ;;  %v8595_v58 = vpop.permute.xlu0 %882  ;;  %2289 = vmatpush.msrb.mxu2 %v1188_v61  ;;  %v8609_v6 = vsel %vm454_vm4, %v451_v62, %v456_v24  ;;  %v1186_v61 = vld [vmem:[%s16393_s5 + $0x468] sm:$0xff]  ;;  %v1185_v24 = vld [vmem:[%s16393_s5 + $0x460] sm:$0xff]  ;;  %v1184_v62 = vld [vmem:[%s16393_s5 + $0x458] sm:$0xff] }
 0x3e7   :  { %v8618_v17 = vpop.permute.xlu2 %712 }
 0x3e8   :  { %2290 = vmatpush.msrb.mxu2 %v1187_v63  ;;  %v1183_v63 = vld [vmem:[%s16393_s5 + $0x450] sm:$0xff] }
 0x3ea   :  { %2291 = vmatpush.msrb.mxu2 %v1186_v61  ;;  %v519_v61 = vmul.f32 %v8451_v16, %v8428_v41  ;;  %v1181_v16 = vld [vmem:[%s16393_s5 + $0x440] sm:$0xff] }
 0x3ec   :  { %2292 = vmatpush.msrb.mxu2 %v1185_v24  ;;  %v1182_v24 = vld [vmem:[%s16393_s5 + $0x448] sm:$0xff] }
 0x3ed   :  { %7509 = vset.pattern.permute.xlu2 %v16475_v3  ;;  %7552 = vset.pattern.permute.xlu0 %v16475_v3 }
 0x3ee   :  { %7498 = vset.pattern.permute.xlu1 %v16477_v53  ;;  %952 = vperm.xlu2 %7509, %v8157_v47   ;;  %v1220_v53 = vld [vmem:[%s16393_s5 + $0x578] sm:$0xff] }
 0x3ef   :  { %956 = vperm.xlu0 %7552, %v8399_v36   ;;  %516 = vperm.xlu1 %7498, %v8399_v36   ;;  %v8613_v34 = vpop.permute.xlu1 %762  ;;  %v477_v39 = vpop.permute.xlu0 %476 }
 0x3f0   :  { %v480_v3 = vmul.f32 %v477_v39, %v8609_v6  ;;  %2335 = vmatpush.msra.mxu0 %v1220_v53  ;;  %2293 = vmatpush.msrb.mxu2 %v1184_v62  ;;  %v16487_v39 = vmov 56   ;;  %v1218_v62 = vld [vmem:[%s16393_s5 + $0x568] sm:$0xff] }
 0x3f2   :  { %2239 = vmatmul.f32.gmra.mxu3 %v480_v3  ;;  %v1219_v3 = vld [vmem:[%s16393_s5 + $0x570] sm:$0xff]  ;;  %2294 = vmatpush.msrb.mxu2 %v1183_v63  ;;  %v1180_v63 = vld [vmem:[%s16393_s5 + $0x438] sm:$0xff] }
 0x3f3   :  { %2336 = vmatpush.msra.mxu0 %v1219_v3  ;;  %v16489_v3 = vmov 58  }
 0x3f4   :  { %2295 = vmatpush.msrb.mxu2 %v1182_v24  ;;  %v1216_v24 = vld [vmem:[%s16393_s5 + $0x558] sm:$0xff] }
 0x3f5   :  { %2337 = vmatpush.msra.mxu0 %v1218_v62  ;;  %v1179_v62 = vld [vmem:[%s16393_s5 + $0x430] sm:$0xff] }
 0x3f6   :  { %7514 = vset.pattern.permute.xlu2 %v16479_v19  ;;  %v8652_v19 = vpop.permute.xlu2 %732  ;;  %2296 = vmatpush.msrb.mxu2 %v1181_v16 }
 0x3f7   :  { %7561 = vset.pattern.permute.xlu0 %v16487_v39  ;;  %7500 = vset.pattern.permute.xlu1 %v16481_v57  ;;  %v1217_v57 = vld [vmem:[%s16393_s5 + $0x560] sm:$0xff]  ;;  %v1214_v39 = vld [vmem:[%s16393_s5 + $0x548] sm:$0xff] }
 0x3f8   :  { %656 = vperm.xlu2 %7514, %v8399_v36   ;;  %1026 = vperm.xlu0 %7561, %v8399_v36   ;;  %v8643_v53 = vpop.permute.xlu1 %782 }
 0x3f9   :  { %536 = vperm.xlu1 %7500, %v8399_v36   ;;  %2338 = vmatpush.msra.mxu0 %v1217_v57  ;;  %v1235_v57 = vld [vmem:[%s16393_s5 + $0x5f0] sm:$0xff] }
 0x3fa   :  { %2328 = vmatmul.f32.vlgmr.msrb.gmra.mxu3 %v519_v61  ;;  %v1236_v61 = vld [vmem:[%s16393_s5 + $0x5f8] sm:$0xff]  ;;  %2297 = vmatpush.msrb.mxu2 %v1180_v63  ;;  %v1215_v63 = vld [vmem:[%s16393_s5 + $0x550] sm:$0xff] }
 0x3fb   :  { %2358 = vmatpush.msra.mxu1 %v1236_v61  ;;  %v1178_v61 = vld [vmem:[%s16393_s5 + $0x428] sm:$0xff]  ;;  %2339 = vmatpush.msra.mxu0 %v1216_v24  ;;  %v1233_v24 = vld [vmem:[%s16393_s5 + $0x5e0] sm:$0xff] }
 0x3fc   :  { %2298 = vmatpush.msrb.mxu2 %v1179_v62  ;;  %v1213_v62 = vld [vmem:[%s16393_s5 + $0x540] sm:$0xff] }
 0x3fd   :  { %2359 = vmatpush.msra.mxu1 %v1235_v57  ;;  %2340 = vmatpush.msra.mxu0 %v1215_v63  ;;  %v16493_v57 = vmov 51   ;;  %v1176_v63 = vld [vmem:[%s16393_s5 + $0x418] sm:$0xff] }
 0x3fe   :  { %2299 = vmatpush.msrb.mxu2 %v1178_v61  ;;  %v16495_v61 = vmov 62  }
 0x3ff   :  { %2341 = vmatpush.msra.mxu0 %v1214_v39  ;;  %v1232_v39 = vld [vmem:[%s16393_s5 + $0x5d8] sm:$0xff] }
 0x400   :  { %7516 = vset.pattern.permute.xlu2 %v16483_v43  ;;  %7564 = vset.pattern.permute.xlu0 %v16489_v3  ;;  %v1234_v43 = vld [vmem:[%s16393_s5 + $0x5e8] sm:$0xff]  ;;  %v1177_v3 = vld [vmem:[%s16393_s5 + $0x420] sm:$0xff] }
 0x401   :  { %7501 = vset.pattern.permute.xlu1 %v16485_v49  ;;  %676 = vperm.xlu2 %7516, %v8399_v36   ;;  %v8692_v49 = vpop.permute.xlu2 %752 }
 0x402   :  { %1046 = vperm.xlu0 %7564, %v8399_v36   ;;  %546 = vperm.xlu1 %7501, %v8399_v36   ;;  %v8681_v16 = vpop.permute.xlu1 %822 }
 0x403   :  { %2360 = vmatpush.msra.mxu1 %v1234_v43  ;;  %2300 = vmatpush.msrb.mxu2 %v1177_v3  ;;  %v1212_v43 = vld [vmem:[%s16393_s5 + $0x538] sm:$0xff] }
 0x404   :  { %2342 = vmatpush.msra.mxu0 %v1213_v62  ;;  %v1211_v62 = vld [vmem:[%s16393_s5 + $0x530] sm:$0xff] }
 0x405   :  { %2361 = vmatpush.msra.mxu1 %v1233_v24  ;;  %v1175_v24 = vld [vmem:[%s16393_s5 + $0x410] sm:$0xff]  ;;  %2301 = vmatpush.msrb.mxu2 %v1176_v63  ;;  %v1210_v63 = vld [vmem:[%s16393_s5 + $0x528] sm:$0xff] }
 0x406   :  { %2343 = vmatpush.msra.mxu0 %v1212_v43  ;;  %v1173_v43 = vld [vmem:[%s16393_s5 + $0x400] sm:$0xff] }
 0x407   :  { %2362 = vmatpush.msra.mxu1 %v1232_v39  ;;  %2302 = vmatpush.msrb.mxu2 %v1175_v24  ;;  %v1268_v39 = vld [vmem:[%s16393_s5 + $0x6f8] sm:$0xff]  ;;  %v1209_v24 = vld [vmem:[%s16393_s5 + $0x520] sm:$0xff] }
 0x408   :  { %2344 = vmatpush.msra.mxu0 %v1211_v62  ;;  %2404 = vmatpush.msra.mxu3 %v1268_v39  ;;  %v1252_v62 = vld [vmem:[%s16393_s5 + $0x678] sm:$0xff] }
 0x409   :  { %7517 = vset.pattern.permute.xlu2 %v16493_v57  ;;  %v1174_v57 = vld [vmem:[%s16393_s5 + $0x408] sm:$0xff] }
 0x40a   :  { %7565 = vset.pattern.permute.xlu0 %v16495_v61  ;;  %7505 = vset.pattern.permute.xlu1 %v16491_v5  ;;  %v1231_v5 = vld [vmem:[%s16393_s5 + $0x5d0] sm:$0xff]  ;;  %v8735_v61 = vpop.permute.xlu2 %772 }
 0x40b   :  { %972 = vperm.xlu2 %7517, %v8157_v47   ;;  %1082 = vperm.xlu0 %7565, %v8157_v47   ;;  %v8720_v3 = vpop.permute.xlu1 %832 }
 0x40c   :  { %586 = vperm.xlu1 %7505, %v8399_v36   ;;  %2363 = vmatpush.msra.mxu1 %v1231_v5  ;;  %v1267_v5 = vld [vmem:[%s16393_s5 + $0x6f0] sm:$0xff] }
 0x40d   :  { %2303 = vmatpush.msrb.mxu2 %v1174_v57  ;;  %2345 = vmatpush.msra.mxu0 %v1210_v63  ;;  %v1229_v57 = vld [vmem:[%s16393_s5 + $0x5c0] sm:$0xff]  ;;  %v1251_v63 = vld [vmem:[%s16393_s5 + $0x670] sm:$0xff] }
 0x40e   :  { %2364 = vmatpush.msra.mxu1 %v1230_v31  ;;  %2405 = vmatpush.msra.mxu3 %v1267_v5  ;;  %v1208_v31 = vld [vmem:[%s16393_s5 + $0x518] sm:$0xff]  ;;  %v1207_v5 = vld [vmem:[%s16393_s5 + $0x510] sm:$0xff] }
 0x40f   :  { %2304 = vmatpush.msrb.mxu2 %v1173_v43  ;;  %2346 = vmatpush.msra.mxu0 %v1209_v24  ;;  %v1266_v43 = vld [vmem:[%s16393_s5 + $0x6e8] sm:$0xff]  ;;  %v1228_v24 = vld [vmem:[%s16393_s5 + $0x5b8] sm:$0xff] }
 0x410   :  { %2365 = vmatpush.msra.mxu1 %v1229_v57  ;;  %2406 = vmatpush.msra.mxu3 %v1266_v43  ;;  %v1205_v43 = vld [vmem:[%s16393_s5 + $0x500] sm:$0xff] }
 0x411   :  { %2381 = vmatpush.msra.mxu2 %v1252_v62  ;;  %2347 = vmatpush.msra.mxu0 %v1208_v31  ;;  %v1227_v62 = vld [vmem:[%s16393_s5 + $0x5b0] sm:$0xff]  ;;  %v1249_v31 = vld [vmem:[%s16393_s5 + $0x660] sm:$0xff] }
 0x412   :  { %v8794_v57 = vpop.permute.xlu2 %802  ;;  %2366 = vmatpush.msra.mxu1 %v1228_v24  ;;  %v1225_v24 = vld [vmem:[%s16393_s5 + $0x5a0] sm:$0xff] }
 0x413   :  { %7523 = vset.pattern.permute.xlu2 %v16501_v40  ;;  %v1265_v40 = vld [vmem:[%s16393_s5 + $0x6e0] sm:$0xff]  ;;  %2382 = vmatpush.msra.mxu2 %v1251_v63  ;;  %v1264_v63 = vld [vmem:[%s16393_s5 + $0x6d8] sm:$0xff] }
 0x414   :  { %7506 = vset.pattern.permute.xlu1 %v16499_v54  ;;  %716 = vperm.xlu2 %7523, %v8399_v36   ;;  %v1250_v54 = vld [vmem:[%s16393_s5 + $0x668] sm:$0xff] }
 0x415   :  { %596 = vperm.xlu1 %7506, %v8399_v36   ;;  %v8774_v39 = vpop.permute.xlu1 %852  ;;  %2348 = vmatpush.msra.mxu0 %v1207_v5 }
 0x416   :  { %2383 = vmatpush.msra.mxu2 %v1250_v54  ;;  %2407 = vmatpush.msra.mxu3 %v1265_v40  ;;  %v1248_v54 = vld [vmem:[%s16393_s5 + $0x658] sm:$0xff]  ;;  %v16509_v40 = vmov 50  }
 0x417   :  { %2367 = vmatpush.msra.mxu1 %v1227_v62  ;;  %2349 = vmatpush.msra.mxu0 %v1206_v2  ;;  %v1284_v2 = vld [vmem:[%s16393_s5 + $0x778] sm:$0xff]  ;;  %v1247_v62 = vld [vmem:[%s16393_s5 + $0x650] sm:$0xff] }
 0x418   :  { %2384 = vmatpush.msra.mxu2 %v1249_v31  ;;  %2408 = vmatpush.msra.mxu3 %v1264_v63  ;;  %v1224_v31 = vld [vmem:[%s16393_s5 + $0x598] sm:$0xff]  ;;  %v1283_v63 = vld [vmem:[%s16393_s5 + $0x770] sm:$0xff] }
 0x419   :  { %2368 = vmatpush.msra.mxu1 %v1226_v23  ;;  %v1263_v23 = vld [vmem:[%s16393_s5 + $0x6d0] sm:$0xff]  ;;  %2350 = vmatpush.msra.mxu0 %v1205_v43  ;;  %v1246_v43 = vld [vmem:[%s16393_s5 + $0x648] sm:$0xff] }
 0x41a   :  { %2385 = vmatpush.msra.mxu2 %v1248_v54  ;;  %2409 = vmatpush.msra.mxu3 %v1263_v23  ;;  %v1282_v54 = vld [vmem:[%s16393_s5 + $0x768] sm:$0xff] }
 0x41b   :  { %2369 = vmatpush.msra.mxu1 %v1225_v24  ;;  %2427 = vmatpush.msrb.mxu0 %v1284_v2  ;;  %v1261_v24 = vld [vmem:[%s16393_s5 + $0x6c0] sm:$0xff]  ;;  %v8850_v2 = vpop.permute.xlu2 %842  ;;  %v1222_v23 = vld [vmem:[%s16393_s5 + $0x588] sm:$0xff] }
 0x41c   :  { %7526 = vset.pattern.permute.xlu2 %v16507_v21  ;;  %v1262_v21 = vld [vmem:[%s16393_s5 + $0x6c8] sm:$0xff]  ;;  %2386 = vmatpush.msra.mxu2 %v1247_v62  ;;  %v16559_v62 = vmov 30  }
 0x41d   :  { %7510 = vset.pattern.permute.xlu1 %v16509_v40  ;;  %746 = vperm.xlu2 %7526, %v8399_v36   ;;  %v1223_v40 = vld [vmem:[%s16393_s5 + $0x590] sm:$0xff] }
 0x41e   :  { %962 = vperm.xlu1 %7510, %v8157_v47   ;;  %v8824_v5 = vpop.permute.xlu1 %872  ;;  %2370 = vmatpush.msra.mxu1 %v1224_v31  ;;  %v1281_v31 = vld [vmem:[%s16393_s5 + $0x760] sm:$0xff] }
 0x41f   :  { %2428 = vmatpush.msrb.mxu0 %v1283_v63  ;;  %2410 = vmatpush.msra.mxu3 %v1262_v21  ;;  %v1244_v63 = vld [vmem:[%s16393_s5 + $0x638] sm:$0xff]  ;;  %v16560_v21 = vmov 17  }
 0x420   :  { %2387 = vmatpush.msra.mxu2 %v1246_v43  ;;  %2371 = vmatpush.msra.mxu1 %v1223_v40  ;;  %v1221_v40 = vld [vmem:[%s16393_s5 + $0x580] sm:$0xff]  ;;  %v1280_v43 = vld [vmem:[%s16393_s5 + $0x758] sm:$0xff] }
 0x421   :  { %2429 = vmatpush.msrb.mxu0 %v1282_v54  ;;  %2411 = vmatpush.msra.mxu3 %v1261_v24  ;;  %v1243_v54 = vld [vmem:[%s16393_s5 + $0x630] sm:$0xff] }
 0x422   :  { %2388 = vmatpush.msra.mxu2 %v1245_v9  ;;  %v1260_v9 = vld [vmem:[%s16393_s5 + $0x6b8] sm:$0xff]  ;;  %2372 = vmatpush.msra.mxu1 %v1222_v23  ;;  %v1259_v23 = vld [vmem:[%s16393_s5 + $0x6b0] sm:$0xff] }
 0x423   :  { %2430 = vmatpush.msrb.mxu0 %v1281_v31  ;;  %2412 = vmatpush.msra.mxu3 %v1260_v9  ;;  %v1299_v31 = vld [vmem:[%s16393_s5 + $0x7f0] sm:$0xff]  ;;  %v8903_v12 = vpop.permute.xlu2 %862  ;;  %v1241_v9 = vld [vmem:[%s16393_s5 + $0x620] sm:$0xff] }
 0x424   :  { %2389 = vmatpush.msra.mxu2 %v1244_v63  ;;  %2373 = vmatpush.msra.mxu1 %v1221_v40  ;;  %v1258_v63 = vld [vmem:[%s16393_s5 + $0x6a8] sm:$0xff] }
 0x425   :  { %7528 = vset.pattern.permute.xlu2 %v16559_v62  ;;  %v1300_v62 = vld [vmem:[%s16393_s5 + $0x7f8] sm:$0xff]  ;;  %2431 = vmatpush.msrb.mxu0 %v1280_v43  ;;  %v1278_v40 = vld [vmem:[%s16393_s5 + $0x748] sm:$0xff]  ;;  %v16561_v43 = vmov 32  }
 0x426   :  { %7512 = vset.pattern.permute.xlu1 %v16560_v21  ;;  %766 = vperm.xlu2 %7528, %v8399_v36   ;;  %v1279_v21 = vld [vmem:[%s16393_s5 + $0x750] sm:$0xff] }
 0x427   :  { %636 = vperm.xlu1 %7512, %v8399_v36   ;;  %2390 = vmatpush.msra.mxu2 %v1243_v54  ;;  %v1277_v54 = vld [vmem:[%s16393_s5 + $0x740] sm:$0xff] }
 0x428   :  { %v8880_v24 = vpop.permute.xlu1 %892  ;;  %2450 = vmatpush.msrb.mxu1 %v1300_v62  ;;  %2413 = vmatpush.msra.mxu3 %v1259_v23  ;;  %v1298_v62 = vld [vmem:[%s16393_s5 + $0x7e8] sm:$0xff]  ;;  %v16562_v23 = vmov 20  }
 0x429   :  { %2432 = vmatpush.msrb.mxu0 %v1279_v21  ;;  %2391 = vmatpush.msra.mxu2 %v1242_v14  ;;  %v1240_v14 = vld [vmem:[%s16393_s5 + $0x618] sm:$0xff]  ;;  %v1257_v21 = vld [vmem:[%s16393_s5 + $0x6a0] sm:$0xff] }
 0x42a   :  { %2451 = vmatpush.msrb.mxu1 %v1299_v31  ;;  %2414 = vmatpush.msra.mxu3 %v1258_v63  ;;  %v1297_v31 = vld [vmem:[%s16393_s5 + $0x7e0] sm:$0xff]  ;;  %v1276_v63 = vld [vmem:[%s16393_s5 + $0x738] sm:$0xff] }
 0x42b   :  { %2433 = vmatpush.msrb.mxu0 %v1278_v40  ;;  %2392 = vmatpush.msra.mxu2 %v1241_v9  ;;  %v1256_v9 = vld [vmem:[%s16393_s5 + $0x698] sm:$0xff] }
 0x42c   :  { %2452 = vmatpush.msrb.mxu1 %v1298_v62  ;;  %2415 = vmatpush.msra.mxu3 %v1257_v21  ;;  %v1238_v62 = vld [vmem:[%s16393_s5 + $0x608] sm:$0xff]  ;;  %v8953_v21 = vpop.permute.xlu2 %902 }
 0x42d   :  { %2434 = vmatpush.msrb.mxu0 %v1277_v54  ;;  %2393 = vmatpush.msra.mxu2 %v1240_v14  ;;  %v1255_v54 = vld [vmem:[%s16393_s5 + $0x690] sm:$0xff] }
 0x42e   :  { %7530 = vset.pattern.permute.xlu2 %v16561_v43  ;;  %v1239_v43 = vld [vmem:[%s16393_s5 + $0x610] sm:$0xff]  ;;  %2453 = vmatpush.msrb.mxu1 %v1297_v31  ;;  %v1274_v31 = vld [vmem:[%s16393_s5 + $0x728] sm:$0xff] }
 0x42f   :  { %7515 = vset.pattern.permute.xlu1 %v16562_v23  ;;  %786 = vperm.xlu2 %7530, %v8399_v36   ;;  %v1296_v23 = vld [vmem:[%s16393_s5 + $0x7d8] sm:$0xff]  ;;  %v1295_v14 = vld [vmem:[%s16393_s5 + $0x7d0] sm:$0xff] }
 0x430   :  { %666 = vperm.xlu1 %7515, %v8399_v36   ;;  %2435 = vmatpush.msrb.mxu0 %v1276_v63  ;;  %v16563_v63 = vmov 34  }
 0x431   :  { %v8930_v40 = vpop.permute.xlu1 %922  ;;  %2394 = vmatpush.msra.mxu2 %v1239_v43  ;;  %2416 = vmatpush.msra.mxu3 %v1256_v9  ;;  %v1237_v43 = vld [vmem:[%s16393_s5 + $0x600] sm:$0xff] }
 0x432   :  { %2454 = vmatpush.msrb.mxu1 %v1296_v23  ;;  %2436 = vmatpush.msrb.mxu0 %v1275_v35  ;;  %v1294_v23 = vld [vmem:[%s16393_s5 + $0x7c8] sm:$0xff]  ;;  %v16517_v35 = vmov 52   ;;  %v1273_v9 = vld [vmem:[%s16393_s5 + $0x720] sm:$0xff] }
 0x433   :  { %2395 = vmatpush.msra.mxu2 %v1238_v62  ;;  %2417 = vmatpush.msra.mxu3 %v1255_v54  ;;  %v1254_v62 = vld [vmem:[%s16393_s5 + $0x688] sm:$0xff]  ;;  %v1293_v54 = vld [vmem:[%s16393_s5 + $0x7c0] sm:$0xff] }
 0x434   :  { %2455 = vmatpush.msrb.mxu1 %v1295_v14  ;;  %2437 = vmatpush.msrb.mxu0 %v1274_v31  ;;  %v1272_v14 = vld [vmem:[%s16393_s5 + $0x718] sm:$0xff] }
 0x435   :  { %2396 = vmatpush.msra.mxu2 %v1237_v43  ;;  %2418 = vmatpush.msra.mxu3 %v1254_v62  ;;  %v1292_v31 = vld [vmem:[%s16393_s5 + $0x7b8] sm:$0xff]  ;;  %v1271_v43 = vld [vmem:[%s16393_s5 + $0x710] sm:$0xff]  ;;  %v9000_v62 = vpop.permute.xlu2 %912 }
 0x436   :  { %2456 = vmatpush.msrb.mxu1 %v1294_v23  ;;  %2438 = vmatpush.msrb.mxu0 %v1273_v9  ;;  %v1332_v23 = vld [vmem:[%s16393_s5 + $0x8f8] sm:$0xff]  ;;  %v1291_v9 = vld [vmem:[%s16393_s5 + $0x7b0] sm:$0xff] }
 0x437   :  { %7532 = vset.pattern.permute.xlu2 %v16563_v63  ;;  %7574 = vset.pattern.permute.xlu0 %v16564_v55  ;;  %v1316_v55 = vld [vmem:[%s16393_s5 + $0x878] sm:$0xff] }
 0x438   :  { %7518 = vset.pattern.permute.xlu1 %v16517_v35  ;;  %806 = vperm.xlu2 %7532, %v8399_v36   ;;  %v1253_v35 = vld [vmem:[%s16393_s5 + $0x680] sm:$0xff] }
 0x439   :  { %982 = vperm.xlu1 %7518, %v8157_v47   ;;  %2457 = vmatpush.msrb.mxu1 %v1293_v54  ;;  %v16565_v54 = vmov 35  }
 0x43a   :  { %2439 = vmatpush.msrb.mxu0 %v1272_v14  ;;  %2419 = vmatpush.msra.mxu3 %v1253_v35  ;;  %v1290_v35 = vld [vmem:[%s16393_s5 + $0x7a8] sm:$0xff]  ;;  %v16566_v14 = vmov 22  }
 0x43b   :  { %v467_v63 = vpop.permute.xlu1 %466  ;;  %2458 = vmatpush.msrb.mxu1 %v1292_v31  ;;  %v1269_v31 = vld [vmem:[%s16393_s5 + $0x700] sm:$0xff] }
 0x43c   :  { %v470_v59 = vmul.f32 %v467_v63, %v8609_v6  ;;  %2440 = vmatpush.msrb.mxu0 %v1271_v43  ;;  %2496 = vmatpush.msrb.mxu3 %v1332_v23  ;;  %v1270_v63 = vld [vmem:[%s16393_s5 + $0x708] sm:$0xff]  ;;  %v1289_v43 = vld [vmem:[%s16393_s5 + $0x7a0] sm:$0xff] }
 0x43d   :  { %2459 = vmatpush.msrb.mxu1 %v1291_v9  ;;  %v1330_v23 = vld [vmem:[%s16393_s5 + $0x8e8] sm:$0xff]  ;;  %v509_v9 = vmul.f32 %v8453_v29, %v8428_v41  ;;  %v1315_v29 = vld [vmem:[%s16393_s5 + $0x870] sm:$0xff] }
 0x43e   :  { %2216 = vmatmul.f32.gmra.mxu2 %v470_v59  ;;  %v1331_v59 = vld [vmem:[%s16393_s5 + $0x8f0] sm:$0xff]  ;;  %2441 = vmatpush.msrb.mxu0 %v1270_v63  ;;  %v1288_v63 = vld [vmem:[%s16393_s5 + $0x798] sm:$0xff] }
 0x43f   :  { %2460 = vmatpush.msrb.mxu1 %v1290_v35  ;;  %2497 = vmatpush.msrb.mxu3 %v1331_v59  ;;  %v1329_v35 = vld [vmem:[%s16393_s5 + $0x8e0] sm:$0xff] }
 0x440   :  { %7533 = vset.pattern.permute.xlu2 %v16565_v54  ;;  %2442 = vmatpush.msrb.mxu0 %v1269_v31  ;;  %v1314_v31 = vld [vmem:[%s16393_s5 + $0x868] sm:$0xff] }
 0x441   :  { %7519 = vset.pattern.permute.xlu1 %v16566_v14  ;;  %816 = vperm.xlu2 %7533, %v8399_v36   ;;  %v1348_v14 = vld [vmem:[%s16393_s5 + $0x978] sm:$0xff] }
 0x442   :  { %686 = vperm.xlu1 %7519, %v8399_v36   ;;  %2461 = vmatpush.msrb.mxu1 %v1289_v43  ;;  %v16523_v43 = vmov 54  }
 0x443   :  { %2498 = vmatpush.msrb.mxu3 %v1330_v23  ;;  %v1328_v23 = vld [vmem:[%s16393_s5 + $0x8d8] sm:$0xff] }
 0x444   :  { %2462 = vmatpush.msrb.mxu1 %v1288_v63  ;;  %v1313_v63 = vld [vmem:[%s16393_s5 + $0x860] sm:$0xff] }
 0x445   :  { %v487_v54 = vpop.permute.xlu1 %486  ;;  %2499 = vmatpush.msrb.mxu3 %v1329_v35  ;;  %v1286_v35 = vld [vmem:[%s16393_s5 + $0x788] sm:$0xff] }
 0x446   :  { %2305 = vmatmul.f32.vlgmr.msrb.gmra.mxu2 %v509_v9  ;;  %v490_v59 = vmul.f32 %v487_v54, %v8609_v6  ;;  %v1287_v54 = vld [vmem:[%s16393_s5 + $0x790] sm:$0xff]  ;;  %v16567_v9 = vmov 24  }
 0x447   :  { %2473 = vmatpush.msrb.mxu2 %v1316_v55  ;;  %v9046_v55 = vpop.permute.xlu2 %932  ;;  %2463 = vmatpush.msrb.mxu1 %v1287_v54  ;;  %v1311_v54 = vld [vmem:[%s16393_s5 + $0x850] sm:$0xff] }
 0x448   :  { %2262 = vmatmul.f32.gmra.mxu0 %v490_v59  ;;  %v1327_v59 = vld [vmem:[%s16393_s5 + $0x8d0] sm:$0xff]  ;;  %2500 = vmatpush.msrb.mxu3 %v1328_v23  ;;  %v16568_v23 = vmov 39  }
 0x449   :  { %7534 = vset.pattern.permute.xlu2 %v16523_v43  ;;  %2474 = vmatpush.msrb.mxu2 %v1315_v29  ;;  %v1312_v29 = vld [vmem:[%s16393_s5 + $0x858] sm:$0xff]  ;;  %v1285_v43 = vld [vmem:[%s16393_s5 + $0x780] sm:$0xff] }
 0x44a   :  { %7522 = vset.pattern.permute.xlu1 %v16567_v9  ;;  %1002 = vperm.xlu2 %7534, %v8157_v47  }
 0x44b   :  { %706 = vperm.xlu1 %7522, %v8399_v36   ;;  %2475 = vmatpush.msrb.mxu2 %v1314_v31  ;;  %v529_v31 = vmul.f32 %v8448_v50, %v8428_v41  ;;  %v1347_v50 = vld [vmem:[%s16393_s5 + $0x970] sm:$0xff] }
 0x44c   :  { %2464 = vmatpush.msrb.mxu1 %v1286_v35  ;;  %2501 = vmatpush.msrb.mxu3 %v1327_v59  ;;  %v16569_v35 = vmov 26   ;;  %v1325_v59 = vld [vmem:[%s16393_s5 + $0x8c0] sm:$0xff] }
 0x44d   :  { %2476 = vmatpush.msrb.mxu2 %v1313_v63  ;;  %v1310_v63 = vld [vmem:[%s16393_s5 + $0x848] sm:$0xff] }
 0x44e   :  { %v497_v9 = vpop.permute.xlu1 %496  ;;  %2465 = vmatpush.msrb.mxu1 %v1285_v43  ;;  %v1309_v43 = vld [vmem:[%s16393_s5 + $0x840] sm:$0xff] }
 0x44f   :  { %2477 = vmatpush.msrb.mxu2 %v1312_v29  ;;  %v500_v45 = vmul.f32 %v497_v9, %v8609_v6  ;;  %v1326_v9 = vld [vmem:[%s16393_s5 + $0x8c8] sm:$0xff]  ;;  %v1345_v29 = vld [vmem:[%s16393_s5 + $0x960] sm:$0xff] }
 0x450   :  { %2351 = vmatmul.f32.vlgmr.msra.gmra.mxu0 %v529_v31  ;;  %2502 = vmatpush.msrb.mxu3 %v1326_v9  ;;  %v1308_v31 = vld [vmem:[%s16393_s5 + $0x838] sm:$0xff]  ;;  %v1307_v9 = vld [vmem:[%s16393_s5 + $0x830] sm:$0xff] }
 0x451   :  { %2519 = vmatpush.msra.mxu0 %v1348_v14  ;;  %2285 = vmatmul.f32.gmra.mxu1 %v500_v45  ;;  %v1346_v45 = vld [vmem:[%s16393_s5 + $0x968] sm:$0xff]  ;;  %v527_v14 = vpop.permute.xlu2 %526 }
 0x452   :  { %7538 = vset.pattern.permute.xlu2 %v16568_v23  ;;  %2478 = vmatpush.msrb.mxu2 %v1311_v54  ;;  %v530_v54 = vmul.f32 %v527_v14, %v8609_v6 }
 0x453   :  { %7524 = vset.pattern.permute.xlu1 %v16569_v35  ;;  %856 = vperm.xlu2 %7538, %v8399_v36   ;;  %v2078_v35 = vld [vmem:[%s16393_s5 + $0x2048] sm:$0xff] }
 0x454   :  { %726 = vperm.xlu1 %7524, %v8399_v36   ;;  %2520 = vmatpush.msra.mxu0 %v1347_v50  ;;  %v1344_v50 = vld [vmem:[%s16393_s5 + $0x958] sm:$0xff] }
 0x455   :  { %2479 = vmatpush.msrb.mxu2 %v1310_v63  ;;  %2503 = vmatpush.msrb.mxu3 %v1325_v59  ;;  %v539_v63 = vmul.f32 %v8463_v26, %v8428_v41  ;;  %v1343_v26 = vld [vmem:[%s16393_s5 + $0x950] sm:$0xff]  ;;  %v16571_v59 = vmov 27  }
 0x456   :  { %2521 = vmatpush.msra.mxu0 %v1346_v45  ;;  %v1364_v45 = vld [vmem:[%s16393_s5 + $0x9f8] sm:$0xff] }
 0x457   :  { %2480 = vmatpush.msrb.mxu2 %v1309_v43  ;;  %v16570_v43 = vmov 41  }
 0x458   :  { %2522 = vmatpush.msra.mxu0 %v1345_v29  ;;  %v507_v23 = vpop.permute.xlu1 %506  ;;  %v1306_v29 = vld [vmem:[%s16393_s5 + $0x828] sm:$0xff] }
 0x459   :  { %2481 = vmatpush.msrb.mxu2 %v1308_v31  ;;  %2354 = vmatmul.f32.gmra.mxu0 %v530_v54  ;;  %v510_v14 = vmul.f32 %v507_v23, %v8609_v6  ;;  %v1363_v31 = vld [vmem:[%s16393_s5 + $0x9f0] sm:$0xff]  ;;  %v1324_v23 = vld [vmem:[%s16393_s5 + $0x8b8] sm:$0xff]  ;;  %v1342_v54 = vld [vmem:[%s16393_s5 + $0x948] sm:$0xff] }
 0x45a   :  { %2523 = vmatpush.msra.mxu0 %v1344_v50  ;;  %2374 = vmatmul.f32.vlgmr.msra.gmra.mxu1 %v539_v63  ;;  %v1305_v50 = vld [vmem:[%s16393_s5 + $0x820] sm:$0xff]  ;;  %v1362_v63 = vld [vmem:[%s16393_s5 + $0x9e8] sm:$0xff] }
 0x45b   :  { %7540 = vset.pattern.permute.xlu2 %v16570_v43  ;;  %2482 = vmatpush.msrb.mxu2 %v1307_v9  ;;  %v1323_v9 = vld [vmem:[%s16393_s5 + $0x8b0] sm:$0xff] }
 0x45c   :  { %7525 = vset.pattern.permute.xlu1 %v16571_v59  ;;  %2542 = vmatpush.msra.mxu1 %v1364_v45  ;;  %v1341_v45 = vld [vmem:[%s16393_s5 + $0x940] sm:$0xff] }
 0x45d   :  { %876 = vperm.xlu2 %7540, %v8399_v36   ;;  %736 = vperm.xlu1 %7525, %v8399_v36  }
 0x45e   :  { %2308 = vmatmul.f32.gmra.mxu2 %v510_v14  ;;  %2524 = vmatpush.msra.mxu0 %v1343_v26  ;;  %v1304_v14 = vld [vmem:[%s16393_s5 + $0x818] sm:$0xff]  ;;  %v1361_v26 = vld [vmem:[%s16393_s5 + $0x9e0] sm:$0xff] }
 0x45f   :  { %2483 = vmatpush.msrb.mxu2 %v1306_v29  ;;  %2543 = vmatpush.msra.mxu1 %v1363_v31  ;;  %v1322_v29 = vld [vmem:[%s16393_s5 + $0x8a8] sm:$0xff]  ;;  %v569_v31 = vmul.f32 %v8461_v8, %v8428_v41  ;;  %v1321_v8 = vld [vmem:[%s16393_s5 + $0x8a0] sm:$0xff] }
 0x460   :  { %2504 = vmatpush.msrb.mxu3 %v1324_v23  ;;  %2525 = vmatpush.msra.mxu0 %v1342_v54  ;;  %v1340_v23 = vld [vmem:[%s16393_s5 + $0x938] sm:$0xff]  ;;  %v1303_v54 = vld [vmem:[%s16393_s5 + $0x810] sm:$0xff] }
 0x461   :  { %2484 = vmatpush.msrb.mxu2 %v1305_v50  ;;  %2544 = vmatpush.msra.mxu1 %v1362_v63  ;;  %v517_v50 = vpop.permute.xlu1 %516  ;;  %v1360_v63 = vld [vmem:[%s16393_s5 + $0x9d8] sm:$0xff] }
 0x462   :  { %2505 = vmatpush.msrb.mxu3 %v1323_v9  ;;  %2526 = vmatpush.msra.mxu0 %v1341_v45  ;;  %v1339_v9 = vld [vmem:[%s16393_s5 + $0x930] sm:$0xff]  ;;  %v549_v45 = vmul.f32 %v8465_v13, %v8428_v41  ;;  %v1320_v13 = vld [vmem:[%s16393_s5 + $0x898] sm:$0xff] }
 0x463   :  { %2485 = vmatpush.msrb.mxu2 %v1304_v14  ;;  %2545 = vmatpush.msra.mxu1 %v1361_v26  ;;  %v16572_v14 = vmov 58   ;;  %v520_v26 = vmul.f32 %v517_v50, %v8609_v6  ;;  %v1301_v50 = vld [vmem:[%s16393_s5 + $0x800] sm:$0xff] }
 0x464   :  { %2506 = vmatpush.msrb.mxu3 %v1322_v29  ;;  %2443 = vmatmul.f32.vlgmr.msrb.gmra.mxu0 %v569_v31  ;;  %v16573_v29 = vmov 31   ;;  %v1302_v31 = vld [vmem:[%s16393_s5 + $0x808] sm:$0xff] }
 0x465   :  { %2527 = vmatpush.msra.mxu0 %v1340_v23  ;;  %2486 = vmatpush.msrb.mxu2 %v1303_v54  ;;  %v1359_v23 = vld [vmem:[%s16393_s5 + $0x9d0] sm:$0xff]  ;;  %v1338_v54 = vld [vmem:[%s16393_s5 + $0x928] sm:$0xff] }
 0x466   :  { %2546 = vmatpush.msra.mxu1 %v1360_v63  ;;  %7546 = vset.pattern.permute.xlu2 %v16572_v14  ;;  %v567_v63 = vpop.permute.xlu2 %566  ;;  %v1380_v14 = vld [vmem:[%s16393_s5 + $0xa78] sm:$0xff] }
 0x467   :  { %2507 = vmatpush.msrb.mxu3 %v1321_v8  ;;  %7529 = vset.pattern.permute.xlu1 %v16573_v29  ;;  %v1358_v8 = vld [vmem:[%s16393_s5 + $0x9c8] sm:$0xff] }
 0x468   :  { %2397 = vmatmul.f32.vlgmr.msra.gmra.mxu2 %v549_v45  ;;  %2528 = vmatpush.msra.mxu0 %v1339_v9  ;;  %v1319_v9 = vld [vmem:[%s16393_s5 + $0x890] sm:$0xff]  ;;  %v1337_v45 = vld [vmem:[%s16393_s5 + $0x920] sm:$0xff] }
 0x469   :  { %1042 = vperm.xlu2 %7546, %v8157_v47   ;;  %776 = vperm.xlu1 %7529, %v8399_v36  }
 0x46a   :  { %2331 = vmatmul.f32.gmra.mxu3 %v520_v26  ;;  %2487 = vmatpush.msrb.mxu2 %v1302_v31  ;;  %v1357_v26 = vld [vmem:[%s16393_s5 + $0x9c0] sm:$0xff]  ;;  %v570_v31 = vmul.f32 %v567_v63, %v8609_v6 }
 0x46b   :  { %2547 = vmatpush.msra.mxu1 %v1359_v23  ;;  %2508 = vmatpush.msrb.mxu3 %v1320_v13  ;;  %v1318_v23 = vld [vmem:[%s16393_s5 + $0x888] sm:$0xff]  ;;  %v1336_v13 = vld [vmem:[%s16393_s5 + $0x918] sm:$0xff]  ;;  %v1317_v63 = vld [vmem:[%s16393_s5 + $0x880] sm:$0xff] }
 0x46c   :  { %2529 = vmatpush.msra.mxu0 %v1338_v54  ;;  %2488 = vmatpush.msrb.mxu2 %v1301_v50  ;;  %v1379_v54 = vld [vmem:[%s16393_s5 + $0xa70] sm:$0xff]  ;;  %v1356_v50 = vld [vmem:[%s16393_s5 + $0x9b8] sm:$0xff] }
 0x46d   :  { %2548 = vmatpush.msra.mxu1 %v1358_v8  ;;  %2509 = vmatpush.msrb.mxu3 %v1319_v9  ;;  %v1335_v8 = vld [vmem:[%s16393_s5 + $0x910] sm:$0xff]  ;;  %v9229_v9 = vpop.permute.xlu0 %942 }
 0x46e   :  { %2530 = vmatpush.msra.mxu0 %v1337_v45  ;;  %2565 = vmatpush.msra.mxu2 %v1380_v14  ;;  %v537_v14 = vpop.permute.xlu1 %536  ;;  %v1378_v45 = vld [vmem:[%s16393_s5 + $0xa68] sm:$0xff] }
 0x46f   :  { %2549 = vmatpush.msra.mxu1 %v1357_v26  ;;  %2446 = vmatmul.f32.gmra.mxu0 %v570_v31  ;;  %v559_v26 = vmul.f32 %v8477_v44, %v8428_v41  ;;  %v1355_v31 = vld [vmem:[%s16393_s5 + $0x9b0] sm:$0xff]  ;;  %v540_v43 = vmul.f32 %v537_v14, %v8609_v6  ;;  %v1334_v44 = vld [vmem:[%s16393_s5 + $0x908] sm:$0xff]  ;;  %v1333_v14 = vld [vmem:[%s16393_s5 + $0x900] sm:$0xff] }
 0x470   :  { %2510 = vmatpush.msrb.mxu3 %v1318_v23  ;;  %2531 = vmatpush.msra.mxu0 %v1336_v13  ;;  %v1396_v23 = vld [vmem:[%s16393_s5 + $0xaf8] sm:$0xff]  ;;  %v16574_v13 = vmov 45  }
 0x471   :  { %2566 = vmatpush.msra.mxu2 %v1379_v54  ;;  %2550 = vmatpush.msra.mxu1 %v1356_v50  ;;  %v16575_v54 = vmov 33   ;;  %v1377_v50 = vld [vmem:[%s16393_s5 + $0xa60] sm:$0xff] }
 0x472   :  { %2511 = vmatpush.msrb.mxu3 %v1317_v63  ;;  %2532 = vmatpush.msra.mxu0 %v1335_v8  ;;  %v1354_v63 = vld [vmem:[%s16393_s5 + $0x9a8] sm:$0xff]  ;;  %v1395_v8 = vld [vmem:[%s16393_s5 + $0xaf0] sm:$0xff] }
 0x473   :  { %2567 = vmatpush.msra.mxu2 %v1378_v45  ;;  %7548 = vset.pattern.permute.xlu2 %v16574_v13  ;;  %v1376_v45 = vld [vmem:[%s16393_s5 + $0xa58] sm:$0xff]  ;;  %v1393_v13 = vld [vmem:[%s16393_s5 + $0xae0] sm:$0xff] }
 0x474   :  { %7531 = vset.pattern.permute.xlu1 %v16575_v54  ;;  %2420 = vmatmul.f32.vlgmr.msra.gmra.mxu3 %v559_v26  ;;  %v1353_v26 = vld [vmem:[%s16393_s5 + $0x9a0] sm:$0xff]  ;;  %v1352_v54 = vld [vmem:[%s16393_s5 + $0x998] sm:$0xff] }
 0x475   :  { %2551 = vmatpush.msra.mxu1 %v1355_v31  ;;  %2588 = vmatpush.msra.mxu3 %v1396_v23  ;;  %v1394_v31 = vld [vmem:[%s16393_s5 + $0xae8] sm:$0xff]  ;;  %v1412_v23 = vld [vmem:[%s16393_s5 + $0xb78] sm:$0xff] }
 0x476   :  { %916 = vperm.xlu2 %7548, %v8399_v36   ;;  %796 = vperm.xlu1 %7531, %v8399_v36  }
 0x477   :  { %2377 = vmatmul.f32.gmra.mxu1 %v540_v43  ;;  %2533 = vmatpush.msra.mxu0 %v1334_v44  ;;  %v9274_v43 = vpop.permute.xlu2 %576  ;;  %v1375_v44 = vld [vmem:[%s16393_s5 + $0xa50] sm:$0xff] }
 0x478   :  { %2568 = vmatpush.msra.mxu2 %v1377_v50  ;;  %2552 = vmatpush.msra.mxu1 %v1354_v63  ;;  %v609_v50 = vmul.f32 %v8510_v10, %v8428_v41  ;;  %v557_v63 = vpop.permute.xlu0 %556  ;;  %v1374_v10 = vld [vmem:[%s16393_s5 + $0xa48] sm:$0xff] }
 0x479   :  { %2589 = vmatpush.msra.mxu3 %v1395_v8  ;;  %2534 = vmatpush.msra.mxu0 %v1333_v14  ;;  %v1411_v8 = vld [vmem:[%s16393_s5 + $0xb70] sm:$0xff] }
 0x47a   :  { %2569 = vmatpush.msra.mxu2 %v1376_v45  ;;  %2553 = vmatpush.msra.mxu1 %v1353_v26  ;;  %v1351_v14 = vld [vmem:[%s16393_s5 + $0x990] sm:$0xff]  ;;  %v560_v45 = vmul.f32 %v557_v63, %v8609_v6  ;;  %v547_v26 = vpop.permute.xlu1 %546  ;;  %v16577_v63 = vmov 37  }
 0x47b   :  { %2590 = vmatpush.msra.mxu3 %v1394_v31  ;;  %2611 = vmatpush.msrb.mxu0 %v1412_v23  ;;  %v1392_v31 = vld [vmem:[%s16393_s5 + $0xad8] sm:$0xff]  ;;  %v1410_v23 = vld [vmem:[%s16393_s5 + $0xb68] sm:$0xff] }
 0x47c   :  { %2535 = vmatmul.f32.vlgmr.msra.gmra.mxu0 %v609_v50  ;;  %2570 = vmatpush.msra.mxu2 %v1375_v44  ;;  %v1373_v44 = vld [vmem:[%s16393_s5 + $0xa40] sm:$0xff]  ;;  %v16576_v50 = vmov 48  }
 0x47d   :  { %2554 = vmatpush.msra.mxu1 %v1352_v54  ;;  %2591 = vmatpush.msra.mxu3 %v1393_v13  ;;  %v579_v13 = vmul.f32 %v8472_v7, %v8428_v41  ;;  %v550_v54 = vmul.f32 %v547_v26, %v8609_v6  ;;  %v1409_v7 = vld [vmem:[%s16393_s5 + $0xb60] sm:$0xff] }
 0x47e   :  { %2612 = vmatpush.msrb.mxu0 %v1411_v8  ;;  %2571 = vmatpush.msra.mxu2 %v1374_v10  ;;  %v1350_v8 = vld [vmem:[%s16393_s5 + $0x988] sm:$0xff]  ;;  %v1391_v10 = vld [vmem:[%s16393_s5 + $0xad0] sm:$0xff]  ;;  %v1349_v26 = vld [vmem:[%s16393_s5 + $0x980] sm:$0xff] }
 0x47f   :  { %2423 = vmatmul.f32.gmra.mxu3 %v560_v45  ;;  %2555 = vmatpush.msra.mxu1 %v1351_v14  ;;  %v607_v14 = vpop.permute.xlu2 %606  ;;  %v1372_v45 = vld [vmem:[%s16393_s5 + $0xa38] sm:$0xff] }
 0x480   :  { %2592 = vmatpush.msra.mxu3 %v1392_v31  ;;  %2613 = vmatpush.msrb.mxu0 %v1410_v23  ;;  %v1390_v31 = vld [vmem:[%s16393_s5 + $0xac8] sm:$0xff]  ;;  %v1408_v23 = vld [vmem:[%s16393_s5 + $0xb58] sm:$0xff] }
 0x481   :  { %7551 = vset.pattern.permute.xlu2 %v16576_v50  ;;  %7536 = vset.pattern.permute.xlu1 %v16577_v63  ;;  %v2013_v50 = vld [vmem:[%s16393_s5 + $0x1e40] sm:$0xff]  ;;  %v2039_v63 = vld [vmem:[%s16393_s5 + $0x1f10] sm:$0xff] }
 0x482   :  { %2466 = vmatmul.f32.vlgmr.msrb.gmra.mxu1 %v579_v13  ;;  %2572 = vmatpush.msra.mxu2 %v1373_v44  ;;  %v1371_v44 = vld [vmem:[%s16393_s5 + $0xa30] sm:$0xff]  ;;  %v610_v13 = vmul.f32 %v607_v14, %v8609_v6 }
 0x483   :  { %946 = vperm.xlu2 %7551, %v8399_v36   ;;  %836 = vperm.xlu1 %7536, %v8399_v36   ;;  %v1427_v14 = vld [vmem:[%s16393_s5 + $0xbf0] sm:$0xff] }
 0x484   :  { %2400 = vmatmul.f32.gmra.mxu2 %v550_v54  ;;  %2556 = vmatpush.msra.mxu1 %v1350_v8  ;;  %v1428_v54 = vld [vmem:[%s16393_s5 + $0xbf8] sm:$0xff]  ;;  %v1389_v8 = vld [vmem:[%s16393_s5 + $0xac0] sm:$0xff] }
 0x485   :  { %2593 = vmatpush.msra.mxu3 %v1391_v10  ;;  %2614 = vmatpush.msrb.mxu0 %v1409_v7  ;;  %v1407_v10 = vld [vmem:[%s16393_s5 + $0xb50] sm:$0xff]  ;;  %v1370_v7 = vld [vmem:[%s16393_s5 + $0xa28] sm:$0xff] }
 0x486   :  { %2573 = vmatpush.msra.mxu2 %v1372_v45  ;;  %2557 = vmatpush.msra.mxu1 %v1349_v26  ;;  %v599_v45 = vmul.f32 %v8492_v25, %v8428_v41  ;;  %v1388_v26 = vld [vmem:[%s16393_s5 + $0xab8] sm:$0xff]  ;;  %v580_v25 = vmul.f32 %v9274_v43, %v8609_v6  ;;  %v1405_v43 = vld [vmem:[%s16393_s5 + $0xb40] sm:$0xff] }
 0x487   :  { %2594 = vmatpush.msra.mxu3 %v1390_v31  ;;  %2615 = vmatpush.msrb.mxu0 %v1408_v23  ;;  %v1406_v31 = vld [vmem:[%s16393_s5 + $0xb48] sm:$0xff]  ;;  %v1369_v23 = vld [vmem:[%s16393_s5 + $0xa20] sm:$0xff] }
 0x488   :  { %2538 = vmatmul.f32.gmra.mxu0 %v610_v13  ;;  %2574 = vmatpush.msra.mxu2 %v1371_v44  ;;  %v1426_v44 = vld [vmem:[%s16393_s5 + $0xbe8] sm:$0xff]  ;;  %v589_v13 = vmul.f32 %v8475_v37, %v8428_v41  ;;  %v1368_v37 = vld [vmem:[%s16393_s5 + $0xa18] sm:$0xff] }
 0x489   :  { %2634 = vmatpush.msrb.mxu1 %v1428_v54  ;;  %2595 = vmatpush.msra.mxu3 %v1389_v8  ;;  %v587_v54 = vpop.permute.xlu1 %586  ;;  %v1387_v8 = vld [vmem:[%s16393_s5 + $0xab0] sm:$0xff] }
 0x48a   :  { %2616 = vmatpush.msrb.mxu0 %v1407_v10  ;;  %2575 = vmatpush.msra.mxu2 %v1370_v7  ;;  %v16578_v10 = vmov 50   ;;  %v16579_v7 = vmov 40  }
 0x48b   :  { %2635 = vmatpush.msrb.mxu1 %v1427_v14  ;;  %2512 = vmatmul.f32.vlgmr.msrb.gmra.mxu3 %v599_v45  ;;  %v1425_v14 = vld [vmem:[%s16393_s5 + $0xbe0] sm:$0xff]  ;;  %v1386_v45 = vld [vmem:[%s16393_s5 + $0xaa8] sm:$0xff] }
 0x48c   :  { %2596 = vmatpush.msra.mxu3 %v1388_v26  ;;  %2617 = vmatpush.msrb.mxu0 %v1406_v31  ;;  %v1404_v26 = vld [vmem:[%s16393_s5 + $0xb38] sm:$0xff]  ;;  %v1367_v31 = vld [vmem:[%s16393_s5 + $0xa10] sm:$0xff] }
 0x48d   :  { %2469 = vmatmul.f32.gmra.mxu1 %v580_v25  ;;  %2576 = vmatpush.msra.mxu2 %v1369_v23  ;;  %v1424_v23 = vld [vmem:[%s16393_s5 + $0xbd8] sm:$0xff]  ;;  %v1385_v25 = vld [vmem:[%s16393_s5 + $0xaa0] sm:$0xff] }
 0x48e   :  { %2636 = vmatpush.msrb.mxu1 %v1426_v44  ;;  %7553 = vset.pattern.permute.xlu2 %v16578_v10  ;;  %v1403_v44 = vld [vmem:[%s16393_s5 + $0xb30] sm:$0xff]  ;;  %v627_v10 = vpop.permute.xlu0 %626 }
 0x48f   :  { %7539 = vset.pattern.permute.xlu1 %v16579_v7  ;;  %2489 = vmatmul.f32.vlgmr.msrb.gmra.mxu2 %v589_v13  ;;  %v1366_v13 = vld [vmem:[%s16393_s5 + $0xa08] sm:$0xff] }
 0x490   :  { %2597 = vmatpush.msra.mxu3 %v1387_v8  ;;  %2618 = vmatpush.msrb.mxu0 %v1405_v43  ;;  %v1423_v8 = vld [vmem:[%s16393_s5 + $0xbd0] sm:$0xff]  ;;  %v1384_v43 = vld [vmem:[%s16393_s5 + $0xa98] sm:$0xff] }
 0x491   :  { %966 = vperm.xlu2 %7553, %v8399_v36   ;;  %866 = vperm.xlu1 %7539, %v8399_v36  }
 0x492   :  { %2577 = vmatpush.msra.mxu2 %v1368_v37  ;;  %2637 = vmatpush.msrb.mxu1 %v1425_v14  ;;  %v1402_v37 = vld [vmem:[%s16393_s5 + $0xb28] sm:$0xff]  ;;  %v1365_v14 = vld [vmem:[%s16393_s5 + $0xa00] sm:$0xff] }
 0x493   :  { %2598 = vmatpush.msra.mxu3 %v1386_v45  ;;  %2619 = vmatpush.msrb.mxu0 %v1404_v26  ;;  %v619_v45 = vmul.f32 %v8487_v0, %v8428_v41  ;;  %v1422_v26 = vld [vmem:[%s16393_s5 + $0xbc8] sm:$0xff]  ;;  %v1444_v0 = vld [vmem:[%s16393_s5 + $0xc78] sm:$0xff] }
 0x494   :  { %2578 = vmatpush.msra.mxu2 %v1367_v31  ;;  %2638 = vmatpush.msrb.mxu1 %v1424_v23  ;;  %v597_v31 = vpop.permute.xlu1 %596  ;;  %v590_v23 = vmul.f32 %v587_v54, %v8609_v6  ;;  %v1421_v54 = vld [vmem:[%s16393_s5 + $0xbc0] sm:$0xff] }
 0x495   :  { %2599 = vmatpush.msra.mxu3 %v1385_v25  ;;  %2620 = vmatpush.msrb.mxu0 %v1403_v44  ;;  %v1383_v25 = vld [vmem:[%s16393_s5 + $0xa90] sm:$0xff]  ;;  %v1401_v44 = vld [vmem:[%s16393_s5 + $0xb20] sm:$0xff] }
 0x496   :  { %2579 = vmatpush.msra.mxu2 %v1366_v13  ;;  %2639 = vmatpush.msrb.mxu1 %v1423_v8  ;;  %v600_v13 = vmul.f32 %v597_v31, %v8609_v6  ;;  %v16580_v8 = vmov 52   ;;  %v1399_v31 = vld [vmem:[%s16393_s5 + $0xb10] sm:$0xff] }
 0x497   :  { %2600 = vmatpush.msra.mxu3 %v1384_v43  ;;  %2621 = vmatpush.msrb.mxu0 %v1402_v37  ;;  %v1400_v43 = vld [vmem:[%s16393_s5 + $0xb18] sm:$0xff]  ;;  %v16581_v37 = vmov 42  }
 0x498   :  { %2558 = vmatmul.f32.vlgmr.msra.gmra.mxu1 %v619_v45  ;;  %2580 = vmatpush.msra.mxu2 %v1365_v14  ;;  %v1382_v14 = vld [vmem:[%s16393_s5 + $0xa88] sm:$0xff]  ;;  %v1443_v45 = vld [vmem:[%s16393_s5 + $0xc70] sm:$0xff] }
 0x499   :  { %2640 = vmatpush.msrb.mxu1 %v1422_v26  ;;  %2492 = vmatmul.f32.gmra.mxu2 %v590_v23  ;;  %v1420_v26 = vld [vmem:[%s16393_s5 + $0xbb8] sm:$0xff]  ;;  %v1381_v23 = vld [vmem:[%s16393_s5 + $0xa80] sm:$0xff] }
 0x49a   :  { %2601 = vmatpush.msra.mxu3 %v1383_v25  ;;  %2622 = vmatpush.msrb.mxu0 %v1401_v44  ;;  %v1442_v25 = vld [vmem:[%s16393_s5 + $0xc68] sm:$0xff]  ;;  %v617_v44 = vpop.permute.xlu2 %616 }
 0x49b   :  { %2657 = vmatpush.msrb.mxu2 %v1444_v0  ;;  %7555 = vset.pattern.permute.xlu2 %v16580_v8  ;;  %v1419_v0 = vld [vmem:[%s16393_s5 + $0xbb0] sm:$0xff] }
 0x49c   :  { %7541 = vset.pattern.permute.xlu1 %v16581_v37  ;;  %2641 = vmatpush.msrb.mxu1 %v1421_v54  ;;  %v1460_v54 = vld [vmem:[%s16393_s5 + $0xcf8] sm:$0xff] }
 0x49d   :  { %986 = vperm.xlu2 %7555, %v8399_v36   ;;  %886 = vperm.xlu1 %7541, %v8399_v36   ;;  %v2100_v37 = vld [vmem:[%s16393_s5 + $0x20f8] sm:$0xff] }
 0x49e   :  { %2515 = vmatmul.f32.gmra.mxu3 %v600_v13  ;;  %2623 = vmatpush.msrb.mxu0 %v1400_v43  ;;  %v1398_v13 = vld [vmem:[%s16393_s5 + $0xb08] sm:$0xff]  ;;  %v1441_v43 = vld [vmem:[%s16393_s5 + $0xc60] sm:$0xff] }
 0x49f   :  { %2602 = vmatpush.msra.mxu3 %v1382_v14  ;;  %2658 = vmatpush.msrb.mxu2 %v1443_v45  ;;  %v1459_v14 = vld [vmem:[%s16393_s5 + $0xcf0] sm:$0xff]  ;;  %v620_v45 = vmul.f32 %v617_v44, %v8609_v6  ;;  %v1417_v44 = vld [vmem:[%s16393_s5 + $0xba0] sm:$0xff] }
 0x4a0   :  { %2642 = vmatpush.msrb.mxu1 %v1420_v26  ;;  %2624 = vmatpush.msrb.mxu0 %v1399_v31  ;;  %v1418_v26 = vld [vmem:[%s16393_s5 + $0xba8] sm:$0xff]  ;;  %v629_v31 = vmul.f32 %v8485_v28, %v8428_v41  ;;  %v649_v28 = vmul.f32 %v8538_v32, %v8428_v41  ;;  %v639_v32 = vmul.f32 %v8502_v18, %v8428_v41  ;;  %v1475_v18 = vld [vmem:[%s16393_s5 + $0xd70] sm:$0xff] }
 0x4a1   :  { %2603 = vmatpush.msra.mxu3 %v1381_v23  ;;  %2659 = vmatpush.msrb.mxu2 %v1442_v25  ;;  %v1397_v23 = vld [vmem:[%s16393_s5 + $0xb00] sm:$0xff]  ;;  %v1440_v25 = vld [vmem:[%s16393_s5 + $0xc58] sm:$0xff] }
 0x4a2   :  { %2643 = vmatpush.msrb.mxu1 %v1419_v0  ;;  %2625 = vmatpush.msrb.mxu0 %v1398_v13  ;;  %v1458_v0 = vld [vmem:[%s16393_s5 + $0xce8] sm:$0xff]  ;;  %v1439_v13 = vld [vmem:[%s16393_s5 + $0xc50] sm:$0xff] }
 0x4a3   :  { %2680 = vmatpush.msrb.mxu3 %v1460_v54  ;;  %2660 = vmatpush.msrb.mxu2 %v1441_v43  ;;  %v1476_v54 = vld [vmem:[%s16393_s5 + $0xd78] sm:$0xff]  ;;  %v9507_v43 = vpop.permute.xlu1 %962 }
 0x4a4   :  { %2561 = vmatmul.f32.gmra.mxu1 %v620_v45  ;;  %2581 = vmatmul.f32.vlgmr.msra.gmra.mxu2 %v629_v31  ;;  %v16583_v45 = vmov 56   ;;  %v1457_v31 = vld [vmem:[%s16393_s5 + $0xce0] sm:$0xff] }
 0x4a5   :  { %2681 = vmatpush.msrb.mxu3 %v1459_v14  ;;  %2644 = vmatpush.msrb.mxu1 %v1418_v26  ;;  %v16582_v14 = vmov 54   ;;  %v1416_v26 = vld [vmem:[%s16393_s5 + $0xb98] sm:$0xff] }
 0x4a6   :  { %2626 = vmatpush.msrb.mxu0 %v1397_v23  ;;  %2661 = vmatpush.msrb.mxu2 %v1440_v25  ;;  %v1438_v23 = vld [vmem:[%s16393_s5 + $0xc48] sm:$0xff]  ;;  %v1415_v25 = vld [vmem:[%s16393_s5 + $0xb90] sm:$0xff] }
 0x4a7   :  { %2627 = vmatmul.f32.vlgmr.msrb.gmra.mxu0 %v649_v28  ;;  %2645 = vmatpush.msrb.mxu1 %v1417_v44  ;;  %v1456_v44 = vld [vmem:[%s16393_s5 + $0xcd8] sm:$0xff]  ;;  %v1474_v28 = vld [vmem:[%s16393_s5 + $0xd68] sm:$0xff] }
 0x4a8   :  { %2682 = vmatpush.msrb.mxu3 %v1458_v0  ;;  %2703 = vmatpush.msra.mxu0 %v1476_v54  ;;  %v1437_v0 = vld [vmem:[%s16393_s5 + $0xc40] sm:$0xff]  ;;  %v647_v54 = vpop.permute.xlu0 %646 }
 0x4a9   :  { %7558 = vset.pattern.permute.xlu2 %v16582_v14  ;;  %7544 = vset.pattern.permute.xlu1 %v16583_v45  ;;  %v9551_v14 = vpop.permute.xlu2 %952 }
 0x4aa   :  { %2604 = vmatmul.f32.vlgmr.msra.gmra.mxu3 %v639_v32  ;;  %2662 = vmatpush.msrb.mxu2 %v1439_v13  ;;  %v1414_v13 = vld [vmem:[%s16393_s5 + $0xb88] sm:$0xff]  ;;  %v1455_v32 = vld [vmem:[%s16393_s5 + $0xcd0] sm:$0xff] }
 0x4ab   :  { %1006 = vperm.xlu2 %7558, %v8399_v36   ;;  %1022 = vperm.xlu1 %7544, %v8157_v47  }
 0x4ac   :  { %2646 = vmatpush.msrb.mxu1 %v1416_v26  ;;  %2683 = vmatpush.msrb.mxu3 %v1457_v31  ;;  %v1473_v26 = vld [vmem:[%s16393_s5 + $0xd60] sm:$0xff]  ;;  %v630_v31 = vmul.f32 %v627_v10, %v8609_v6  ;;  %v1454_v10 = vld [vmem:[%s16393_s5 + $0xcc8] sm:$0xff] }
 0x4ad   :  { %2704 = vmatpush.msra.mxu0 %v1475_v18  ;;  %2663 = vmatpush.msrb.mxu2 %v1438_v23  ;;  %v1436_v18 = vld [vmem:[%s16393_s5 + $0xc38] sm:$0xff]  ;;  %v650_v23 = vmul.f32 %v647_v54, %v8609_v6  ;;  %v1435_v54 = vld [vmem:[%s16393_s5 + $0xc30] sm:$0xff] }
 0x4ae   :  { %2647 = vmatpush.msrb.mxu1 %v1415_v25  ;;  %2684 = vmatpush.msrb.mxu3 %v1456_v44  ;;  %v1413_v25 = vld [vmem:[%s16393_s5 + $0xb80] sm:$0xff]  ;;  %v1472_v44 = vld [vmem:[%s16393_s5 + $0xd58] sm:$0xff] }
 0x4af   :  { %2705 = vmatpush.msra.mxu0 %v1474_v28  ;;  %2664 = vmatpush.msrb.mxu2 %v1437_v0  ;;  %v659_v28 = vmul.f32 %v8521_v27, %v8428_v41  ;;  %v637_v0 = vpop.permute.xlu1 %636  ;;  %v1471_v27 = vld [vmem:[%s16393_s5 + $0xd50] sm:$0xff] }
 0x4b0   :  { %2648 = vmatpush.msrb.mxu1 %v1414_v13  ;;  %2685 = vmatpush.msrb.mxu3 %v1455_v32  ;;  %v1492_v13 = vld [vmem:[%s16393_s5 + $0xdf8] sm:$0xff]  ;;  %v1453_v32 = vld [vmem:[%s16393_s5 + $0xcc0] sm:$0xff] }
 0x4b1   :  { %2706 = vmatpush.msra.mxu0 %v1473_v26  ;;  %2584 = vmatmul.f32.gmra.mxu2 %v630_v31  ;;  %v640_v26 = vmul.f32 %v637_v0, %v8609_v6  ;;  %v16584_v31 = vmov 55   ;;  %v1490_v0 = vld [vmem:[%s16393_s5 + $0xde8] sm:$0xff] }
 0x4b2   :  { %2665 = vmatpush.msrb.mxu2 %v1436_v18  ;;  %2630 = vmatmul.f32.gmra.mxu0 %v650_v23  ;;  %v16528_v18 = vmov 57   ;;  %v1434_v23 = vld [vmem:[%s16393_s5 + $0xc28] sm:$0xff] }
 0x4b3   :  { %2649 = vmatpush.msrb.mxu1 %v1413_v25  ;;  %2686 = vmatpush.msrb.mxu3 %v1454_v10  ;;  %v1491_v25 = vld [vmem:[%s16393_s5 + $0xdf0] sm:$0xff]  ;;  %v1452_v10 = vld [vmem:[%s16393_s5 + $0xcb8] sm:$0xff] }
 0x4b4   :  { %2707 = vmatpush.msra.mxu0 %v1472_v44  ;;  %2650 = vmatmul.f32.vlgmr.msrb.gmra.mxu1 %v659_v28  ;;  %v1470_v44 = vld [vmem:[%s16393_s5 + $0xd48] sm:$0xff]  ;;  %v1433_v28 = vld [vmem:[%s16393_s5 + $0xc20] sm:$0xff] }
 0x4b5   :  { %2666 = vmatpush.msrb.mxu2 %v1435_v54  ;;  %2726 = vmatpush.msra.mxu1 %v1492_v13  ;;  %v1451_v54 = vld [vmem:[%s16393_s5 + $0xcb0] sm:$0xff]  ;;  %v657_v13 = vpop.permute.xlu2 %656 }
 0x4b6   :  { %7559 = vset.pattern.permute.xlu2 %v16584_v31  ;;  %7545 = vset.pattern.permute.xlu1 %v16528_v18 }
 0x4b7   :  { %2687 = vmatpush.msrb.mxu3 %v1453_v32  ;;  %2708 = vmatpush.msra.mxu0 %v1471_v27  ;;  %v1469_v32 = vld [vmem:[%s16393_s5 + $0xd40] sm:$0xff]  ;;  %v1432_v27 = vld [vmem:[%s16393_s5 + $0xc18] sm:$0xff] }
 0x4b8   :  { %1016 = vperm.xlu2 %7559, %v8399_v36   ;;  %1032 = vperm.xlu1 %7545, %v8157_v47  }
 0x4b9   :  { %2607 = vmatmul.f32.gmra.mxu3 %v640_v26  ;;  %2667 = vmatpush.msrb.mxu2 %v1434_v23  ;;  %v1489_v26 = vld [vmem:[%s16393_s5 + $0xde0] sm:$0xff]  ;;  %v1450_v23 = vld [vmem:[%s16393_s5 + $0xca8] sm:$0xff] }
 0x4ba   :  { %2727 = vmatpush.msra.mxu1 %v1491_v25  ;;  %2688 = vmatpush.msrb.mxu3 %v1452_v10  ;;  %v1468_v25 = vld [vmem:[%s16393_s5 + $0xd38] sm:$0xff]  ;;  %v660_v10 = vmul.f32 %v657_v13, %v8609_v6  ;;  %v1430_v13 = vld [vmem:[%s16393_s5 + $0xc08] sm:$0xff] }
 0x4bb   :  { %2709 = vmatpush.msra.mxu0 %v1470_v44  ;;  %2668 = vmatpush.msrb.mxu2 %v1433_v28  ;;  %v1431_v44 = vld [vmem:[%s16393_s5 + $0xc10] sm:$0xff]  ;;  %v1488_v28 = vld [vmem:[%s16393_s5 + $0xdd8] sm:$0xff] }
 0x4bc   :  { %2728 = vmatpush.msra.mxu1 %v1490_v0  ;;  %2689 = vmatpush.msrb.mxu3 %v1451_v54  ;;  %v1449_v0 = vld [vmem:[%s16393_s5 + $0xca0] sm:$0xff]  ;;  %v1467_v54 = vld [vmem:[%s16393_s5 + $0xd30] sm:$0xff] }
 0x4bd   :  { %2710 = vmatpush.msra.mxu0 %v1469_v32  ;;  %2669 = vmatpush.msrb.mxu2 %v1432_v27  ;;  %v1487_v32 = vld [vmem:[%s16393_s5 + $0xdd0] sm:$0xff]  ;;  %v16526_v27 = vmov 60   ;;  %v677_v18 = vpop.permute.xlu2 %676 }
 0x4be   :  { %2729 = vmatpush.msra.mxu1 %v1489_v26  ;;  %2690 = vmatpush.msrb.mxu3 %v1450_v23  ;;  %v16585_v26 = vmov 44   ;;  %v1448_v23 = vld [vmem:[%s16393_s5 + $0xc98] sm:$0xff] }
 0x4bf   :  { %2711 = vmatpush.msra.mxu0 %v1468_v25  ;;  %2653 = vmatmul.f32.gmra.mxu1 %v660_v10  ;;  %v1466_v25 = vld [vmem:[%s16393_s5 + $0xd28] sm:$0xff]  ;;  %v1429_v10 = vld [vmem:[%s16393_s5 + $0xc00] sm:$0xff] }
 0x4c0   :  { %2670 = vmatpush.msrb.mxu2 %v1431_v44  ;;  %2730 = vmatpush.msra.mxu1 %v1488_v28  ;;  %v1486_v44 = vld [vmem:[%s16393_s5 + $0xdc8] sm:$0xff]  ;;  %v667_v28 = vpop.permute.xlu1 %666 }
 0x4c1   :  { %2691 = vmatpush.msrb.mxu3 %v1449_v0  ;;  %2712 = vmatpush.msra.mxu0 %v1467_v54  ;;  %v1447_v0 = vld [vmem:[%s16393_s5 + $0xc90] sm:$0xff]  ;;  %v669_v54 = vmul.f32 %v8563_v11, %v8428_v41  ;;  %v1446_v11 = vld [vmem:[%s16393_s5 + $0xc88] sm:$0xff] }
 0x4c2   :  { %7560 = vset.pattern.permute.xlu2 %v16526_v27  ;;  %7547 = vset.pattern.permute.xlu1 %v16585_v26  ;;  %v1485_v27 = vld [vmem:[%s16393_s5 + $0xdc0] sm:$0xff] }
 0x4c3   :  { %2671 = vmatpush.msrb.mxu2 %v1430_v13  ;;  %2731 = vmatpush.msra.mxu1 %v1487_v32  ;;  %v1465_v13 = vld [vmem:[%s16393_s5 + $0xd20] sm:$0xff]  ;;  %v1508_v32 = vld [vmem:[%s16393_s5 + $0xe78] sm:$0xff] }
 0x4c4   :  { %1062 = vperm.xlu2 %7560, %v8157_v47   ;;  %906 = vperm.xlu1 %7547, %v8399_v36  }
 0x4c5   :  { %2692 = vmatpush.msrb.mxu3 %v1448_v23  ;;  %2713 = vmatpush.msra.mxu0 %v1466_v25  ;;  %v1464_v23 = vld [vmem:[%s16393_s5 + $0xd18] sm:$0xff]  ;;  %v1507_v25 = vld [vmem:[%s16393_s5 + $0xe70] sm:$0xff] }
 0x4c6   :  { %2672 = vmatpush.msrb.mxu2 %v1429_v10  ;;  %2732 = vmatpush.msra.mxu1 %v1486_v44  ;;  %v1484_v10 = vld [vmem:[%s16393_s5 + $0xdb8] sm:$0xff]  ;;  %v1445_v44 = vld [vmem:[%s16393_s5 + $0xc80] sm:$0xff] }
 0x4c7   :  { %2673 = vmatmul.f32.vlgmr.msrb.gmra.mxu2 %v669_v54  ;;  %2693 = vmatpush.msrb.mxu3 %v1447_v0  ;;  %v1463_v0 = vld [vmem:[%s16393_s5 + $0xd10] sm:$0xff]  ;;  %v1506_v54 = vld [vmem:[%s16393_s5 + $0xe68] sm:$0xff] }
 0x4c8   :  { %2714 = vmatpush.msra.mxu0 %v1465_v13  ;;  %2749 = vmatpush.msra.mxu2 %v1508_v32  ;;  %v1483_v13 = vld [vmem:[%s16393_s5 + $0xdb0] sm:$0xff]  ;;  %v679_v32 = vmul.f32 %v8544_v56, %v8428_v41  ;;  %v16532_v56 = vmov 59  }
 0x4c9   :  { %2733 = vmatpush.msra.mxu1 %v1485_v27  ;;  %2694 = vmatpush.msrb.mxu3 %v1446_v11  ;;  %v1524_v27 = vld [vmem:[%s16393_s5 + $0xef8] sm:$0xff]  ;;  %v1462_v11 = vld [vmem:[%s16393_s5 + $0xd08] sm:$0xff] }
 0x4ca   :  { %2715 = vmatpush.msra.mxu0 %v1464_v23  ;;  %2750 = vmatpush.msra.mxu2 %v1507_v25  ;;  %v1505_v23 = vld [vmem:[%s16393_s5 + $0xe60] sm:$0xff]  ;;  %v9701_v25 = vpop.permute.xlu1 %982 }
 0x4cb   :  { %2734 = vmatpush.msra.mxu1 %v1484_v10  ;;  %2695 = vmatpush.msrb.mxu3 %v1445_v44  ;;  %v1482_v10 = vld [vmem:[%s16393_s5 + $0xda8] sm:$0xff]  ;;  %v16586_v44 = vmov 46  }
 0x4cc   :  { %2716 = vmatpush.msra.mxu0 %v1463_v0  ;;  %2751 = vmatpush.msra.mxu2 %v1506_v54  ;;  %v1523_v0 = vld [vmem:[%s16393_s5 + $0xef0] sm:$0xff]  ;;  %v670_v54 = vmul.f32 %v667_v28, %v8609_v6  ;;  %v1522_v28 = vld [vmem:[%s16393_s5 + $0xee8] sm:$0xff] }
 0x4cd   :  { %2696 = vmatmul.f32.vlgmr.msrb.gmra.mxu3 %v679_v32  ;;  %2735 = vmatpush.msra.mxu1 %v1483_v13  ;;  %v1461_v13 = vld [vmem:[%s16393_s5 + $0xd00] sm:$0xff]  ;;  %v1504_v32 = vld [vmem:[%s16393_s5 + $0xe58] sm:$0xff] }
 0x4ce   :  { %2772 = vmatpush.msra.mxu3 %v1524_v27  ;;  %7566 = vset.pattern.permute.xlu2 %v16532_v56  ;;  %v1481_v27 = vld [vmem:[%s16393_s5 + $0xda0] sm:$0xff]  ;;  %v1530_v56 = vld [vmem:[%s16393_s5 + $0xf28] sm:$0xff] }
 0x4cf   :  { %7549 = vset.pattern.permute.xlu1 %v16586_v44  ;;  %2717 = vmatpush.msra.mxu0 %v1462_v11  ;;  %v689_v11 = vmul.f32 %v8508_v20, %v8428_v41  ;;  %v1480_v20 = vld [vmem:[%s16393_s5 + $0xd98] sm:$0xff] }
 0x4d0   :  { %2752 = vmatpush.msra.mxu2 %v1505_v23  ;;  %1056 = vperm.xlu2 %7566, %v8399_v36   ;;  %v1540_v23 = vld [vmem:[%s16393_s5 + $0xf78] sm:$0xff] }
 0x4d1   :  { %926 = vperm.xlu1 %7549, %v8399_v36   ;;  %2736 = vmatpush.msra.mxu1 %v1482_v10  ;;  %v1503_v10 = vld [vmem:[%s16393_s5 + $0xe50] sm:$0xff]  ;;  %v2044_v44 = vld [vmem:[%s16393_s5 + $0x1f38] sm:$0xff] }
 0x4d2   :  { %2773 = vmatpush.msra.mxu3 %v1523_v0  ;;  %2676 = vmatmul.f32.gmra.mxu2 %v670_v54  ;;  %v1521_v0 = vld [vmem:[%s16393_s5 + $0xee0] sm:$0xff]  ;;  %v1539_v54 = vld [vmem:[%s16393_s5 + $0xf70] sm:$0xff] }
 0x4d3   :  { %2718 = vmatpush.msra.mxu0 %v1461_v13  ;;  %2753 = vmatpush.msra.mxu2 %v1504_v32  ;;  %v1502_v13 = vld [vmem:[%s16393_s5 + $0xe48] sm:$0xff]  ;;  %v680_v32 = vmul.f32 %v677_v18, %v8609_v6  ;;  %v687_v18 = vpop.permute.xlu1 %686 }
 0x4d4   :  { %2719 = vmatmul.f32.vlgmr.msra.gmra.mxu0 %v689_v11  ;;  %2737 = vmatpush.msra.mxu1 %v1481_v27  ;;  %v1479_v27 = vld [vmem:[%s16393_s5 + $0xd90] sm:$0xff]  ;;  %v1520_v11 = vld [vmem:[%s16393_s5 + $0xed8] sm:$0xff] }
 0x4d5   :  { %2774 = vmatpush.msra.mxu3 %v1522_v28  ;;  %2795 = vmatpush.msrb.mxu0 %v1540_v23  ;;  %v1538_v28 = vld [vmem:[%s16393_s5 + $0xf68] sm:$0xff]  ;;  %v1501_v23 = vld [vmem:[%s16393_s5 + $0xe40] sm:$0xff] }
 0x4d6   :  { %2754 = vmatpush.msra.mxu2 %v1503_v10  ;;  %2738 = vmatpush.msra.mxu1 %v1480_v20  ;;  %v1478_v10 = vld [vmem:[%s16393_s5 + $0xd88] sm:$0xff]  ;;  %v1519_v20 = vld [vmem:[%s16393_s5 + $0xed0] sm:$0xff] }
 0x4d7   :  { %2775 = vmatpush.msra.mxu3 %v1521_v0  ;;  %2796 = vmatpush.msrb.mxu0 %v1539_v54  ;;  %v1537_v0 = vld [vmem:[%s16393_s5 + $0xf60] sm:$0xff]  ;;  %v16530_v54 = vmov 61  }
 0x4d8   :  { %2755 = vmatpush.msra.mxu2 %v1502_v13  ;;  %2699 = vmatmul.f32.gmra.mxu3 %v680_v32  ;;  %v16587_v13 = vmov 47   ;;  %v1500_v32 = vld [vmem:[%s16393_s5 + $0xe38] sm:$0xff] }
 0x4d9   :  { %2739 = vmatpush.msra.mxu1 %v1479_v27  ;;  %2776 = vmatpush.msra.mxu3 %v1520_v11  ;;  %v690_v27 = vmul.f32 %v687_v18, %v8609_v6  ;;  %v1477_v11 = vld [vmem:[%s16393_s5 + $0xd80] sm:$0xff]  ;;  %v1499_v18 = vld [vmem:[%s16393_s5 + $0xe30] sm:$0xff] }
 0x4da   :  { %2797 = vmatpush.msrb.mxu0 %v1538_v28  ;;  %2756 = vmatpush.msra.mxu2 %v1501_v23  ;;  %v1518_v28 = vld [vmem:[%s16393_s5 + $0xec8] sm:$0xff]  ;;  %v1536_v23 = vld [vmem:[%s16393_s5 + $0xf58] sm:$0xff] }
 0x4db   :  { %7569 = vset.pattern.permute.xlu2 %v16530_v54  ;;  %7550 = vset.pattern.permute.xlu1 %v16587_v13  ;;  %v1551_v54 = vld [vmem:[%s16393_s5 + $0xfd0] sm:$0xff] }
 0x4dc   :  { %2740 = vmatpush.msra.mxu1 %v1478_v10  ;;  %2777 = vmatpush.msra.mxu3 %v1519_v20  ;;  %v699_v10 = vmul.f32 %v8569_v1, %v8428_v41  ;;  %v1556_v20 = vld [vmem:[%s16393_s5 + $0xff8] sm:$0xff]  ;;  %v1498_v1 = vld [vmem:[%s16393_s5 + $0xe28] sm:$0xff] }
 0x4dd   :  { %2798 = vmatpush.msrb.mxu0 %v1537_v0  ;;  %1076 = vperm.xlu2 %7569, %v8399_v36   ;;  %v1517_v0 = vld [vmem:[%s16393_s5 + $0xec0] sm:$0xff] }
 0x4de   :  { %936 = vperm.xlu1 %7550, %v8399_v36   ;;  %2757 = vmatpush.msra.mxu2 %v1500_v32  ;;  %v1535_v32 = vld [vmem:[%s16393_s5 + $0xf50] sm:$0xff] }
 0x4df   :  { %2722 = vmatmul.f32.gmra.mxu0 %v690_v27  ;;  %2741 = vmatpush.msra.mxu1 %v1477_v11  ;;  %v1555_v27 = vld [vmem:[%s16393_s5 + $0xff0] sm:$0xff]  ;;  %v1516_v11 = vld [vmem:[%s16393_s5 + $0xeb8] sm:$0xff] }
 0x4e0   :  { %2778 = vmatpush.msra.mxu3 %v1518_v28  ;;  %2799 = vmatpush.msrb.mxu0 %v1536_v23  ;;  %v1534_v28 = vld [vmem:[%s16393_s5 + $0xf48] sm:$0xff]  ;;  %v1497_v23 = vld [vmem:[%s16393_s5 + $0xe20] sm:$0xff] }
 0x4e1   :  { %2742 = vmatmul.f32.vlgmr.msra.gmra.mxu1 %v699_v10  ;;  %2758 = vmatpush.msra.mxu2 %v1499_v18  ;;  %v1554_v18 = vld [vmem:[%s16393_s5 + $0xfe8] sm:$0xff]  ;;  %v1515_v10 = vld [vmem:[%s16393_s5 + $0xeb0] sm:$0xff] }
 0x4e2   :  { %2818 = vmatpush.msrb.mxu1 %v1556_v20  ;;  %2779 = vmatpush.msra.mxu3 %v1517_v0  ;;  %v1533_v20 = vld [vmem:[%s16393_s5 + $0xf40] sm:$0xff]  ;;  %v1496_v0 = vld [vmem:[%s16393_s5 + $0xe18] sm:$0xff] }
 0x4e3   :  { %2800 = vmatpush.msrb.mxu0 %v1535_v32  ;;  %2759 = vmatpush.msra.mxu2 %v1498_v1  ;;  %v697_v32 = vpop.permute.xlu0 %696  ;;  %v1553_v1 = vld [vmem:[%s16393_s5 + $0xfe0] sm:$0xff] }
 0x4e4   :  { %2819 = vmatpush.msrb.mxu1 %v1555_v27  ;;  %2780 = vmatpush.msra.mxu3 %v1516_v11  ;;  %v16588_v27 = vmov 62   ;;  %v1514_v11 = vld [vmem:[%s16393_s5 + $0xea8] sm:$0xff] }
 0x4e5   :  { %2801 = vmatpush.msrb.mxu0 %v1534_v28  ;;  %2760 = vmatpush.msra.mxu2 %v1497_v23  ;;  %v16589_v28 = vmov 51   ;;  %v1532_v23 = vld [vmem:[%s16393_s5 + $0xf38] sm:$0xff] }
 0x4e6   :  { %2820 = vmatpush.msrb.mxu1 %v1554_v18  ;;  %2781 = vmatpush.msra.mxu3 %v1515_v10  ;;  %v700_v18 = vmul.f32 %v697_v32, %v8609_v6  ;;  %v1495_v10 = vld [vmem:[%s16393_s5 + $0xe10] sm:$0xff] }
 0x4e7   :  { %2802 = vmatpush.msrb.mxu0 %v1533_v20  ;;  %7570 = vset.pattern.permute.xlu2 %v16588_v27  ;;  %v1552_v20 = vld [vmem:[%s16393_s5 + $0xfd8] sm:$0xff]  ;;  %v1531_v32 = vld [vmem:[%s16393_s5 + $0xf30] sm:$0xff]  ;;  %v1569_v27 = vld [vmem:[%s16393_s5 + $0x1060] sm:$0xff] }
 0x4e8   :  { %7554 = vset.pattern.permute.xlu1 %v16589_v28  ;;  %2761 = vmatpush.msra.mxu2 %v1496_v0  ;;  %v1513_v0 = vld [vmem:[%s16393_s5 + $0xea0] sm:$0xff] }
 0x4e9   :  { %2821 = vmatpush.msrb.mxu1 %v1553_v1  ;;  %1086 = vperm.xlu2 %7570, %v8399_v36   ;;  %v1494_v1 = vld [vmem:[%s16393_s5 + $0xe08] sm:$0xff]  ;;  %v2045_v28 = vld [vmem:[%s16393_s5 + $0x1f40] sm:$0xff] }
 0x4ea   :  { %976 = vperm.xlu1 %7554, %v8399_v36   ;;  %2782 = vmatpush.msra.mxu3 %v1514_v11  ;;  %v1512_v11 = vld [vmem:[%s16393_s5 + $0xe98] sm:$0xff] }
 0x4eb   :  { %2803 = vmatpush.msrb.mxu0 %v1532_v23  ;;  %2745 = vmatmul.f32.gmra.mxu1 %v700_v18  ;;  %v1493_v23 = vld [vmem:[%s16393_s5 + $0xe00] sm:$0xff]  ;;  %v1550_v18 = vld [vmem:[%s16393_s5 + $0xfc8] sm:$0xff] }
 0x4ec   :  { %2762 = vmatpush.msra.mxu2 %v1495_v10  ;;  %2822 = vmatpush.msrb.mxu1 %v1552_v20  ;;  %v1511_v10 = vld [vmem:[%s16393_s5 + $0xe90] sm:$0xff]  ;;  %v709_v20 = vmul.f32 %v8592_v15, %v8428_v41  ;;  %v1510_v15 = vld [vmem:[%s16393_s5 + $0xe88] sm:$0xff] }
 0x4ed   :  { %2783 = vmatpush.msra.mxu3 %v1513_v0  ;;  %2804 = vmatpush.msrb.mxu0 %v1531_v32  ;;  %v1529_v0 = vld [vmem:[%s16393_s5 + $0xf20] sm:$0xff]  ;;  %v1572_v32 = vld [vmem:[%s16393_s5 + $0x1078] sm:$0xff] }
 0x4ee   :  { %2763 = vmatpush.msra.mxu2 %v1494_v1  ;;  %2823 = vmatpush.msrb.mxu1 %v1551_v54  ;;  %v1549_v54 = vld [vmem:[%s16393_s5 + $0xfc0] sm:$0xff]  ;;  %v1571_v1 = vld [vmem:[%s16393_s5 + $0x1070] sm:$0xff] }
 0x4ef   :  { %2784 = vmatpush.msra.mxu3 %v1512_v11  ;;  %2805 = vmatpush.msrb.mxu0 %v1530_v56  ;;  %v1528_v56 = vld [vmem:[%s16393_s5 + $0xf18] sm:$0xff]  ;;  %v9893_v11 = vpop.permute.xlu2 %972 }
 0x4f0   :  { %2764 = vmatpush.msra.mxu2 %v1493_v23  ;;  %2824 = vmatpush.msrb.mxu1 %v1550_v18  ;;  %v16590_v23 = vmov 53   ;;  %v1548_v18 = vld [vmem:[%s16393_s5 + $0xfb8] sm:$0xff] }
 0x4f1   :  { %2765 = vmatmul.f32.vlgmr.msra.gmra.mxu2 %v709_v20  ;;  %2785 = vmatpush.msra.mxu3 %v1511_v10  ;;  %v1509_v10 = vld [vmem:[%s16393_s5 + $0xe80] sm:$0xff]  ;;  %v1527_v20 = vld [vmem:[%s16393_s5 + $0xf10] sm:$0xff] }
 0x4f2   :  { %2806 = vmatpush.msrb.mxu0 %v1529_v0  ;;  %2841 = vmatpush.msrb.mxu2 %v1572_v32  ;;  %v1570_v0 = vld [vmem:[%s16393_s5 + $0x1068] sm:$0xff]  ;;  %v1547_v32 = vld [vmem:[%s16393_s5 + $0xfb0] sm:$0xff] }
 0x4f3   :  { %2825 = vmatpush.msrb.mxu1 %v1549_v54  ;;  %7556 = vset.pattern.permute.xlu1 %v16590_v23  ;;  %v719_v54 = vmul.f32 %v8618_v17, %v8428_v41  ;;  %v1546_v17 = vld [vmem:[%s16393_s5 + $0xfa8] sm:$0xff]  ;;  %v2035_v23 = vld [vmem:[%s16393_s5 + $0x1ef0] sm:$0xff] }
 0x4f4   :  { %2786 = vmatpush.msra.mxu3 %v1510_v15  ;;  %2807 = vmatpush.msrb.mxu0 %v1528_v56  ;;  %v707_v15 = vpop.permute.xlu1 %706  ;;  %v1588_v56 = vld [vmem:[%s16393_s5 + $0x10f8] sm:$0xff] }
 0x4f5   :  { %2842 = vmatpush.msrb.mxu2 %v1571_v1  ;;  %996 = vperm.xlu1 %7556, %v8399_v36   ;;  %v1526_v1 = vld [vmem:[%s16393_s5 + $0xf08] sm:$0xff] }
 0x4f6   :  { %2826 = vmatpush.msrb.mxu1 %v1548_v18  ;;  %2787 = vmatpush.msra.mxu3 %v1509_v10  ;;  %v1587_v18 = vld [vmem:[%s16393_s5 + $0x10f0] sm:$0xff]  ;;  %v710_v10 = vmul.f32 %v707_v15, %v8609_v6  ;;  %v1586_v15 = vld [vmem:[%s16393_s5 + $0x10e8] sm:$0xff] }
 0x4f7   :  { %2808 = vmatpush.msrb.mxu0 %v1527_v20  ;;  %2843 = vmatpush.msrb.mxu2 %v1570_v0  ;;  %v1525_v20 = vld [vmem:[%s16393_s5 + $0xf00] sm:$0xff]  ;;  %v1568_v0 = vld [vmem:[%s16393_s5 + $0x1058] sm:$0xff] }
 0x4f8   :  { %2788 = vmatmul.f32.vlgmr.msra.gmra.mxu3 %v719_v54  ;;  %2827 = vmatpush.msrb.mxu1 %v1547_v32  ;;  %v1545_v32 = vld [vmem:[%s16393_s5 + $0xfa0] sm:$0xff]  ;;  %v729_v54 = vmul.f32 %v8590_v60, %v8428_v41  ;;  %v1544_v60 = vld [vmem:[%s16393_s5 + $0xf98] sm:$0xff] }
 0x4f9   :  { %2864 = vmatpush.msrb.mxu3 %v1588_v56  ;;  %2809 = vmatpush.msrb.mxu0 %v1526_v1  ;;  %v1604_v56 = vld [vmem:[%s16393_s5 + $0x1178] sm:$0xff]  ;;  %v717_v1 = vpop.permute.xlu2 %716 }
 0x4fa   :  { %2844 = vmatpush.msrb.mxu2 %v1569_v27  ;;  %2828 = vmatpush.msrb.mxu1 %v1546_v17  ;;  %v1567_v27 = vld [vmem:[%s16393_s5 + $0x1050] sm:$0xff]  ;;  %v1585_v17 = vld [vmem:[%s16393_s5 + $0x10e0] sm:$0xff] }
 0x4fb   :  { %2865 = vmatpush.msrb.mxu3 %v1587_v18  ;;  %2768 = vmatmul.f32.gmra.mxu2 %v710_v10  ;;  %v1603_v18 = vld [vmem:[%s16393_s5 + $0x1170] sm:$0xff]  ;;  %v16591_v10 = vmov 59  }
 0x4fc   :  { %2810 = vmatpush.msrb.mxu0 %v1525_v20  ;;  %2845 = vmatpush.msrb.mxu2 %v1568_v0  ;;  %v1566_v20 = vld [vmem:[%s16393_s5 + $0x1048] sm:$0xff]  ;;  %v720_v0 = vmul.f32 %v717_v1, %v8609_v6 }
 0x4fd   :  { %2811 = vmatmul.f32.vlgmr.msrb.gmra.mxu0 %v729_v54  ;;  %2829 = vmatpush.msrb.mxu1 %v1545_v32  ;;  %v1543_v32 = vld [vmem:[%s16393_s5 + $0xf90] sm:$0xff]  ;;  %v1584_v54 = vld [vmem:[%s16393_s5 + $0x10d8] sm:$0xff]  ;;  %v1542_v1 = vld [vmem:[%s16393_s5 + $0xf88] sm:$0xff] }
 0x4fe   :  { %2866 = vmatpush.msrb.mxu3 %v1586_v15  ;;  %2887 = vmatpush.msra.mxu0 %v1604_v56  ;;  %v1602_v15 = vld [vmem:[%s16393_s5 + $0x1168] sm:$0xff]  ;;  %v1565_v56 = vld [vmem:[%s16393_s5 + $0x1040] sm:$0xff] }
 0x4ff   :  { %2846 = vmatpush.msrb.mxu2 %v1567_v27  ;;  %7557 = vset.pattern.permute.xlu1 %v16591_v10  ;;  %v727_v27 = vpop.permute.xlu1 %726 }
 0x500   :  { %2830 = vmatpush.msrb.mxu1 %v1544_v60  ;;  %2867 = vmatpush.msrb.mxu3 %v1585_v17  ;;  %v1583_v60 = vld [vmem:[%s16393_s5 + $0x10d0] sm:$0xff]  ;;  %v1601_v17 = vld [vmem:[%s16393_s5 + $0x1160] sm:$0xff] }
 0x501   :  { %2888 = vmatpush.msra.mxu0 %v1603_v18  ;;  %1052 = vperm.xlu1 %7557, %v8157_v47   ;;  %v1564_v18 = vld [vmem:[%s16393_s5 + $0x1038] sm:$0xff] }
 0x502   :  { %2847 = vmatpush.msrb.mxu2 %v1566_v20  ;;  %2791 = vmatmul.f32.gmra.mxu3 %v720_v0  ;;  %v1541_v20 = vld [vmem:[%s16393_s5 + $0xf80] sm:$0xff]  ;;  %v730_v0 = vmul.f32 %v727_v27, %v8609_v6  ;;  %v1620_v27 = vld [vmem:[%s16393_s5 + $0x11f8] sm:$0xff] }
 0x503   :  { %2831 = vmatpush.msrb.mxu1 %v1543_v32  ;;  %2868 = vmatpush.msrb.mxu3 %v1584_v54  ;;  %v1582_v32 = vld [vmem:[%s16393_s5 + $0x10c8] sm:$0xff]  ;;  %v1600_v54 = vld [vmem:[%s16393_s5 + $0x1158] sm:$0xff] }
 0x504   :  { %2889 = vmatpush.msra.mxu0 %v1602_v15  ;;  %2848 = vmatpush.msrb.mxu2 %v1565_v56  ;;  %v1563_v15 = vld [vmem:[%s16393_s5 + $0x1030] sm:$0xff]  ;;  %v739_v56 = vmul.f32 %v8652_v19, %v8428_v41  ;;  %v1562_v19 = vld [vmem:[%s16393_s5 + $0x1028] sm:$0xff] }
 0x505   :  { %2832 = vmatpush.msrb.mxu1 %v1542_v1  ;;  %2869 = vmatpush.msrb.mxu3 %v1583_v60  ;;  %v1581_v1 = vld [vmem:[%s16393_s5 + $0x10c0] sm:$0xff]  ;;  %v1599_v60 = vld [vmem:[%s16393_s5 + $0x1150] sm:$0xff] }
 0x506   :  { %2890 = vmatpush.msra.mxu0 %v1601_v17  ;;  %2849 = vmatpush.msrb.mxu2 %v1564_v18  ;;  %v1619_v17 = vld [vmem:[%s16393_s5 + $0x11f0] sm:$0xff]  ;;  %v1580_v18 = vld [vmem:[%s16393_s5 + $0x10b8] sm:$0xff] }
 0x507   :  { %2814 = vmatmul.f32.gmra.mxu0 %v730_v0  ;;  %2833 = vmatpush.msrb.mxu1 %v1541_v20  ;;  %v16592_v20 = vmov 57   ;;  %v1598_v0 = vld [vmem:[%s16393_s5 + $0x1148] sm:$0xff] }
 0x508   :  { %2870 = vmatpush.msrb.mxu3 %v1582_v32  ;;  %2891 = vmatpush.msra.mxu0 %v1600_v54  ;;  %v1561_v32 = vld [vmem:[%s16393_s5 + $0x1020] sm:$0xff]  ;;  %v1618_v54 = vld [vmem:[%s16393_s5 + $0x11e8] sm:$0xff] }
 0x509   :  { %2834 = vmatmul.f32.vlgmr.msrb.gmra.mxu1 %v739_v56  ;;  %2850 = vmatpush.msrb.mxu2 %v1563_v15  ;;  %v1579_v15 = vld [vmem:[%s16393_s5 + $0x10b0] sm:$0xff]  ;;  %v737_v56 = vpop.permute.xlu1 %736 }
 0x50a   :  { %2910 = vmatpush.msra.mxu1 %v1620_v27  ;;  %2871 = vmatpush.msrb.mxu3 %v1581_v1  ;;  %v1597_v27 = vld [vmem:[%s16393_s5 + $0x1140] sm:$0xff]  ;;  %v1560_v1 = vld [vmem:[%s16393_s5 + $0x1018] sm:$0xff] }
 0x50b   :  { %2892 = vmatpush.msra.mxu0 %v1599_v60  ;;  %7562 = vset.pattern.permute.xlu1 %v16592_v20  ;;  %v1617_v60 = vld [vmem:[%s16393_s5 + $0x11e0] sm:$0xff]  ;;  %v747_v20 = vpop.permute.xlu2 %746 }
 0x50c   :  { %2851 = vmatpush.msrb.mxu2 %v1562_v19  ;;  %2911 = vmatpush.msra.mxu1 %v1619_v17  ;;  %v1578_v19 = vld [vmem:[%s16393_s5 + $0x10a8] sm:$0xff]  ;;  %v1596_v17 = vld [vmem:[%s16393_s5 + $0x1138] sm:$0xff] }
 0x50d   :  { %1036 = vperm.xlu1 %7562, %v8399_v36   ;;  %2872 = vmatpush.msrb.mxu3 %v1580_v18  ;;  %v740_v18 = vmul.f32 %v737_v56, %v8609_v6  ;;  %v1558_v56 = vld [vmem:[%s16393_s5 + $0x1008] sm:$0xff] }
 0x50e   :  { %2893 = vmatpush.msra.mxu0 %v1598_v0  ;;  %2852 = vmatpush.msrb.mxu2 %v1561_v32  ;;  %v1559_v0 = vld [vmem:[%s16393_s5 + $0x1010] sm:$0xff]  ;;  %v1616_v32 = vld [vmem:[%s16393_s5 + $0x11d8] sm:$0xff] }
 0x50f   :  { %2912 = vmatpush.msra.mxu1 %v1618_v54  ;;  %2873 = vmatpush.msrb.mxu3 %v1579_v15  ;;  %v1577_v54 = vld [vmem:[%s16393_s5 + $0x10a0] sm:$0xff]  ;;  %v1595_v15 = vld [vmem:[%s16393_s5 + $0x1130] sm:$0xff] }
 0x510   :  { %2894 = vmatpush.msra.mxu0 %v1597_v27  ;;  %2853 = vmatpush.msrb.mxu2 %v1560_v1  ;;  %v1615_v27 = vld [vmem:[%s16393_s5 + $0x11d0] sm:$0xff]  ;;  %v1576_v1 = vld [vmem:[%s16393_s5 + $0x1098] sm:$0xff] }
 0x511   :  { %2913 = vmatpush.msra.mxu1 %v1617_v60  ;;  %2874 = vmatpush.msrb.mxu3 %v1578_v19  ;;  %v1594_v60 = vld [vmem:[%s16393_s5 + $0x1128] sm:$0xff]  ;;  %v1557_v19 = vld [vmem:[%s16393_s5 + $0x1000] sm:$0xff] }
 0x512   :  { %2895 = vmatpush.msra.mxu0 %v1596_v17  ;;  %2837 = vmatmul.f32.gmra.mxu1 %v740_v18  ;;  %v1614_v17 = vld [vmem:[%s16393_s5 + $0x11c8] sm:$0xff]  ;;  %v16593_v18 = vmov 61  }
 0x513   :  { %2854 = vmatpush.msrb.mxu2 %v1559_v0  ;;  %2914 = vmatpush.msra.mxu1 %v1616_v32  ;;  %v1575_v0 = vld [vmem:[%s16393_s5 + $0x1090] sm:$0xff]  ;;  %v749_v32 = vmul.f32 %v8523_v51, %v8428_v41  ;;  %v1574_v51 = vld [vmem:[%s16393_s5 + $0x1088] sm:$0xff] }
 0x514   :  { %2875 = vmatpush.msrb.mxu3 %v1577_v54  ;;  %2896 = vmatpush.msra.mxu0 %v1595_v15  ;;  %v1593_v54 = vld [vmem:[%s16393_s5 + $0x1120] sm:$0xff]  ;;  %v1636_v15 = vld [vmem:[%s16393_s5 + $0x1278] sm:$0xff] }
 0x515   :  { %2855 = vmatpush.msrb.mxu2 %v1558_v56  ;;  %2915 = vmatpush.msra.mxu1 %v1615_v27  ;;  %v1613_v56 = vld [vmem:[%s16393_s5 + $0x11c0] sm:$0xff]  ;;  %v1592_v27 = vld [vmem:[%s16393_s5 + $0x1118] sm:$0xff] }
 0x516   :  { %7563 = vset.pattern.permute.xlu1 %v16593_v18  ;;  %2876 = vmatpush.msrb.mxu3 %v1576_v1  ;;  %v1635_v1 = vld [vmem:[%s16393_s5 + $0x1270] sm:$0xff]  ;;  %v2032_v18 = vld [vmem:[%s16393_s5 + $0x1ed8] sm:$0xff] }
 0x517   :  { %2897 = vmatpush.msra.mxu0 %v1594_v60  ;;  %1072 = vperm.xlu1 %7563, %v8157_v47   ;;  %v10107_v60 = vpop.permute.xlu0 %992 }
 0x518   :  { %2856 = vmatpush.msrb.mxu2 %v1557_v19  ;;  %2916 = vmatpush.msra.mxu1 %v1614_v17  ;;  %v1612_v19 = vld [vmem:[%s16393_s5 + $0x11b8] sm:$0xff]  ;;  %v1573_v17 = vld [vmem:[%s16393_s5 + $0x1080] sm:$0xff] }
 0x519   :  { %2857 = vmatmul.f32.vlgmr.msrb.gmra.mxu2 %v749_v32  ;;  %2877 = vmatpush.msrb.mxu3 %v1575_v0  ;;  %v1591_v0 = vld [vmem:[%s16393_s5 + $0x1110] sm:$0xff]  ;;  %v1634_v32 = vld [vmem:[%s16393_s5 + $0x1268] sm:$0xff] }
 0x51a   :  { %2898 = vmatpush.msra.mxu0 %v1593_v54  ;;  %2933 = vmatpush.msra.mxu2 %v1636_v15  ;;  %v1611_v54 = vld [vmem:[%s16393_s5 + $0x11b0] sm:$0xff]  ;;  %v759_v15 = vmul.f32 %v8692_v49, %v8428_v41  ;;  %v1610_v49 = vld [vmem:[%s16393_s5 + $0x11a8] sm:$0xff] }
 0x51b   :  { %2917 = vmatpush.msra.mxu1 %v1613_v56  ;;  %2878 = vmatpush.msrb.mxu3 %v1574_v51  ;;  %v1652_v56 = vld [vmem:[%s16393_s5 + $0x12f8] sm:$0xff]  ;;  %v1590_v51 = vld [vmem:[%s16393_s5 + $0x1108] sm:$0xff] }
 0x51c   :  { %2899 = vmatpush.msra.mxu0 %v1592_v27  ;;  %2934 = vmatpush.msra.mxu2 %v1635_v1  ;;  %v1633_v27 = vld [vmem:[%s16393_s5 + $0x1260] sm:$0xff]  ;;  %v1651_v1 = vld [vmem:[%s16393_s5 + $0x12f0] sm:$0xff] }
 0x51d   :  { %2918 = vmatpush.msra.mxu1 %v1612_v19  ;;  %2879 = vmatpush.msrb.mxu3 %v1573_v17  ;;  %v16594_v19 = vmov 60   ;;  %v750_v17 = vmul.f32 %v747_v20, %v8609_v6  ;;  %v1650_v20 = vld [vmem:[%s16393_s5 + $0x12e8] sm:$0xff] }
 0x51e   :  { %2900 = vmatpush.msra.mxu0 %v1591_v0  ;;  %2935 = vmatpush.msra.mxu2 %v1634_v32  ;;  %v1589_v0 = vld [vmem:[%s16393_s5 + $0x1100] sm:$0xff]  ;;  %v1632_v32 = vld [vmem:[%s16393_s5 + $0x1258] sm:$0xff] }
 0x51f   :  { %2880 = vmatmul.f32.vlgmr.msrb.gmra.mxu3 %v759_v15  ;;  %2919 = vmatpush.msra.mxu1 %v1611_v54  ;;  %v1609_v54 = vld [vmem:[%s16393_s5 + $0x11a0] sm:$0xff]  ;;  %v769_v15 = vmul.f32 %v8613_v34, %v8428_v41  ;;  %v1608_v34 = vld [vmem:[%s16393_s5 + $0x1198] sm:$0xff] }
 0x520   :  { %2956 = vmatpush.msra.mxu3 %v1652_v56  ;;  %2901 = vmatpush.msra.mxu0 %v1590_v51  ;;  %v1668_v56 = vld [vmem:[%s16393_s5 + $0x1378] sm:$0xff]  ;;  %v757_v51 = vpop.permute.xlu0 %756 }
 0x521   :  { %2936 = vmatpush.msra.mxu2 %v1633_v27  ;;  %7567 = vset.pattern.permute.xlu1 %v16594_v19  ;;  %v1631_v27 = vld [vmem:[%s16393_s5 + $0x1250] sm:$0xff] }
 0x522   :  { %2920 = vmatpush.msra.mxu1 %v1610_v49  ;;  %2957 = vmatpush.msra.mxu3 %v1651_v1  ;;  %v1649_v49 = vld [vmem:[%s16393_s5 + $0x12e0] sm:$0xff]  ;;  %v1667_v1 = vld [vmem:[%s16393_s5 + $0x1370] sm:$0xff] }
 0x523   :  { %1066 = vperm.xlu1 %7567, %v8399_v36   ;;  %2860 = vmatmul.f32.gmra.mxu2 %v750_v17  ;;  %v1630_v17 = vld [vmem:[%s16393_s5 + $0x1248] sm:$0xff]  ;;  %v1995_v19 = vld [vmem:[%s16393_s5 + $0x1db0] sm:$0xff] }
 0x524   :  { %2902 = vmatpush.msra.mxu0 %v1589_v0  ;;  %2937 = vmatpush.msra.mxu2 %v1632_v32  ;;  %v760_v0 = vmul.f32 %v757_v51, %v8609_v6  ;;  %v1607_v32 = vld [vmem:[%s16393_s5 + $0x1190] sm:$0xff] }
 0x525   :  { %2903 = vmatmul.f32.vlgmr.msra.gmra.mxu0 %v769_v15  ;;  %2921 = vmatpush.msra.mxu1 %v1609_v54  ;;  %v1648_v54 = vld [vmem:[%s16393_s5 + $0x12d8] sm:$0xff]  ;;  %v1666_v15 = vld [vmem:[%s16393_s5 + $0x1368] sm:$0xff]  ;;  %v1647_v51 = vld [vmem:[%s16393_s5 + $0x12d0] sm:$0xff] }
 0x526   :  { %2958 = vmatpush.msra.mxu3 %v1650_v20  ;;  %2979 = vmatpush.msrb.mxu0 %v1668_v56  ;;  %v1629_v20 = vld [vmem:[%s16393_s5 + $0x1240] sm:$0xff]  ;;  %v1606_v56 = vld [vmem:[%s16393_s5 + $0x1188] sm:$0xff] }
 0x527   :  { %2938 = vmatpush.msra.mxu2 %v1631_v27  ;;  %2922 = vmatpush.msra.mxu1 %v1608_v34  ;;  %v767_v27 = vpop.permute.xlu2 %766  ;;  %v1665_v34 = vld [vmem:[%s16393_s5 + $0x1360] sm:$0xff] }
 0x528   :  { %2959 = vmatpush.msra.mxu3 %v1649_v49  ;;  %2980 = vmatpush.msrb.mxu0 %v1667_v1  ;;  %v1628_v49 = vld [vmem:[%s16393_s5 + $0x1238] sm:$0xff]  ;;  %v1605_v1 = vld [vmem:[%s16393_s5 + $0x1180] sm:$0xff] }
 0x529   :  { %2939 = vmatpush.msra.mxu2 %v1630_v17  ;;  %2883 = vmatmul.f32.gmra.mxu3 %v760_v0  ;;  %v16534_v17 = vmov 63   ;;  %v770_v0 = vmul.f32 %v767_v27, %v8609_v6  ;;  %v1683_v27 = vld [vmem:[%s16393_s5 + $0x13f0] sm:$0xff] }
 0x52a   :  { %2923 = vmatpush.msra.mxu1 %v1607_v32  ;;  %2960 = vmatpush.msra.mxu3 %v1648_v54  ;;  %v1646_v32 = vld [vmem:[%s16393_s5 + $0x12c8] sm:$0xff]  ;;  %v1664_v54 = vld [vmem:[%s16393_s5 + $0x1358] sm:$0xff] }
 0x52b   :  { %2981 = vmatpush.msrb.mxu0 %v1666_v15  ;;  %2940 = vmatpush.msra.mxu2 %v1629_v20  ;;  %v1627_v15 = vld [vmem:[%s16393_s5 + $0x1230] sm:$0xff]  ;;  %v779_v20 = vmul.f32 %v8735_v61, %v8428_v41  ;;  %v1626_v61 = vld [vmem:[%s16393_s5 + $0x1228] sm:$0xff] }
 0x52c   :  { %2924 = vmatpush.msra.mxu1 %v1606_v56  ;;  %2961 = vmatpush.msra.mxu3 %v1647_v51  ;;  %v1684_v56 = vld [vmem:[%s16393_s5 + $0x13f8] sm:$0xff]  ;;  %v1645_v51 = vld [vmem:[%s16393_s5 + $0x12c0] sm:$0xff] }
 0x52d   :  { %2982 = vmatpush.msrb.mxu0 %v1665_v34  ;;  %7568 = vset.pattern.permute.xlu1 %v16534_v17  ;;  %v1644_v34 = vld [vmem:[%s16393_s5 + $0x12b8] sm:$0xff] }
 0x52e   :  { %2941 = vmatpush.msra.mxu2 %v1628_v49  ;;  %1092 = vperm.xlu1 %7568, %v8157_v47   ;;  %v1663_v47 = vld [vmem:[%s16393_s5 + $0x1350] sm:$0xff]  ;;  %v1662_v49 = vld [vmem:[%s16393_s5 + $0x1348] sm:$0xff]  ;;  %v1960_v17 = vld [vmem:[%s16393_s5 + $0x1c98] sm:$0xff] }
 0x52f   :  { %2906 = vmatmul.f32.gmra.mxu0 %v770_v0  ;;  %2925 = vmatpush.msra.mxu1 %v1605_v1  ;;  %v1625_v1 = vld [vmem:[%s16393_s5 + $0x1220] sm:$0xff]  ;;  %v1682_v0 = vld [vmem:[%s16393_s5 + $0x13e8] sm:$0xff] }
 0x530   :  { %2962 = vmatpush.msra.mxu3 %v1646_v32  ;;  %2983 = vmatpush.msrb.mxu0 %v1664_v54  ;;  %v1643_v32 = vld [vmem:[%s16393_s5 + $0x12b0] sm:$0xff]  ;;  %v1661_v54 = vld [vmem:[%s16393_s5 + $0x1340] sm:$0xff] }
 0x531   :  { %2926 = vmatmul.f32.vlgmr.msra.gmra.mxu1 %v779_v20  ;;  %2942 = vmatpush.msra.mxu2 %v1627_v15  ;;  %v1624_v15 = vld [vmem:[%s16393_s5 + $0x1218] sm:$0xff]  ;;  %v777_v20 = vpop.permute.xlu1 %776 }
 0x532   :  { %3002 = vmatpush.msrb.mxu1 %v1684_v56  ;;  %2963 = vmatpush.msra.mxu3 %v1645_v51  ;;  %v1681_v56 = vld [vmem:[%s16393_s5 + $0x13e0] sm:$0xff]  ;;  %v1642_v51 = vld [vmem:[%s16393_s5 + $0x12a8] sm:$0xff] }
 0x533   :  { %2984 = vmatpush.msrb.mxu0 %v1663_v47  ;;  %2943 = vmatpush.msra.mxu2 %v1626_v61  ;;  %v1660_v47 = vld [vmem:[%s16393_s5 + $0x1338] sm:$0xff]  ;;  %v1623_v61 = vld [vmem:[%s16393_s5 + $0x1210] sm:$0xff] }
 0x534   :  { %3003 = vmatpush.msrb.mxu1 %v1683_v27  ;;  %2964 = vmatpush.msra.mxu3 %v1644_v34  ;;  %v780_v27 = vmul.f32 %v777_v20, %v8609_v6  ;;  %v1680_v34 = vld [vmem:[%s16393_s5 + $0x13d8] sm:$0xff]  ;;  %v1678_v20 = vld [vmem:[%s16393_s5 + $0x13c8] sm:$0xff] }
 0x535   :  { %2985 = vmatpush.msrb.mxu0 %v1662_v49  ;;  %2944 = vmatpush.msra.mxu2 %v1625_v1  ;;  %v1641_v49 = vld [vmem:[%s16393_s5 + $0x12a0] sm:$0xff]  ;;  %v1659_v1 = vld [vmem:[%s16393_s5 + $0x1330] sm:$0xff] }
 0x536   :  { %3004 = vmatpush.msrb.mxu1 %v1682_v0  ;;  %2965 = vmatpush.msra.mxu3 %v1643_v32  ;;  %v1679_v0 = vld [vmem:[%s16393_s5 + $0x13d0] sm:$0xff]  ;;  %v1640_v32 = vld [vmem:[%s16393_s5 + $0x1298] sm:$0xff] }
 0x537   :  { %2986 = vmatpush.msrb.mxu0 %v1661_v54  ;;  %2945 = vmatpush.msra.mxu2 %v1624_v15  ;;  %v1658_v54 = vld [vmem:[%s16393_s5 + $0x1328] sm:$0xff]  ;;  %v1621_v15 = vld [vmem:[%s16393_s5 + $0x1200] sm:$0xff] }
 0x538   :  { %3005 = vmatpush.msrb.mxu1 %v1681_v56  ;;  %1096 = vperm.xlu1 %7568, %v8399_v36   ;;  %v1622_v36 = vld [vmem:[%s16393_s5 + $0x1208] sm:$0xff]  ;;  %v789_v56 = vmul.f32 %v8643_v53, %v8428_v41  ;;  %v1677_v53 = vld [vmem:[%s16393_s5 + $0x13c0] sm:$0xff] }
 0x539   :  { %2966 = vmatpush.msra.mxu3 %v1642_v51  ;;  %2987 = vmatpush.msrb.mxu0 %v1660_v47  ;;  %v1639_v51 = vld [vmem:[%s16393_s5 + $0x1290] sm:$0xff]  ;;  %v1657_v47 = vld [vmem:[%s16393_s5 + $0x1320] sm:$0xff] }
 0x53a   :  { %2929 = vmatmul.f32.gmra.mxu1 %v780_v27  ;;  %2946 = vmatpush.msra.mxu2 %v1623_v61  ;;  %v1700_v61 = vld [vmem:[%s16393_s5 + $0x1478] sm:$0xff]  ;;  %v1638_v27 = vld [vmem:[%s16393_s5 + $0x1288] sm:$0xff] }
 0x53b   :  { %3006 = vmatpush.msrb.mxu1 %v1680_v34  ;;  %2967 = vmatpush.msra.mxu3 %v1641_v49  ;;  %v1656_v34 = vld [vmem:[%s16393_s5 + $0x1318] sm:$0xff]  ;;  %v1699_v49 = vld [vmem:[%s16393_s5 + $0x1470] sm:$0xff] }
 0x53c   :  { %2988 = vmatpush.msrb.mxu0 %v1659_v1  ;;  %2947 = vmatpush.msra.mxu2 %v1622_v36  ;;  %v1676_v1 = vld [vmem:[%s16393_s5 + $0x13b8] sm:$0xff]  ;;  %v1637_v36 = vld [vmem:[%s16393_s5 + $0x1280] sm:$0xff] }
 0x53d   :  { %3007 = vmatpush.msrb.mxu1 %v1679_v0  ;;  %2968 = vmatpush.msra.mxu3 %v1640_v32  ;;  %v1655_v0 = vld [vmem:[%s16393_s5 + $0x1310] sm:$0xff]  ;;  %v1698_v32 = vld [vmem:[%s16393_s5 + $0x1468] sm:$0xff] }
 0x53e   :  { %2989 = vmatpush.msrb.mxu0 %v1658_v54  ;;  %2948 = vmatpush.msra.mxu2 %v1621_v15  ;;  %v799_v54 = vmul.f32 %v8550_v22, %v8428_v41  ;;  %v1675_v15 = vld [vmem:[%s16393_s5 + $0x13b0] sm:$0xff]  ;;  %v1697_v22 = vld [vmem:[%s16393_s5 + $0x1460] sm:$0xff] }
 0x53f   :  { %3008 = vmatpush.msrb.mxu1 %v1678_v20  ;;  %2949 = vmatmul.f32.vlgmr.msra.gmra.mxu2 %v789_v56  ;;  %v1716_v20 = vld [vmem:[%s16393_s5 + $0x14f8] sm:$0xff]  ;;  %v787_v56 = vpop.permute.xlu2 %786 }
 0x540   :  { %2969 = vmatpush.msra.mxu3 %v1639_v51  ;;  %2990 = vmatpush.msrb.mxu0 %v1657_v47  ;;  %v1654_v51 = vld [vmem:[%s16393_s5 + $0x1308] sm:$0xff] }
 0x541   :  { %3025 = vmatpush.msrb.mxu2 %v1700_v61  ;;  %3009 = vmatpush.msrb.mxu1 %v1677_v53  ;;  %v1674_v47 = vld [vmem:[%s16393_s5 + $0x13a8] sm:$0xff]  ;;  %v1715_v61 = vld [vmem:[%s16393_s5 + $0x14f0] sm:$0xff]  ;;  %v1653_v53 = vld [vmem:[%s16393_s5 + $0x1300] sm:$0xff] }
 0x542   :  { %2970 = vmatpush.msra.mxu3 %v1638_v27  ;;  %2991 = vmatpush.msrb.mxu0 %v1656_v34  ;;  %v790_v27 = vmul.f32 %v787_v56, %v8609_v6  ;;  %v1696_v34 = vld [vmem:[%s16393_s5 + $0x1458] sm:$0xff]  ;;  %v1694_v56 = vld [vmem:[%s16393_s5 + $0x1448] sm:$0xff] }
 0x543   :  { %3026 = vmatpush.msrb.mxu2 %v1699_v49  ;;  %3010 = vmatpush.msrb.mxu1 %v1676_v1  ;;  %v809_v49 = vmul.f32 %v8794_v57, %v8428_v41  ;;  %v1673_v1 = vld [vmem:[%s16393_s5 + $0x13a0] sm:$0xff]  ;;  %v1695_v57 = vld [vmem:[%s16393_s5 + $0x1450] sm:$0xff] }
 0x544   :  { %2971 = vmatpush.msra.mxu3 %v1637_v36  ;;  %2992 = vmatpush.msrb.mxu0 %v1655_v0  ;;  %v1714_v36 = vld [vmem:[%s16393_s5 + $0x14e8] sm:$0xff]  ;;  %v1732_v0 = vld [vmem:[%s16393_s5 + $0x1578] sm:$0xff] }
 0x545   :  { %3027 = vmatpush.msrb.mxu2 %v1698_v32  ;;  %2972 = vmatmul.f32.vlgmr.msra.gmra.mxu3 %v799_v54  ;;  %v797_v32 = vpop.permute.xlu1 %796  ;;  %v1672_v54 = vld [vmem:[%s16393_s5 + $0x1398] sm:$0xff] }
 0x546   :  { %3011 = vmatpush.msrb.mxu1 %v1675_v15  ;;  %3048 = vmatpush.msrb.mxu3 %v1716_v20  ;;  %v1713_v15 = vld [vmem:[%s16393_s5 + $0x14e0] sm:$0xff]  ;;  %v1731_v20 = vld [vmem:[%s16393_s5 + $0x1570] sm:$0xff] }
 0x547   :  { %2993 = vmatpush.msrb.mxu0 %v1654_v51  ;;  %3028 = vmatpush.msrb.mxu2 %v1697_v22  ;;  %v1671_v51 = vld [vmem:[%s16393_s5 + $0x1390] sm:$0xff]  ;;  %v800_v22 = vmul.f32 %v797_v32, %v8609_v6  ;;  %v1710_v32 = vld [vmem:[%s16393_s5 + $0x14c8] sm:$0xff] }
 0x548   :  { %3012 = vmatpush.msrb.mxu1 %v1674_v47  ;;  %3049 = vmatpush.msrb.mxu3 %v1715_v61  ;;  %v1712_v47 = vld [vmem:[%s16393_s5 + $0x14d8] sm:$0xff]  ;;  %v1730_v61 = vld [vmem:[%s16393_s5 + $0x1568] sm:$0xff] }
 0x549   :  { %2952 = vmatmul.f32.gmra.mxu2 %v790_v27  ;;  %2994 = vmatpush.msrb.mxu0 %v1653_v53  ;;  %v807_v53 = vpop.permute.xlu2 %806  ;;  %v1693_v27 = vld [vmem:[%s16393_s5 + $0x1440] sm:$0xff] }
 0x54a   :  { %3029 = vmatpush.msrb.mxu2 %v1696_v34  ;;  %2995 = vmatmul.f32.vlgmr.msrb.gmra.mxu0 %v809_v49  ;;  %v1670_v34 = vld [vmem:[%s16393_s5 + $0x1388] sm:$0xff]  ;;  %v1711_v49 = vld [vmem:[%s16393_s5 + $0x14d0] sm:$0xff] }
 0x54b   :  { %3013 = vmatpush.msrb.mxu1 %v1673_v1  ;;  %3050 = vmatpush.msrb.mxu3 %v1714_v36  ;;  %v1729_v1 = vld [vmem:[%s16393_s5 + $0x1560] sm:$0xff]  ;;  %v1692_v36 = vld [vmem:[%s16393_s5 + $0x1438] sm:$0xff] }
 0x54c   :  { %3071 = vmatpush.msra.mxu0 %v1732_v0  ;;  %3030 = vmatpush.msrb.mxu2 %v1695_v57  ;;  %v810_v0 = vmul.f32 %v807_v53, %v8609_v6  ;;  %v1669_v57 = vld [vmem:[%s16393_s5 + $0x1380] sm:$0xff]  ;;  %v1726_v53 = vld [vmem:[%s16393_s5 + $0x1548] sm:$0xff] }
 0x54d   :  { %3014 = vmatpush.msrb.mxu1 %v1672_v54  ;;  %3051 = vmatpush.msrb.mxu3 %v1713_v15  ;;  %v1728_v54 = vld [vmem:[%s16393_s5 + $0x1558] sm:$0xff]  ;;  %v819_v15 = vmul.f32 %v8571_v33, %v8428_v41  ;;  %v1727_v33 = vld [vmem:[%s16393_s5 + $0x1550] sm:$0xff] }
 0x54e   :  { %3072 = vmatpush.msra.mxu0 %v1731_v20  ;;  %3031 = vmatpush.msrb.mxu2 %v1694_v56  ;;  %v1691_v20 = vld [vmem:[%s16393_s5 + $0x1430] sm:$0xff]  ;;  %v1748_v56 = vld [vmem:[%s16393_s5 + $0x15f8] sm:$0xff] }
 0x54f   :  { %2975 = vmatmul.f32.gmra.mxu3 %v800_v22  ;;  %3015 = vmatpush.msrb.mxu1 %v1671_v51  ;;  %v1709_v51 = vld [vmem:[%s16393_s5 + $0x14c0] sm:$0xff]  ;;  %v1690_v22 = vld [vmem:[%s16393_s5 + $0x1428] sm:$0xff] }
 0x550   :  { %3052 = vmatpush.msrb.mxu3 %v1712_v47  ;;  %3073 = vmatpush.msra.mxu0 %v1730_v61  ;;  %v1747_v47 = vld [vmem:[%s16393_s5 + $0x15f0] sm:$0xff]  ;;  %v1708_v61 = vld [vmem:[%s16393_s5 + $0x14b8] sm:$0xff] }
 0x551   :  { %3032 = vmatpush.msrb.mxu2 %v1693_v27  ;;  %3016 = vmatpush.msrb.mxu1 %v1670_v34  ;;  %v1689_v27 = vld [vmem:[%s16393_s5 + $0x1420] sm:$0xff]  ;;  %v1746_v34 = vld [vmem:[%s16393_s5 + $0x15e8] sm:$0xff] }
 0x552   :  { %3053 = vmatpush.msrb.mxu3 %v1711_v49  ;;  %3074 = vmatpush.msra.mxu0 %v1729_v1  ;;  %v1707_v49 = vld [vmem:[%s16393_s5 + $0x14b0] sm:$0xff]  ;;  %v1725_v1 = vld [vmem:[%s16393_s5 + $0x1540] sm:$0xff] }
 0x553   :  { %3033 = vmatpush.msrb.mxu2 %v1692_v36  ;;  %2998 = vmatmul.f32.gmra.mxu0 %v810_v0  ;;  %v817_v36 = vpop.permute.xlu2 %816  ;;  %v1688_v0 = vld [vmem:[%s16393_s5 + $0x1418] sm:$0xff] }
 0x554   :  { %3017 = vmatpush.msrb.mxu1 %v1669_v57  ;;  %3054 = vmatpush.msrb.mxu3 %v1710_v32  ;;  %v1745_v57 = vld [vmem:[%s16393_s5 + $0x15e0] sm:$0xff]  ;;  %v1706_v32 = vld [vmem:[%s16393_s5 + $0x14a8] sm:$0xff] }
 0x555   :  { %3075 = vmatpush.msra.mxu0 %v1728_v54  ;;  %3018 = vmatmul.f32.vlgmr.msrb.gmra.mxu1 %v819_v15  ;;  %v1724_v54 = vld [vmem:[%s16393_s5 + $0x1538] sm:$0xff]  ;;  %v1687_v15 = vld [vmem:[%s16393_s5 + $0x1410] sm:$0xff] }
 0x556   :  { %3034 = vmatpush.msrb.mxu2 %v1691_v20  ;;  %3094 = vmatpush.msra.mxu1 %v1748_v56  ;;  %v820_v20 = vmul.f32 %v817_v36, %v8609_v6  ;;  %v1744_v56 = vld [vmem:[%s16393_s5 + $0x15d8] sm:$0xff]  ;;  %v1721_v36 = vld [vmem:[%s16393_s5 + $0x1520] sm:$0xff] }
 0x557   :  { %3055 = vmatpush.msrb.mxu3 %v1709_v51  ;;  %3076 = vmatpush.msra.mxu0 %v1727_v33  ;;  %v1705_v51 = vld [vmem:[%s16393_s5 + $0x14a0] sm:$0xff]  ;;  %v1723_v33 = vld [vmem:[%s16393_s5 + $0x1530] sm:$0xff] }
 0x558   :  { %3035 = vmatpush.msrb.mxu2 %v1690_v22  ;;  %3095 = vmatpush.msra.mxu1 %v1747_v47  ;;  %v1686_v22 = vld [vmem:[%s16393_s5 + $0x1408] sm:$0xff]  ;;  %v1743_v47 = vld [vmem:[%s16393_s5 + $0x15d0] sm:$0xff] }
 0x559   :  { %3056 = vmatpush.msrb.mxu3 %v1708_v61  ;;  %3077 = vmatpush.msra.mxu0 %v1726_v53  ;;  %v1704_v61 = vld [vmem:[%s16393_s5 + $0x1498] sm:$0xff]  ;;  %v1722_v53 = vld [vmem:[%s16393_s5 + $0x1528] sm:$0xff] }
 0x55a   :  { %3036 = vmatpush.msrb.mxu2 %v1689_v27  ;;  %3096 = vmatpush.msra.mxu1 %v1746_v34  ;;  %v1685_v27 = vld [vmem:[%s16393_s5 + $0x1400] sm:$0xff]  ;;  %v1742_v34 = vld [vmem:[%s16393_s5 + $0x15c8] sm:$0xff] }
 0x55b   :  { %3057 = vmatpush.msrb.mxu3 %v1707_v49  ;;  %3078 = vmatpush.msra.mxu0 %v1725_v1  ;;  %v829_v49 = vmul.f32 %v8681_v16, %v8428_v41  ;;  %v1703_v1 = vld [vmem:[%s16393_s5 + $0x1490] sm:$0xff]  ;;  %v1741_v16 = vld [vmem:[%s16393_s5 + $0x15c0] sm:$0xff] }
 0x55c   :  { %3037 = vmatpush.msrb.mxu2 %v1688_v0  ;;  %3097 = vmatpush.msra.mxu1 %v1745_v57  ;;  %v1764_v0 = vld [vmem:[%s16393_s5 + $0x1678] sm:$0xff]  ;;  %v1702_v57 = vld [vmem:[%s16393_s5 + $0x1488] sm:$0xff] }
 0x55d   :  { %3058 = vmatpush.msrb.mxu3 %v1706_v32  ;;  %3079 = vmatpush.msra.mxu0 %v1724_v54  ;;  %v1720_v32 = vld [vmem:[%s16393_s5 + $0x1518] sm:$0xff]  ;;  %v1763_v54 = vld [vmem:[%s16393_s5 + $0x1670] sm:$0xff] }
 0x55e   :  { %3021 = vmatmul.f32.gmra.mxu1 %v820_v20  ;;  %3038 = vmatpush.msrb.mxu2 %v1687_v15  ;;  %v1740_v15 = vld [vmem:[%s16393_s5 + $0x15b8] sm:$0xff]  ;;  %v1701_v20 = vld [vmem:[%s16393_s5 + $0x1480] sm:$0xff] }
 0x55f   :  { %3098 = vmatpush.msra.mxu1 %v1744_v56  ;;  %3059 = vmatpush.msrb.mxu3 %v1705_v51  ;;  %v1719_v56 = vld [vmem:[%s16393_s5 + $0x1510] sm:$0xff]  ;;  %v1762_v51 = vld [vmem:[%s16393_s5 + $0x1668] sm:$0xff] }
 0x560   :  { %3080 = vmatpush.msra.mxu0 %v1723_v33  ;;  %3039 = vmatpush.msrb.mxu2 %v1686_v22  ;;  %v839_v33 = vmul.f32 %v8720_v3, %v8428_v41  ;;  %v1739_v22 = vld [vmem:[%s16393_s5 + $0x15b0] sm:$0xff]  ;;  %v1761_v3 = vld [vmem:[%s16393_s5 + $0x1660] sm:$0xff] }
 0x561   :  { %3099 = vmatpush.msra.mxu1 %v1743_v47  ;;  %3060 = vmatpush.msrb.mxu3 %v1704_v61  ;;  %v1780_v47 = vld [vmem:[%s16393_s5 + $0x16f8] sm:$0xff]  ;;  %v827_v61 = vpop.permute.xlu0 %826 }
 0x562   :  { %3081 = vmatpush.msra.mxu0 %v1722_v53  ;;  %3040 = vmatpush.msrb.mxu2 %v1685_v27  ;;  %v1718_v53 = vld [vmem:[%s16393_s5 + $0x1508] sm:$0xff] }
 0x563   :  { %3100 = vmatpush.msra.mxu1 %v1742_v34  ;;  %3041 = vmatmul.f32.vlgmr.msrb.gmra.mxu2 %v829_v49  ;;  %v1738_v27 = vld [vmem:[%s16393_s5 + $0x15a8] sm:$0xff]  ;;  %v1779_v34 = vld [vmem:[%s16393_s5 + $0x16f0] sm:$0xff]  ;;  %v1717_v49 = vld [vmem:[%s16393_s5 + $0x1500] sm:$0xff] }
 0x564   :  { %3061 = vmatpush.msrb.mxu3 %v1703_v1  ;;  %3082 = vmatpush.msra.mxu0 %v1721_v36  ;;  %v830_v1 = vmul.f32 %v827_v61, %v8609_v6  ;;  %v1760_v36 = vld [vmem:[%s16393_s5 + $0x1658] sm:$0xff]  ;;  %v1794_v61 = vld [vmem:[%s16393_s5 + $0x1768] sm:$0xff] }
 0x565   :  { %3117 = vmatpush.msra.mxu2 %v1764_v0  ;;  %3101 = vmatpush.msra.mxu1 %v1741_v16  ;;  %v849_v0 = vmul.f32 %v8850_v2, %v8428_v41  ;;  %v1737_v16 = vld [vmem:[%s16393_s5 + $0x15a0] sm:$0xff]  ;;  %v1759_v2 = vld [vmem:[%s16393_s5 + $0x1650] sm:$0xff] }
 0x566   :  { %3062 = vmatpush.msrb.mxu3 %v1702_v57  ;;  %3083 = vmatpush.msra.mxu0 %v1720_v32  ;;  %v1778_v57 = vld [vmem:[%s16393_s5 + $0x16e8] sm:$0xff]  ;;  %v1796_v32 = vld [vmem:[%s16393_s5 + $0x1778] sm:$0xff] }
 0x567   :  { %3118 = vmatpush.msra.mxu2 %v1763_v54  ;;  %3102 = vmatpush.msra.mxu1 %v1740_v15  ;;  %v837_v54 = vpop.permute.xlu1 %836  ;;  %v1736_v15 = vld [vmem:[%s16393_s5 + $0x1598] sm:$0xff] }
 0x568   :  { %3063 = vmatpush.msrb.mxu3 %v1701_v20  ;;  %3084 = vmatpush.msra.mxu0 %v1719_v56  ;;  %v1777_v20 = vld [vmem:[%s16393_s5 + $0x16e0] sm:$0xff]  ;;  %v1795_v56 = vld [vmem:[%s16393_s5 + $0x1770] sm:$0xff] }
 0x569   :  { %3119 = vmatpush.msra.mxu2 %v1762_v51  ;;  %3064 = vmatmul.f32.vlgmr.msrb.gmra.mxu3 %v839_v33  ;;  %v1758_v51 = vld [vmem:[%s16393_s5 + $0x1648] sm:$0xff]  ;;  %v1735_v33 = vld [vmem:[%s16393_s5 + $0x1590] sm:$0xff] }
 0x56a   :  { %3103 = vmatpush.msra.mxu1 %v1739_v22  ;;  %3140 = vmatpush.msra.mxu3 %v1780_v47  ;;  %v840_v22 = vmul.f32 %v837_v54, %v8609_v6  ;;  %v1776_v47 = vld [vmem:[%s16393_s5 + $0x16d8] sm:$0xff]  ;;  %v1755_v54 = vld [vmem:[%s16393_s5 + $0x1630] sm:$0xff] }
 0x56b   :  { %3085 = vmatpush.msra.mxu0 %v1718_v53  ;;  %3120 = vmatpush.msra.mxu2 %v1761_v3  ;;  %v847_v53 = vpop.permute.xlu0 %846  ;;  %v1757_v3 = vld [vmem:[%s16393_s5 + $0x1640] sm:$0xff] }
 0x56c   :  { %3104 = vmatpush.msra.mxu1 %v1738_v27  ;;  %3141 = vmatpush.msra.mxu3 %v1779_v34  ;;  %v1734_v27 = vld [vmem:[%s16393_s5 + $0x1588] sm:$0xff]  ;;  %v10603_v34 = vpop.permute.xlu2 %1002 }
 0x56d   :  { %3044 = vmatmul.f32.gmra.mxu2 %v830_v1  ;;  %3086 = vmatpush.msra.mxu0 %v1717_v49  ;;  %v1775_v49 = vld [vmem:[%s16393_s5 + $0x16d0] sm:$0xff]  ;;  %v1793_v1 = vld [vmem:[%s16393_s5 + $0x1760] sm:$0xff] }
 0x56e   :  { %3121 = vmatpush.msra.mxu2 %v1760_v36  ;;  %3087 = vmatmul.f32.vlgmr.msra.gmra.mxu0 %v849_v0  ;;  %v1756_v36 = vld [vmem:[%s16393_s5 + $0x1638] sm:$0xff]  ;;  %v850_v0 = vmul.f32 %v847_v53, %v8609_v6  ;;  %v1771_v53 = vld [vmem:[%s16393_s5 + $0x16b0] sm:$0xff] }
 0x56f   :  { %3105 = vmatpush.msra.mxu1 %v1737_v16  ;;  %3142 = vmatpush.msra.mxu3 %v1778_v57  ;;  %v1733_v16 = vld [vmem:[%s16393_s5 + $0x1580] sm:$0xff]  ;;  %v1774_v57 = vld [vmem:[%s16393_s5 + $0x16c8] sm:$0xff] }
 0x570   :  { %3163 = vmatpush.msrb.mxu0 %v1796_v32  ;;  %3122 = vmatpush.msra.mxu2 %v1759_v2  ;;  %v1792_v32 = vld [vmem:[%s16393_s5 + $0x1758] sm:$0xff]  ;;  %v859_v2 = vmul.f32 %v8774_v39, %v8428_v41  ;;  %v1791_v39 = vld [vmem:[%s16393_s5 + $0x1750] sm:$0xff] }
 0x571   :  { %3106 = vmatpush.msra.mxu1 %v1736_v15  ;;  %3143 = vmatpush.msra.mxu3 %v1777_v20  ;;  %v1812_v15 = vld [vmem:[%s16393_s5 + $0x17f8] sm:$0xff]  ;;  %v1773_v20 = vld [vmem:[%s16393_s5 + $0x16c0] sm:$0xff] }
 0x572   :  { %3164 = vmatpush.msrb.mxu0 %v1795_v56  ;;  %3123 = vmatpush.msra.mxu2 %v1758_v51  ;;  %v1754_v56 = vld [vmem:[%s16393_s5 + $0x1628] sm:$0xff]  ;;  %v1811_v51 = vld [vmem:[%s16393_s5 + $0x17f0] sm:$0xff] }
 0x573   :  { %3067 = vmatmul.f32.gmra.mxu3 %v840_v22  ;;  %3107 = vmatpush.msra.mxu1 %v1735_v33  ;;  %v1772_v33 = vld [vmem:[%s16393_s5 + $0x16b8] sm:$0xff]  ;;  %v1790_v22 = vld [vmem:[%s16393_s5 + $0x1748] sm:$0xff] }
 0x574   :  { %3144 = vmatpush.msra.mxu3 %v1776_v47  ;;  %3165 = vmatpush.msrb.mxu0 %v1794_v61  ;;  %v1753_v47 = vld [vmem:[%s16393_s5 + $0x1620] sm:$0xff]  ;;  %v1810_v61 = vld [vmem:[%s16393_s5 + $0x17e8] sm:$0xff] }
 0x575   :  { %3124 = vmatpush.msra.mxu2 %v1757_v3  ;;  %3108 = vmatpush.msra.mxu1 %v1734_v27  ;;  %v1789_v3 = vld [vmem:[%s16393_s5 + $0x1740] sm:$0xff]  ;;  %v857_v27 = vpop.permute.xlu2 %856 }
 0x576   :  { %3145 = vmatpush.msra.mxu3 %v1775_v49  ;;  %3166 = vmatpush.msrb.mxu0 %v1793_v1  ;;  %v1752_v49 = vld [vmem:[%s16393_s5 + $0x1618] sm:$0xff]  ;;  %v1809_v1 = vld [vmem:[%s16393_s5 + $0x17e0] sm:$0xff] }
 0x577   :  { %3125 = vmatpush.msra.mxu2 %v1756_v36  ;;  %3090 = vmatmul.f32.gmra.mxu0 %v850_v0  ;;  %v1770_v36 = vld [vmem:[%s16393_s5 + $0x16a8] sm:$0xff]  ;;  %v1788_v0 = vld [vmem:[%s16393_s5 + $0x1738] sm:$0xff] }
 0x578   :  { %3109 = vmatpush.msra.mxu1 %v1733_v16  ;;  %3146 = vmatpush.msra.mxu3 %v1774_v57  ;;  %v1751_v16 = vld [vmem:[%s16393_s5 + $0x1610] sm:$0xff]  ;;  %v860_v57 = vmul.f32 %v857_v27, %v8609_v6  ;;  %v1784_v27 = vld [vmem:[%s16393_s5 + $0x1718] sm:$0xff] }
 0x579   :  { %3167 = vmatpush.msrb.mxu0 %v1792_v32  ;;  %3110 = vmatmul.f32.vlgmr.msra.gmra.mxu1 %v859_v2  ;;  %v1808_v32 = vld [vmem:[%s16393_s5 + $0x17d8] sm:$0xff]  ;;  %v1769_v2 = vld [vmem:[%s16393_s5 + $0x16a0] sm:$0xff] }
 0x57a   :  { %3126 = vmatpush.msra.mxu2 %v1755_v54  ;;  %3186 = vmatpush.msrb.mxu1 %v1812_v15  ;;  %v1787_v54 = vld [vmem:[%s16393_s5 + $0x1730] sm:$0xff]  ;;  %v1750_v15 = vld [vmem:[%s16393_s5 + $0x1608] sm:$0xff] }
 0x57b   :  { %3147 = vmatpush.msra.mxu3 %v1773_v20  ;;  %3168 = vmatpush.msrb.mxu0 %v1791_v39  ;;  %v1807_v20 = vld [vmem:[%s16393_s5 + $0x17d0] sm:$0xff]  ;;  %v1768_v39 = vld [vmem:[%s16393_s5 + $0x1698] sm:$0xff] }
 0x57c   :  { %3127 = vmatpush.msra.mxu2 %v1754_v56  ;;  %3187 = vmatpush.msrb.mxu1 %v1811_v51  ;;  %v1786_v56 = vld [vmem:[%s16393_s5 + $0x1728] sm:$0xff]  ;;  %v1749_v51 = vld [vmem:[%s16393_s5 + $0x1600] sm:$0xff] }
 0x57d   :  { %3148 = vmatpush.msra.mxu3 %v1772_v33  ;;  %3169 = vmatpush.msrb.mxu0 %v1790_v22  ;;  %v1806_v33 = vld [vmem:[%s16393_s5 + $0x17c8] sm:$0xff]  ;;  %v869_v22 = vmul.f32 %v8903_v12, %v8428_v41  ;;  %v1805_v12 = vld [vmem:[%s16393_s5 + $0x17c0] sm:$0xff] }
 0x57e   :  { %3128 = vmatpush.msra.mxu2 %v1753_v47  ;;  %3188 = vmatpush.msrb.mxu1 %v1810_v61  ;;  %v1767_v47 = vld [vmem:[%s16393_s5 + $0x1690] sm:$0xff]  ;;  %v1785_v61 = vld [vmem:[%s16393_s5 + $0x1720] sm:$0xff] }
 0x57f   :  { %3149 = vmatpush.msra.mxu3 %v1771_v53  ;;  %3170 = vmatpush.msrb.mxu0 %v1789_v3  ;;  %v1828_v53 = vld [vmem:[%s16393_s5 + $0x1878] sm:$0xff]  ;;  %v1766_v3 = vld [vmem:[%s16393_s5 + $0x1688] sm:$0xff] }
 0x580   :  { %3129 = vmatpush.msra.mxu2 %v1752_v49  ;;  %3189 = vmatpush.msrb.mxu1 %v1809_v1  ;;  %v867_v49 = vpop.permute.xlu1 %866  ;;  %v1827_v1 = vld [vmem:[%s16393_s5 + $0x1870] sm:$0xff] }
 0x581   :  { %3150 = vmatpush.msra.mxu3 %v1770_v36  ;;  %3171 = vmatpush.msrb.mxu0 %v1788_v0  ;;  %v1804_v36 = vld [vmem:[%s16393_s5 + $0x17b8] sm:$0xff]  ;;  %v1765_v0 = vld [vmem:[%s16393_s5 + $0x1680] sm:$0xff] }
 0x582   :  { %3113 = vmatmul.f32.gmra.mxu1 %v860_v57  ;;  %3130 = vmatpush.msra.mxu2 %v1751_v16  ;;  %v1783_v16 = vld [vmem:[%s16393_s5 + $0x1710] sm:$0xff]  ;;  %v1826_v57 = vld [vmem:[%s16393_s5 + $0x1868] sm:$0xff] }
 0x583   :  { %3190 = vmatpush.msrb.mxu1 %v1808_v32  ;;  %3151 = vmatpush.msra.mxu3 %v1769_v2  ;;  %v879_v32 = vmul.f32 %v8824_v5, %v8428_v41  ;;  %v1803_v2 = vld [vmem:[%s16393_s5 + $0x17b0] sm:$0xff]  ;;  %v1825_v5 = vld [vmem:[%s16393_s5 + $0x1860] sm:$0xff] }
 0x584   :  { %3172 = vmatpush.msrb.mxu0 %v1787_v54  ;;  %3131 = vmatpush.msra.mxu2 %v1750_v15  ;;  %v1844_v54 = vld [vmem:[%s16393_s5 + $0x18f8] sm:$0xff]  ;;  %v1782_v15 = vld [vmem:[%s16393_s5 + $0x1708] sm:$0xff] }
 0x585   :  { %3191 = vmatpush.msrb.mxu1 %v1807_v20  ;;  %3152 = vmatpush.msra.mxu3 %v1768_v39  ;;  %v1802_v20 = vld [vmem:[%s16393_s5 + $0x17a8] sm:$0xff]  ;;  %v1843_v39 = vld [vmem:[%s16393_s5 + $0x18f0] sm:$0xff] }
 0x586   :  { %3173 = vmatpush.msrb.mxu0 %v1786_v56  ;;  %3132 = vmatpush.msra.mxu2 %v1749_v51  ;;  %v1781_v56 = vld [vmem:[%s16393_s5 + $0x1700] sm:$0xff]  ;;  %v870_v51 = vmul.f32 %v867_v49, %v8609_v6 }
 0x587   :  { %3192 = vmatpush.msrb.mxu1 %v1806_v33  ;;  %3133 = vmatmul.f32.vlgmr.msra.gmra.mxu2 %v869_v22  ;;  %v1824_v33 = vld [vmem:[%s16393_s5 + $0x1858] sm:$0xff]  ;;  %v889_v22 = vmul.f32 %v8595_v58, %v8428_v41  ;;  %v1823_v58 = vld [vmem:[%s16393_s5 + $0x1850] sm:$0xff]  ;;  %v1841_v49 = vld [vmem:[%s16393_s5 + $0x18e0] sm:$0xff] }
 0x588   :  { %3153 = vmatpush.msra.mxu3 %v1767_v47  ;;  %3174 = vmatpush.msrb.mxu0 %v1785_v61  ;;  %v1801_v47 = vld [vmem:[%s16393_s5 + $0x17a0] sm:$0xff]  ;;  %v1842_v61 = vld [vmem:[%s16393_s5 + $0x18e8] sm:$0xff] }
 0x589   :  { %3209 = vmatpush.msrb.mxu2 %v1828_v53  ;;  %3193 = vmatpush.msrb.mxu1 %v1805_v12  ;;  %v1860_v53 = vld [vmem:[%s16393_s5 + $0x1978] sm:$0xff]  ;;  %v877_v12 = vpop.permute.xlu2 %876 }
 0x58a   :  { %3154 = vmatpush.msra.mxu3 %v1766_v3  ;;  %3175 = vmatpush.msrb.mxu0 %v1784_v27  ;;  %v887_v3 = vpop.permute.xlu1 %886  ;;  %v1800_v27 = vld [vmem:[%s16393_s5 + $0x1798] sm:$0xff] }
 0x58b   :  { %3210 = vmatpush.msrb.mxu2 %v1827_v1  ;;  %3194 = vmatpush.msrb.mxu1 %v1804_v36  ;;  %v1859_v1 = vld [vmem:[%s16393_s5 + $0x1970] sm:$0xff]  ;;  %v1822_v36 = vld [vmem:[%s16393_s5 + $0x1848] sm:$0xff] }
 0x58c   :  { %3155 = vmatpush.msra.mxu3 %v1765_v0  ;;  %3176 = vmatpush.msrb.mxu0 %v1783_v16  ;;  %v1799_v0 = vld [vmem:[%s16393_s5 + $0x1790] sm:$0xff]  ;;  %v880_v16 = vmul.f32 %v877_v12, %v8609_v6  ;;  %v1818_v12 = vld [vmem:[%s16393_s5 + $0x1828] sm:$0xff] }
 0x58d   :  { %3211 = vmatpush.msrb.mxu2 %v1826_v57  ;;  %3156 = vmatmul.f32.vlgmr.msra.gmra.mxu3 %v879_v32  ;;  %v1840_v57 = vld [vmem:[%s16393_s5 + $0x18d8] sm:$0xff]  ;;  %v1858_v32 = vld [vmem:[%s16393_s5 + $0x1968] sm:$0xff] }
 0x58e   :  { %3195 = vmatpush.msrb.mxu1 %v1803_v2  ;;  %3232 = vmatpush.msrb.mxu3 %v1844_v54  ;;  %v1821_v2 = vld [vmem:[%s16393_s5 + $0x1840] sm:$0xff]  ;;  %v1798_v54 = vld [vmem:[%s16393_s5 + $0x1788] sm:$0xff] }
 0x58f   :  { %3177 = vmatpush.msrb.mxu0 %v1782_v15  ;;  %3212 = vmatpush.msrb.mxu2 %v1825_v5  ;;  %v1839_v15 = vld [vmem:[%s16393_s5 + $0x18d0] sm:$0xff]  ;;  %v1857_v5 = vld [vmem:[%s16393_s5 + $0x1960] sm:$0xff] }
 0x590   :  { %3196 = vmatpush.msrb.mxu1 %v1802_v20  ;;  %3233 = vmatpush.msrb.mxu3 %v1843_v39  ;;  %v1820_v20 = vld [vmem:[%s16393_s5 + $0x1838] sm:$0xff]  ;;  %v890_v39 = vmul.f32 %v887_v3, %v8609_v6  ;;  %v1875_v3 = vld [vmem:[%s16393_s5 + $0x19f0] sm:$0xff] }
 0x591   :  { %3136 = vmatmul.f32.gmra.mxu2 %v870_v51  ;;  %3178 = vmatpush.msrb.mxu0 %v1781_v56  ;;  %v1797_v56 = vld [vmem:[%s16393_s5 + $0x1780] sm:$0xff]  ;;  %v1838_v51 = vld [vmem:[%s16393_s5 + $0x18c8] sm:$0xff] }
 0x592   :  { %3213 = vmatpush.msrb.mxu2 %v1824_v33  ;;  %3179 = vmatmul.f32.vlgmr.msrb.gmra.mxu0 %v889_v22  ;;  %v1856_v33 = vld [vmem:[%s16393_s5 + $0x1958] sm:$0xff]  ;;  %v899_v22 = vmul.f32 %v8880_v24, %v8428_v41  ;;  %v1855_v24 = vld [vmem:[%s16393_s5 + $0x1950] sm:$0xff] }
 0x593   :  { %3197 = vmatpush.msrb.mxu1 %v1801_v47  ;;  %3234 = vmatpush.msrb.mxu3 %v1842_v61  ;;  %v1819_v47 = vld [vmem:[%s16393_s5 + $0x1830] sm:$0xff]  ;;  %v1876_v61 = vld [vmem:[%s16393_s5 + $0x19f8] sm:$0xff] }
 0x594   :  { %3255 = vmatpush.msra.mxu0 %v1860_v53  ;;  %3214 = vmatpush.msrb.mxu2 %v1823_v58  ;;  %v10836_v53 = vpop.permute.xlu1 %1022  ;;  %v1837_v58 = vld [vmem:[%s16393_s5 + $0x18c0] sm:$0xff] }
 0x595   :  { %3198 = vmatpush.msrb.mxu1 %v1800_v27  ;;  %3235 = vmatpush.msrb.mxu3 %v1841_v49  ;;  %v1836_v27 = vld [vmem:[%s16393_s5 + $0x18b8] sm:$0xff]  ;;  %v1854_v49 = vld [vmem:[%s16393_s5 + $0x1948] sm:$0xff]  ;;  %v1029_v13 = vmul.f32 %v10836_v53, %v8428_v41  ;;  %v2061_v53 = vld [vmem:[%s16393_s5 + $0x1fc0] sm:$0xff] }
 0x596   :  { %3256 = vmatpush.msra.mxu0 %v1859_v1  ;;  %3215 = vmatpush.msrb.mxu2 %v1822_v36  ;;  %v1817_v1 = vld [vmem:[%s16393_s5 + $0x1820] sm:$0xff]  ;;  %v1874_v36 = vld [vmem:[%s16393_s5 + $0x19e8] sm:$0xff] }
 0x597   :  { %3159 = vmatmul.f32.gmra.mxu3 %v880_v16  ;;  %3199 = vmatpush.msrb.mxu1 %v1799_v0  ;;  %v1835_v0 = vld [vmem:[%s16393_s5 + $0x18b0] sm:$0xff]  ;;  %v1853_v16 = vld [vmem:[%s16393_s5 + $0x1940] sm:$0xff] }
 0x598   :  { %3236 = vmatpush.msrb.mxu3 %v1840_v57  ;;  %3257 = vmatpush.msra.mxu0 %v1858_v32  ;;  %v897_v57 = vpop.permute.xlu0 %896  ;;  %v1816_v32 = vld [vmem:[%s16393_s5 + $0x1818] sm:$0xff] }
 0x599   :  { %3216 = vmatpush.msrb.mxu2 %v1821_v2  ;;  %3200 = vmatpush.msrb.mxu1 %v1798_v54  ;;  %v1873_v2 = vld [vmem:[%s16393_s5 + $0x19e0] sm:$0xff]  ;;  %v1834_v54 = vld [vmem:[%s16393_s5 + $0x18a8] sm:$0xff] }
 0x59a   :  { %3237 = vmatpush.msrb.mxu3 %v1839_v15  ;;  %3258 = vmatpush.msra.mxu0 %v1857_v5  ;;  %v1852_v15 = vld [vmem:[%s16393_s5 + $0x1938] sm:$0xff]  ;;  %v1815_v5 = vld [vmem:[%s16393_s5 + $0x1810] sm:$0xff] }
 0x59b   :  { %3217 = vmatpush.msrb.mxu2 %v1820_v20  ;;  %3182 = vmatmul.f32.gmra.mxu0 %v890_v39  ;;  %v900_v20 = vmul.f32 %v897_v57, %v8609_v6  ;;  %v1872_v39 = vld [vmem:[%s16393_s5 + $0x19d8] sm:$0xff]  ;;  %v1891_v57 = vld [vmem:[%s16393_s5 + $0x1a70] sm:$0xff] }
 0x59c   :  { %3201 = vmatpush.msrb.mxu1 %v1797_v56  ;;  %3238 = vmatpush.msrb.mxu3 %v1838_v51  ;;  %v1833_v56 = vld [vmem:[%s16393_s5 + $0x18a0] sm:$0xff]  ;;  %v1851_v51 = vld [vmem:[%s16393_s5 + $0x1930] sm:$0xff] }
 0x59d   :  { %3259 = vmatpush.msra.mxu0 %v1856_v33  ;;  %3202 = vmatmul.f32.vlgmr.msrb.gmra.mxu1 %v899_v22  ;;  %v1814_v33 = vld [vmem:[%s16393_s5 + $0x1808] sm:$0xff]  ;;  %v10896_v22 = vpop.permute.xlu1 %1032 }
 0x59e   :  { %3218 = vmatpush.msrb.mxu2 %v1819_v47  ;;  %3278 = vmatpush.msra.mxu1 %v1876_v61  ;;  %v1871_v47 = vld [vmem:[%s16393_s5 + $0x19d0] sm:$0xff]  ;;  %v1832_v61 = vld [vmem:[%s16393_s5 + $0x1898] sm:$0xff] }
 0x59f   :  { %3239 = vmatpush.msrb.mxu3 %v1837_v58  ;;  %3260 = vmatpush.msra.mxu0 %v1855_v24  ;;  %v1850_v58 = vld [vmem:[%s16393_s5 + $0x1928] sm:$0xff]  ;;  %v1813_v24 = vld [vmem:[%s16393_s5 + $0x1800] sm:$0xff] }
 0x5a0   :  { %3219 = vmatpush.msrb.mxu2 %v1818_v12  ;;  %3279 = vmatpush.msra.mxu1 %v1875_v3  ;;  %v1870_v12 = vld [vmem:[%s16393_s5 + $0x19c8] sm:$0xff]  ;;  %v909_v3 = vmul.f32 %v8953_v21, %v8428_v41  ;;  %v1869_v21 = vld [vmem:[%s16393_s5 + $0x19c0] sm:$0xff] }
 0x5a1   :  { %3240 = vmatpush.msrb.mxu3 %v1836_v27  ;;  %3261 = vmatpush.msra.mxu0 %v1854_v49  ;;  %v1831_v27 = vld [vmem:[%s16393_s5 + $0x1890] sm:$0xff]  ;;  %v1849_v49 = vld [vmem:[%s16393_s5 + $0x1920] sm:$0xff] }
 0x5a2   :  { %3220 = vmatpush.msrb.mxu2 %v1817_v1  ;;  %3280 = vmatpush.msra.mxu1 %v1874_v36  ;;  %v1892_v1 = vld [vmem:[%s16393_s5 + $0x1a78] sm:$0xff]  ;;  %v1830_v36 = vld [vmem:[%s16393_s5 + $0x1888] sm:$0xff] }
 0x5a3   :  { %3241 = vmatpush.msrb.mxu3 %v1835_v0  ;;  %3262 = vmatpush.msra.mxu0 %v1853_v16  ;;  %v1848_v0 = vld [vmem:[%s16393_s5 + $0x1918] sm:$0xff]  ;;  %v10933_v16 = vpop.permute.xlu2 %1042 }
 0x5a4   :  { %3221 = vmatpush.msrb.mxu2 %v1816_v32  ;;  %3281 = vmatpush.msra.mxu1 %v1873_v2  ;;  %v1868_v32 = vld [vmem:[%s16393_s5 + $0x19b8] sm:$0xff]  ;;  %v1829_v2 = vld [vmem:[%s16393_s5 + $0x1880] sm:$0xff] }
 0x5a5   :  { %3242 = vmatpush.msrb.mxu3 %v1834_v54  ;;  %3263 = vmatpush.msra.mxu0 %v1852_v15  ;;  %v1847_v54 = vld [vmem:[%s16393_s5 + $0x1910] sm:$0xff]  ;;  %v1890_v15 = vld [vmem:[%s16393_s5 + $0x1a68] sm:$0xff] }
 0x5a6   :  { %3205 = vmatmul.f32.gmra.mxu1 %v900_v20  ;;  %3222 = vmatpush.msrb.mxu2 %v1815_v5  ;;  %v919_v5 = vmul.f32 %v9000_v62, %v8428_v41  ;;  %v1867_v20 = vld [vmem:[%s16393_s5 + $0x19b0] sm:$0xff]  ;;  %v1889_v62 = vld [vmem:[%s16393_s5 + $0x1a60] sm:$0xff] }
 0x5a7   :  { %3282 = vmatpush.msra.mxu1 %v1872_v39  ;;  %3243 = vmatpush.msrb.mxu3 %v1833_v56  ;;  %v1908_v39 = vld [vmem:[%s16393_s5 + $0x1af8] sm:$0xff]  ;;  %v907_v56 = vpop.permute.xlu1 %906 }
 0x5a8   :  { %3264 = vmatpush.msra.mxu0 %v1851_v51  ;;  %3223 = vmatpush.msrb.mxu2 %v1814_v33  ;;  %v1846_v51 = vld [vmem:[%s16393_s5 + $0x1908] sm:$0xff] }
 0x5a9   :  { %3283 = vmatpush.msra.mxu1 %v1871_v47  ;;  %3244 = vmatpush.msrb.mxu3 %v1832_v61  ;;  %v1866_v33 = vld [vmem:[%s16393_s5 + $0x19a8] sm:$0xff]  ;;  %v1907_v47 = vld [vmem:[%s16393_s5 + $0x1af0] sm:$0xff]  ;;  %v1845_v61 = vld [vmem:[%s16393_s5 + $0x1900] sm:$0xff] }
 0x5aa   :  { %3265 = vmatpush.msra.mxu0 %v1850_v58  ;;  %3224 = vmatpush.msrb.mxu2 %v1813_v24  ;;  %v910_v58 = vmul.f32 %v907_v56, %v8609_v6  ;;  %v1888_v24 = vld [vmem:[%s16393_s5 + $0x1a58] sm:$0xff]  ;;  %v1903_v56 = vld [vmem:[%s16393_s5 + $0x1ad0] sm:$0xff] }
 0x5ab   :  { %3284 = vmatpush.msra.mxu1 %v1870_v12  ;;  %3225 = vmatmul.f32.vlgmr.msrb.gmra.mxu2 %v909_v3  ;;  %v929_v12 = vmul.f32 %v8930_v40, %v8428_v41  ;;  %v1865_v3 = vld [vmem:[%s16393_s5 + $0x19a0] sm:$0xff]  ;;  %v1887_v40 = vld [vmem:[%s16393_s5 + $0x1a50] sm:$0xff] }
 0x5ac   :  { %3245 = vmatpush.msrb.mxu3 %v1831_v27  ;;  %3266 = vmatpush.msra.mxu0 %v1849_v49  ;;  %v1906_v27 = vld [vmem:[%s16393_s5 + $0x1ae8] sm:$0xff]  ;;  %v1924_v49 = vld [vmem:[%s16393_s5 + $0x1b78] sm:$0xff] }
 0x5ad   :  { %3301 = vmatpush.msra.mxu2 %v1892_v1  ;;  %3285 = vmatpush.msra.mxu1 %v1869_v21  ;;  %v917_v1 = vpop.permute.xlu2 %916  ;;  %v1864_v21 = vld [vmem:[%s16393_s5 + $0x1998] sm:$0xff] }
 0x5ae   :  { %3246 = vmatpush.msrb.mxu3 %v1830_v36  ;;  %3267 = vmatpush.msra.mxu0 %v1848_v0  ;;  %v1905_v36 = vld [vmem:[%s16393_s5 + $0x1ae0] sm:$0xff]  ;;  %v1923_v0 = vld [vmem:[%s16393_s5 + $0x1b70] sm:$0xff] }
 0x5af   :  { %3302 = vmatpush.msra.mxu2 %v1891_v57  ;;  %3286 = vmatpush.msra.mxu1 %v1868_v32  ;;  %v1886_v57 = vld [vmem:[%s16393_s5 + $0x1a48] sm:$0xff]  ;;  %v1863_v32 = vld [vmem:[%s16393_s5 + $0x1990] sm:$0xff] }
 0x5b0   :  { %3247 = vmatpush.msrb.mxu3 %v1829_v2  ;;  %3268 = vmatpush.msra.mxu0 %v1847_v54  ;;  %v920_v2 = vmul.f32 %v917_v1, %v8609_v6  ;;  %v1904_v54 = vld [vmem:[%s16393_s5 + $0x1ad8] sm:$0xff]  ;;  %v1939_v1 = vld [vmem:[%s16393_s5 + $0x1bf0] sm:$0xff] }
 0x5b1   :  { %3303 = vmatpush.msra.mxu2 %v1890_v15  ;;  %3248 = vmatmul.f32.vlgmr.msrb.gmra.mxu3 %v919_v5  ;;  %v1922_v15 = vld [vmem:[%s16393_s5 + $0x1b68] sm:$0xff]  ;;  %v927_v5 = vpop.permute.xlu1 %926 }
 0x5b2   :  { %3287 = vmatpush.msra.mxu1 %v1867_v20  ;;  %3324 = vmatpush.msra.mxu3 %v1908_v39  ;;  %v1885_v20 = vld [vmem:[%s16393_s5 + $0x1a40] sm:$0xff]  ;;  %v1862_v39 = vld [vmem:[%s16393_s5 + $0x1988] sm:$0xff] }
 0x5b3   :  { %3269 = vmatpush.msra.mxu0 %v1846_v51  ;;  %3304 = vmatpush.msra.mxu2 %v1889_v62  ;;  %v1921_v51 = vld [vmem:[%s16393_s5 + $0x1b60] sm:$0xff]  ;;  %v1884_v62 = vld [vmem:[%s16393_s5 + $0x1a38] sm:$0xff] }
 0x5b4   :  { %3288 = vmatpush.msra.mxu1 %v1866_v33  ;;  %3325 = vmatpush.msra.mxu3 %v1907_v47  ;;  %v930_v33 = vmul.f32 %v927_v5, %v8609_v6  ;;  %v1861_v47 = vld [vmem:[%s16393_s5 + $0x1980] sm:$0xff] }
 0x5b5   :  { %3228 = vmatmul.f32.gmra.mxu2 %v910_v58  ;;  %3270 = vmatpush.msra.mxu0 %v1845_v61  ;;  %v1902_v61 = vld [vmem:[%s16393_s5 + $0x1ac8] sm:$0xff]  ;;  %v1920_v58 = vld [vmem:[%s16393_s5 + $0x1b58] sm:$0xff]  ;;  %v1937_v5 = vld [vmem:[%s16393_s5 + $0x1be0] sm:$0xff] }
 0x5b6   :  { %3305 = vmatpush.msra.mxu2 %v1888_v24  ;;  %3271 = vmatmul.f32.vlgmr.msra.gmra.mxu0 %v929_v12  ;;  %v939_v24 = vmul.f32 %v9046_v55, %v8428_v41  ;;  %v1883_v12 = vld [vmem:[%s16393_s5 + $0x1a30] sm:$0xff] }
 0x5b7   :  { %3289 = vmatpush.msra.mxu1 %v1865_v3  ;;  %3326 = vmatpush.msra.mxu3 %v1906_v27  ;;  %v1940_v3 = vld [vmem:[%s16393_s5 + $0x1bf8] sm:$0xff]  ;;  %v1901_v27 = vld [vmem:[%s16393_s5 + $0x1ac0] sm:$0xff]  ;;  %v1919_v55 = vld [vmem:[%s16393_s5 + $0x1b50] sm:$0xff] }
 0x5b8   :  { %3347 = vmatpush.msrb.mxu0 %v1924_v49  ;;  %3306 = vmatpush.msra.mxu2 %v1887_v40  ;;  %v11052_v49 = vpop.f32.mrf.mxu2  ;;  %v1882_v40 = vld [vmem:[%s16393_s5 + $0x1a28] sm:$0xff] }
 0x5b9   :  { %3290 = vmatpush.msra.mxu1 %v1864_v21  ;;  %3327 = vmatpush.msra.mxu3 %v1905_v36  ;;  %v1900_v21 = vld [vmem:[%s16393_s5 + $0x1ab8] sm:$0xff]  ;;  %v1918_v36 = vld [vmem:[%s16393_s5 + $0x1b48] sm:$0xff] }
 0x5ba   :  { %3348 = vmatpush.msrb.mxu0 %v1923_v0  ;;  %3307 = vmatpush.msra.mxu2 %v1886_v57  ;;  %v1881_v0 = vld [vmem:[%s16393_s5 + $0x1a20] sm:$0xff]  ;;  %v1938_v57 = vld [vmem:[%s16393_s5 + $0x1be8] sm:$0xff] }
 0x5bb   :  { %3251 = vmatmul.f32.gmra.mxu3 %v920_v2  ;;  %3291 = vmatpush.msra.mxu1 %v1863_v32  ;;  %v1899_v32 = vld [vmem:[%s16393_s5 + $0x1ab0] sm:$0xff]  ;;  %v1917_v2 = vld [vmem:[%s16393_s5 + $0x1b40] sm:$0xff] }
 0x5bc   :  { %3328 = vmatpush.msra.mxu3 %v1904_v54  ;;  %3349 = vmatpush.msrb.mxu0 %v1922_v15  ;;  %v937_v54 = vpop.permute.xlu1 %936  ;;  %v1880_v15 = vld [vmem:[%s16393_s5 + $0x1a18] sm:$0xff] }
 0x5bd   :  { %3308 = vmatpush.msra.mxu2 %v1885_v20  ;;  %3292 = vmatpush.msra.mxu1 %v1862_v39  ;;  %v1898_v20 = vld [vmem:[%s16393_s5 + $0x1aa8] sm:$0xff]  ;;  %v1916_v39 = vld [vmem:[%s16393_s5 + $0x1b38] sm:$0xff] }
 0x5be   :  { %3329 = vmatpush.msra.mxu3 %v1903_v56  ;;  %3350 = vmatpush.msrb.mxu0 %v1921_v51  ;;  %v11090_v56 = vpop.f32.mrf.mxu0  ;;  %v1879_v51 = vld [vmem:[%s16393_s5 + $0x1a10] sm:$0xff] }
 0x5bf   :  { %3309 = vmatpush.msra.mxu2 %v1884_v62  ;;  %3274 = vmatmul.f32.gmra.mxu0 %v930_v33  ;;  %v11095_v62 = vpop.f32.mrf.mxu3  ;;  %v940_v33 = vmul.f32 %v937_v54, %v8609_v6  ;;  %v1894_v54 = vld [vmem:[%s16393_s5 + $0x1a88] sm:$0xff] }
 0x5c0   :  { %3293 = vmatpush.msra.mxu1 %v1861_v47  ;;  %3330 = vmatpush.msra.mxu3 %v1902_v61  ;;  %v1936_v47 = vld [vmem:[%s16393_s5 + $0x1bd8] sm:$0xff]  ;;  %v1897_v61 = vld [vmem:[%s16393_s5 + $0x1aa0] sm:$0xff] }
 0x5c1   :  { %3351 = vmatpush.msrb.mxu0 %v1920_v58  ;;  %3294 = vmatmul.f32.vlgmr.msra.gmra.mxu1 %v939_v24  ;;  %v11104_v58 = vpop.f32.mrf.mxu2  ;;  %v1915_v24 = vld [vmem:[%s16393_s5 + $0x1b30] sm:$0xff] }
 0x5c2   :  { %3310 = vmatpush.msra.mxu2 %v1883_v12  ;;  %3370 = vmatpush.msrb.mxu1 %v1940_v3  ;;  %v1878_v12 = vld [vmem:[%s16393_s5 + $0x1a08] sm:$0xff]  ;;  %v1935_v3 = vld [vmem:[%s16393_s5 + $0x1bd0] sm:$0xff] }
 0x5c3   :  { %3331 = vmatpush.msra.mxu3 %v1901_v27  ;;  %3352 = vmatpush.msrb.mxu0 %v1919_v55  ;;  %v1896_v27 = vld [vmem:[%s16393_s5 + $0x1a98] sm:$0xff]  ;;  %v1914_v55 = vld [vmem:[%s16393_s5 + $0x1b28] sm:$0xff] }
 0x5c4   :  { %3311 = vmatpush.msra.mxu2 %v1882_v40  ;;  %3371 = vmatpush.msrb.mxu1 %v1939_v1  ;;  %v1877_v40 = vld [vmem:[%s16393_s5 + $0x1a00] sm:$0xff]  ;;  %v1934_v1 = vld [vmem:[%s16393_s5 + $0x1bc8] sm:$0xff] }
 0x5c5   :  { %3332 = vmatpush.msra.mxu3 %v1900_v21  ;;  %3353 = vmatpush.msrb.mxu0 %v1918_v36  ;;  %v949_v21 = vmul.f32 %v9229_v9, %v8428_v41  ;;  %v11129_v36 = vpop.f32.mrf.mxu1  ;;  %v1933_v9 = vld [vmem:[%s16393_s5 + $0x1bc0] sm:$0xff] }
 0x5c6   :  { %3312 = vmatpush.msra.mxu2 %v1881_v0  ;;  %3372 = vmatpush.msrb.mxu1 %v1938_v57  ;;  %v1895_v0 = vld [vmem:[%s16393_s5 + $0x1a90] sm:$0xff]  ;;  %v1913_v57 = vld [vmem:[%s16393_s5 + $0x1b20] sm:$0xff] }
 0x5c7   :  { %3333 = vmatpush.msra.mxu3 %v1899_v32  ;;  %3354 = vmatpush.msrb.mxu0 %v1917_v2  ;;  %v1956_v32 = vld [vmem:[%s16393_s5 + $0x1c78] sm:$0xff]  ;;  %v11143_v2 = vpop.f32.mrf.mxu0 }
 0x5c8   :  { %3313 = vmatpush.msra.mxu2 %v1880_v15  ;;  %3373 = vmatpush.msrb.mxu1 %v1937_v5  ;;  %v1912_v15 = vld [vmem:[%s16393_s5 + $0x1b18] sm:$0xff]  ;;  %v11151_v5 = vpop.permute.xlu0 %1012 }
 0x5c9   :  { %3334 = vmatpush.msra.mxu3 %v1898_v20  ;;  %3355 = vmatpush.msrb.mxu0 %v1916_v39  ;;  %v11153_v20 = vpop.f32.mrf.mxu3  ;;  %v1955_v39 = vld [vmem:[%s16393_s5 + $0x1c70] sm:$0xff] }
 0x5ca   :  { %3297 = vmatmul.f32.gmra.mxu1 %v940_v33  ;;  %3314 = vmatpush.msra.mxu2 %v1879_v51  ;;  %v1932_v51 = vld [vmem:[%s16393_s5 + $0x1bb8] sm:$0xff]  ;;  %v1893_v33 = vld [vmem:[%s16393_s5 + $0x1a80] sm:$0xff] }
 0x5cb   :  { %3374 = vmatpush.msrb.mxu1 %v1936_v47  ;;  %3335 = vmatpush.msra.mxu3 %v1897_v61  ;;  %v1911_v47 = vld [vmem:[%s16393_s5 + $0x1b10] sm:$0xff]  ;;  %v1954_v61 = vld [vmem:[%s16393_s5 + $0x1c68] sm:$0xff] }
 0x5cc   :  { %3356 = vmatpush.msrb.mxu0 %v1915_v24  ;;  %3315 = vmatpush.msra.mxu2 %v1878_v12  ;;  %v959_v24 = vmul.f32 %v9551_v14, %v8428_v41  ;;  %v11172_v12 = vpop.f32.mrf.mxu2  ;;  %v1953_v14 = vld [vmem:[%s16393_s5 + $0x1c60] sm:$0xff] }
 0x5cd   :  { %3375 = vmatpush.msrb.mxu1 %v1935_v3  ;;  %3336 = vmatpush.msra.mxu3 %v1896_v27  ;;  %v1931_v3 = vld [vmem:[%s16393_s5 + $0x1bb0] sm:$0xff]  ;;  %v1972_v27 = vld [vmem:[%s16393_s5 + $0x1cf8] sm:$0xff] }
 0x5ce   :  { %3357 = vmatpush.msrb.mxu0 %v1914_v55  ;;  %3316 = vmatpush.msra.mxu2 %v1877_v40  ;;  %v947_v55 = vpop.permute.xlu2 %946  ;;  %v1910_v40 = vld [vmem:[%s16393_s5 + $0x1b08] sm:$0xff] }
 0x5cf   :  { %3376 = vmatpush.msrb.mxu1 %v1934_v1  ;;  %3317 = vmatmul.f32.vlgmr.msra.gmra.mxu2 %v949_v21  ;;  %v11186_v1 = vpop.f32.mrf.mxu1  ;;  %v1930_v21 = vld [vmem:[%s16393_s5 + $0x1ba8] sm:$0xff] }
 0x5d0   :  { %3337 = vmatpush.msra.mxu3 %v1895_v0  ;;  %3358 = vmatpush.msrb.mxu0 %v1913_v57  ;;  %v1971_v0 = vld [vmem:[%s16393_s5 + $0x1cf0] sm:$0xff]  ;;  %v1909_v57 = vld [vmem:[%s16393_s5 + $0x1b00] sm:$0xff] }
 0x5d1   :  { %3393 = vmatpush.msrb.mxu2 %v1956_v32  ;;  %3377 = vmatpush.msrb.mxu1 %v1933_v9  ;;  %v950_v32 = vmul.f32 %v947_v55, %v8609_v6  ;;  %v1952_v9 = vld [vmem:[%s16393_s5 + $0x1c58] sm:$0xff]  ;;  %v1987_v55 = vld [vmem:[%s16393_s5 + $0x1d70] sm:$0xff] }
 0x5d2   :  { %3338 = vmatpush.msra.mxu3 %v1894_v54  ;;  %3359 = vmatpush.msrb.mxu0 %v1912_v15  ;;  %v969_v54 = vmul.f32 %v9507_v43, %v8428_v41  ;;  %v1929_v15 = vld [vmem:[%s16393_s5 + $0x1ba0] sm:$0xff]  ;;  %v1951_v43 = vld [vmem:[%s16393_s5 + $0x1c50] sm:$0xff] }
 0x5d3   :  { %3394 = vmatpush.msrb.mxu2 %v1955_v39  ;;  %3378 = vmatpush.msrb.mxu1 %v1932_v51  ;;  %v1970_v39 = vld [vmem:[%s16393_s5 + $0x1ce8] sm:$0xff]  ;;  %v11209_v51 = vpop.f32.mrf.mxu0 }
 0x5d4   :  { %3339 = vmatpush.msra.mxu3 %v1893_v33  ;;  %3360 = vmatpush.msrb.mxu0 %v1911_v47  ;;  %v1988_v33 = vld [vmem:[%s16393_s5 + $0x1d78] sm:$0xff]  ;;  %v957_v47 = vpop.permute.xlu0 %956 }
 0x5d5   :  { %3395 = vmatpush.msrb.mxu2 %v1954_v61  ;;  %3340 = vmatmul.f32.vlgmr.msra.gmra.mxu3 %v959_v24  ;;  %v11217_v61 = vpop.f32.mrf.mxu3  ;;  %v1928_v24 = vld [vmem:[%s16393_s5 + $0x1b98] sm:$0xff] }
 0x5d6   :  { %3379 = vmatpush.msrb.mxu1 %v1931_v3  ;;  %3416 = vmatpush.msrb.mxu3 %v1972_v27  ;;  %v1969_v3 = vld [vmem:[%s16393_s5 + $0x1ce0] sm:$0xff]  ;;  %v11225_v27 = vpop.f32.mrf.mxu2 }
 0x5d7   :  { %3361 = vmatpush.msrb.mxu0 %v1910_v40  ;;  %3396 = vmatpush.msrb.mxu2 %v1953_v14  ;;  %v1950_v40 = vld [vmem:[%s16393_s5 + $0x1c48] sm:$0xff]  ;;  %v1927_v14 = vld [vmem:[%s16393_s5 + $0x1b90] sm:$0xff] }
 0x5d8   :  { %3380 = vmatpush.msrb.mxu1 %v1930_v21  ;;  %3417 = vmatpush.msrb.mxu3 %v1971_v0  ;;  %v960_v21 = vmul.f32 %v957_v47, %v8609_v6  ;;  %v1968_v0 = vld [vmem:[%s16393_s5 + $0x1cd8] sm:$0xff] }
 0x5d9   :  { %3320 = vmatmul.f32.gmra.mxu2 %v950_v32  ;;  %3362 = vmatpush.msrb.mxu0 %v1909_v57  ;;  %v1986_v57 = vld [vmem:[%s16393_s5 + $0x1d68] sm:$0xff]  ;;  %v967_v32 = vpop.permute.xlu2 %966 }
 0x5da   :  { %3397 = vmatpush.msrb.mxu2 %v1952_v9  ;;  %3363 = vmatmul.f32.vlgmr.msrb.gmra.mxu0 %v969_v54  ;;  %v1949_v9 = vld [vmem:[%s16393_s5 + $0x1c40] sm:$0xff]  ;;  %v1926_v54 = vld [vmem:[%s16393_s5 + $0x1b88] sm:$0xff]  ;;  %v970_v47 = vmul.f32 %v967_v32, %v8609_v6 }
 0x5db   :  { %3381 = vmatpush.msrb.mxu1 %v1929_v15  ;;  %3418 = vmatpush.msrb.mxu3 %v1970_v39  ;;  %v11249_v15 = vpop.f32.mrf.mxu1  ;;  %v1967_v39 = vld [vmem:[%s16393_s5 + $0x1cd0] sm:$0xff]  ;;  %v1965_v32 = vld [vmem:[%s16393_s5 + $0x1cc0] sm:$0xff] }
 0x5dc   :  { %3439 = vmatpush.msra.mxu0 %v1988_v33  ;;  %3398 = vmatpush.msrb.mxu2 %v1951_v43  ;;  %v1985_v33 = vld [vmem:[%s16393_s5 + $0x1d60] sm:$0xff]  ;;  %v1948_v43 = vld [vmem:[%s16393_s5 + $0x1c38] sm:$0xff]  ;;  %v1027_v7 = vpop.permute.xlu0 %1026 }
 0x5dd   :  { %3382 = vmatpush.msrb.mxu1 %v1928_v24  ;;  %3419 = vmatpush.msrb.mxu3 %v1969_v3  ;;  %v1925_v24 = vld [vmem:[%s16393_s5 + $0x1b80] sm:$0xff]  ;;  %v1966_v3 = vld [vmem:[%s16393_s5 + $0x1cc8] sm:$0xff]  ;;  %v1030_v29 = vmul.f32 %v1027_v7, %v8609_v6 }
 0x5de   :  { %3440 = vmatpush.msra.mxu0 %v1987_v55  ;;  %3399 = vmatpush.msrb.mxu2 %v1950_v40  ;;  %v11267_v55 = vpop.f32.mrf.mxu3  ;;  %v1984_v40 = vld [vmem:[%s16393_s5 + $0x1d58] sm:$0xff] }
 0x5df   :  { %3343 = vmatmul.f32.gmra.mxu3 %v960_v21  ;;  %3383 = vmatpush.msrb.mxu1 %v1927_v14  ;;  %v979_v14 = vmul.f32 %v9893_v11, %v8428_v41  ;;  %v11274_v21 = vpop.f32.mrf.mxu0  ;;  %v1983_v11 = vld [vmem:[%s16393_s5 + $0x1d50] sm:$0xff] }
 0x5e0   :  { %3420 = vmatpush.msrb.mxu3 %v1968_v0  ;;  %3441 = vmatpush.msra.mxu0 %v1986_v57  ;;  %v1947_v0 = vld [vmem:[%s16393_s5 + $0x1c30] sm:$0xff]  ;;  %v2004_v57 = vld [vmem:[%s16393_s5 + $0x1df8] sm:$0xff] }
 0x5e1   :  { %3400 = vmatpush.msrb.mxu2 %v1949_v9  ;;  %3384 = vmatpush.msrb.mxu1 %v1926_v54  ;;  %v11288_v9 = vpop.f32.mrf.mxu2  ;;  %v1946_v54 = vld [vmem:[%s16393_s5 + $0x1c28] sm:$0xff] }
 0x5e2   :  { %3421 = vmatpush.msrb.mxu3 %v1967_v39  ;;  %3442 = vmatpush.msra.mxu0 %v1985_v33  ;;  %v2003_v39 = vld [vmem:[%s16393_s5 + $0x1df0] sm:$0xff]  ;;  %v1964_v33 = vld [vmem:[%s16393_s5 + $0x1cb8] sm:$0xff] }
 0x5e3   :  { %3401 = vmatpush.msrb.mxu2 %v1948_v43  ;;  %3366 = vmatmul.f32.gmra.mxu0 %v970_v47  ;;  %v1982_v43 = vld [vmem:[%s16393_s5 + $0x1d48] sm:$0xff]  ;;  %v11302_v47 = vpop.f32.mrf.mxu1 }
 0x5e4   :  { %3385 = vmatpush.msrb.mxu1 %v1925_v24  ;;  %3422 = vmatpush.msrb.mxu3 %v1966_v3  ;;  %v1945_v24 = vld [vmem:[%s16393_s5 + $0x1c20] sm:$0xff]  ;;  %v2002_v3 = vld [vmem:[%s16393_s5 + $0x1de8] sm:$0xff] }
 0x5e5   :  { %3443 = vmatpush.msra.mxu0 %v1984_v40  ;;  %3386 = vmatmul.f32.vlgmr.msrb.gmra.mxu1 %v979_v14  ;;  %v1963_v40 = vld [vmem:[%s16393_s5 + $0x1cb0] sm:$0xff]  ;;  %v1981_v14 = vld [vmem:[%s16393_s5 + $0x1d40] sm:$0xff] }
 0x5e6   :  { %3402 = vmatpush.msrb.mxu2 %v1947_v0  ;;  %3462 = vmatpush.msra.mxu1 %v2004_v57  ;;  %v977_v0 = vpop.permute.xlu1 %976  ;;  %v1944_v57 = vld [vmem:[%s16393_s5 + $0x1c18] sm:$0xff] }
 0x5e7   :  { %3423 = vmatpush.msrb.mxu3 %v1965_v32  ;;  %3444 = vmatpush.msra.mxu0 %v1983_v11  ;;  %v2001_v32 = vld [vmem:[%s16393_s5 + $0x1de0] sm:$0xff]  ;;  %v1962_v11 = vld [vmem:[%s16393_s5 + $0x1ca8] sm:$0xff] }
 0x5e8   :  { %3403 = vmatpush.msrb.mxu2 %v1946_v54  ;;  %3463 = vmatpush.msra.mxu1 %v2003_v39  ;;  %v1980_v54 = vld [vmem:[%s16393_s5 + $0x1d38] sm:$0xff]  ;;  %v1943_v39 = vld [vmem:[%s16393_s5 + $0x1c10] sm:$0xff] }
 0x5e9   :  { %3424 = vmatpush.msrb.mxu3 %v1964_v33  ;;  %3445 = vmatpush.msra.mxu0 %v1982_v43  ;;  %v11331_v33 = vpop.f32.mrf.mxu3  ;;  %v980_v43 = vmul.f32 %v977_v0, %v8609_v6  ;;  %v1979_v0 = vld [vmem:[%s16393_s5 + $0x1d30] sm:$0xff] }
 0x5ea   :  { %3404 = vmatpush.msrb.mxu2 %v1945_v24  ;;  %3464 = vmatpush.msra.mxu1 %v2002_v3  ;;  %v2000_v24 = vld [vmem:[%s16393_s5 + $0x1dd8] sm:$0xff]  ;;  %v1961_v3 = vld [vmem:[%s16393_s5 + $0x1ca0] sm:$0xff] }
 0x5eb   :  { %3425 = vmatpush.msrb.mxu3 %v1963_v40  ;;  %3446 = vmatpush.msra.mxu0 %v1981_v14  ;;  %v11340_v40 = vpop.f32.mrf.mxu0  ;;  %v11342_v14 = vpop.f32.mrf.mxu2 }
 0x5ec   :  { %3405 = vmatpush.msrb.mxu2 %v1944_v57  ;;  %3465 = vmatpush.msra.mxu1 %v2001_v32  ;;  %v1942_v57 = vld [vmem:[%s16393_s5 + $0x1c08] sm:$0xff]  ;;  %v1999_v32 = vld [vmem:[%s16393_s5 + $0x1dd0] sm:$0xff]  ;;  %v11367_v10 = vpop.f32.mrf.mxu1 }
 0x5ed   :  { %3426 = vmatpush.msrb.mxu3 %v1962_v11  ;;  %3447 = vmatpush.msra.mxu0 %v1980_v54  ;;  %v1978_v11 = vld [vmem:[%s16393_s5 + $0x1d28] sm:$0xff]  ;;  %v1941_v54 = vld [vmem:[%s16393_s5 + $0x1c00] sm:$0xff] }
 0x5ee   :  { %3389 = vmatmul.f32.gmra.mxu1 %v980_v43  ;;  %3406 = vmatpush.msrb.mxu2 %v1943_v39  ;;  %v1998_v39 = vld [vmem:[%s16393_s5 + $0x1dc8] sm:$0xff]  ;;  %v989_v43 = vmul.f32 %v9701_v25, %v8428_v41  ;;  %v1997_v25 = vld [vmem:[%s16393_s5 + $0x1dc0] sm:$0xff] }
 0x5ef   :  { %3466 = vmatpush.msra.mxu1 %v2000_v24  ;;  %3427 = vmatpush.msrb.mxu3 %v1961_v3  ;;  %v1959_v24 = vld [vmem:[%s16393_s5 + $0x1c90] sm:$0xff]  ;;  %v1977_v3 = vld [vmem:[%s16393_s5 + $0x1d20] sm:$0xff] }
 0x5f0   :  { %3448 = vmatpush.msra.mxu0 %v1979_v0  ;;  %3407 = vmatpush.msrb.mxu2 %v1942_v57  ;;  %v2020_v0 = vld [vmem:[%s16393_s5 + $0x1e78] sm:$0xff] }
 0x5f1   :  { %3467 = vmatpush.msra.mxu1 %v1999_v32  ;;  %3428 = vmatpush.msrb.mxu3 %v1960_v17  ;;  %v1958_v17 = vld [vmem:[%s16393_s5 + $0x1c88] sm:$0xff]  ;;  %v1976_v57 = vld [vmem:[%s16393_s5 + $0x1d18] sm:$0xff]  ;;  %v2019_v32 = vld [vmem:[%s16393_s5 + $0x1e70] sm:$0xff] }
 0x5f2   :  { %3449 = vmatpush.msra.mxu0 %v1978_v11  ;;  %3408 = vmatpush.msrb.mxu2 %v1941_v54  ;;  %v1996_v11 = vld [vmem:[%s16393_s5 + $0x1db8] sm:$0xff]  ;;  %v1957_v54 = vld [vmem:[%s16393_s5 + $0x1c80] sm:$0xff] }
 0x5f3   :  { %3468 = vmatpush.msra.mxu1 %v1998_v39  ;;  %3409 = vmatmul.f32.vlgmr.msrb.gmra.mxu2 %v989_v43  ;;  %v1975_v39 = vld [vmem:[%s16393_s5 + $0x1d10] sm:$0xff]  ;;  %v11399_v43 = vpop.f32.mrf.mxu3 }
 0x5f4   :  { %3429 = vmatpush.msrb.mxu3 %v1959_v24  ;;  %3450 = vmatpush.msra.mxu0 %v1977_v3  ;;  %v2018_v24 = vld [vmem:[%s16393_s5 + $0x1e68] sm:$0xff]  ;;  %v999_v3 = vmul.f32 %v10107_v60, %v8428_v41  ;;  %v11432_v31 = vpop.f32.mrf.mxu1 }
 0x5f5   :  { %3485 = vmatpush.msra.mxu2 %v2020_v0  ;;  %3469 = vmatpush.msra.mxu1 %v1997_v25  ;;  %v11406_v0 = vpop.f32.mrf.mxu0  ;;  %v11408_v25 = vpop.f32.mrf.mxu2  ;;  %v1974_v60 = vld [vmem:[%s16393_s5 + $0x1d08] sm:$0xff] }
 0x5f6   :  { %3430 = vmatpush.msrb.mxu3 %v1958_v17  ;;  %3451 = vmatpush.msra.mxu0 %v1976_v57  ;;  %v2036_v17 = vld [vmem:[%s16393_s5 + $0x1ef8] sm:$0xff]  ;;  %v987_v57 = vpop.permute.xlu2 %986 }
 0x5f7   :  { %3486 = vmatpush.msra.mxu2 %v2019_v32  ;;  %3470 = vmatpush.msra.mxu1 %v1996_v11  ;;  %v2017_v32 = vld [vmem:[%s16393_s5 + $0x1e60] sm:$0xff]  ;;  %v1994_v11 = vld [vmem:[%s16393_s5 + $0x1da8] sm:$0xff] }
 0x5f8   :  { %3431 = vmatpush.msrb.mxu3 %v1957_v54  ;;  %3452 = vmatpush.msra.mxu0 %v1975_v39  ;;  %v1973_v54 = vld [vmem:[%s16393_s5 + $0x1d00] sm:$0xff]  ;;  %v990_v39 = vmul.f32 %v987_v57, %v8609_v6  ;;  %v2052_v57 = vld [vmem:[%s16393_s5 + $0x1f78] sm:$0xff] }
 0x5f9   :  { %3487 = vmatpush.msra.mxu2 %v2018_v24  ;;  %3432 = vmatmul.f32.vlgmr.msrb.gmra.mxu3 %v999_v3  ;;  %v2016_v24 = vld [vmem:[%s16393_s5 + $0x1e58] sm:$0xff]  ;;  %v1009_v3 = vmul.f32 %v10603_v34, %v8428_v41  ;;  %v2015_v34 = vld [vmem:[%s16393_s5 + $0x1e50] sm:$0xff] }
 0x5fa   :  { %3471 = vmatpush.msra.mxu1 %v1995_v19  ;;  %3508 = vmatpush.msra.mxu3 %v2036_v17  ;;  %v1993_v19 = vld [vmem:[%s16393_s5 + $0x1da0] sm:$0xff]  ;;  %v2034_v17 = vld [vmem:[%s16393_s5 + $0x1ee8] sm:$0xff] }
 0x5fb   :  { %3453 = vmatpush.msra.mxu0 %v1974_v60  ;;  %3488 = vmatpush.msra.mxu2 %v2017_v32  ;;  %v997_v60 = vpop.permute.xlu1 %996  ;;  %v2033_v32 = vld [vmem:[%s16393_s5 + $0x1ee0] sm:$0xff] }
 0x5fc   :  { %3472 = vmatpush.msra.mxu1 %v1994_v11  ;;  %3509 = vmatpush.msra.mxu3 %v2035_v23  ;;  %v1992_v23 = vld [vmem:[%s16393_s5 + $0x1d98] sm:$0xff]  ;;  %v2051_v11 = vld [vmem:[%s16393_s5 + $0x1f70] sm:$0xff]  ;;  %v11495_v8 = vpop.f32.mrf.mxu1 }
 0x5fd   :  { %3412 = vmatmul.f32.gmra.mxu2 %v990_v39  ;;  %3454 = vmatpush.msra.mxu0 %v1973_v54  ;;  %v2014_v54 = vld [vmem:[%s16393_s5 + $0x1e48] sm:$0xff]  ;;  %v11463_v39 = vpop.f32.mrf.mxu3 }
 0x5fe   :  { %3489 = vmatpush.msra.mxu2 %v2016_v24  ;;  %3455 = vmatmul.f32.vlgmr.msra.gmra.mxu0 %v1009_v3  ;;  %v1991_v24 = vld [vmem:[%s16393_s5 + $0x1d90] sm:$0xff]  ;;  %v11468_v3 = vpop.f32.mrf.mxu0 }
 0x5ff   :  { %3473 = vmatpush.msra.mxu1 %v1993_v19  ;;  %3510 = vmatpush.msra.mxu3 %v2034_v17  ;;  %v11470_v19 = vpop.f32.mrf.mxu2  ;;  %v1000_v17 = vmul.f32 %v997_v60, %v8609_v6  ;;  %v1990_v60 = vld [vmem:[%s16393_s5 + $0x1d88] sm:$0xff] }
 0x600   :  { %3531 = vmatpush.msrb.mxu0 %v2052_v57  ;;  %3490 = vmatpush.msra.mxu2 %v2015_v34  ;;  %v2050_v57 = vld [vmem:[%s16393_s5 + $0x1f68] sm:$0xff]  ;;  %v1007_v34 = vpop.permute.xlu2 %1006 }
 0x601   :  { %3474 = vmatpush.msra.mxu1 %v1992_v23  ;;  %3511 = vmatpush.msra.mxu3 %v2033_v32  ;;  %v2031_v23 = vld [vmem:[%s16393_s5 + $0x1ed0] sm:$0xff]  ;;  %v2049_v32 = vld [vmem:[%s16393_s5 + $0x1f60] sm:$0xff] }
 0x602   :  { %3532 = vmatpush.msrb.mxu0 %v2051_v11  ;;  %3491 = vmatpush.msra.mxu2 %v2014_v54  ;;  %v2012_v11 = vld [vmem:[%s16393_s5 + $0x1e38] sm:$0xff]  ;;  %v1010_v54 = vmul.f32 %v1007_v34, %v8609_v6 }
 0x603   :  { %3435 = vmatmul.f32.gmra.mxu3 %v1000_v17  ;;  %3475 = vmatpush.msra.mxu1 %v1991_v24  ;;  %v1989_v24 = vld [vmem:[%s16393_s5 + $0x1d80] sm:$0xff]  ;;  %v2030_v17 = vld [vmem:[%s16393_s5 + $0x1ec8] sm:$0xff]  ;;  %v2068_v34 = vld [vmem:[%s16393_s5 + $0x1ff8] sm:$0xff] }
 0x604   :  { %3512 = vmatpush.msra.mxu3 %v2032_v18  ;;  %3533 = vmatpush.msrb.mxu0 %v2050_v57  ;;  %v2048_v18 = vld [vmem:[%s16393_s5 + $0x1f58] sm:$0xff]  ;;  %v1019_v57 = vmul.f32 %v11151_v5, %v8428_v41  ;;  %v2047_v5 = vld [vmem:[%s16393_s5 + $0x1f50] sm:$0xff] }
 0x605   :  { %3492 = vmatpush.msra.mxu2 %v2013_v50  ;;  %3476 = vmatpush.msra.mxu1 %v1990_v60  ;;  %v2011_v50 = vld [vmem:[%s16393_s5 + $0x1e30] sm:$0xff]  ;;  %v11514_v60 = vpop.f32.mrf.mxu3 }
 0x606   :  { %3513 = vmatpush.msra.mxu3 %v2031_v23  ;;  %3534 = vmatpush.msrb.mxu0 %v2049_v32  ;;  %v2029_v23 = vld [vmem:[%s16393_s5 + $0x1ec0] sm:$0xff]  ;;  %v2010_v32 = vld [vmem:[%s16393_s5 + $0x1e28] sm:$0xff] }
 0x607   :  { %3493 = vmatpush.msra.mxu2 %v2012_v11  ;;  %3458 = vmatmul.f32.gmra.mxu0 %v1010_v54  ;;  %v2067_v11 = vld [vmem:[%s16393_s5 + $0x1ff0] sm:$0xff]  ;;  %v2028_v54 = vld [vmem:[%s16393_s5 + $0x1eb8] sm:$0xff] }
 0x608   :  { %3477 = vmatpush.msra.mxu1 %v1989_v24  ;;  %3514 = vmatpush.msra.mxu3 %v2030_v17  ;;  %v2046_v24 = vld [vmem:[%s16393_s5 + $0x1f48] sm:$0xff]  ;;  %v11534_v17 = vpop.f32.mrf.mxu0 }
 0x609   :  { %3535 = vmatpush.msrb.mxu0 %v2048_v18  ;;  %3478 = vmatmul.f32.vlgmr.msra.gmra.mxu1 %v1019_v57  ;;  %v11536_v18 = vpop.f32.mrf.mxu2  ;;  %v2009_v57 = vld [vmem:[%s16393_s5 + $0x1e20] sm:$0xff] }
 0x60a   :  { %3494 = vmatpush.msra.mxu2 %v2011_v50  ;;  %3554 = vmatpush.msrb.mxu1 %v2068_v34  ;;  %v2066_v50 = vld [vmem:[%s16393_s5 + $0x1fe8] sm:$0xff]  ;;  %v2027_v34 = vld [vmem:[%s16393_s5 + $0x1eb0] sm:$0xff] }
 0x60b   :  { %3515 = vmatpush.msra.mxu3 %v2029_v23  ;;  %3536 = vmatpush.msrb.mxu0 %v2047_v5  ;;  %v1017_v23 = vpop.permute.xlu2 %1016  ;;  %v2008_v5 = vld [vmem:[%s16393_s5 + $0x1e18] sm:$0xff] }
 0x60c   :  { %3495 = vmatpush.msra.mxu2 %v2010_v32  ;;  %3555 = vmatpush.msrb.mxu1 %v2067_v11  ;;  %v2065_v32 = vld [vmem:[%s16393_s5 + $0x1fe0] sm:$0xff]  ;;  %v2026_v11 = vld [vmem:[%s16393_s5 + $0x1ea8] sm:$0xff]  ;;  %v1020_v45 = vmul.f32 %v1017_v23, %v8609_v6 }
 0x60d   :  { %3516 = vmatpush.msra.mxu3 %v2028_v54  ;;  %3537 = vmatpush.msrb.mxu0 %v2046_v24  ;;  %v11562_v54 = vpop.f32.mrf.mxu1  ;;  %v2007_v24 = vld [vmem:[%s16393_s5 + $0x1e10] sm:$0xff]  ;;  %v11580_v23 = vpop.f32.mrf.mxu3 }
 0x60e   :  { %3496 = vmatpush.msra.mxu2 %v2009_v57  ;;  %3556 = vmatpush.msrb.mxu1 %v2066_v50  ;;  %v2064_v57 = vld [vmem:[%s16393_s5 + $0x1fd8] sm:$0xff]  ;;  %v2025_v50 = vld [vmem:[%s16393_s5 + $0x1ea0] sm:$0xff] }
 0x60f   :  { %3517 = vmatpush.msra.mxu3 %v2027_v34  ;;  %3538 = vmatpush.msrb.mxu0 %v2045_v28  ;;  %v2043_v28 = vld [vmem:[%s16393_s5 + $0x1f30] sm:$0xff]  ;;  %v2006_v34 = vld [vmem:[%s16393_s5 + $0x1e08] sm:$0xff] }
 0x610   :  { %3497 = vmatpush.msra.mxu2 %v2008_v5  ;;  %3557 = vmatpush.msrb.mxu1 %v2065_v32  ;;  %v2063_v5 = vld [vmem:[%s16393_s5 + $0x1fd0] sm:$0xff]  ;;  %v11588_v32 = vpop.f32.mrf.mxu0 }
 0x611   :  { %3518 = vmatpush.msra.mxu3 %v2026_v11  ;;  %3539 = vmatpush.msrb.mxu0 %v2044_v44  ;;  %v2024_v44 = vld [vmem:[%s16393_s5 + $0x1e98] sm:$0xff]  ;;  %v2042_v11 = vld [vmem:[%s16393_s5 + $0x1f28] sm:$0xff]  ;;  %v11601_v26 = vpop.f32.mrf.mxu2 }
 0x612   :  { %3481 = vmatmul.f32.gmra.mxu1 %v1020_v45  ;;  %3498 = vmatpush.msra.mxu2 %v2007_v24  ;;  %v2005_v45 = vld [vmem:[%s16393_s5 + $0x1e00] sm:$0xff]  ;;  %v2062_v24 = vld [vmem:[%s16393_s5 + $0x1fc8] sm:$0xff] }
 0x613   :  { %3558 = vmatpush.msrb.mxu1 %v2064_v57  ;;  %3519 = vmatpush.msra.mxu3 %v2025_v50  ;;  %v2023_v57 = vld [vmem:[%s16393_s5 + $0x1e90] sm:$0xff]  ;;  %v2041_v50 = vld [vmem:[%s16393_s5 + $0x1f20] sm:$0xff] }
 0x614   :  { %3540 = vmatpush.msrb.mxu0 %v2043_v28  ;;  %3499 = vmatpush.msra.mxu2 %v2006_v34  ;;  %v2084_v28 = vld [vmem:[%s16393_s5 + $0x2078] sm:$0xff] }
 0x615   :  { %3559 = vmatpush.msrb.mxu1 %v2063_v5  ;;  %3520 = vmatpush.msra.mxu3 %v2024_v44  ;;  %v11615_v34 = vpop.f32.mrf.mxu1  ;;  %v2022_v5 = vld [vmem:[%s16393_s5 + $0x1e88] sm:$0xff]  ;;  %v2040_v44 = vld [vmem:[%s16393_s5 + $0x1f18] sm:$0xff] }
 0x616   :  { %3541 = vmatpush.msrb.mxu0 %v2042_v11  ;;  %3500 = vmatpush.msra.mxu2 %v2005_v45  ;;  %v11623_v11 = vpop.permute.xlu1 %1052  ;;  %v2083_v45 = vld [vmem:[%s16393_s5 + $0x2070] sm:$0xff] }
 0x617   :  { %3560 = vmatpush.msrb.mxu1 %v2062_v24  ;;  %3501 = vmatmul.f32.vlgmr.msra.gmra.mxu2 %v1029_v13  ;;  %v2060_v13 = vld [vmem:[%s16393_s5 + $0x1fb8] sm:$0xff]  ;;  %v2021_v24 = vld [vmem:[%s16393_s5 + $0x1e80] sm:$0xff] }
 0x618   :  { %3521 = vmatpush.msra.mxu3 %v2023_v57  ;;  %3542 = vmatpush.msrb.mxu0 %v2041_v50  ;;  %v11637_v57 = vpop.f32.mrf.mxu3  ;;  %v2082_v50 = vld [vmem:[%s16393_s5 + $0x2068] sm:$0xff] }
 0x619   :  { %3577 = vmatpush.msrb.mxu2 %v2084_v28  ;;  %3561 = vmatpush.msrb.mxu1 %v2061_v53  ;;  %v1039_v28 = vmul.f32 %v10896_v22, %v8428_v41  ;;  %v2059_v53 = vld [vmem:[%s16393_s5 + $0x1fb0] sm:$0xff]  ;;  %v2081_v22 = vld [vmem:[%s16393_s5 + $0x2060] sm:$0xff] }
 0x61a   :  { %3522 = vmatpush.msra.mxu3 %v2022_v5  ;;  %3543 = vmatpush.msrb.mxu0 %v2040_v44  ;;  %v2038_v5 = vld [vmem:[%s16393_s5 + $0x1f08] sm:$0xff]  ;;  %v11656_v44 = vpop.f32.mrf.mxu0 }
 0x61b   :  { %3578 = vmatpush.msrb.mxu2 %v2083_v45  ;;  %3562 = vmatpush.msrb.mxu1 %v2060_v13  ;;  %v11658_v45 = vpop.f32.mrf.mxu2  ;;  %v2058_v13 = vld [vmem:[%s16393_s5 + $0x1fa8] sm:$0xff] }
 0x61c   :  { %3523 = vmatpush.msra.mxu3 %v2021_v24  ;;  %3544 = vmatpush.msrb.mxu0 %v2039_v63  ;;  %16595 = vst [vmem:[#allocation19_spill] sm:$0xff] %v11658_v45  ;;  %v2099_v63 = vld [vmem:[%s16393_s5 + $0x20f0] sm:$0xff]  ;;  %v2037_v24 = vld [vmem:[%s16393_s5 + $0x1f00] sm:$0xff] }
 0x61d   :  { %3579 = vmatpush.msrb.mxu2 %v2082_v50  ;;  %3524 = vmatmul.f32.vlgmr.msra.gmra.mxu3 %v1039_v28  ;;  %v2080_v50 = vld [vmem:[%s16393_s5 + $0x2058] sm:$0xff]  ;;  %v1049_v28 = vmul.f32 %v10933_v16, %v8428_v41  ;;  %v11681_v7 = vpop.f32.mrf.mxu1  ;;  %v2079_v16 = vld [vmem:[%s16393_s5 + $0x2050] sm:$0xff] }
 0x61e   :  { %3563 = vmatpush.msrb.mxu1 %v2059_v53  ;;  %3600 = vmatpush.msrb.mxu3 %v2100_v37  ;;  %v2057_v37 = vld [vmem:[%s16393_s5 + $0x1fa0] sm:$0xff]  ;;  %v2098_v53 = vld [vmem:[%s16393_s5 + $0x20e8] sm:$0xff] }
 0x61f   :  { %3545 = vmatpush.msrb.mxu0 %v2038_v5  ;;  %3580 = vmatpush.msrb.mxu2 %v2081_v22  ;;  %v2116_v5 = vld [vmem:[%s16393_s5 + $0x2178] sm:$0xff] }
 0x620   :  { %3564 = vmatpush.msrb.mxu1 %v2058_v13  ;;  %3601 = vmatpush.msrb.mxu3 %v2099_v63  ;;  %v11689_v22 = vpop.f32.mrf.mxu3  ;;  %v1037_v13 = vpop.permute.xlu1 %1036  ;;  %v2056_v63 = vld [vmem:[%s16393_s5 + $0x1f98] sm:$0xff] }
 0x621   :  { %3504 = vmatmul.f32.gmra.mxu2 %v1030_v29  ;;  %3546 = vmatpush.msrb.mxu0 %v2037_v24  ;;  %16596 = vst [vmem:[#allocation20_spill] sm:$0xff] %v11689_v22  ;;  %v2097_v29 = vld [vmem:[%s16393_s5 + $0x20e0] sm:$0xff]  ;;  %v2115_v24 = vld [vmem:[%s16393_s5 + $0x2170] sm:$0xff]  ;;  %v1040_v59 = vmul.f32 %v1037_v13, %v8609_v6  ;;  %v2054_v13 = vld [vmem:[%s16393_s5 + $0x1f88] sm:$0xff] }
 0x622   :  { %3581 = vmatpush.msrb.mxu2 %v2080_v50  ;;  %3547 = vmatmul.f32.vlgmr.msrb.gmra.mxu0 %v1049_v28  ;;  %v2055_v50 = vld [vmem:[%s16393_s5 + $0x1f90] sm:$0xff]  ;;  %v11706_v28 = vpop.f32.mrf.mxu0 }
 0x623   :  { %3565 = vmatpush.msrb.mxu1 %v2057_v37  ;;  %3602 = vmatpush.msrb.mxu3 %v2098_v53  ;;  %16597 = vst [vmem:[#allocation21_spill] sm:$0xff] %v11706_v28  ;;  %v2096_v37 = vld [vmem:[%s16393_s5 + $0x20d8] sm:$0xff]  ;;  %v2114_v53 = vld [vmem:[%s16393_s5 + $0x2168] sm:$0xff]  ;;  %v2095_v28 = vld [vmem:[%s16393_s5 + $0x20d0] sm:$0xff] }
 0x624   :  { %3623 = vmatpush.msra.mxu0 %v2116_v5  ;;  %3582 = vmatpush.msrb.mxu2 %v2079_v16  ;;  %v1047_v5 = vpop.permute.xlu0 %1046  ;;  %v2077_v16 = vld [vmem:[%s16393_s5 + $0x2040] sm:$0xff] }
 0x625   :  { %3566 = vmatpush.msrb.mxu1 %v2056_v63  ;;  %3603 = vmatpush.msrb.mxu3 %v2097_v29  ;;  %v11721_v63 = vpop.permute.xlu2 %1062  ;;  %v11723_v29 = vpop.f32.mrf.mxu2  ;;  %v1050_v22 = vmul.f32 %v1047_v5, %v8609_v6  ;;  %v2075_v5 = vld [vmem:[%s16393_s5 + $0x2030] sm:$0xff] }
 0x626   :  { %3624 = vmatpush.msra.mxu0 %v2115_v24  ;;  %3583 = vmatpush.msrb.mxu2 %v2078_v35  ;;  %v2113_v35 = vld [vmem:[%s16393_s5 + $0x2160] sm:$0xff]  ;;  %v2076_v24 = vld [vmem:[%s16393_s5 + $0x2038] sm:$0xff]  ;;  %v11735_v45 = vpop.f32.mrf.mxu1 }
 0x627   :  { %3527 = vmatmul.f32.gmra.mxu3 %v1040_v59  ;;  %3567 = vmatpush.msrb.mxu1 %v2055_v50  ;;  %16598 = vst [vmem:[#allocation22_spill] sm:$0xff] %v11735_v45  ;;  %v2053_v59 = vld [vmem:[%s16393_s5 + $0x1f80] sm:$0xff]  ;;  %v2094_v50 = vld [vmem:[%s16393_s5 + $0x20c8] sm:$0xff]  ;;  %v2108_v45 = vld [vmem:[%s16393_s5 + $0x2138] sm:$0xff] }
 0x628   :  { %3604 = vmatpush.msrb.mxu3 %v2096_v37  ;;  %3625 = vmatpush.msra.mxu0 %v2114_v53  ;;  %v2112_v37 = vld [vmem:[%s16393_s5 + $0x2158] sm:$0xff]  ;;  %v1059_v53 = vmul.f32 %v11623_v11, %v8428_v41  ;;  %v2111_v11 = vld [vmem:[%s16393_s5 + $0x2150] sm:$0xff] }
 0x629   :  { %3584 = vmatpush.msrb.mxu2 %v2077_v16  ;;  %3568 = vmatpush.msrb.mxu1 %v2054_v13  ;;  %v2132_v16 = vld [vmem:[%s16393_s5 + $0x21f8] sm:$0xff]  ;;  %v11754_v13 = vpop.f32.mrf.mxu3 }
 0x62a   :  { %3605 = vmatpush.msrb.mxu3 %v2095_v28  ;;  %3626 = vmatpush.msra.mxu0 %v2113_v35  ;;  %16599 = vst [vmem:[#allocation23_spill] sm:$0xff] %v11754_v13  ;;  %v2093_v28 = vld [vmem:[%s16393_s5 + $0x20c0] sm:$0xff]  ;;  %v2131_v35 = vld [vmem:[%s16393_s5 + $0x21f0] sm:$0xff]  ;;  %v2122_v13 = vld [vmem:[%s16393_s5 + $0x21a8] sm:$0xff] }
 0x62b   :  { %3585 = vmatpush.msrb.mxu2 %v2076_v24  ;;  %3550 = vmatmul.f32.gmra.mxu0 %v1050_v22  ;;  %v2074_v22 = vld [vmem:[%s16393_s5 + $0x2028] sm:$0xff]  ;;  %v2092_v24 = vld [vmem:[%s16393_s5 + $0x20b8] sm:$0xff] }
 0x62c   :  { %3569 = vmatpush.msrb.mxu1 %v2053_v59  ;;  %3606 = vmatpush.msrb.mxu3 %v2094_v50  ;;  %v2110_v59 = vld [vmem:[%s16393_s5 + $0x2148] sm:$0xff]  ;;  %v11774_v50 = vpop.f32.mrf.mxu0 }
 0x62d   :  { %3627 = vmatpush.msra.mxu0 %v2112_v37  ;;  %3570 = vmatmul.f32.vlgmr.msrb.gmra.mxu1 %v1059_v53  ;;  %16600 = vst [vmem:[#allocation24_spill] sm:$0xff] %v11774_v50  ;;  %v11776_v37 = vpop.f32.mrf.mxu2  ;;  %v2073_v53 = vld [vmem:[%s16393_s5 + $0x2020] sm:$0xff] }
 0x62e   :  { %3586 = vmatpush.msrb.mxu2 %v2075_v5  ;;  %3646 = vmatpush.msra.mxu1 %v2132_v16  ;;  %16601 = vst [vmem:[#allocation25_spill] sm:$0xff] %v11776_v37  ;;  %v2130_v5 = vld [vmem:[%s16393_s5 + $0x21e8] sm:$0xff]  ;;  %v2091_v16 = vld [vmem:[%s16393_s5 + $0x20b0] sm:$0xff]  ;;  %v2109_v37 = vld [vmem:[%s16393_s5 + $0x2140] sm:$0xff] }
 0x62f   :  { %3607 = vmatpush.msrb.mxu3 %v2093_v28  ;;  %3628 = vmatpush.msra.mxu0 %v2111_v11  ;;  %v1057_v28 = vpop.permute.xlu2 %1056  ;;  %v2072_v11 = vld [vmem:[%s16393_s5 + $0x2018] sm:$0xff] }
 0x630   :  { %3587 = vmatpush.msrb.mxu2 %v2074_v22  ;;  %3647 = vmatpush.msra.mxu1 %v2131_v35  ;;  %v2129_v22 = vld [vmem:[%s16393_s5 + $0x21e0] sm:$0xff]  ;;  %v2090_v35 = vld [vmem:[%s16393_s5 + $0x20a8] sm:$0xff]  ;;  %v1060_v50 = vmul.f32 %v1057_v28, %v8609_v6  ;;  %v1073_v28 = vpop.permute.xlu1 %1072 }
 0x631   :  { %3608 = vmatpush.msrb.mxu3 %v2092_v24  ;;  %3629 = vmatpush.msra.mxu0 %v2110_v59  ;;  %v11802_v24 = vpop.f32.mrf.mxu1  ;;  %v2071_v59 = vld [vmem:[%s16393_s5 + $0x2010] sm:$0xff] }
 0x632   :  { %3588 = vmatpush.msrb.mxu2 %v2073_v53  ;;  %3648 = vmatpush.msra.mxu1 %v2130_v5  ;;  %16602 = vst [vmem:[#allocation26_spill] sm:$0xff] %v11802_v24  ;;  %v11808_v53 = vpop.f32.mrf.mxu3  ;;  %v2128_v5 = vld [vmem:[%s16393_s5 + $0x21d8] sm:$0xff]  ;;  %v2089_v24 = vld [vmem:[%s16393_s5 + $0x20a0] sm:$0xff] }
 0x633   :  { %3609 = vmatpush.msrb.mxu3 %v2091_v16  ;;  %3630 = vmatpush.msra.mxu0 %v2109_v37  ;;  %16603 = vst [vmem:[#allocation27_spill] sm:$0xff] %v11808_v53  ;;  %v2107_v37 = vld [vmem:[%s16393_s5 + $0x2130] sm:$0xff]  ;;  %v2070_v16 = vld [vmem:[%s16393_s5 + $0x2008] sm:$0xff]  ;;  %v1069_v53 = vmul.f32 %v11721_v63, %v8428_v41  ;;  %v2125_v63 = vld [vmem:[%s16393_s5 + $0x21c0] sm:$0xff] }
 0x634   :  { %3589 = vmatpush.msrb.mxu2 %v2072_v11  ;;  %3649 = vmatpush.msra.mxu1 %v2129_v22  ;;  %v2127_v11 = vld [vmem:[%s16393_s5 + $0x21d0] sm:$0xff]  ;;  %v2088_v22 = vld [vmem:[%s16393_s5 + $0x2098] sm:$0xff] }
 0x635   :  { %3610 = vmatpush.msrb.mxu3 %v2090_v35  ;;  %3631 = vmatpush.msra.mxu0 %v2108_v45  ;;  %v11828_v45 = vpop.f32.mrf.mxu0  ;;  %v2106_v35 = vld [vmem:[%s16393_s5 + $0x2128] sm:$0xff] }
 0x636   :  { %3573 = vmatmul.f32.gmra.mxu1 %v1060_v50  ;;  %3590 = vmatpush.msrb.mxu2 %v2071_v59  ;;  %16604 = vst [vmem:[#allocation28_spill] sm:$0xff] %v11828_v45  ;;  %v2069_v50 = vld [vmem:[%s16393_s5 + $0x2000] sm:$0xff]  ;;  %v2126_v59 = vld [vmem:[%s16393_s5 + $0x21c8] sm:$0xff]  ;;  %v11841_v45 = vpop.f32.mrf.mxu2 }
 0x637   :  { %3650 = vmatpush.msra.mxu1 %v2128_v5  ;;  %3611 = vmatpush.msrb.mxu3 %v2089_v24  ;;  %16605 = vst [vmem:[#allocation29_spill] sm:$0xff] %v11841_v45  ;;  %v2087_v24 = vld [vmem:[%s16393_s5 + $0x2090] sm:$0xff]  ;;  %v2105_v5 = vld [vmem:[%s16393_s5 + $0x2120] sm:$0xff]  ;;  %v2164_v45 = vld [vmem:[%s16393_s5 + $0x22f8] sm:$0xff] }
 0x638   :  { %3632 = vmatpush.msra.mxu0 %v2107_v37  ;;  %3591 = vmatpush.msrb.mxu2 %v2070_v16  ;;  %v2148_v37 = vld [vmem:[%s16393_s5 + $0x2278] sm:$0xff] }
 0x639   :  { %3651 = vmatpush.msra.mxu1 %v2127_v11  ;;  %3612 = vmatpush.msrb.mxu3 %v2088_v22  ;;  %v11855_v16 = vpop.f32.mrf.mxu1  ;;  %v2086_v11 = vld [vmem:[%s16393_s5 + $0x2088] sm:$0xff]  ;;  %v2104_v22 = vld [vmem:[%s16393_s5 + $0x2118] sm:$0xff] }
 0x63a   :  { %3633 = vmatpush.msra.mxu0 %v2106_v35  ;;  %3592 = vmatpush.msrb.mxu2 %v2069_v50  ;;  %16606 = vst [vmem:[#allocation30_spill] sm:$0xff] %v11855_v16  ;;  %v2147_v35 = vld [vmem:[%s16393_s5 + $0x2270] sm:$0xff]  ;;  %v2124_v50 = vld [vmem:[%s16393_s5 + $0x21b8] sm:$0xff]  ;;  %v1083_v16 = vpop.permute.xlu0 %1082 }
 0x63b   :  { %3652 = vmatpush.msra.mxu1 %v2126_v59  ;;  %3593 = vmatmul.f32.vlgmr.msrb.gmra.mxu2 %v1069_v53  ;;  %v2085_v53 = vld [vmem:[%s16393_s5 + $0x2080] sm:$0xff]  ;;  %v2103_v59 = vld [vmem:[%s16393_s5 + $0x2110] sm:$0xff] }
 0x63c   :  { %3613 = vmatpush.msrb.mxu3 %v2087_v24  ;;  %3634 = vmatpush.msra.mxu0 %v2105_v5  ;;  %v11875_v24 = vpop.f32.mrf.mxu3  ;;  %v2146_v5 = vld [vmem:[%s16393_s5 + $0x2268] sm:$0xff] }
 0x63d   :  { %3669 = vmatpush.msra.mxu2 %v2148_v37  ;;  %3653 = vmatpush.msra.mxu1 %v2125_v63  ;;  %16607 = vst [vmem:[#allocation31_spill] sm:$0xff] %v11875_v24  ;;  %v1079_v37 = vmul.f32 %v1073_v28, %v8428_v41  ;;  %v2123_v63 = vld [vmem:[%s16393_s5 + $0x21b0] sm:$0xff]  ;;  %v1077_v24 = vpop.permute.xlu2 %1076  ;;  %v2145_v28 = vld [vmem:[%s16393_s5 + $0x2260] sm:$0xff] }
 0x63e   :  { %3614 = vmatpush.msrb.mxu3 %v2086_v11  ;;  %3635 = vmatpush.msra.mxu0 %v2104_v22  ;;  %v1067_v11 = vpop.permute.xlu1 %1066  ;;  %v2102_v22 = vld [vmem:[%s16393_s5 + $0x2108] sm:$0xff] }
 0x63f   :  { %3670 = vmatpush.msra.mxu2 %v2147_v35  ;;  %3654 = vmatpush.msra.mxu1 %v2124_v50  ;;  %v11893_v35 = vpop.f32.mrf.mxu0  ;;  %v11895_v50 = vpop.f32.mrf.mxu2 }
 0x640   :  { %3615 = vmatpush.msrb.mxu3 %v2085_v53  ;;  %3636 = vmatpush.msra.mxu0 %v2103_v59  ;;  %16608 = vst [vmem:[#allocation32_spill] sm:$0xff] %v11893_v35  ;;  %v2163_v53 = vld [vmem:[%s16393_s5 + $0x22f0] sm:$0xff]  ;;  %v2101_v59 = vld [vmem:[%s16393_s5 + $0x2100] sm:$0xff]  ;;  %v1070_v35 = vmul.f32 %v1067_v11, %v8609_v6  ;;  %v2180_v11 = vld [vmem:[%s16393_s5 + $0x2378] sm:$0xff] }
 0x641   :  { %16609 = vst [vmem:[#allocation33_spill] sm:$0xff] %v11895_v50  ;;  %3671 = vmatpush.msra.mxu2 %v2146_v5  ;;  %3616 = vmatmul.f32.vlgmr.msrb.gmra.mxu3 %v1079_v37  ;;  %v2144_v5 = vld [vmem:[%s16393_s5 + $0x2258] sm:$0xff]  ;;  %v1089_v37 = vmul.f32 %v1083_v16, %v8428_v41  ;;  %v11917_v50 = vpop.f32.mrf.mxu1  ;;  %v2238_v16 = vadd.f32 %v11095_v62, %v11052_v49  ;;  %v2179_v49 = vld [vmem:[%s16393_s5 + $0x2370] sm:$0xff]  ;;  %v2142_v62 = vld [vmem:[%s16393_s5 + $0x2248] sm:$0xff] }
 0x642   :  { %3655 = vmatpush.msra.mxu1 %v2123_v63  ;;  %3692 = vmatpush.msra.mxu3 %v2164_v45  ;;  %v2121_v45 = vld [vmem:[%s16393_s5 + $0x21a0] sm:$0xff]  ;;  %v2162_v63 = vld [vmem:[%s16393_s5 + $0x22e8] sm:$0xff] }
 0x643   :  { %3637 = vmatpush.msra.mxu0 %v2102_v22  ;;  %3672 = vmatpush.msra.mxu2 %v2145_v28  ;;  %v2241_v22 = vadd.f32 %v11153_v20, %v11104_v58  ;;  %v2119_v58 = vld [vmem:[%s16393_s5 + $0x2190] sm:$0xff]  ;;  %v1080_v20 = vmul.f32 %v1077_v24, %v8609_v6  ;;  %v2141_v24 = vld [vmem:[%s16393_s5 + $0x2240] sm:$0xff] }
 0x644   :  { %3656 = vmatpush.msra.mxu1 %v2122_v13  ;;  %3693 = vmatpush.msra.mxu3 %v2163_v53  ;;  %v2143_v13 = vld [vmem:[%s16393_s5 + $0x2250] sm:$0xff]  ;;  %v11929_v28 = vpop.f32.mrf.mxu3  ;;  %v2161_v53 = vld [vmem:[%s16393_s5 + $0x22e0] sm:$0xff] }
 0x645   :  { %3596 = vmatmul.f32.gmra.mxu2 %v1070_v35  ;;  %3638 = vmatpush.msra.mxu0 %v2101_v59  ;;  %v2120_v35 = vld [vmem:[%s16393_s5 + $0x2198] sm:$0xff] }
 0x646   :  { %3673 = vmatpush.msra.mxu2 %v2144_v5  ;;  %3639 = vmatmul.f32.vlgmr.msra.gmra.mxu0 %v1089_v37  ;;  %v2160_v5 = vld [vmem:[%s16393_s5 + $0x22d8] sm:$0xff]  ;;  %v2178_v37 = vld [vmem:[%s16393_s5 + $0x2368] sm:$0xff] }
 0x647   :  { %3657 = vmatpush.msra.mxu1 %v2121_v45  ;;  %3694 = vmatpush.msra.mxu3 %v2162_v63  ;;  %v11947_v59 = vpop.f32.mrf.mxu0  ;;  %v2261_v45 = vadd.f32 %v11090_v56, %v2238_v16  ;;  %v2264_v63 = vadd.f32 %v11143_v2, %v2241_v22  ;;  %v2159_v56 = vld [vmem:[%s16393_s5 + $0x22d0] sm:$0xff]  ;;  %v2177_v2 = vld [vmem:[%s16393_s5 + $0x2360] sm:$0xff]  ;;  %v2140_v22 = vld [vmem:[%s16393_s5 + $0x2238] sm:$0xff] }
 0x648   :  { %3715 = vmatpush.msrb.mxu0 %v2180_v11  ;;  %3674 = vmatpush.msra.mxu2 %v2143_v13  ;;  %v1087_v11 = vpop.permute.xlu2 %1086  ;;  %v2118_v13 = vld [vmem:[%s16393_s5 + $0x2188] sm:$0xff] }
 0x649   :  { %3658 = vmatpush.msra.mxu1 %v2120_v35  ;;  %3695 = vmatpush.msra.mxu3 %v2161_v53  ;;  %v1093_v35 = vpop.permute.xlu1 %1092  ;;  %v11963_v53 = vpop.f32.mrf.mxu2  ;;  %v2287_v16 = vadd.f32 %v11186_v1, %v2264_v63  ;;  %v2158_v1 = vld [vmem:[%s16393_s5 + $0x22c8] sm:$0xff] }
 0x64a   :  { %3716 = vmatpush.msrb.mxu0 %v2179_v49  ;;  %3675 = vmatpush.msra.mxu2 %v2142_v62  ;;  %v1090_v49 = vmul.f32 %v1087_v11, %v8609_v6  ;;  %v11976_v62 = vpop.f32.mrf.mxu1  ;;  %v1099_v63 = vmul.f32 %v1093_v35, %v8428_v41  ;;  %v2139_v11 = vld [vmem:[%s16393_s5 + $0x2230] sm:$0xff] }
 0x64b   :  { %3619 = vmatmul.f32.gmra.mxu3 %v1080_v20  ;;  %3659 = vmatpush.msra.mxu1 %v2119_v58  ;;  %v2117_v58 = vld [vmem:[%s16393_s5 + $0x2180] sm:$0xff]  ;;  %v2284_v20 = vadd.f32 %v11129_v36, %v2261_v45  ;;  %v2196_v36 = vld [vmem:[%s16393_s5 + $0x23f8] sm:$0xff]  ;;  %v2175_v35 = vld [vmem:[%s16393_s5 + $0x2350] sm:$0xff] }
 0x64c   :  { %3696 = vmatpush.msra.mxu3 %v2160_v5  ;;  %3717 = vmatpush.msrb.mxu0 %v2178_v37  ;;  %v2310_v5 = vadd.f32 %v11225_v27, %v2287_v16  ;;  %v2176_v37 = vld [vmem:[%s16393_s5 + $0x2358] sm:$0xff] }
 0x64d   :  { %3676 = vmatpush.msra.mxu2 %v2141_v24  ;;  %3660 = vmatpush.msra.mxu1 %v2118_v13  ;;  %v2307_v27 = vadd.f32 %v11172_v12, %v2284_v20  ;;  %v11998_v24 = vpop.f32.mrf.mxu3  ;;  %v2157_v13 = vld [vmem:[%s16393_s5 + $0x22c0] sm:$0xff]  ;;  %v2138_v12 = vld [vmem:[%s16393_s5 + $0x2228] sm:$0xff] }
 0x64e   :  { %3697 = vmatpush.msra.mxu3 %v2159_v56  ;;  %3718 = vmatpush.msrb.mxu0 %v2177_v2  ;;  %v2333_v45 = vadd.f32 %v11267_v55, %v2310_v5  ;;  %v2195_v55 = vld [vmem:[%s16393_s5 + $0x23f0] sm:$0xff]  ;;  %v2156_v56 = vld [vmem:[%s16393_s5 + $0x22b8] sm:$0xff]  ;;  %v2174_v2 = vld [vmem:[%s16393_s5 + $0x2348] sm:$0xff] }
 0x64f   :  { %3677 = vmatpush.msra.mxu2 %v2140_v22  ;;  %3642 = vmatmul.f32.gmra.mxu0 %v1090_v49  ;;  %v12018_v16 = vpop.f32.mrf.mxu0  ;;  %v2137_v49 = vld [vmem:[%s16393_s5 + $0x2220] sm:$0xff]  ;;  %v2155_v5 = vld [vmem:[%s16393_s5 + $0x22b0] sm:$0xff] }
 0x650   :  { %3661 = vmatpush.msra.mxu1 %v2117_v58  ;;  %3698 = vmatpush.msra.mxu3 %v2158_v1  ;;  %v2194_v58 = vld [vmem:[%s16393_s5 + $0x23e8] sm:$0xff]  ;;  %v2330_v1 = vadd.f32 %v11217_v61, %v2307_v27  ;;  %v2356_v20 = vadd.f32 %v11274_v21, %v2333_v45  ;;  %v2193_v61 = vld [vmem:[%s16393_s5 + $0x23e0] sm:$0xff]  ;;  %v2135_v45 = vld [vmem:[%s16393_s5 + $0x2210] sm:$0xff] }
 0x651   :  { %3719 = vmatpush.msrb.mxu0 %v2176_v37  ;;  %3662 = vmatmul.f32.vlgmr.msra.gmra.mxu1 %v1099_v63  ;;  %v12020_v22 = vpop.f32.mrf.mxu2  ;;  %v2173_v37 = vld [vmem:[%s16393_s5 + $0x2340] sm:$0xff]  ;;  %v1097_v63 = vpop.permute.xlu1 %1096  ;;  %v2154_v21 = vld [vmem:[%s16393_s5 + $0x22a8] sm:$0xff] }
 0x652   :  { %3678 = vmatpush.msra.mxu2 %v2139_v11  ;;  %3738 = vmatpush.msrb.mxu1 %v2196_v36  ;;  %v2136_v11 = vld [vmem:[%s16393_s5 + $0x2218] sm:$0xff]  ;;  %v12048_v27 = vpop.f32.mrf.mxu1 }
 0x653   :  { %3699 = vmatpush.msra.mxu3 %v2157_v13  ;;  %3720 = vmatpush.msrb.mxu0 %v2175_v35  ;;  %v2172_v36 = vld [vmem:[%s16393_s5 + $0x2338] sm:$0xff]  ;;  %v2353_v13 = vadd.f32 %v11209_v51, %v2330_v1  ;;  %v2379_v35 = vadd.f32 %v11302_v47, %v2356_v20  ;;  %v2171_v51 = vld [vmem:[%s16393_s5 + $0x2330] sm:$0xff]  ;;  %v2134_v47 = vld [vmem:[%s16393_s5 + $0x2208] sm:$0xff] }
 0x654   :  { %3679 = vmatpush.msra.mxu2 %v2138_v12  ;;  %3739 = vmatpush.msrb.mxu1 %v2195_v55  ;;  %v1100_v12 = vmul.f32 %v1097_v63, %v8609_v6  ;;  %v2191_v1 = vld [vmem:[%s16393_s5 + $0x23d0] sm:$0xff]  ;;  %v2152_v20 = vld [vmem:[%s16393_s5 + $0x2298] sm:$0xff]  ;;  %v2190_v63 = vld [vmem:[%s16393_s5 + $0x23c8] sm:$0xff] }
 0x655   :  { %3700 = vmatpush.msra.mxu3 %v2156_v56  ;;  %3721 = vmatpush.msrb.mxu0 %v2174_v2  ;;  %v12056_v55 = vpop.f32.mrf.mxu3  ;;  %v2192_v56 = vld [vmem:[%s16393_s5 + $0x23d8] sm:$0xff]  ;;  %v2153_v2 = vld [vmem:[%s16393_s5 + $0x22a0] sm:$0xff] }
 0x656   :  { %3680 = vmatpush.msra.mxu2 %v2137_v49  ;;  %3740 = vmatpush.msrb.mxu1 %v2194_v58  ;;  %v2376_v49 = vadd.f32 %v11249_v15, %v2353_v13  ;;  %v2402_v58 = vadd.f32 %v11342_v14, %v2379_v35  ;;  %v2170_v15 = vld [vmem:[%s16393_s5 + $0x2328] sm:$0xff]  ;;  %v2133_v14 = vld [vmem:[%s16393_s5 + $0x2200] sm:$0xff] }
 0x657   :  { %3701 = vmatpush.msra.mxu3 %v2155_v5  ;;  %3722 = vmatpush.msrb.mxu0 %v2173_v37  ;;  %v12078_v5 = vpop.f32.mrf.mxu0  ;;  %v2189_v13 = vld [vmem:[%s16393_s5 + $0x23c0] sm:$0xff] }
 0x658   :  { %3681 = vmatpush.msra.mxu2 %v2136_v11  ;;  %3741 = vmatpush.msrb.mxu1 %v2193_v61  ;;  %v2399_v37 = vadd.f32 %v11288_v9, %v2376_v49  ;;  %v1101_v11 = vmul.f32 %v8428_v41, %v8107_v4  ;;  %v2169_v9 = vld [vmem:[%s16393_s5 + $0x2320] sm:$0xff]  ;;  %v4626_v4 = vld [vmem:[%s16393_s5 + $0x2650] sm:$0xff] }
 0x659   :  { %3702 = vmatpush.msra.mxu3 %v2154_v21  ;;  %3723 = vmatpush.msrb.mxu0 %v2172_v36  ;;  %v12092_v61 = vpop.f32.mrf.mxu2  ;;  %v2151_v21 = vld [vmem:[%s16393_s5 + $0x2290] sm:$0xff] }
 0x65a   :  { %3665 = vmatmul.f32.gmra.mxu1 %v1100_v12  ;;  %3682 = vmatpush.msra.mxu2 %v2135_v45  ;;  %v2422_v36 = vadd.f32 %v11331_v33, %v2399_v37  ;;  %v2425_v45 = vadd.f32 %v11399_v43, %v2402_v58  ;;  %v12105_v35 = vpop.f32.mrf.mxu1  ;;  %v2150_v12 = vld [vmem:[%s16393_s5 + $0x2288] sm:$0xff]  ;;  %v2168_v33 = vld [vmem:[%s16393_s5 + $0x2318] sm:$0xff] }
 0x65b   :  { %3742 = vmatpush.msrb.mxu1 %v2192_v56  ;;  %3703 = vmatpush.msra.mxu3 %v2153_v2  ;;  %v2188_v43 = vld [vmem:[%s16393_s5 + $0x23b8] sm:$0xff]  ;;  %v2149_v56 = vld [vmem:[%s16393_s5 + $0x2280] sm:$0xff]  ;;  %v2167_v2 = vld [vmem:[%s16393_s5 + $0x2310] sm:$0xff] }
 0x65c   :  { %3724 = vmatpush.msrb.mxu0 %v2171_v51  ;;  %3683 = vmatpush.msra.mxu2 %v2134_v47  ;;  %v16610_v51 = vmov 0   ;;  %v2445_v47 = vadd.f32 %v11340_v40, %v2422_v36  ;;  %v2448_v49 = vadd.f32 %v11406_v0, %v2425_v45  ;;  %v3789_v40 = vld [vmem:[%s16394_s6 + $0x40] sm:$0xff]  ;;  %v16611_v0 = vmov 1  }
 0x65d   :  { %3743 = vmatpush.msrb.mxu1 %v2191_v1  ;;  %3704 = vmatpush.msra.mxu3 %v2152_v20  ;;  %v12125_v58 = vpop.f32.mrf.mxu3  ;;  %v2187_v1 = vld [vmem:[%s16393_s5 + $0x23b0] sm:$0xff]  ;;  %v1103_v20 = vmul.f32 %v8428_v41, %v8113_v48  ;;  %v4624_v48 = vld [vmem:[%s16393_s5 + $0x2640] sm:$0xff] }
 0x65e   :  { %3725 = vmatpush.msrb.mxu0 %v2170_v15  ;;  %3684 = vmatpush.msra.mxu2 %v2133_v14  ;;  %v2166_v15 = vld [vmem:[%s16393_s5 + $0x2308] sm:$0xff]  ;;  %v2468_v36 = vadd.f32 %v11367_v10, %v2445_v47  ;;  %v2471_v45 = vadd.f32 %v11432_v31, %v2448_v49  ;;  %v2184_v31 = vld [vmem:[%s16393_s5 + $0x2398] sm:$0xff]  ;;  %v3785_v49 = vld [vmem:[%s16394_s6 + $0x20] sm:$0xff] }
 0x65f   :  { %3744 = vmatpush.msrb.mxu1 %v2190_v63  ;;  %3685 = vmatmul.f32.vlgmr.msra.gmra.mxu2 %v1101_v11  ;;  %v2186_v14 = vld [vmem:[%s16393_s5 + $0x23a8] sm:$0xff]  ;;  %v12142_v37 = vpop.f32.mrf.mxu0  ;;  %v1102_v11 = vmul.f32 %v8609_v6, %v8090_v30  ;;  %v16676_v30 = vmov 44  }
 0x660   :  { %3705 = vmatpush.msra.mxu3 %v2151_v21  ;;  %3726 = vmatpush.msrb.mxu0 %v2169_v9  ;;  %v2165_v21 = vld [vmem:[%s16393_s5 + $0x2300] sm:$0xff]  ;;  %v3788_v9 = vld [vmem:[%s16394_s6 + $0x38] sm:$0xff]  ;;  %v2494_v10 = vadd.f32 %v11470_v19, %v2471_v45  ;;  %v1104_v19 = vmul.f32 %v8609_v6, %v8096_v38  ;;  %v16679_v38 = vmov 47  }
 0x661   :  { %3745 = vmatpush.msrb.mxu1 %v2189_v13  ;;  %7571 = vset.pattern.permute.xlu2 %v16610_v51  ;;  %v12144_v63 = vpop.f32.mrf.mxu2  ;;  %v2185_v13 = vld [vmem:[%s16393_s5 + $0x23a0] sm:$0xff] }
 0x662   :  { %3706 = vmatpush.msra.mxu3 %v2150_v12  ;;  %3727 = vmatpush.msrb.mxu0 %v2168_v33  ;;  %v1105_v12 = vmul.f32 %v8428_v41, %v8105_v42  ;;  %v3787_v33 = vld [vmem:[%s16394_s6 + $0x30] sm:$0xff] }
 0x663   :  { %3746 = vmatpush.msrb.mxu1 %v2188_v43  ;;  %7572 = vset.pattern.permute.xlu1 %v16611_v0  ;;  %v2491_v43 = vadd.f32 %v11408_v25, %v2468_v36  ;;  %v2183_v25 = vld [vmem:[%s16393_s5 + $0x2390] sm:$0xff] }
 0x664   :  { %3707 = vmatpush.msra.mxu3 %v2149_v56  ;;  %3728 = vmatpush.msrb.mxu0 %v2167_v2  ;;  %v12169_v56 = vpop.f32.mrf.mxu1  ;;  %v3786_v2 = vld [vmem:[%s16394_s6 + $0x28] sm:$0xff] }
 0x665   :  { %3708 = vmatmul.f32.vlgmr.msra.gmra.mxu3 %v1103_v20  ;;  %3747 = vmatpush.msrb.mxu1 %v2187_v1  ;;  %v12174_v47 = vpop.f32.mrf.mxu3  ;;  %v2514_v1 = vadd.f32 %v11463_v39, %v2491_v43  ;;  %v2517_v20 = vadd.f32 %v11514_v60, %v2494_v10  ;;  %v2181_v39 = vld [vmem:[%s16393_s5 + $0x2380] sm:$0xff]  ;;  %v1106_v60 = vmul.f32 %v8609_v6, %v8111_v46 }
 0x666   :  { %3729 = vmatpush.msrb.mxu0 %v2166_v15  ;;  %3805 = vmatpush.msrb.mxu3 %v3789_v40  ;;  %v2182_v15 = vld [vmem:[%s16393_s5 + $0x2388] sm:$0xff] }
 0x667   :  { %3748 = vmatpush.msrb.mxu1 %v2186_v14  ;;  %3688 = vmatmul.f32.gmra.mxu2 %v1102_v11  ;;  %v12189_v40 = vpop.f32.mrf.mxu0  ;;  %v3784_v14 = vld [vmem:[%s16394_s6 + $0x18] sm:$0xff]  ;;  %v2537_v36 = vadd.f32 %v11468_v3, %v2514_v1  ;;  %v2540_v45 = vadd.f32 %v11534_v17, %v2517_v20  ;;  %v16612_v3 = vld [vmem:[#allocation18_spill] sm:$0xff] }
 0x668   :  { %3730 = vmatpush.msrb.mxu0 %v2165_v21  ;;  %3806 = vmatpush.msrb.mxu3 %v3788_v9  ;;  %v3783_v21 = vld [vmem:[%s16394_s6 + $0x10] sm:$0xff]  ;;  %v1107_v9 = vmul.f32 %v8428_v41, %v8118_v52 }
 0x669   :  { %3731 = vmatmul.f32.vlgmr.msrb.gmra.mxu0 %v1105_v12  ;;  %3749 = vmatpush.msrb.mxu1 %v2185_v13  ;;  %v12197_v11 = vpop.f32.mrf.mxu2  ;;  %v3782_v12 = vld [vmem:[%s16394_s6 + $0x8] sm:$0xff]  ;;  %v2563_v41 = vadd.f32 %v11562_v54, %v2540_v45 }
 0x66a   :  { %3807 = vmatpush.msrb.mxu3 %v3787_v33  ;;  %v2560_v33 = vadd.f32 %v11495_v8, %v2537_v36 }
 0x66b   :  { %3750 = vmatpush.msrb.mxu1 %v2184_v31  ;;  %v2586_v10 = vadd.f32 %v11601_v26, %v2563_v41 }
 0x66c   :  { %3808 = vmatpush.msrb.mxu3 %v3786_v2  ;;  %v12208_v13 = vpop.f32.mrf.mxu1  ;;  %v2583_v17 = vadd.f32 %v11536_v18, %v2560_v33 }
 0x66d   :  { %3711 = vmatmul.f32.gmra.mxu3 %v1104_v19  ;;  %3751 = vmatpush.msrb.mxu1 %v2183_v25  ;;  %v12215_v43 = vpop.f32.mrf.mxu3  ;;  %v2609_v25 = vadd.f32 %v11637_v57, %v2586_v10  ;;  %v16613_v19 = vld [vmem:[#allocation15_spill] sm:$0xff]  ;;  %v16620_v10 = vld [vmem:[#allocation22_spill] sm:$0xff] }
 0x66e   :  { %3809 = vmatpush.msrb.mxu3 %v3785_v49  ;;  %v1108_v8 = vmul.f32 %v8609_v6, %v16613_v19  ;;  %v2606_v54 = vadd.f32 %v11580_v23, %v2583_v17  ;;  %v16619_v17 = vld [vmem:[#allocation26_spill] sm:$0xff] }
 0x66f   :  { %3752 = vmatpush.msrb.mxu1 %v2182_v15  ;;  %v12221_v31 = vpop.f32.mrf.mxu0  ;;  %v2632_v1 = vadd.f32 %v11656_v44, %v2609_v25  ;;  %v16621_v25 = vld [vmem:[#allocation29_spill] sm:$0xff] }
 0x670   :  { %3810 = vmatpush.msrb.mxu3 %v3784_v14  ;;  %v2629_v26 = vadd.f32 %v11588_v32, %v2606_v54  ;;  %v16617_v32 = vld [vmem:[#allocation24_spill] sm:$0xff] }
 0x671   :  { %3734 = vmatmul.f32.gmra.mxu0 %v1106_v60  ;;  %3753 = vmatpush.msrb.mxu1 %v2181_v39  ;;  %v12223_v2 = vpop.f32.mrf.mxu2  ;;  %v2655_v15 = vadd.f32 %v11681_v7, %v2632_v1  ;;  %v16614_v39 = vld [vmem:[#allocation19_spill] sm:$0xff]  ;;  %v16618_v7 = vld [vmem:[#allocation21_spill] sm:$0xff] }
 0x672   :  { %3754 = vmatmul.f32.vlgmr.msrb.gmra.mxu1 %v1107_v9  ;;  %3811 = vmatpush.msrb.mxu3 %v3783_v21  ;;  %v2652_v57 = vadd.f32 %v11615_v34, %v2629_v26  ;;  %v16615_v21 = vld [vmem:[#allocation23_spill] sm:$0xff]  ;;  %v16616_v9 = vld [vmem:[#allocation20_spill] sm:$0xff]  ;;  %v16622_v1 = vld [vmem:[#allocation25_spill] sm:$0xff] }
 0x673   :  { %v2678_v6 = vadd.f32 %v11723_v29, %v2655_v15  ;;  %v16623_v15 = vld [vmem:[#allocation31_spill] sm:$0xff] }
 0x674   :  { %3812 = vmatpush.msrb.mxu3 %v3782_v12  ;;  %v12229_v49 = vpop.f32.mrf.mxu1  ;;  %v2675_v60 = vadd.f32 %v16614_v39, %v2652_v57  ;;  %v16624_v39 = vld [vmem:[#allocation27_spill] sm:$0xff] }
 0x675   :  { %7356 = vmatmul.msk.f32.vlgmr.msrb.gmra.mxu3 %vm3793_vm5, %v16612_v3  ;;  %v12232_v20 = vpop.f32.mrf.mxu3  ;;  %v2701_v44 = vadd.f32 %v16615_v21, %v2678_v6 }
 0x676   :  { %v2698_v36 = vadd.f32 %v16616_v9, %v2675_v60 }
 0x677   :  { %v12235_v18 = vpop.f32.mrf.mxu0  ;;  %v2724_v12 = vadd.f32 %v16617_v32, %v2701_v44  ;;  %v16625_v44 = vld [vmem:[#allocation32_spill] sm:$0xff] }
 0x678   :  { %v2721_v3 = vadd.f32 %v16618_v7, %v2698_v36  ;;  %v16626_v32 = vld [vmem:[#allocation28_spill] sm:$0xff] }
 0x679   :  { %v12238_v14 = vpop.f32.mrf.mxu2  ;;  %v2747_v34 = vadd.f32 %v16619_v17, %v2724_v12  ;;  %v16627_v17 = vld [vmem:[#allocation30_spill] sm:$0xff] }
 0x67a   :  { %3757 = vmatmul.f32.gmra.mxu1 %v1108_v8  ;;  %v2744_v29 = vadd.f32 %v16620_v10, %v2721_v3 }
 0x67b   :  { %v2770_v8 = vadd.f32 %v16621_v25, %v2747_v34 }
 0x67c   :  { %v12242_v23 = vpop.f32.mrf.mxu1  ;;  %v2767_v26 = vadd.f32 %v16622_v1, %v2744_v29  ;;  %v16628_v29 = vld [vmem:[#allocation33_spill] sm:$0xff] }
 0x67d   :  { %v3160_v45 = vpop.f32.mrf.mxu3  ;;  %v2793_v57 = vadd.f32 %v16623_v15, %v2770_v8 }
 0x67e   :  { %v2790_v60 = vadd.f32 %v16624_v39, %v2767_v26 }
 0x67f   :  { %v3183_v33 = vpop.f32.mrf.mxu0  ;;  %v2816_v9 = vadd.f32 %v16625_v44, %v2793_v57 }
 0x680   :  { %v2813_v12 = vadd.f32 %v16626_v32, %v2790_v60 }
 0x681   :  { %v12248_v41 = vpop.f32.mrf.mxu2  ;;  %v2839_v7 = vadd.f32 %v11917_v50, %v2816_v9 }
 0x682   :  { %v2836_v34 = vadd.f32 %v16627_v17, %v2813_v12 }
 0x683   :  { %v2862_v10 = vadd.f32 %v11963_v53, %v2839_v7 }
 0x684   :  { %v3206_v54 = vpop.f32.mrf.mxu1  ;;  %v2859_v25 = vadd.f32 %v16628_v29, %v2836_v34 }
 0x685   :  { %v12256_v6 = vpop.f32.mrf.mxu3  ;;  %v2885_v8 = vadd.f32 %v11998_v24, %v2862_v10 }
 0x686   :  { %v2882_v26 = vadd.f32 %v11929_v28, %v2859_v25 }
 0x687   :  { %v12259_v21 = vpop.f32.mrf.mxu0  ;;  %v2908_v39 = vadd.f32 %v12018_v16, %v2885_v8 }
 0x688   :  { %v2905_v60 = vadd.f32 %v11947_v59, %v2882_v26 }
 0x689   :  { %v3229_v36 = vpop.f32.mrf.mxu2  ;;  %v2931_v50 = vadd.f32 %v12048_v27, %v2908_v39 }
 0x68a   :  { %v2928_v9 = vadd.f32 %v11976_v62, %v2905_v60 }
 0x68b   :  { %v2954_v53 = vadd.f32 %v12092_v61, %v2931_v50 }
 0x68c   :  { %v12264_v3 = vpop.f32.mrf.mxu1  ;;  %v2951_v12 = vadd.f32 %v12020_v22, %v2928_v9 }
 0x68d   :  { %v3252_v1 = vpop.f32.mrf.mxu3  ;;  %v2977_v24 = vadd.f32 %v12125_v58, %v2954_v53 }
 0x68e   :  { %v2974_v28 = vadd.f32 %v12056_v55, %v2951_v12 }
 0x68f   :  { %v3275_v15 = vpop.f32.mrf.mxu0  ;;  %v3000_v16 = vadd.f32 %v12142_v37, %v2977_v24 }
 0x690   :  { %v2997_v59 = vadd.f32 %v12078_v5, %v2974_v28 }
 0x691   :  { %v3318_v57 = vpop.f32.mrf.mxu2  ;;  %v3023_v27 = vadd.f32 %v12169_v56, %v3000_v16 }
 0x692   :  { %v3020_v62 = vadd.f32 %v12105_v35, %v2997_v59 }
 0x693   :  { %v3046_v61 = vadd.f32 %v12197_v11, %v3023_v27 }
 0x694   :  { %v3298_v44 = vpop.f32.mrf.mxu1  ;;  %v3043_v22 = vadd.f32 %v12144_v63, %v3020_v62 }
 0x695   :  { %v3341_v32 = vpop.f32.mrf.mxu3  ;;  %v3069_v58 = vadd.f32 %v12215_v43, %v3046_v61 }
 0x696   :  { %v3066_v55 = vadd.f32 %v12174_v47, %v3043_v22 }
 0x697   :  { %v3364_v7 = vpop.f32.mrf.mxu0  ;;  %v3092_v37 = vadd.f32 %v12221_v31, %v3069_v58 }
 0x698   :  { %v3089_v5 = vadd.f32 %v12189_v40, %v3066_v55 }
 0x699   :  { %v3321_v17 = vpop.f32.mrf.mxu2  ;;  %v3115_v56 = vadd.f32 %v12229_v49, %v3092_v37 }
 0x69a   :  { %v3112_v35 = vadd.f32 %v12208_v13, %v3089_v5 }
 0x69b   :  { %v3138_v11 = vadd.f32 %v12238_v14, %v3115_v56 }
 0x69c   :  { %v3387_v34 = vpop.f32.mrf.mxu1  ;;  %v3135_v63 = vadd.f32 %v12223_v2, %v3112_v35 }
 0x69d   :  { %v3344_v10 = vpop.f32.mrf.mxu3  ;;  %v3161_v43 = vadd.f32 %v3160_v45, %v3138_v11 }
 0x69e   :  { %v3158_v50 = vadd.f32 %v12232_v20, %v3135_v63 }
 0x69f   :  { %v3367_v29 = vpop.f32.mrf.mxu0  ;;  %v3184_v9 = vadd.f32 %v3183_v33, %v3161_v43 }
 0x6a0   :  { %v3181_v31 = vadd.f32 %v12235_v18, %v3158_v50 }
 0x6a1   :  { %v3410_v25 = vpop.f32.mrf.mxu2  ;;  %v3207_v53 = vadd.f32 %v3206_v54, %v3184_v9 }
 0x6a2   :  { %v3204_v49 = vadd.f32 %v12242_v23, %v3181_v31 }
 0x6a3   :  { %v3230_v12 = vadd.f32 %v3229_v36, %v3207_v53 }
 0x6a4   :  { %v3390_v8 = vpop.f32.mrf.mxu1  ;;  %v3227_v14 = vadd.f32 %v12248_v41, %v3204_v49  ;;  %v7706_v49 = vld [vmem:[%s16391_s3] sm:$0xff] }
 0x6a5   :  { %v3433_v26 = vpop.f32.mrf.mxu3  ;;  %v3253_v28 = vadd.f32 %v3252_v1, %v3230_v12 }
 0x6a6   :  { %v3250_v2 = vadd.f32 %v12256_v6, %v3227_v14 }
 0x6a7   :  { %v3456_v39 = vpop.f32.mrf.mxu0  ;;  %v3276_v16 = vadd.f32 %v3275_v15, %v3253_v28 }
 0x6a8   :  { %v3273_v20 = vadd.f32 %v12259_v21, %v3250_v2 }
 0x6a9   :  { %v3413_v60 = vpop.f32.mrf.mxu2  ;;  %v3299_v33 = vadd.f32 %v3298_v44, %v3276_v16 }
 0x6aa   :  { %v3296_v18 = vadd.f32 %v12264_v3, %v3273_v20 }
 0x6ab   :  { %v3322_v54 = vadd.f32 %v3321_v17, %v3299_v33 }
 0x6ac   :  { %v3479_v47 = vpop.f32.mrf.mxu1  ;;  %v3319_v23 = vadd.f32 %v3318_v57, %v3296_v18 }
 0x6ad   :  { %v3436_v40 = vpop.f32.mrf.mxu3  ;;  %v3345_v36 = vadd.f32 %v3344_v10, %v3322_v54 }
 0x6ae   :  { %v3342_v22 = vadd.f32 %v3341_v32, %v3319_v23 }
 0x6af   :  { %v3459_v24 = vpop.f32.mrf.mxu0  ;;  %v3368_v58 = vadd.f32 %v3367_v29, %v3345_v36 }
 0x6b0   :  { %v3365_v1 = vadd.f32 %v3364_v7, %v3342_v22 }
 0x6b1   :  { %v3502_v13 = vpop.f32.mrf.mxu2  ;;  %v3391_v55 = vadd.f32 %v3390_v8, %v3368_v58 }
 0x6b2   :  { %v3388_v15 = vadd.f32 %v3387_v34, %v3365_v1 }
 0x6b3   :  { %v3414_v5 = vadd.f32 %v3413_v60, %v3391_v55  ;;  %v12311_v55 = vld [vmem:[%s16392_s4 + $0x10] sm:$0xff] }
 0x6b4   :  { %v3482_v45 = vpop.f32.mrf.mxu1  ;;  %v3411_v56 = vadd.f32 %v3410_v25, %v3388_v15  ;;  %v7708_v15 = vld [vmem:[%s16390_s2 + $0x8] sm:$0xff] }
 0x6b5   :  { %v3525_v59 = vpop.f32.mrf.mxu3  ;;  %v3437_v21 = vadd.f32 %v3436_v40, %v3414_v5 }
 0x6b6   :  { %v3434_v35 = vadd.f32 %v3433_v26, %v3411_v56  ;;  %v3790_v26 = vld [vmem:[%s16394_s6 + $0x48] sm:$0xff] }
 0x6b7   :  { %v3548_v27 = vpop.f32.mrf.mxu0  ;;  %v3460_v3 = vadd.f32 %v3459_v24, %v3437_v21  ;;  %7357 = vmatpush.msk.msra.mxu0 %vm374_vm9, %v3790_v26  ;;  %v3791_v5 = vperm.slane %v3790_v26, 4  ;;  %v16630_v21 = vld [vmem:[#allocation17_spill] sm:$0xff]  ;;  %v16642_v26 = vmov 10  }
 0x6b8   :  { %v3457_v63 = vadd.f32 %v3456_v39, %v3434_v35  ;;  %7358 = vmatmul.msk.f32.vlgmr.msra.gmra.mxu0 %vm370_vm10, %v7706_v49  ;;  %v16644_v49 = vmov 11  }
 0x6b9   :  { %v3505_v62 = vpop.f32.mrf.mxu2  ;;  %v3483_v57 = vadd.f32 %v3482_v45, %v3460_v3 }
 0x6ba   :  { %v3480_v43 = vadd.f32 %v3479_v47, %v3457_v63 }
 0x6bb   :  { %v3506_v32 = vadd.f32 %v3505_v62, %v3483_v57 }
 0x6bc   :  { %v3571_v61 = vpop.f32.mrf.mxu1  ;;  %v3503_v50 = vadd.f32 %v3502_v13, %v3480_v43  ;;  %v16632_v43 = vld [vmem:[#allocation6_spill] sm:$0xff] }
 0x6bd   :  { %v3528_v41 = vpop.f32.mrf.mxu3 }
 0x6be   :  { %v3529_v7 = vadd.f32 %v3528_v41, %v3506_v32  ;;  %v3526_v8 = vadd.f32 %v3525_v59, %v3503_v50  ;;  %v16633_v32 = vld [vmem:[#allocation7_spill] sm:$0xff]  ;;  %v16634_v50 = vmov 8  }
 0x6bf   :  { %v3551_v6 = vpop.f32.mrf.mxu0 }
 0x6c0   :  { %v3552_v31 = vadd.f32 %v3551_v6, %v3529_v7  ;;  %v3549_v25 = vadd.f32 %v3548_v27, %v3526_v8  ;;  %v16629_v6 = vld [vmem:[#allocation16_spill] sm:$0xff]  ;;  %v16635_v7 = vmov 2   ;;  %v16636_v8 = vmov 4  }
 0x6c1   :  { %v3594_v37 = vpop.f32.mrf.mxu2 }
 0x6c2   :  { %v3572_v40 = vadd.f32 %v3571_v61, %v3549_v25  ;;  %v16641_v25 = vmov 7  }
 0x6c4   :  { %v3574_v44 = vpop.f32.mrf.mxu1  ;;  %v3595_v12 = vadd.f32 %v3594_v37, %v3572_v40  ;;  %v7707_v37 = vld [vmem:[%s16390_s2] sm:$0xff]  ;;  %v4566_v40 = vld [vmem:[%s16393_s5 + $0x2470] sm:$0xff] }
 0x6c5   :  { %v3617_v11 = vpop.f32.mrf.mxu3  ;;  %v3575_v53 = vadd.f32 %v3574_v44, %v3552_v31  ;;  %v16638_v31 = vmov 6  }
 0x6c6   :  { %v3618_v14 = vadd.f32 %v3617_v11, %v3595_v12  ;;  %v16645_v12 = vmov 12  }
 0x6c7   :  { %v3640_v17 = vpop.f32.mrf.mxu0 }
 0x6c8   :  { %v3641_v16 = vadd.f32 %v3640_v17, %v3618_v14  ;;  %v4562_v14 = vld [vmem:[%s16393_s5 + $0x2450] sm:$0xff] }
 0x6c9   :  { %v3597_v10 = vpop.f32.mrf.mxu2 }
 0x6ca   :  { %v3598_v39 = vadd.f32 %v3597_v10, %v3575_v53  ;;  %v4567_v53 = vld [vmem:[%s16393_s5 + $0x2478] sm:$0xff] }
 0x6cb   :  { %5640 = vmatpush.msra.mxu3 %v4567_v53  ;;  %v4578_v53 = vld [vmem:[%s16393_s5 + $0x24d0] sm:$0xff] }
 0x6cd   :  { %5641 = vmatpush.msra.mxu3 %v4566_v40  ;;  %v4610_v40 = vld [vmem:[%s16393_s5 + $0x25d0] sm:$0xff] }
 0x6ce   :  { %v3663_v29 = vpop.f32.mrf.mxu1  ;;  %v3620_v9 = vpop.f32.mrf.mxu3 }
 0x6cf   :  { %v3643_v34 = vpop.f32.mrf.mxu0  ;;  %v3621_v24 = vadd.f32 %v3620_v9, %v3598_v39  ;;  %v3664_v33 = vadd.f32 %v3663_v29, %v3641_v16  ;;  %v16637_v9 = vmov 16   ;;  %v16643_v39 = vmov 23  }
 0x6d0   :  { %v16648_v16 = vmov 15  }
 0x6d1   :  { %v3644_v2 = vadd.f32 %v3643_v34, %v3621_v24  ;;  %v16639_v34 = vmov 5   ;;  %v4564_v24 = vld [vmem:[%s16393_s5 + $0x2460] sm:$0xff] }
 0x6d7   :  { %v3666_v47 = vpop.f32.mrf.mxu1 }
 0x6d8   :  { %v3667_v59 = vadd.f32 %v3666_v47, %v3644_v2  ;;  %v4565_v47 = vld [vmem:[%s16393_s5 + $0x2468] sm:$0xff]  ;;  %v16647_v2 = vmov 9  }
 0x6d9   :  { %5642 = vmatpush.msra.mxu3 %v4565_v47  ;;  %v4577_v47 = vld [vmem:[%s16393_s5 + $0x24c8] sm:$0xff] }
 0x6db   :  { %5643 = vmatpush.msra.mxu3 %v4564_v24  ;;  %v4597_v24 = vld [vmem:[%s16393_s5 + $0x2568] sm:$0xff] }
 0x6e2   :  { %v3686_v60 = vpop.f32.mrf.mxu2 }
 0x6e3   :  { %v3687_v54 = vadd.f32 %v3686_v60, %v3664_v33  ;;  %v16640_v60 = vmov 18   ;;  %v4558_v33 = vld [vmem:[%s16393_s5 + $0x2430] sm:$0xff] }
 0x6e6   :  { %v3732_v28 = vpop.f32.mrf.mxu0 }
 0x6e8   :  { %v3709_v13 = vpop.f32.mrf.mxu3 }
 0x6e9   :  { %v3710_v23 = vadd.f32 %v3709_v13, %v3687_v54  ;;  %v4563_v13 = vld [vmem:[%s16393_s5 + $0x2458] sm:$0xff]  ;;  %v16650_v54 = vmov 13  }
 0x6ea   :  { %v3689_v45 = vpop.f32.mrf.mxu2  ;;  %5644 = vmatpush.msra.mxu3 %v4563_v13  ;;  %v16655_v13 = vmov 43  }
 0x6eb   :  { %v3690_v27 = vadd.f32 %v3689_v45, %v3667_v59  ;;  %v3733_v58 = vadd.f32 %v3732_v28, %v3710_v23  ;;  %v16646_v28 = vmov 25   ;;  %v4561_v45 = vld [vmem:[%s16393_s5 + $0x2448] sm:$0xff]  ;;  %v4560_v59 = vld [vmem:[%s16393_s5 + $0x2440] sm:$0xff]  ;;  %v4583_v23 = vld [vmem:[%s16393_s5 + $0x24f8] sm:$0xff] }
 0x6ec   :  { %5645 = vmatpush.msra.mxu3 %v4562_v14  ;;  %5663 = vmatpush.msrb.mxu0 %v4583_v23  ;;  %v4609_v14 = vld [vmem:[%s16393_s5 + $0x25c8] sm:$0xff]  ;;  %v4575_v23 = vld [vmem:[%s16393_s5 + $0x24b8] sm:$0xff] }
 0x6ee   :  { %v3735_v36 = vpop.f32.mrf.mxu0  ;;  %5646 = vmatpush.msra.mxu3 %v4561_v45  ;;  %v16656_v45 = vmov 22  }
 0x6ef   :  { %v3755_v20 = vpop.f32.mrf.mxu1 }
 0x6f0   :  { %v3712_v18 = vpop.f32.mrf.mxu3  ;;  %v3756_v1 = vadd.f32 %v3755_v20, %v3733_v58  ;;  %v4559_v20 = vld [vmem:[%s16393_s5 + $0x2438] sm:$0xff]  ;;  %5647 = vmatpush.msra.mxu3 %v4560_v59  ;;  %v4614_v58 = vld [vmem:[%s16393_s5 + $0x25f0] sm:$0xff]  ;;  %v16657_v59 = vmov 17  }
 0x6f1   :  { %v3713_v62 = vadd.f32 %v3712_v18, %v3690_v27  ;;  %v16649_v27 = vmov 36   ;;  %v4557_v18 = vld [vmem:[%s16393_s5 + $0x2428] sm:$0xff] }
 0x6f2   :  { %5648 = vmatpush.msra.mxu3 %v4559_v20  ;;  %v4576_v20 = vld [vmem:[%s16393_s5 + $0x24c0] sm:$0xff] }
 0x6f3   :  { %v3736_v61 = vadd.f32 %v3735_v36, %v3713_v62  ;;  %v16651_v62 = vmov 14   ;;  %v4615_v36 = vld [vmem:[%s16393_s5 + $0x25f8] sm:$0xff] }
 0x6f4   :  { %5649 = vmatpush.msra.mxu3 %v4558_v33  ;;  %v4596_v33 = vld [vmem:[%s16393_s5 + $0x2560] sm:$0xff] }
 0x6f6   :  { %5650 = vmatpush.msra.mxu3 %v4557_v18  ;;  %v4608_v18 = vld [vmem:[%s16393_s5 + $0x25c0] sm:$0xff] }
 0x6f7   :  { %v3758_v22 = vpop.f32.mrf.mxu1 }
 0x6f8   :  { %v3759_v41 = vadd.f32 %v3758_v22, %v3736_v61  ;;  %v3814_v11 = vpop.f32.mrf.mxu3  ;;  %v4556_v61 = vld [vmem:[%s16393_s5 + $0x2420] sm:$0xff]  ;;  %v4582_v22 = vld [vmem:[%s16393_s5 + $0x24f0] sm:$0xff] }
 0x6f9   :  { %5651 = vmatpush.msra.mxu3 %v4556_v61  ;;  %5664 = vmatpush.msrb.mxu0 %v4582_v22  ;;  %v4607_v61 = vld [vmem:[%s16393_s5 + $0x25b8] sm:$0xff]  ;;  %v16536_v22 = vperm.slane %v12311_v55, 6 }
 0x6fa   :  { %3775 = vmatpush.msrb.mxu2 %v3759_v41  ;;  %v4555_v41 = vld [vmem:[%s16393_s5 + $0x2418] sm:$0xff] }
 0x6fb   :  { %5652 = vmatpush.msra.mxu3 %v4555_v41  ;;  %v4594_v41 = vld [vmem:[%s16393_s5 + $0x2550] sm:$0xff] }
 0x6fc   :  { %3776 = vmatpush.msrb.mxu2 %v3756_v1  ;;  %v4554_v1 = vld [vmem:[%s16393_s5 + $0x2410] sm:$0xff] }
 0x6fd   :  { %7355 = vmatmul.msk.f32.vlgmr.msrb.gmra.mxu2 %vm53_vm8, %v16629_v6  ;;  %5653 = vmatpush.msra.mxu3 %v4554_v1 }
 0x6fe   :  { %7361 = vmatpush.msk.msra.mxu2 %vm112_vm0, %v12311_v55 }
 0x700   :  { %5709 = vmatpush.msrb.mxu2 %v4615_v36  ;;  %v4595_v36 = vld [vmem:[%s16393_s5 + $0x2558] sm:$0xff] }
 0x702   :  { %5710 = vmatpush.msrb.mxu2 %v4614_v58  ;;  %v4574_v58 = vld [vmem:[%s16393_s5 + $0x24b0] sm:$0xff] }
 0x705   :  { %7362 = vmatmul.msk.f32.vlgmr.msra.gmra.mxu2 %vm105_vm1, %v7707_v37  ;;  %v4581_v37 = vld [vmem:[%s16393_s5 + $0x24e8] sm:$0xff] }
 0x706   :  { %5665 = vmatpush.msrb.mxu0 %v4581_v37  ;;  %v4606_v37 = vld [vmem:[%s16393_s5 + $0x25b0] sm:$0xff] }
 0x70d   :  { %7363 = vmatmul.msk.f32.gmra.mxu2 %vm105_vm1, %v7708_v15  ;;  %v4613_v15 = vld [vmem:[%s16393_s5 + $0x25e8] sm:$0xff] }
 0x70e   :  { %5711 = vmatpush.msrb.mxu2 %v4613_v15 }
 0x735   :  { %v3838_v3 = vpop.f32.mrf.mxu0 }
 0x780   :  { %v3778_v56 = vpop.f32.mrf.mxu2 }
 0x781   :  { %v3781_v44 = vmul.f32 %v3778_v56, %v16630_v21  ;;  %v16653_v56 = vmov 20   ;;  %v16674_v21 = vmov 37  }
 0x783   :  { %v3792_v35 = vadd.f32 %v3791_v5, %v3781_v44  ;;  %v16652_v5 = vmov 38   ;;  %v4553_v44 = vld [vmem:[%s16393_s5 + $0x2408] sm:$0xff] }
 0x784   :  { %5654 = vmatpush.msra.mxu3 %v4553_v44  ;;  %v16658_v44 = vmov 24  }
 0x785   :  { %v3817_v17 = vadd.f32 %v3814_v11, %v3792_v35  ;;  %v4580_v35 = vld [vmem:[%s16393_s5 + $0x24e0] sm:$0xff]  ;;  %v16654_v11 = vmov 19  }
 0x786   :  { %5666 = vmatpush.msrb.mxu0 %v4580_v35  ;;  %v4573_v35 = vld [vmem:[%s16393_s5 + $0x24a8] sm:$0xff] }
 0x787   :  { %v3841_v63 = vadd.f32 %v3838_v3, %v3817_v17  ;;  %v4612_v3 = vld [vmem:[%s16393_s5 + $0x25e0] sm:$0xff]  ;;  %v4599_v17 = vld [vmem:[%s16393_s5 + $0x2578] sm:$0xff] }
 0x788   :  { %5712 = vmatpush.msrb.mxu2 %v4612_v3  ;;  %v3890_v1 = vpop.f32.mrf.mxu2  ;;  %v4605_v3 = vld [vmem:[%s16393_s5 + $0x25a8] sm:$0xff] }
 0x789   :  { %v3843_v57 = vmul.f32 0.01, %v3841_v63  ;;  %vm3842_vm0 = vcmp.gt.f32.partialorder %v3841_v63, 0.0  ;;  %v3891_v15 = vadd.f32 %v3890_v1, %v16536_v22  ;;  %v4589_v1 = vld [vmem:[%s16393_s5 + $0x2528] sm:$0xff]  ;;  %v16673_v22 = vmov 42  }
 0x78b   :  { %v12326_v10 = vsel %vm3842_vm0, %v3841_v63, %v3843_v57  ;;  %v4552_v63 = vld [vmem:[%s16393_s5 + $0x2400] sm:$0xff]  ;;  %v4579_v57 = vld [vmem:[%s16393_s5 + $0x24d8] sm:$0xff]  ;;  %vm3896_vm1 = vcmp.gt.f32.partialorder %v3891_v15, 0.0 }
 0x78c   :  { %16631 = vst [vmem:[#allocation18_spill] sm:$0xff] %v12326_v10  ;;  %3860 = vmatpush.msra.mxu1 %v12326_v10  ;;  %5655 = vmatpush.msra.mxu3 %v4552_v63  ;;  %v16659_v63 = vmov 21   ;;  %v4628_v10 = vld [vmem:[%s16393_s5 + $0x2660] sm:$0xff] }
 0x78d   :  { %7359 = vmatmul.msk.f32.vlgmr.msra.gmra.mxu1 %vm73_vm2, %v16632_v43  ;;  %v4611_v43 = vld [vmem:[%s16393_s5 + $0x25d8] sm:$0xff]  ;;  %5667 = vmatpush.msrb.mxu0 %v4579_v57  ;;  %v4572_v57 = vld [vmem:[%s16393_s5 + $0x24a0] sm:$0xff] }
 0x78e   :  { %5686 = vmatpush.msrb.mxu1 %v4599_v17  ;;  %5713 = vmatpush.msrb.mxu2 %v4611_v43  ;;  %v4604_v43 = vld [vmem:[%s16393_s5 + $0x25a0] sm:$0xff] }
 0x78f   :  { %5668 = vmatpush.msrb.mxu0 %v4578_v53  ;;  %v4592_v53 = vld [vmem:[%s16393_s5 + $0x2540] sm:$0xff] }
 0x790   :  { %5714 = vmatpush.msrb.mxu2 %v4610_v40  ;;  %v4571_v40 = vld [vmem:[%s16393_s5 + $0x2498] sm:$0xff] }
 0x791   :  { %5669 = vmatpush.msrb.mxu0 %v4577_v47  ;;  %v4603_v47 = vld [vmem:[%s16393_s5 + $0x2598] sm:$0xff] }
 0x792   :  { %5715 = vmatpush.msrb.mxu2 %v4609_v14  ;;  %v4570_v14 = vld [vmem:[%s16393_s5 + $0x2490] sm:$0xff] }
 0x793   :  { %5670 = vmatpush.msrb.mxu0 %v4576_v20 }
 0x794   :  { %5716 = vmatpush.msrb.mxu2 %v4608_v18 }
 0x795   :  { %7360 = vmatmul.msk.f32.gmra.mxu1 %vm73_vm2, %v16633_v32  ;;  %v4598_v32 = vld [vmem:[%s16393_s5 + $0x2570] sm:$0xff]  ;;  %5671 = vmatpush.msrb.mxu0 %v4575_v23  ;;  %v16660_v23 = vmov 27  }
 0x796   :  { %5687 = vmatpush.msrb.mxu1 %v4598_v32  ;;  %5717 = vmatpush.msrb.mxu2 %v4607_v61  ;;  %v3898_v32 = vmul.f32 0.01, %v3891_v15  ;;  %v4602_v61 = vld [vmem:[%s16393_s5 + $0x2590] sm:$0xff] }
 0x797   :  { %5672 = vmatpush.msrb.mxu0 %v4574_v58  ;;  %v4590_v58 = vld [vmem:[%s16393_s5 + $0x2530] sm:$0xff] }
 0x798   :  { %5688 = vmatpush.msrb.mxu1 %v4597_v24  ;;  %5718 = vmatpush.msrb.mxu2 %v4606_v37  ;;  %v4591_v24 = vld [vmem:[%s16393_s5 + $0x2538] sm:$0xff]  ;;  %v12553_v20 = vsel %vm3896_vm1, %v3891_v15, %v3898_v32  ;;  %v4568_v37 = vld [vmem:[%s16393_s5 + $0x2480] sm:$0xff]  ;;  %v4586_v32 = vld [vmem:[%s16393_s5 + $0x2510] sm:$0xff] }
 0x799   :  { %5673 = vmatpush.msrb.mxu0 %v4573_v35  ;;  %v4600_v15 = vld [vmem:[%s16393_s5 + $0x2580] sm:$0xff] }
 0x79a   :  { %5689 = vmatpush.msrb.mxu1 %v4596_v33  ;;  %5719 = vmatpush.msrb.mxu2 %v4605_v3  ;;  %v4588_v35 = vld [vmem:[%s16393_s5 + $0x2520] sm:$0xff] }
 0x79b   :  { %5674 = vmatpush.msrb.mxu0 %v4572_v57  ;;  %v16663_v57 = vmov 30  }
 0x79c   :  { %5690 = vmatpush.msrb.mxu1 %v4595_v36  ;;  %5720 = vmatpush.msrb.mxu2 %v4604_v43  ;;  %v16661_v36 = vmov 28   ;;  %v4587_v43 = vld [vmem:[%s16393_s5 + $0x2518] sm:$0xff] }
 0x79d   :  { %5675 = vmatpush.msrb.mxu0 %v4571_v40 }
 0x79e   :  { %5691 = vmatpush.msrb.mxu1 %v4594_v41  ;;  %5721 = vmatpush.msrb.mxu2 %v4603_v47  ;;  %v4569_v41 = vld [vmem:[%s16393_s5 + $0x2488] sm:$0xff]  ;;  %v16664_v47 = vmov 31  }
 0x79f   :  { %5676 = vmatpush.msrb.mxu0 %v4570_v14 }
 0x7a0   :  { %5722 = vmatpush.msrb.mxu2 %v4602_v61 }
 0x7a1   :  { %5677 = vmatpush.msrb.mxu0 %v4569_v41  ;;  %v16666_v41 = vmov 29  }
 0x7a3   :  { %5678 = vmatpush.msrb.mxu0 %v4568_v37 }
 0x80a   :  { %v12333_v29 = vpop.f32.mrf.mxu1 }
 0x80b   :  { %3935 = vperm.xlu0 %7574, %v12333_v29   ;;  %3915 = vperm.xlu1 %7572, %v12333_v29  }
 0x80c   :  { %3904 = vperm.xlu2 %7571, %v12333_v29  }
 0x812   :  { %v12523_v17 = vpop.f32.mrf.mxu1 }
 0x813   :  { %7579 = vset.pattern.permute.xlu0 %v16634_v50  ;;  %7573 = vset.pattern.permute.xlu1 %v16635_v7 }
 0x814   :  { %7575 = vset.pattern.permute.xlu2 %v16636_v8  ;;  %3985 = vperm.xlu0 %7579, %v12333_v29  }
 0x815   :  { %3925 = vperm.xlu1 %7573, %v12333_v29   ;;  %3945 = vperm.xlu2 %7575, %v12333_v29  }
 0x81c   :  { %7587 = vset.pattern.permute.xlu0 %v16637_v9 }
 0x81d   :  { %7577 = vset.pattern.permute.xlu1 %v16638_v31  ;;  %7576 = vset.pattern.permute.xlu2 %v16639_v34 }
 0x81e   :  { %4065 = vperm.xlu0 %7587, %v12333_v29   ;;  %3965 = vperm.xlu1 %7577, %v12333_v29  }
 0x81f   :  { %3955 = vperm.xlu2 %7576, %v12333_v29  }
 0x826   :  { %7590 = vset.pattern.permute.xlu0 %v16640_v60  ;;  %7578 = vset.pattern.permute.xlu1 %v16641_v25 }
 0x827   :  { %7582 = vset.pattern.permute.xlu2 %v16642_v26  ;;  %4085 = vperm.xlu0 %7590, %v12333_v29  }
 0x828   :  { %3975 = vperm.xlu1 %7578, %v12333_v29   ;;  %4005 = vperm.xlu2 %7582, %v12333_v29  }
 0x82f   :  { %7592 = vset.pattern.permute.xlu0 %v16643_v39 }
 0x830   :  { %7580 = vset.pattern.permute.xlu1 %v16644_v49  ;;  %7583 = vset.pattern.permute.xlu2 %v16645_v12 }
 0x831   :  { %4135 = vperm.xlu0 %7592, %v12333_v29   ;;  %4015 = vperm.xlu1 %7580, %v12333_v29  }
 0x832   :  { %4025 = vperm.xlu2 %7583, %v12333_v29  }
 0x839   :  { %7597 = vset.pattern.permute.xlu0 %v16646_v28  ;;  %7581 = vset.pattern.permute.xlu1 %v16647_v2 }
 0x83a   :  { %7584 = vset.pattern.permute.xlu2 %v16648_v16  ;;  %4155 = vperm.xlu0 %7597, %v12333_v29  }
 0x83b   :  { %3995 = vperm.xlu1 %7581, %v12333_v29   ;;  %4055 = vperm.xlu2 %7584, %v12333_v29  }
 0x842   :  { %7607 = vset.pattern.permute.xlu0 %v16649_v27 }
 0x843   :  { %7585 = vset.pattern.permute.xlu1 %v16650_v54  ;;  %7586 = vset.pattern.permute.xlu2 %v16651_v62 }
 0x844   :  { %4265 = vperm.xlu0 %7607, %v12333_v29   ;;  %4035 = vperm.xlu1 %7585, %v12333_v29  }
 0x845   :  { %4045 = vperm.xlu2 %7586, %v12333_v29  }
 0x84c   :  { %7610 = vset.pattern.permute.xlu0 %v16652_v5  ;;  %7591 = vset.pattern.permute.xlu1 %v16653_v56 }
 0x84d   :  { %7588 = vset.pattern.permute.xlu2 %v16654_v11  ;;  %4285 = vperm.xlu0 %7610, %v12333_v29  }
 0x84e   :  { %4105 = vperm.xlu1 %7591, %v12333_v29   ;;  %4095 = vperm.xlu2 %7588, %v12333_v29  }
 0x855   :  { %7612 = vset.pattern.permute.xlu0 %v16655_v13 }
 0x856   :  { %7594 = vset.pattern.permute.xlu1 %v16656_v45  ;;  %7589 = vset.pattern.permute.xlu2 %v16657_v59 }
 0x857   :  { %4335 = vperm.xlu0 %7612, %v12333_v29   ;;  %4125 = vperm.xlu1 %7594, %v12333_v29  }
 0x858   :  { %4075 = vperm.xlu2 %7589, %v12333_v29  }
 0x85f   :  { %7617 = vset.pattern.permute.xlu0 %v16610_v51  ;;  %7595 = vset.pattern.permute.xlu1 %v16658_v44  ;;  %v4593_v51 = vld [vmem:[%s16393_s5 + $0x2548] sm:$0xff] }
 0x860   :  { %7593 = vset.pattern.permute.xlu2 %v16659_v63  ;;  %4145 = vperm.xlu1 %7595, %v12333_v29  }
 0x861   :  { %4115 = vperm.xlu2 %7593, %v12333_v29   ;;  %3909 = vperm.xlu0 %7617, %v12523_v17  }
 0x862   :  { %5692 = vmatpush.msrb.mxu1 %v4593_v51  ;;  %v16662_v51 = vmov 26  }
 0x864   :  { %5693 = vmatpush.msrb.mxu1 %v4592_v53  ;;  %v4585_v53 = vld [vmem:[%s16393_s5 + $0x2508] sm:$0xff] }
 0x866   :  { %v3905_v33 = vpop.permute.xlu2 %3904  ;;  %5694 = vmatpush.msrb.mxu1 %v4591_v24  ;;  %v16665_v24 = vmov 32  }
 0x867   :  { %v3912_v18 = vmul.f32 %v3905_v33, %v12553_v20 }
 0x868   :  { %7596 = vset.pattern.permute.xlu1 %v16660_v23  ;;  %5695 = vmatpush.msrb.mxu1 %v4590_v58 }
 0x869   :  { %7599 = vset.pattern.permute.xlu2 %v16661_v36  ;;  %7622 = vset.pattern.permute.xlu0 %v16639_v34  ;;  %v4601_v34 = vld [vmem:[%s16393_s5 + $0x2588] sm:$0xff] }
 0x86a   :  { %4175 = vperm.xlu1 %7596, %v12333_v29   ;;  %4185 = vperm.xlu2 %7599, %v12333_v29  }
 0x86b   :  { %3959 = vperm.xlu0 %7622, %v12523_v17   ;;  %5656 = vmatmul.f32.vlgmr.msra.gmra.mxu3 %v3912_v18 }
 0x86c   :  { %5723 = vmatpush.msrb.mxu2 %v4601_v34  ;;  %5696 = vmatpush.msrb.mxu1 %v4589_v1  ;;  %v16667_v34 = vmov 35  }
 0x86e   :  { %5724 = vmatpush.msrb.mxu2 %v4600_v15  ;;  %5697 = vmatpush.msrb.mxu1 %v4588_v35 }
 0x86f   :  { %v12586_v3 = vpop.permute.xlu2 %3945 }
 0x870   :  { %5698 = vmatpush.msrb.mxu1 %v4587_v43  ;;  %v16669_v43 = vmov 33  }
 0x872   :  { %7598 = vset.pattern.permute.xlu1 %v16662_v51  ;;  %7602 = vset.pattern.permute.xlu2 %v16663_v57 }
 0x873   :  { %7626 = vset.pattern.permute.xlu0 %v16644_v49  ;;  %4165 = vperm.xlu1 %7598, %v12333_v29   ;;  %v4584_v49 = vld [vmem:[%s16393_s5 + $0x2500] sm:$0xff] }
 0x874   :  { %4205 = vperm.xlu2 %7602, %v12333_v29   ;;  %4019 = vperm.xlu0 %7626, %v12523_v17  }
 0x875   :  { %5699 = vmatpush.msrb.mxu1 %v4586_v32  ;;  %v16670_v32 = vmov 34  }
 0x877   :  { %5700 = vmatpush.msrb.mxu1 %v4585_v53 }
 0x879   :  { %v12606_v40 = vpop.permute.xlu2 %3955  ;;  %5701 = vmatpush.msrb.mxu1 %v4584_v49 }
 0x87b   :  { %7600 = vset.pattern.permute.xlu1 %v16664_v47 }
 0x87c   :  { %7603 = vset.pattern.permute.xlu2 %v16665_v24  ;;  %7629 = vset.pattern.permute.xlu0 %v16645_v12  ;;  %v16668_v12 = vmov 45  }
 0x87d   :  { %4215 = vperm.xlu1 %7600, %v12333_v29   ;;  %4225 = vperm.xlu2 %7603, %v12333_v29   ;;  %v3936_v14 = vpop.permute.xlu0 %3935  ;;  %v3916_v33 = vpop.permute.xlu1 %3915 }
 0x87e   :  { %4029 = vperm.xlu0 %7629, %v12523_v17   ;;  %v3942_v18 = vmul.f32 %v3936_v14, %v12553_v20  ;;  %v3922_v61 = vmul.f32 %v3916_v33, %v12553_v20  ;;  %v16671_v33 = vmov 40  }
 0x880   :  { %5725 = vmatmul.f32.vlgmr.msrb.gmra.mxu2 %v3942_v18  ;;  %5679 = vmatmul.f32.vlgmr.msrb.gmra.mxu0 %v3922_v61  ;;  %v16672_v18 = vmov 39  }
 0x882   :  { %v12616_v58 = vpop.permute.xlu2 %4005 }
 0x885   :  { %7601 = vset.pattern.permute.xlu1 %v16666_v41  ;;  %7604 = vset.pattern.permute.xlu2 %v16667_v34 }
 0x886   :  { %7630 = vset.pattern.permute.xlu0 %v16668_v12  ;;  %4195 = vperm.xlu1 %7601, %v12333_v29   ;;  %v12622_v1 = vpop.permute.xlu0 %3985 }
 0x887   :  { %4255 = vperm.xlu2 %7604, %v12333_v29   ;;  %4355 = vperm.xlu0 %7630, %v12333_v29   ;;  %v3926_v37 = vpop.permute.xlu1 %3925 }
 0x888   :  { %v3932_v15 = vmul.f32 %v3926_v37, %v12553_v20 }
 0x88a   :  { %5702 = vmatmul.f32.vlgmr.msrb.gmra.mxu1 %v3932_v15  ;;  %v4631_v15 = vld [vmem:[%s16393_s5 + $0x2678] sm:$0xff] }
 0x88b   :  { %5732 = vmatpush.msrb.mxu3 %v4631_v15  ;;  %v4629_v15 = vld [vmem:[%s16393_s5 + $0x2668] sm:$0xff] }
 0x88c   :  { %v12627_v35 = vpop.permute.xlu2 %4025 }
 0x88e   :  { %7605 = vset.pattern.permute.xlu1 %v16669_v43 }
 0x88f   :  { %7606 = vset.pattern.permute.xlu2 %v16670_v32  ;;  %7646 = vset.pattern.permute.xlu0 %v16659_v63 }
 0x890   :  { %4235 = vperm.xlu1 %7605, %v12333_v29   ;;  %4245 = vperm.xlu2 %7606, %v12333_v29   ;;  %v12634_v53 = vpop.permute.xlu0 %4065  ;;  %v12636_v49 = vpop.permute.xlu1 %3965 }
 0x891   :  { %4119 = vperm.xlu0 %7646, %v12523_v17  }
 0x895   :  { %v12639_v14 = vpop.permute.xlu2 %4055 }
 0x898   :  { %7611 = vset.pattern.permute.xlu1 %v16671_v33  ;;  %7608 = vset.pattern.permute.xlu2 %v16672_v18 }
 0x899   :  { %7651 = vset.pattern.permute.xlu0 %v16662_v51  ;;  %4305 = vperm.xlu1 %7611, %v12333_v29   ;;  %v12645_v63 = vpop.permute.xlu0 %4085  ;;  %v4630_v51 = vld [vmem:[%s16393_s5 + $0x2670] sm:$0xff] }
 0x89a   :  { %4295 = vperm.xlu2 %7608, %v12333_v29   ;;  %4169 = vperm.xlu0 %7651, %v12523_v17   ;;  %v12649_v61 = vpop.permute.xlu1 %3975 }
 0x89b   :  { %5733 = vmatpush.msrb.mxu3 %v4630_v51 }
 0x89d   :  { %5734 = vmatpush.msrb.mxu3 %v4629_v15  ;;  %v4627_v15 = vld [vmem:[%s16393_s5 + $0x2658] sm:$0xff] }
 0x89f   :  { %v12651_v37 = vpop.permute.xlu2 %4045  ;;  %5735 = vmatpush.msrb.mxu3 %v4628_v10  ;;  %v16680_v10 = vmov 56  }
 0x8a1   :  { %7614 = vset.pattern.permute.xlu1 %v16673_v22  ;;  %5736 = vmatpush.msrb.mxu3 %v4627_v15 }
 0x8a2   :  { %7609 = vset.pattern.permute.xlu2 %v16674_v21  ;;  %7654 = vset.pattern.permute.xlu0 %v16664_v47  ;;  %v16677_v47 = vmov 41  }
 0x8a3   :  { %4325 = vperm.xlu1 %7614, %v12333_v29   ;;  %4275 = vperm.xlu2 %7609, %v12333_v29   ;;  %v12664_v6 = vpop.permute.xlu0 %4135  ;;  %v12666_v19 = vpop.permute.xlu1 %4015 }
 0x8a4   :  { %16675 = vst [vmem:[#allocation19_spill] sm:$0xff] %v12664_v6  ;;  %4219 = vperm.xlu0 %7654, %v12523_v17   ;;  %5737 = vmatpush.msrb.mxu3 %v4626_v4  ;;  %v4623_v4 = vld [vmem:[%s16393_s5 + $0x2638] sm:$0xff] }
 0x8a8   :  { %v12672_v52 = vpop.permute.xlu2 %4095 }
 0x8ab   :  { %7615 = vset.pattern.permute.xlu1 %v16676_v30  ;;  %7613 = vset.pattern.permute.xlu2 %v16677_v47 }
 0x8ac   :  { %7657 = vset.pattern.permute.xlu0 %v16665_v24  ;;  %4345 = vperm.xlu1 %7615, %v12333_v29   ;;  %v12681_v46 = vpop.permute.xlu0 %4155  ;;  %v4625_v24 = vld [vmem:[%s16393_s5 + $0x2648] sm:$0xff] }
 0x8ad   :  { %16678 = vst [vmem:[#allocation23_spill] sm:$0xff] %v12681_v46  ;;  %4315 = vperm.xlu2 %7613, %v12333_v29   ;;  %4229 = vperm.xlu0 %7657, %v12523_v17   ;;  %v12685_v51 = vpop.permute.xlu1 %3995 }
 0x8ae   :  { %5738 = vmatpush.msrb.mxu3 %v4625_v24  ;;  %v4621_v24 = vld [vmem:[%s16393_s5 + $0x2628] sm:$0xff] }
 0x8b0   :  { %5739 = vmatpush.msrb.mxu3 %v4624_v48  ;;  %v4620_v48 = vld [vmem:[%s16393_s5 + $0x2620] sm:$0xff] }
 0x8b2   :  { %v12696_v42 = vpop.permute.xlu2 %4075  ;;  %5740 = vmatpush.msrb.mxu3 %v4623_v4  ;;  %v4647_v4 = vld [vmem:[%s16393_s5 + $0x26f8] sm:$0xff] }
 0x8b3   :  { %5755 = vmatpush.msra.mxu0 %v4647_v4  ;;  %v3893_v4 = vpop.f32.mrf.mxu2 }
 0x8b4   :  { %7616 = vset.pattern.permute.xlu1 %v16679_v38  ;;  %v4617_v38 = vld [vmem:[%s16393_s5 + $0x2608] sm:$0xff] }
 0x8b5   :  { %7618 = vset.pattern.permute.xlu2 %v16611_v0  ;;  %7668 = vset.pattern.permute.xlu0 %v16680_v10  ;;  %v4622_v0 = vld [vmem:[%s16393_s5 + $0x2630] sm:$0xff] }
 0x8b6   :  { %4375 = vperm.xlu1 %7616, %v12333_v29   ;;  %3919 = vperm.xlu2 %7618, %v12523_v17   ;;  %v12706_v15 = vpop.permute.xlu0 %4265  ;;  %v12708_v6 = vpop.permute.xlu1 %4035 }
 0x8b7   :  { %16681 = vst [vmem:[#allocation20_spill] sm:$0xff] %v12706_v15  ;;  %4465 = vperm.xlu0 %7668, %v12333_v29   ;;  %5741 = vmatpush.msrb.mxu3 %v4622_v0  ;;  %v16682_v15 = vmov 3   ;;  %v4646_v0 = vld [vmem:[%s16393_s5 + $0x26f0] sm:$0xff] }
 0x8b8   :  { %5756 = vmatpush.msra.mxu0 %v4646_v0  ;;  %v4644_v0 = vld [vmem:[%s16393_s5 + $0x26e0] sm:$0xff] }
 0x8b9   :  { %5742 = vmatpush.msrb.mxu3 %v4621_v24  ;;  %v4645_v24 = vld [vmem:[%s16393_s5 + $0x26e8] sm:$0xff] }
 0x8ba   :  { %5757 = vmatpush.msra.mxu0 %v4645_v24  ;;  %v4662_v24 = vld [vmem:[%s16393_s5 + $0x2770] sm:$0xff] }
 0x8bb   :  { %v12720_v10 = vpop.permute.xlu2 %4115  ;;  %5743 = vmatpush.msrb.mxu3 %v4620_v48  ;;  %v4616_v48 = vld [vmem:[%s16393_s5 + $0x2600] sm:$0xff] }
 0x8bc   :  { %5758 = vmatpush.msra.mxu0 %v4644_v0 }
 0x8be   :  { %7620 = vset.pattern.permute.xlu1 %v16682_v15  ;;  %7619 = vset.pattern.permute.xlu2 %v16635_v7  ;;  %v4619_v7 = vld [vmem:[%s16393_s5 + $0x2618] sm:$0xff] }
 0x8bf   :  { %7670 = vset.pattern.permute.xlu0 %v16677_v47  ;;  %3939 = vperm.xlu1 %7620, %v12523_v17   ;;  %v12732_v46 = vpop.permute.xlu0 %4285  ;;  %v4618_v47 = vld [vmem:[%s16393_s5 + $0x2610] sm:$0xff] }
 0x8c0   :  { %16683 = vst [vmem:[#allocation24_spill] sm:$0xff] %v12732_v46  ;;  %3929 = vperm.xlu2 %7619, %v12523_v17   ;;  %4319 = vperm.xlu0 %7670, %v12523_v17   ;;  %v12736_v15 = vpop.permute.xlu1 %4105 }
 0x8c1   :  { %16684 = vst [vmem:[#allocation21_spill] sm:$0xff] %v12736_v15  ;;  %5744 = vmatpush.msrb.mxu3 %v4619_v7  ;;  %v16686_v7 = vmov 46  }
 0x8c3   :  { %5745 = vmatpush.msrb.mxu3 %v4618_v47  ;;  %v4663_v47 = vld [vmem:[%s16393_s5 + $0x2778] sm:$0xff] }
 0x8c4   :  { %v12750_v46 = vpop.permute.xlu2 %4185  ;;  %5778 = vmatpush.msra.mxu1 %v4663_v47 }
 0x8c5   :  { %16685 = vst [vmem:[#allocation26_spill] sm:$0xff] %v12750_v46  ;;  %5746 = vmatpush.msrb.mxu3 %v4617_v38  ;;  %v16689_v46 = vperm.slane %v12311_v55, 6  ;;  %v4660_v55 = vld [vmem:[%s16393_s5 + $0x2760] sm:$0xff] }
 0x8c6   :  { %5779 = vmatpush.msra.mxu1 %v4662_v24 }
 0x8c7   :  { %7621 = vset.pattern.permute.xlu1 %v16636_v8  ;;  %5747 = vmatpush.msrb.mxu3 %v4616_v48  ;;  %v3894_v30 = vadd.f32 %v3893_v4, %v16689_v46  ;;  %v4661_v48 = vld [vmem:[%s16393_s5 + $0x2768] sm:$0xff]  ;;  %v16690_v4 = vmov 51  }
 0x8c8   :  { %7623 = vset.pattern.permute.xlu2 %v16638_v31  ;;  %7675 = vset.pattern.permute.xlu0 %v16686_v7  ;;  %v4643_v31 = vld [vmem:[%s16393_s5 + $0x26d8] sm:$0xff]  ;;  %v4641_v46 = vld [vmem:[%s16393_s5 + $0x26c8] sm:$0xff] }
 0x8c9   :  { %3949 = vperm.xlu1 %7621, %v12523_v17   ;;  %3969 = vperm.xlu2 %7623, %v12523_v17   ;;  %v12769_v38 = vpop.permute.xlu0 %4335  ;;  %v12771_v8 = vpop.permute.xlu1 %4125  ;;  %vm3897_vm2 = vcmp.gt.f32.partialorder %v3894_v30, 0.0 }
 0x8ca   :  { %16687 = vst [vmem:[#allocation22_spill] sm:$0xff] %v12769_v38  ;;  %4369 = vperm.xlu0 %7675, %v12523_v17   ;;  %v4642_v38 = vld [vmem:[%s16393_s5 + $0x26d0] sm:$0xff]  ;;  %5759 = vmatpush.msra.mxu0 %v4643_v31  ;;  %v4659_v31 = vld [vmem:[%s16393_s5 + $0x2758] sm:$0xff] }
 0x8cb   :  { %16688 = vst [vmem:[#allocation29_spill] sm:$0xff] %v12771_v8  ;;  %v3899_v8 = vmul.f32 0.01, %v3894_v30  ;;  %5780 = vmatpush.msra.mxu1 %v4661_v48  ;;  %v4638_v48 = vld [vmem:[%s16393_s5 + $0x26b0] sm:$0xff] }
 0x8cc   :  { %5760 = vmatpush.msra.mxu0 %v4642_v38 }
 0x8cd   :  { %v12802_v47 = vsel %vm3897_vm2, %v3894_v30, %v3899_v8  ;;  %5781 = vmatpush.msra.mxu1 %v4660_v55  ;;  %v4639_v30 = vld [vmem:[%s16393_s5 + $0x26b8] sm:$0xff]  ;;  %v4658_v8 = vld [vmem:[%s16393_s5 + $0x2750] sm:$0xff]  ;;  %v16692_v55 = vmov 52  }
 0x8ce   :  { %v12788_v15 = vpop.permute.xlu2 %4205  ;;  %5761 = vmatpush.msra.mxu0 %v4641_v46  ;;  %v4637_v46 = vld [vmem:[%s16393_s5 + $0x26a8] sm:$0xff] }
 0x8cf   :  { %5782 = vmatpush.msra.mxu1 %v4659_v31  ;;  %v4655_v31 = vld [vmem:[%s16393_s5 + $0x2738] sm:$0xff] }
 0x8d1   :  { %7627 = vset.pattern.permute.xlu1 %v16647_v2  ;;  %7624 = vset.pattern.permute.xlu2 %v16641_v25  ;;  %v4640_v2 = vld [vmem:[%s16393_s5 + $0x26c0] sm:$0xff] }
 0x8d2   :  { %7679 = vset.pattern.permute.xlu0 %v16690_v4  ;;  %3999 = vperm.xlu1 %7627, %v12523_v17   ;;  %v12800_v0 = vpop.permute.xlu1 %4145 }
 0x8d3   :  { %3979 = vperm.xlu2 %7624, %v12523_v17   ;;  %4419 = vperm.xlu0 %7679, %v12523_v17   ;;  %v3910_v25 = vpop.permute.xlu0 %3909 }
 0x8d4   :  { %v3913_v38 = vmul.f32 %v3910_v25, %v12802_v47  ;;  %5762 = vmatpush.msra.mxu0 %v4640_v2  ;;  %5783 = vmatpush.msra.mxu1 %v4658_v8  ;;  %v4657_v25 = vld [vmem:[%s16393_s5 + $0x2748] sm:$0xff]  ;;  %v3952_v2 = vmul.f32 %v12586_v3, %v12553_v20  ;;  %v4635_v3 = vld [vmem:[%s16393_s5 + $0x2698] sm:$0xff] }
 0x8d6   :  { %5659 = vmatmul.f32.gmra.mxu3 %v3913_v38  ;;  %5763 = vmatpush.msra.mxu0 %v4639_v30  ;;  %v4636_v38 = vld [vmem:[%s16393_s5 + $0x26a0] sm:$0xff]  ;;  %v4634_v30 = vld [vmem:[%s16393_s5 + $0x2690] sm:$0xff] }
 0x8d7   :  { %v12819_v24 = vpop.permute.xlu2 %4225  ;;  %5784 = vmatpush.msra.mxu1 %v4657_v25  ;;  %v4654_v25 = vld [vmem:[%s16393_s5 + $0x2730] sm:$0xff] }
 0x8d8   :  { %16691 = vst [vmem:[#allocation25_spill] sm:$0xff] %v12819_v24  ;;  %5764 = vmatpush.msra.mxu0 %v4638_v48  ;;  %v4679_v48 = vld [vmem:[%s16393_s5 + $0x27f8] sm:$0xff] }
 0x8d9   :  { %5801 = vmatpush.msra.mxu2 %v4679_v48  ;;  %v4677_v48 = vld [vmem:[%s16393_s5 + $0x27e8] sm:$0xff] }
 0x8da   :  { %7628 = vset.pattern.permute.xlu1 %v16642_v26  ;;  %5765 = vmatpush.msra.mxu0 %v4637_v46  ;;  %v16694_v46 = vmov 48  }
 0x8db   :  { %7625 = vset.pattern.permute.xlu2 %v16634_v50  ;;  %7682 = vset.pattern.permute.xlu0 %v16692_v55  ;;  %v4656_v50 = vld [vmem:[%s16393_s5 + $0x2740] sm:$0xff] }
 0x8dc   :  { %4009 = vperm.xlu1 %7628, %v12523_v17   ;;  %3989 = vperm.xlu2 %7625, %v12523_v17   ;;  %v12837_v26 = vpop.permute.xlu1 %4175 }
 0x8dd   :  { %4429 = vperm.xlu0 %7682, %v12523_v17   ;;  %5766 = vmatpush.msra.mxu0 %v4636_v38  ;;  %v16695_v38 = vmov 58  }
 0x8de   :  { %5748 = vmatmul.f32.vlgmr.msrb.gmra.mxu3 %v3952_v2  ;;  %5785 = vmatpush.msra.mxu1 %v4656_v50  ;;  %v4633_v2 = vld [vmem:[%s16393_s5 + $0x2688] sm:$0xff] }
 0x8df   :  { %5767 = vmatpush.msra.mxu0 %v4635_v3  ;;  %v4653_v3 = vld [vmem:[%s16393_s5 + $0x2728] sm:$0xff] }
 0x8e0   :  { %5786 = vmatpush.msra.mxu1 %v4655_v31  ;;  %v4632_v31 = vld [vmem:[%s16393_s5 + $0x2680] sm:$0xff] }
 0x8e1   :  { %v12855_v8 = vpop.permute.xlu2 %4255  ;;  %5768 = vmatpush.msra.mxu0 %v4634_v30  ;;  %v4711_v30 = vld [vmem:[%s16393_s5 + $0x28f8] sm:$0xff] }
 0x8e2   :  { %16693 = vst [vmem:[#allocation31_spill] sm:$0xff] %v12855_v8  ;;  %5787 = vmatpush.msra.mxu1 %v4654_v25  ;;  %v4652_v8 = vld [vmem:[%s16393_s5 + $0x2720] sm:$0xff]  ;;  %v4710_v25 = vld [vmem:[%s16393_s5 + $0x28f0] sm:$0xff] }
 0x8e3   :  { %5769 = vmatpush.msra.mxu0 %v4633_v2  ;;  %v4676_v2 = vld [vmem:[%s16393_s5 + $0x27e0] sm:$0xff] }
 0x8e4   :  { %7631 = vset.pattern.permute.xlu1 %v16686_v7  ;;  %7632 = vset.pattern.permute.xlu2 %v16694_v46  ;;  %v4678_v7 = vld [vmem:[%s16393_s5 + $0x27f0] sm:$0xff] }
 0x8e5   :  { %7683 = vset.pattern.permute.xlu0 %v16695_v38  ;;  %4365 = vperm.xlu1 %7631, %v12333_v29   ;;  %v12870_v50 = vpop.permute.xlu1 %4165  ;;  %v4651_v38 = vld [vmem:[%s16393_s5 + $0x2718] sm:$0xff] }
 0x8e6   :  { %4385 = vperm.xlu2 %7632, %v12333_v29   ;;  %4485 = vperm.xlu0 %7683, %v12333_v29  }
 0x8e7   :  { %5802 = vmatpush.msra.mxu2 %v4678_v7  ;;  %5788 = vmatpush.msra.mxu1 %v4653_v3  ;;  %v4695_v7 = vld [vmem:[%s16393_s5 + $0x2878] sm:$0xff]  ;;  %v4650_v3 = vld [vmem:[%s16393_s5 + $0x2710] sm:$0xff] }
 0x8e8   :  { %5770 = vmatpush.msra.mxu0 %v4632_v31  ;;  %5824 = vmatpush.msra.mxu3 %v4695_v7  ;;  %v16697_v31 = vmov 63   ;;  %v4693_v7 = vld [vmem:[%s16393_s5 + $0x2868] sm:$0xff] }
 0x8e9   :  { %5803 = vmatpush.msra.mxu2 %v4677_v48  ;;  %5789 = vmatpush.msra.mxu1 %v4652_v8  ;;  %v4675_v8 = vld [vmem:[%s16393_s5 + $0x27d8] sm:$0xff]  ;;  %v4708_v48 = vld [vmem:[%s16393_s5 + $0x28e0] sm:$0xff] }
 0x8ea   :  { %v12898_v24 = vpop.permute.xlu2 %4245  ;;  %5847 = vmatpush.msrb.mxu0 %v4711_v30  ;;  %v4709_v30 = vld [vmem:[%s16393_s5 + $0x28e8] sm:$0xff] }
 0x8eb   :  { %16696 = vst [vmem:[#allocation27_spill] sm:$0xff] %v12898_v24  ;;  %5804 = vmatpush.msra.mxu2 %v4676_v2  ;;  %5790 = vmatpush.msra.mxu1 %v4651_v38  ;;  %v4694_v38 = vld [vmem:[%s16393_s5 + $0x2870] sm:$0xff]  ;;  %v4648_v2 = vld [vmem:[%s16393_s5 + $0x2700] sm:$0xff]  ;;  %v4727_v24 = vld [vmem:[%s16393_s5 + $0x2978] sm:$0xff] }
 0x8ec   :  { %5848 = vmatpush.msrb.mxu0 %v4710_v25  ;;  %v4674_v25 = vld [vmem:[%s16393_s5 + $0x27d0] sm:$0xff]  ;;  %5825 = vmatpush.msra.mxu3 %v4694_v38 }
 0x8ed   :  { %7633 = vset.pattern.permute.xlu1 %v16648_v16  ;;  %5791 = vmatpush.msra.mxu1 %v4650_v3  ;;  %v4707_v3 = vld [vmem:[%s16393_s5 + $0x28d8] sm:$0xff]  ;;  %v4706_v38 = vld [vmem:[%s16393_s5 + $0x28d0] sm:$0xff] }
 0x8ee   :  { %7634 = vset.pattern.permute.xlu2 %v16650_v54  ;;  %7685 = vset.pattern.permute.xlu0 %v16697_v31  ;;  %v4649_v54 = vld [vmem:[%s16393_s5 + $0x2708] sm:$0xff] }
 0x8ef   :  { %4059 = vperm.xlu1 %7633, %v12523_v17   ;;  %4039 = vperm.xlu2 %7634, %v12523_v17   ;;  %v12920_v16 = vpop.permute.xlu1 %4215 }
 0x8f0   :  { %16698 = vst [vmem:[#allocation32_spill] sm:$0xff] %v12920_v16  ;;  %4535 = vperm.xlu0 %7685, %v12333_v29   ;;  %5849 = vmatpush.msrb.mxu0 %v4709_v30  ;;  %v4673_v30 = vld [vmem:[%s16393_s5 + $0x27c8] sm:$0xff] }
 0x8f1   :  { %5805 = vmatpush.msra.mxu2 %v4675_v8  ;;  %5792 = vmatpush.msra.mxu1 %v4649_v54  ;;  %v4692_v8 = vld [vmem:[%s16393_s5 + $0x2860] sm:$0xff] }
 0x8f2   :  { %5850 = vmatpush.msrb.mxu0 %v4708_v48  ;;  %5826 = vmatpush.msra.mxu3 %v4693_v7  ;;  %v4726_v48 = vld [vmem:[%s16393_s5 + $0x2970] sm:$0xff]  ;;  %v4725_v7 = vld [vmem:[%s16393_s5 + $0x2968] sm:$0xff] }
 0x8f3   :  { %5806 = vmatpush.msra.mxu2 %v4674_v25  ;;  %5793 = vmatpush.msra.mxu1 %v4648_v2  ;;  %v16700_v25 = vmov 61  }
 0x8f4   :  { %v12953_v54 = vpop.permute.xlu2 %4295  ;;  %5851 = vmatpush.msrb.mxu0 %v4707_v3  ;;  %5827 = vmatpush.msra.mxu3 %v4692_v8  ;;  %v4671_v3 = vld [vmem:[%s16393_s5 + $0x27b8] sm:$0xff]  ;;  %v4704_v8 = vld [vmem:[%s16393_s5 + $0x28c0] sm:$0xff] }
 0x8f5   :  { %16699 = vst [vmem:[#allocation28_spill] sm:$0xff] %v12953_v54  ;;  %5870 = vmatpush.msrb.mxu1 %v4727_v24  ;;  %5807 = vmatpush.msra.mxu2 %v4673_v30  ;;  %v4705_v24 = vld [vmem:[%s16393_s5 + $0x28c8] sm:$0xff]  ;;  %v4690_v30 = vld [vmem:[%s16393_s5 + $0x2850] sm:$0xff]  ;;  %v4724_v54 = vld [vmem:[%s16393_s5 + $0x2960] sm:$0xff] }
 0x8f6   :  { %5852 = vmatpush.msrb.mxu0 %v4706_v38  ;;  %v4670_v38 = vld [vmem:[%s16393_s5 + $0x27b0] sm:$0xff] }
 0x8f7   :  { %7635 = vset.pattern.permute.xlu1 %v16651_v62  ;;  %7638 = vset.pattern.permute.xlu2 %v16657_v59  ;;  %v4672_v62 = vld [vmem:[%s16393_s5 + $0x27c0] sm:$0xff]  ;;  %v4691_v59 = vld [vmem:[%s16393_s5 + $0x2858] sm:$0xff] }
 0x8f8   :  { %7697 = vset.pattern.permute.xlu0 %v16700_v25  ;;  %4049 = vperm.xlu1 %7635, %v12523_v17   ;;  %v12965_v2 = vpop.permute.xlu1 %4195  ;;  %v4703_v25 = vld [vmem:[%s16393_s5 + $0x28b8] sm:$0xff] }
 0x8f9   :  { %4079 = vperm.xlu2 %7638, %v12523_v17   ;;  %4519 = vperm.xlu0 %7697, %v12523_v17  }
 0x8fa   :  { %5871 = vmatpush.msrb.mxu1 %v4726_v48  ;;  %5808 = vmatpush.msra.mxu2 %v4672_v62  ;;  %v4689_v48 = vld [vmem:[%s16393_s5 + $0x2848] sm:$0xff]  ;;  %v4723_v62 = vld [vmem:[%s16393_s5 + $0x2958] sm:$0xff] }
 0x8fb   :  { %5828 = vmatpush.msra.mxu3 %v4691_v59  ;;  %5853 = vmatpush.msrb.mxu0 %v4705_v24  ;;  %v4702_v59 = vld [vmem:[%s16393_s5 + $0x28b0] sm:$0xff]  ;;  %v4669_v24 = vld [vmem:[%s16393_s5 + $0x27a8] sm:$0xff] }
 0x8fc   :  { %5872 = vmatpush.msrb.mxu1 %v4725_v7  ;;  %5809 = vmatpush.msra.mxu2 %v4671_v3  ;;  %v4701_v7 = vld [vmem:[%s16393_s5 + $0x28a8] sm:$0xff] }
 0x8fd   :  { %v12999_v16 = vpop.permute.xlu2 %4275  ;;  %5829 = vmatpush.msra.mxu3 %v4690_v30  ;;  %5854 = vmatpush.msrb.mxu0 %v4704_v8  ;;  %v4721_v3 = vld [vmem:[%s16393_s5 + $0x2948] sm:$0xff]  ;;  %v4687_v30 = vld [vmem:[%s16393_s5 + $0x2838] sm:$0xff]  ;;  %v4700_v8 = vld [vmem:[%s16393_s5 + $0x28a0] sm:$0xff] }
 0x8fe   :  { %5873 = vmatpush.msrb.mxu1 %v4724_v54  ;;  %5810 = vmatpush.msra.mxu2 %v4670_v38  ;;  %v4722_v54 = vld [vmem:[%s16393_s5 + $0x2950] sm:$0xff]  ;;  %v4667_v38 = vld [vmem:[%s16393_s5 + $0x2798] sm:$0xff] }
 0x8ff   :  { %5830 = vmatpush.msra.mxu3 %v4689_v48  ;;  %5855 = vmatpush.msrb.mxu0 %v4703_v25  ;;  %v4720_v48 = vld [vmem:[%s16393_s5 + $0x2940] sm:$0xff] }
 0x900   :  { %7636 = vset.pattern.permute.xlu1 %v16637_v9  ;;  %v4688_v9 = vld [vmem:[%s16393_s5 + $0x2840] sm:$0xff]  ;;  %5874 = vmatpush.msrb.mxu1 %v4723_v62  ;;  %v4686_v62 = vld [vmem:[%s16393_s5 + $0x2830] sm:$0xff] }
 0x901   :  { %7639 = vset.pattern.permute.xlu2 %v16640_v60  ;;  %4069 = vperm.xlu1 %7636, %v12523_v17   ;;  %v4668_v60 = vld [vmem:[%s16393_s5 + $0x27a0] sm:$0xff] }
 0x902   :  { %4089 = vperm.xlu2 %7639, %v12523_v17   ;;  %v13023_v25 = vpop.permute.xlu1 %4235  ;;  %5856 = vmatpush.msrb.mxu0 %v4702_v59  ;;  %v4699_v59 = vld [vmem:[%s16393_s5 + $0x2898] sm:$0xff] }
 0x903   :  { %5811 = vmatpush.msra.mxu2 %v4669_v24  ;;  %5875 = vmatpush.msrb.mxu1 %v4722_v54  ;;  %v4719_v54 = vld [vmem:[%s16393_s5 + $0x2938] sm:$0xff] }
 0x904   :  { %5831 = vmatpush.msra.mxu3 %v4688_v9  ;;  %5857 = vmatpush.msrb.mxu0 %v4701_v7  ;;  %v4698_v9 = vld [vmem:[%s16393_s5 + $0x2890] sm:$0xff] }
 0x905   :  { %5812 = vmatpush.msra.mxu2 %v4668_v60  ;;  %5876 = vmatpush.msrb.mxu1 %v4721_v3  ;;  %v4666_v7 = vld [vmem:[%s16393_s5 + $0x2790] sm:$0xff]  ;;  %v16701_v60 = vmov 50  }
 0x906   :  { %5832 = vmatpush.msra.mxu3 %v4687_v30  ;;  %5858 = vmatpush.msrb.mxu0 %v4700_v8  ;;  %v4718_v3 = vld [vmem:[%s16393_s5 + $0x2930] sm:$0xff]  ;;  %v4697_v8 = vld [vmem:[%s16393_s5 + $0x2888] sm:$0xff] }
 0x907   :  { %v13052_v24 = vpop.permute.xlu2 %4315  ;;  %5813 = vmatpush.msra.mxu2 %v4667_v38  ;;  %5877 = vmatpush.msrb.mxu1 %v4720_v48  ;;  %v4665_v38 = vld [vmem:[%s16393_s5 + $0x2788] sm:$0xff] }
 0x908   :  { %5833 = vmatpush.msra.mxu3 %v4686_v62  ;;  %5859 = vmatpush.msrb.mxu0 %v4699_v59  ;;  %v4717_v48 = vld [vmem:[%s16393_s5 + $0x2928] sm:$0xff]  ;;  %v4684_v62 = vld [vmem:[%s16393_s5 + $0x2820] sm:$0xff] }
 0x909   :  { %7637 = vset.pattern.permute.xlu1 %v16654_v11  ;;  %v4685_v11 = vld [vmem:[%s16393_s5 + $0x2828] sm:$0xff]  ;;  %5878 = vmatpush.msrb.mxu1 %v4719_v54  ;;  %v4696_v59 = vld [vmem:[%s16393_s5 + $0x2880] sm:$0xff] }
 0x90a   :  { %7643 = vset.pattern.permute.xlu2 %v16701_v60  ;;  %4099 = vperm.xlu1 %7637, %v12523_v17   ;;  %v4664_v54 = vld [vmem:[%s16393_s5 + $0x2780] sm:$0xff] }
 0x90b   :  { %4405 = vperm.xlu2 %7643, %v12333_v29   ;;  %v13073_v30 = vpop.permute.xlu1 %4305  ;;  %5860 = vmatpush.msrb.mxu0 %v4698_v9  ;;  %v4716_v9 = vld [vmem:[%s16393_s5 + $0x2920] sm:$0xff] }
 0x90c   :  { %5814 = vmatpush.msra.mxu2 %v4666_v7  ;;  %5879 = vmatpush.msrb.mxu1 %v4718_v3  ;;  %v4743_v7 = vld [vmem:[%s16393_s5 + $0x29f8] sm:$0xff] }
 0x90d   :  { %5834 = vmatpush.msra.mxu3 %v4685_v11  ;;  %5861 = vmatpush.msrb.mxu0 %v4697_v8  ;;  %v4683_v3 = vld [vmem:[%s16393_s5 + $0x2818] sm:$0xff] }
 0x90e   :  { %5815 = vmatpush.msra.mxu2 %v4665_v38  ;;  %5880 = vmatpush.msrb.mxu1 %v4717_v48  ;;  %v4715_v38 = vld [vmem:[%s16393_s5 + $0x2918] sm:$0xff]  ;;  %v4742_v48 = vld [vmem:[%s16393_s5 + $0x29f0] sm:$0xff] }
 0x90f   :  { %5835 = vmatpush.msra.mxu3 %v4684_v62  ;;  %5862 = vmatpush.msrb.mxu0 %v4696_v59  ;;  %v4682_v62 = vld [vmem:[%s16393_s5 + $0x2810] sm:$0xff]  ;;  %v4741_v59 = vld [vmem:[%s16393_s5 + $0x29e8] sm:$0xff] }
 0x910   :  { %v3920_v11 = vpop.permute.xlu2 %3919  ;;  %5816 = vmatpush.msra.mxu2 %v4664_v54  ;;  %5881 = vmatpush.msrb.mxu1 %v4716_v9  ;;  %v4713_v9 = vld [vmem:[%s16393_s5 + $0x2908] sm:$0xff] }
 0x911   :  { %v3923_v8 = vmul.f32 %v3920_v11, %v12802_v47  ;;  %5836 = vmatpush.msra.mxu3 %v4683_v3  ;;  %7698 = vset.pattern.permute.xlu0 %v16697_v31  ;;  %v4680_v3 = vld [vmem:[%s16393_s5 + $0x2800] sm:$0xff] }
 0x912   :  { %5893 = vmatpush.msrb.mxu2 %v4743_v7  ;;  %7640 = vset.pattern.permute.xlu1 %v16653_v56  ;;  %v4714_v56 = vld [vmem:[%s16393_s5 + $0x2910] sm:$0xff]  ;;  %v4740_v7 = vld [vmem:[%s16393_s5 + $0x29e0] sm:$0xff] }
 0x913   :  { %7644 = vset.pattern.permute.xlu2 %v16692_v55  ;;  %4109 = vperm.xlu1 %7640, %v12523_v17   ;;  %v4681_v55 = vld [vmem:[%s16393_s5 + $0x2808] sm:$0xff]  ;;  %v4712_v11 = vld [vmem:[%s16393_s5 + $0x2900] sm:$0xff] }
 0x914   :  { %4425 = vperm.xlu2 %7644, %v12333_v29   ;;  %5682 = vmatmul.f32.gmra.mxu0 %v3923_v8 }
 0x915   :  { %v13122_v54 = vpop.permute.xlu1 %4325  ;;  %5882 = vmatpush.msrb.mxu1 %v4715_v38  ;;  %5894 = vmatpush.msrb.mxu2 %v4742_v48  ;;  %v3962_v38 = vmul.f32 %v12606_v40, %v12553_v20  ;;  %v4759_v40 = vld [vmem:[%s16393_s5 + $0x2a78] sm:$0xff] }
 0x916   :  { %5837 = vmatpush.msra.mxu3 %v4682_v62  ;;  %v4775_v62 = vld [vmem:[%s16393_s5 + $0x2af8] sm:$0xff] }
 0x917   :  { %5883 = vmatpush.msrb.mxu1 %v4714_v56  ;;  %5895 = vmatpush.msrb.mxu2 %v4741_v59  ;;  %v4739_v56 = vld [vmem:[%s16393_s5 + $0x29d8] sm:$0xff]  ;;  %v4738_v59 = vld [vmem:[%s16393_s5 + $0x29d0] sm:$0xff] }
 0x918   :  { %5838 = vmatpush.msra.mxu3 %v4681_v55  ;;  %v4758_v55 = vld [vmem:[%s16393_s5 + $0x2a70] sm:$0xff] }
 0x919   :  { %5884 = vmatpush.msrb.mxu1 %v4713_v9  ;;  %5896 = vmatpush.msrb.mxu2 %v4740_v7  ;;  %v4773_v9 = vld [vmem:[%s16393_s5 + $0x2ae8] sm:$0xff] }
 0x91a   :  { %v3930_v8 = vpop.permute.xlu2 %3929  ;;  %5839 = vmatpush.msra.mxu3 %v4680_v3  ;;  %v4737_v7 = vld [vmem:[%s16393_s5 + $0x29c8] sm:$0xff] }
 0x91b   :  { %7641 = vset.pattern.permute.xlu1 %v16690_v4  ;;  %v3933_v48 = vmul.f32 %v3930_v8, %v12802_v47  ;;  %5885 = vmatpush.msrb.mxu1 %v4712_v11  ;;  %v4774_v4 = vld [vmem:[%s16393_s5 + $0x2af0] sm:$0xff]  ;;  %v4757_v3 = vld [vmem:[%s16393_s5 + $0x2a68] sm:$0xff]  ;;  %v3960_v11 = vpop.permute.xlu0 %3959  ;;  %v4772_v8 = vld [vmem:[%s16393_s5 + $0x2ae0] sm:$0xff] }
 0x91c   :  { %7645 = vset.pattern.permute.xlu2 %v16643_v39  ;;  %4415 = vperm.xlu1 %7641, %v12333_v29  }
 0x91d   :  { %4139 = vperm.xlu2 %7645, %v12523_v17   ;;  %5771 = vmatmul.f32.vlgmr.msra.gmra.mxu0 %v3962_v38  ;;  %v3963_v38 = vmul.f32 %v3960_v11, %v12802_v47  ;;  %v4789_v11 = vld [vmem:[%s16393_s5 + $0x2b68] sm:$0xff] }
 0x91e   :  { %5939 = vmatpush.msra.mxu0 %v4775_v62  ;;  %5705 = vmatmul.f32.gmra.mxu1 %v3933_v48  ;;  %v13159_v39 = vpop.permute.xlu1 %4345  ;;  %v16702_v48 = vmov 49   ;;  %v4771_v62 = vld [vmem:[%s16393_s5 + $0x2ad8] sm:$0xff] }
 0x91f   :  { %5897 = vmatpush.msrb.mxu2 %v4739_v56  ;;  %5916 = vmatpush.msrb.mxu3 %v4759_v40  ;;  %v3972_v56 = vmul.f32 %v12636_v49, %v12553_v20  ;;  %v4791_v40 = vld [vmem:[%s16393_s5 + $0x2b78] sm:$0xff]  ;;  %v4790_v49 = vld [vmem:[%s16393_s5 + $0x2b70] sm:$0xff] }
 0x920   :  { %5940 = vmatpush.msra.mxu0 %v4774_v4  ;;  %v4736_v4 = vld [vmem:[%s16393_s5 + $0x29c0] sm:$0xff] }
 0x921   :  { %5898 = vmatpush.msrb.mxu2 %v4738_v59  ;;  %5917 = vmatpush.msrb.mxu3 %v4758_v55  ;;  %v4770_v59 = vld [vmem:[%s16393_s5 + $0x2ad0] sm:$0xff]  ;;  %v4735_v55 = vld [vmem:[%s16393_s5 + $0x29b8] sm:$0xff] }
 0x922   :  { %5941 = vmatpush.msra.mxu0 %v4773_v9  ;;  %v4769_v9 = vld [vmem:[%s16393_s5 + $0x2ac8] sm:$0xff] }
 0x923   :  { %5899 = vmatpush.msrb.mxu2 %v4737_v7  ;;  %5918 = vmatpush.msrb.mxu3 %v4757_v3  ;;  %v4755_v3 = vld [vmem:[%s16393_s5 + $0x2a58] sm:$0xff] }
 0x924   :  { %7642 = vset.pattern.permute.xlu1 %v16702_v48  ;;  %5942 = vmatpush.msra.mxu0 %v4772_v8  ;;  %v4734_v8 = vld [vmem:[%s16393_s5 + $0x29b0] sm:$0xff] }
 0x925   :  { %7647 = vset.pattern.permute.xlu2 %v16656_v45  ;;  %4395 = vperm.xlu1 %7642, %v12333_v29   ;;  %v4756_v45 = vld [vmem:[%s16393_s5 + $0x2a60] sm:$0xff] }
 0x926   :  { %4129 = vperm.xlu2 %7647, %v12523_v17   ;;  %5774 = vmatmul.f32.gmra.mxu0 %v3963_v38  ;;  %v4768_v38 = vld [vmem:[%s16393_s5 + $0x2ac0] sm:$0xff] }
 0x927   :  { %5943 = vmatpush.msra.mxu0 %v4771_v62  ;;  %5794 = vmatmul.f32.vlgmr.msra.gmra.mxu1 %v3972_v56  ;;  %v3970_v62 = vpop.permute.xlu2 %3969  ;;  %v4788_v56 = vld [vmem:[%s16393_s5 + $0x2b60] sm:$0xff] }
 0x928   :  { %5962 = vmatpush.msra.mxu1 %v4791_v40  ;;  %v13210_v7 = vpop.permute.xlu1 %4375  ;;  %5900 = vmatpush.msrb.mxu2 %v4736_v4  ;;  %v4767_v40 = vld [vmem:[%s16393_s5 + $0x2ab8] sm:$0xff]  ;;  %v3973_v4 = vmul.f32 %v3970_v62, %v12802_v47  ;;  %v4764_v62 = vld [vmem:[%s16393_s5 + $0x2aa0] sm:$0xff] }
 0x929   :  { %5944 = vmatpush.msra.mxu0 %v4770_v59  ;;  %5919 = vmatpush.msrb.mxu3 %v4756_v45  ;;  %v4787_v59 = vld [vmem:[%s16393_s5 + $0x2b58] sm:$0xff]  ;;  %v4002_v45 = vmul.f32 %v12685_v51, %v12553_v20  ;;  %v4733_v51 = vld [vmem:[%s16393_s5 + $0x29a8] sm:$0xff] }
 0x92a   :  { %5963 = vmatpush.msra.mxu1 %v4790_v49  ;;  %5901 = vmatpush.msrb.mxu2 %v4735_v55  ;;  %v4786_v49 = vld [vmem:[%s16393_s5 + $0x2b50] sm:$0xff]  ;;  %v4765_v55 = vld [vmem:[%s16393_s5 + $0x2aa8] sm:$0xff] }
 0x92b   :  { %5945 = vmatpush.msra.mxu0 %v4769_v9  ;;  %5920 = vmatpush.msrb.mxu3 %v4755_v3  ;;  %v4753_v3 = vld [vmem:[%s16393_s5 + $0x2a48] sm:$0xff] }
 0x92c   :  { %5964 = vmatpush.msra.mxu1 %v4789_v11  ;;  %5902 = vmatpush.msrb.mxu2 %v4734_v8  ;;  %v4785_v11 = vld [vmem:[%s16393_s5 + $0x2b48] sm:$0xff] }
 0x92d   :  { %5946 = vmatpush.msra.mxu0 %v4768_v38  ;;  %7650 = vset.pattern.permute.xlu1 %v16646_v28  ;;  %v4766_v28 = vld [vmem:[%s16393_s5 + $0x2ab0] sm:$0xff]  ;;  %v4732_v38 = vld [vmem:[%s16393_s5 + $0x29a0] sm:$0xff] }
 0x92e   :  { %7648 = vset.pattern.permute.xlu2 %v16658_v44  ;;  %5965 = vmatpush.msra.mxu1 %v4788_v56  ;;  %v4754_v44 = vld [vmem:[%s16393_s5 + $0x2a50] sm:$0xff]  ;;  %v4784_v56 = vld [vmem:[%s16393_s5 + $0x2b40] sm:$0xff] }
 0x92f   :  { %4159 = vperm.xlu1 %7650, %v12523_v17   ;;  %4149 = vperm.xlu2 %7648, %v12523_v17  }
 0x930   :  { %5947 = vmatpush.msra.mxu0 %v4767_v40  ;;  %5797 = vmatmul.f32.gmra.mxu1 %v3973_v4  ;;  %v4763_v40 = vld [vmem:[%s16393_s5 + $0x2a98] sm:$0xff]  ;;  %v4752_v4 = vld [vmem:[%s16393_s5 + $0x2a40] sm:$0xff] }
 0x931   :  { %5863 = vmatmul.f32.vlgmr.msrb.gmra.mxu0 %v4002_v45  ;;  %5966 = vmatpush.msra.mxu1 %v4787_v59  ;;  %v3940_v9 = vpop.permute.xlu1 %3939  ;;  %v4012_v59 = vmul.f32 %v12616_v58, %v12553_v20  ;;  %v4783_v45 = vld [vmem:[%s16393_s5 + $0x2b38] sm:$0xff]  ;;  %v4782_v58 = vld [vmem:[%s16393_s5 + $0x2b30] sm:$0xff] }
 0x932   :  { %5948 = vmatpush.msra.mxu0 %v4766_v28  ;;  %5921 = vmatpush.msrb.mxu3 %v4754_v44  ;;  %v3943_v8 = vmul.f32 %v3940_v9, %v12802_v47  ;;  %v4731_v28 = vld [vmem:[%s16393_s5 + $0x2998] sm:$0xff]  ;;  %v4730_v44 = vld [vmem:[%s16393_s5 + $0x2990] sm:$0xff]  ;;  %v4729_v9 = vld [vmem:[%s16393_s5 + $0x2988] sm:$0xff] }
 0x933   :  { %5967 = vmatpush.msra.mxu1 %v4786_v49  ;;  %5903 = vmatpush.msrb.mxu2 %v4733_v51  ;;  %v4761_v49 = vld [vmem:[%s16393_s5 + $0x2a88] sm:$0xff]  ;;  %v4750_v51 = vld [vmem:[%s16393_s5 + $0x2a30] sm:$0xff] }
 0x934   :  { %5949 = vmatpush.msra.mxu0 %v4765_v55  ;;  %5922 = vmatpush.msrb.mxu3 %v4753_v3  ;;  %v4781_v55 = vld [vmem:[%s16393_s5 + $0x2b28] sm:$0xff]  ;;  %v4760_v3 = vld [vmem:[%s16393_s5 + $0x2a80] sm:$0xff] }
 0x935   :  { %5968 = vmatpush.msra.mxu1 %v4785_v11  ;;  %5904 = vmatpush.msrb.mxu2 %v4732_v38  ;;  %v4749_v11 = vld [vmem:[%s16393_s5 + $0x2a28] sm:$0xff]  ;;  %v4839_v38 = vld [vmem:[%s16393_s5 + $0x2cf8] sm:$0xff] }
 0x936   :  { %5950 = vmatpush.msra.mxu0 %v4764_v62  ;;  %5728 = vmatmul.f32.gmra.mxu2 %v3943_v8  ;;  %v4780_v8 = vld [vmem:[%s16393_s5 + $0x2b20] sm:$0xff] }
 0x937   :  { %5969 = vmatpush.msra.mxu1 %v4784_v56  ;;  %7655 = vset.pattern.permute.xlu1 %v16666_v41  ;;  %v4762_v41 = vld [vmem:[%s16393_s5 + $0x2a90] sm:$0xff]  ;;  %v4728_v62 = vld [vmem:[%s16393_s5 + $0x2980] sm:$0xff] }
 0x938   :  { %7649 = vset.pattern.permute.xlu2 %v16660_v23  ;;  %5951 = vmatpush.msra.mxu0 %v4763_v40  ;;  %v4751_v23 = vld [vmem:[%s16393_s5 + $0x2a38] sm:$0xff]  ;;  %v3982_v40 = vmul.f32 %v12649_v61, %v12553_v20  ;;  %v4838_v61 = vld [vmem:[%s16393_s5 + $0x2cf0] sm:$0xff] }
 0x939   :  { %4199 = vperm.xlu1 %7655, %v12523_v17   ;;  %4179 = vperm.xlu2 %7649, %v12523_v17  }
 0x93a   :  { %5886 = vmatmul.f32.vlgmr.msrb.gmra.mxu1 %v4012_v59  ;;  %5923 = vmatpush.msrb.mxu3 %v4752_v4  ;;  %v4807_v4 = vld [vmem:[%s16393_s5 + $0x2bf8] sm:$0xff]  ;;  %v4748_v59 = vld [vmem:[%s16393_s5 + $0x2a20] sm:$0xff] }
 0x93b   :  { %5970 = vmatpush.msra.mxu1 %v4783_v45  ;;  %5905 = vmatpush.msrb.mxu2 %v4731_v28  ;;  %v3950_v56 = vpop.permute.xlu1 %3949  ;;  %v4779_v45 = vld [vmem:[%s16393_s5 + $0x2b18] sm:$0xff] }
 0x93c   :  { %5952 = vmatpush.msra.mxu0 %v4762_v41  ;;  %5924 = vmatpush.msrb.mxu3 %v4751_v23  ;;  %v3953_v28 = vmul.f32 %v3950_v56, %v12802_v47  ;;  %v4778_v41 = vld [vmem:[%s16393_s5 + $0x2b10] sm:$0xff] }
 0x93d   :  { %5971 = vmatpush.msra.mxu1 %v4782_v58  ;;  %5906 = vmatpush.msrb.mxu2 %v4730_v44  ;;  %v4806_v23 = vld [vmem:[%s16393_s5 + $0x2bf0] sm:$0xff]  ;;  %v3980_v58 = vpop.permute.xlu2 %3979  ;;  %v4777_v44 = vld [vmem:[%s16393_s5 + $0x2b08] sm:$0xff] }
 0x93e   :  { %5953 = vmatpush.msra.mxu0 %v4761_v49  ;;  %5925 = vmatpush.msrb.mxu3 %v4750_v51  ;;  %v4746_v49 = vld [vmem:[%s16393_s5 + $0x2a10] sm:$0xff]  ;;  %v4805_v51 = vld [vmem:[%s16393_s5 + $0x2be8] sm:$0xff]  ;;  %v3983_v56 = vmul.f32 %v3980_v58, %v12802_v47 }
 0x93f   :  { %5972 = vmatpush.msra.mxu1 %v4781_v55  ;;  %5907 = vmatpush.msrb.mxu2 %v4729_v9  ;;  %v4836_v55 = vld [vmem:[%s16393_s5 + $0x2ce0] sm:$0xff]  ;;  %v4802_v58 = vld [vmem:[%s16393_s5 + $0x2bd0] sm:$0xff] }
 0x940   :  { %5954 = vmatpush.msra.mxu0 %v4760_v3  ;;  %5926 = vmatpush.msrb.mxu3 %v4749_v11  ;;  %v4776_v9 = vld [vmem:[%s16393_s5 + $0x2b00] sm:$0xff]  ;;  %v4745_v3 = vld [vmem:[%s16393_s5 + $0x2a08] sm:$0xff] }
 0x941   :  { %5973 = vmatpush.msra.mxu1 %v4780_v8  ;;  %5908 = vmatpush.msrb.mxu2 %v4728_v62  ;;  %v4804_v11 = vld [vmem:[%s16393_s5 + $0x2be0] sm:$0xff]  ;;  %v4835_v8 = vld [vmem:[%s16393_s5 + $0x2cd8] sm:$0xff] }
 0x942   :  { %6031 = vmatpush.msrb.mxu0 %v4839_v38  ;;  %7656 = vset.pattern.permute.xlu1 %v16663_v57  ;;  %v4747_v57 = vld [vmem:[%s16393_s5 + $0x2a18] sm:$0xff]  ;;  %v4744_v62 = vld [vmem:[%s16393_s5 + $0x2a00] sm:$0xff] }
 0x943   :  { %5817 = vmatmul.f32.vlgmr.msra.gmra.mxu2 %v3982_v40  ;;  %7652 = vset.pattern.permute.xlu2 %v16661_v36  ;;  %v4837_v36 = vld [vmem:[%s16393_s5 + $0x2ce8] sm:$0xff]  ;;  %v4855_v38 = vld [vmem:[%s16393_s5 + $0x2d78] sm:$0xff] }
 0x944   :  { %5985 = vmatpush.msra.mxu2 %v4807_v4  ;;  %5927 = vmatpush.msrb.mxu3 %v4748_v59  ;;  %v4803_v40 = vld [vmem:[%s16393_s5 + $0x2bd8] sm:$0xff]  ;;  %v4834_v4 = vld [vmem:[%s16393_s5 + $0x2cd0] sm:$0xff]  ;;  %v4000_v59 = vpop.permute.xlu1 %3999 }
 0x945   :  { %5974 = vmatpush.msra.mxu1 %v4779_v45  ;;  %6032 = vmatpush.msrb.mxu0 %v4838_v61  ;;  %v4854_v45 = vld [vmem:[%s16393_s5 + $0x2d70] sm:$0xff]  ;;  %v3992_v61 = vmul.f32 %v12622_v1, %v12553_v20 }
 0x946   :  { %4209 = vperm.xlu1 %7656, %v12523_v17   ;;  %4189 = vperm.xlu2 %7652, %v12523_v17   ;;  %v4822_v1 = vld [vmem:[%s16393_s5 + $0x2c70] sm:$0xff] }
 0x947   :  { %5751 = vmatmul.f32.gmra.mxu3 %v3953_v28  ;;  %5975 = vmatpush.msra.mxu1 %v4778_v41  ;;  %v4823_v28 = vld [vmem:[%s16393_s5 + $0x2c78] sm:$0xff]  ;;  %v3990_v41 = vpop.permute.xlu2 %3989 }
 0x948   :  { %5928 = vmatpush.msrb.mxu3 %v4747_v57  ;;  %5986 = vmatpush.msra.mxu2 %v4806_v23  ;;  %v4003_v57 = vmul.f32 %v4000_v59, %v12802_v47  ;;  %v16703_v23 = vmov 55   ;;  %v4819_v59 = vld [vmem:[%s16393_s5 + $0x2c58] sm:$0xff] }
 0x949   :  { %6033 = vmatpush.msrb.mxu0 %v4837_v36  ;;  %5976 = vmatpush.msra.mxu1 %v4777_v44  ;;  %v4833_v36 = vld [vmem:[%s16393_s5 + $0x2cc8] sm:$0xff] }
 0x94a   :  { %5929 = vmatpush.msrb.mxu3 %v4746_v49  ;;  %5987 = vmatpush.msra.mxu2 %v4805_v51  ;;  %v4801_v44 = vld [vmem:[%s16393_s5 + $0x2bc8] sm:$0xff]  ;;  %v4832_v51 = vld [vmem:[%s16393_s5 + $0x2cc0] sm:$0xff] }
 0x94b   :  { %6034 = vmatpush.msrb.mxu0 %v4836_v55  ;;  %5977 = vmatpush.msra.mxu1 %v4776_v9  ;;  %v4821_v49 = vld [vmem:[%s16393_s5 + $0x2c68] sm:$0xff]  ;;  %v4852_v55 = vld [vmem:[%s16393_s5 + $0x2d60] sm:$0xff] }
 0x94c   :  { %5930 = vmatpush.msrb.mxu3 %v4745_v3  ;;  %5988 = vmatpush.msra.mxu2 %v4804_v11  ;;  %v4800_v9 = vld [vmem:[%s16393_s5 + $0x2bc0] sm:$0xff]  ;;  %v4831_v11 = vld [vmem:[%s16393_s5 + $0x2cb8] sm:$0xff] }
 0x94d   :  { %6035 = vmatpush.msrb.mxu0 %v4835_v8  ;;  %6054 = vmatpush.msrb.mxu1 %v4855_v38  ;;  %v4820_v3 = vld [vmem:[%s16393_s5 + $0x2c60] sm:$0xff]  ;;  %v4851_v8 = vld [vmem:[%s16393_s5 + $0x2d58] sm:$0xff] }
 0x94e   :  { %5820 = vmatmul.f32.gmra.mxu2 %v3983_v56  ;;  %5931 = vmatpush.msrb.mxu3 %v4744_v62  ;;  %v4799_v38 = vld [vmem:[%s16393_s5 + $0x2bb8] sm:$0xff]  ;;  %v3993_v62 = vmul.f32 %v3990_v41, %v12802_v47  ;;  %v4830_v56 = vld [vmem:[%s16393_s5 + $0x2cb0] sm:$0xff] }
 0x94f   :  { %5989 = vmatpush.msra.mxu2 %v4803_v40  ;;  %6036 = vmatpush.msrb.mxu0 %v4834_v4  ;;  %v4022_v40 = vmul.f32 %v12666_v19, %v12553_v20  ;;  %v4010_v4 = vpop.permute.xlu1 %4009  ;;  %v4042_v19 = vmul.f32 %v12708_v6, %v12553_v20  ;;  %v4818_v6 = vld [vmem:[%s16393_s5 + $0x2c50] sm:$0xff] }
 0x950   :  { %7658 = vset.pattern.permute.xlu1 %v16667_v34  ;;  %7653 = vset.pattern.permute.xlu2 %v16703_v23  ;;  %v4853_v34 = vld [vmem:[%s16393_s5 + $0x2d68] sm:$0xff]  ;;  %v4013_v41 = vmul.f32 %v4010_v4, %v12802_v47 }
 0x951   :  { %5840 = vmatmul.f32.vlgmr.msra.gmra.mxu3 %v3992_v61  ;;  %6055 = vmatpush.msrb.mxu1 %v4854_v45  ;;  %v4850_v45 = vld [vmem:[%s16393_s5 + $0x2d50] sm:$0xff]  ;;  %v13460_v61 = vpop.permute.xlu2 %4385 }
 0x952   :  { %6008 = vmatpush.msra.mxu3 %v4823_v28  ;;  %4259 = vperm.xlu1 %7658, %v12523_v17   ;;  %v4798_v28 = vld [vmem:[%s16393_s5 + $0x2bb0] sm:$0xff] }
 0x953   :  { %5990 = vmatpush.msra.mxu2 %v4802_v58  ;;  %4455 = vperm.xlu2 %7653, %v12333_v29   ;;  %v4849_v58 = vld [vmem:[%s16393_s5 + $0x2d48] sm:$0xff] }
 0x954   :  { %5866 = vmatmul.f32.gmra.mxu0 %v4003_v57  ;;  %6009 = vmatpush.msra.mxu3 %v4822_v1  ;;  %v4829_v57 = vld [vmem:[%s16393_s5 + $0x2ca8] sm:$0xff] }
 0x955   :  { %6037 = vmatpush.msrb.mxu0 %v4833_v36  ;;  %6056 = vmatpush.msrb.mxu1 %v4853_v34  ;;  %v4797_v1 = vld [vmem:[%s16393_s5 + $0x2ba8] sm:$0xff]  ;;  %v4848_v36 = vld [vmem:[%s16393_s5 + $0x2d40] sm:$0xff]  ;;  %v4020_v34 = vpop.permute.xlu0 %4019 }
 0x956   :  { %5991 = vmatpush.msra.mxu2 %v4801_v44  ;;  %6010 = vmatpush.msra.mxu3 %v4821_v49  ;;  %v4796_v44 = vld [vmem:[%s16393_s5 + $0x2ba0] sm:$0xff]  ;;  %v4827_v49 = vld [vmem:[%s16393_s5 + $0x2c98] sm:$0xff] }
 0x957   :  { %6038 = vmatpush.msrb.mxu0 %v4832_v51  ;;  %6057 = vmatpush.msrb.mxu1 %v4852_v55  ;;  %v4816_v51 = vld [vmem:[%s16393_s5 + $0x2c40] sm:$0xff]  ;;  %v4847_v55 = vld [vmem:[%s16393_s5 + $0x2d38] sm:$0xff] }
 0x958   :  { %5992 = vmatpush.msra.mxu2 %v4800_v9  ;;  %6011 = vmatpush.msra.mxu3 %v4820_v3  ;;  %v4826_v9 = vld [vmem:[%s16393_s5 + $0x2c90] sm:$0xff]  ;;  %v4023_v3 = vmul.f32 %v4020_v34, %v12802_v47  ;;  %v4062_v34 = vmul.f32 %v12639_v14, %v12553_v20  ;;  %v4901_v14 = vld [vmem:[%s16393_s5 + $0x2ee8] sm:$0xff] }
 0x959   :  { %6039 = vmatpush.msrb.mxu0 %v4831_v11  ;;  %6058 = vmatpush.msrb.mxu1 %v4851_v8  ;;  %v4040_v11 = vpop.permute.xlu2 %4039  ;;  %v4795_v8 = vld [vmem:[%s16393_s5 + $0x2b98] sm:$0xff] }
 0x95a   :  { %5993 = vmatpush.msra.mxu2 %v4799_v38  ;;  %5843 = vmatmul.f32.gmra.mxu3 %v3993_v62  ;;  %v4032_v38 = vmul.f32 %v12627_v35, %v12553_v20  ;;  %v4815_v62 = vld [vmem:[%s16393_s5 + $0x2c38] sm:$0xff]  ;;  %v4043_v4 = vmul.f32 %v4040_v11, %v12802_v47  ;;  %v4825_v35 = vld [vmem:[%s16393_s5 + $0x2c88] sm:$0xff] }
 0x95b   :  { %5909 = vmatmul.f32.vlgmr.msrb.gmra.mxu2 %v4022_v40  ;;  %6040 = vmatpush.msrb.mxu0 %v4830_v56  ;;  %v4846_v56 = vld [vmem:[%s16393_s5 + $0x2d30] sm:$0xff]  ;;  %v4841_v11 = vld [vmem:[%s16393_s5 + $0x2d08] sm:$0xff] }
 0x95c   :  { %6012 = vmatpush.msra.mxu3 %v4819_v59  ;;  %6059 = vmatpush.msrb.mxu1 %v4850_v45  ;;  %v4794_v40 = vld [vmem:[%s16393_s5 + $0x2b90] sm:$0xff]  ;;  %v4052_v59 = vmul.f32 %v12651_v37, %v12553_v20  ;;  %v4824_v37 = vld [vmem:[%s16393_s5 + $0x2c80] sm:$0xff] }
 0x95d   :  { %7660 = vset.pattern.permute.xlu1 %v16670_v32  ;;  %5994 = vmatpush.msra.mxu2 %v4798_v28  ;;  %v4817_v32 = vld [vmem:[%s16393_s5 + $0x2c48] sm:$0xff]  ;;  %v4814_v45 = vld [vmem:[%s16393_s5 + $0x2c30] sm:$0xff] }
 0x95e   :  { %7659 = vset.pattern.permute.xlu2 %v16669_v43  ;;  %5955 = vmatmul.f32.vlgmr.msra.gmra.mxu0 %v4042_v19  ;;  %v4828_v43 = vld [vmem:[%s16393_s5 + $0x2ca0] sm:$0xff]  ;;  %v4845_v28 = vld [vmem:[%s16393_s5 + $0x2d28] sm:$0xff] }
 0x95f   :  { %6041 = vmatpush.msrb.mxu0 %v4829_v57  ;;  %4249 = vperm.xlu1 %7660, %v12523_v17   ;;  %v4793_v19 = vld [vmem:[%s16393_s5 + $0x2b88] sm:$0xff]  ;;  %v13549_v57 = vpop.permute.xlu1 %4365 }
 0x960   :  { %4239 = vperm.xlu2 %7659, %v12523_v17   ;;  %5889 = vmatmul.f32.gmra.mxu1 %v4013_v41  ;;  %v4813_v41 = vld [vmem:[%s16393_s5 + $0x2c28] sm:$0xff] }
 0x961   :  { %6060 = vmatpush.msrb.mxu1 %v4849_v58  ;;  %6013 = vmatpush.msra.mxu3 %v4818_v6  ;;  %v4792_v58 = vld [vmem:[%s16393_s5 + $0x2b80] sm:$0xff]  ;;  %v4030_v6 = vpop.permute.xlu0 %4029 }
 0x962   :  { %5995 = vmatpush.msra.mxu2 %v4797_v1  ;;  %6042 = vmatpush.msrb.mxu0 %v4828_v43  ;;  %v4812_v1 = vld [vmem:[%s16393_s5 + $0x2c20] sm:$0xff]  ;;  %v4843_v43 = vld [vmem:[%s16393_s5 + $0x2d18] sm:$0xff] }
 0x963   :  { %6014 = vmatpush.msra.mxu3 %v4817_v32  ;;  %6061 = vmatpush.msrb.mxu1 %v4848_v36  ;;  %v4871_v32 = vld [vmem:[%s16393_s5 + $0x2df8] sm:$0xff]  ;;  %v4902_v36 = vld [vmem:[%s16393_s5 + $0x2ef0] sm:$0xff] }
 0x964   :  { %5996 = vmatpush.msra.mxu2 %v4796_v44  ;;  %6043 = vmatpush.msrb.mxu0 %v4827_v49  ;;  %v4033_v44 = vmul.f32 %v4030_v6, %v12802_v47  ;;  %v4811_v49 = vld [vmem:[%s16393_s5 + $0x2c18] sm:$0xff]  ;;  %v4917_v6 = vld [vmem:[%s16393_s5 + $0x2f68] sm:$0xff] }
 0x965   :  { %6015 = vmatpush.msra.mxu3 %v4816_v51  ;;  %6062 = vmatpush.msrb.mxu1 %v4847_v55  ;;  %v4842_v51 = vld [vmem:[%s16393_s5 + $0x2d10] sm:$0xff] }
 0x966   :  { %5912 = vmatmul.f32.gmra.mxu2 %v4023_v3  ;;  %6044 = vmatpush.msrb.mxu0 %v4826_v9  ;;  %v4870_v55 = vld [vmem:[%s16393_s5 + $0x2df0] sm:$0xff]  ;;  %v4082_v3 = vmul.f32 %v12696_v42, %v12553_v20  ;;  %v4840_v42 = vld [vmem:[%s16393_s5 + $0x2d00] sm:$0xff] }
 0x967   :  { %5997 = vmatpush.msra.mxu2 %v4795_v8  ;;  %5932 = vmatmul.f32.vlgmr.msrb.gmra.mxu3 %v4032_v38  ;;  %v4810_v9 = vld [vmem:[%s16393_s5 + $0x2c10] sm:$0xff]  ;;  %v4869_v8 = vld [vmem:[%s16393_s5 + $0x2de8] sm:$0xff]  ;;  %v4900_v38 = vld [vmem:[%s16393_s5 + $0x2ee0] sm:$0xff] }
 0x968   :  { %6016 = vmatpush.msra.mxu3 %v4815_v62  ;;  %6063 = vmatpush.msrb.mxu1 %v4846_v56  ;;  %v4060_v62 = vpop.permute.xlu1 %4059  ;;  %v4868_v56 = vld [vmem:[%s16393_s5 + $0x2de0] sm:$0xff] }
 0x969   :  { %5958 = vmatmul.f32.gmra.mxu0 %v4043_v4  ;;  %5998 = vmatpush.msra.mxu2 %v4794_v40  ;;  %v4809_v40 = vld [vmem:[%s16393_s5 + $0x2c08] sm:$0xff]  ;;  %v4899_v4 = vld [vmem:[%s16393_s5 + $0x2ed8] sm:$0xff] }
 0x96a   :  { %6045 = vmatpush.msrb.mxu0 %v4825_v35  ;;  %7661 = vset.pattern.permute.xlu1 %v16649_v27  ;;  %v4844_v27 = vld [vmem:[%s16393_s5 + $0x2d20] sm:$0xff] }
 0x96b   :  { %7663 = vset.pattern.permute.xlu2 %v16674_v21  ;;  %5978 = vmatmul.f32.vlgmr.msra.gmra.mxu1 %v4052_v59  ;;  %v4903_v21 = vld [vmem:[%s16393_s5 + $0x2ef8] sm:$0xff]  ;;  %v4808_v35 = vld [vmem:[%s16393_s5 + $0x2c00] sm:$0xff]  ;;  %v4898_v59 = vld [vmem:[%s16393_s5 + $0x2ed0] sm:$0xff] }
 0x96c   :  { %6017 = vmatpush.msra.mxu3 %v4814_v45  ;;  %6064 = vmatpush.msrb.mxu1 %v4845_v28  ;;  %v4063_v45 = vmul.f32 %v4060_v62, %v12802_v47  ;;  %v4887_v28 = vld [vmem:[%s16393_s5 + $0x2e78] sm:$0xff]  ;;  %v4862_v62 = vld [vmem:[%s16393_s5 + $0x2db0] sm:$0xff] }
 0x96d   :  { %4269 = vperm.xlu1 %7661, %v12523_v17   ;;  %5999 = vmatpush.msra.mxu2 %v4793_v19  ;;  %v4918_v19 = vld [vmem:[%s16393_s5 + $0x2f70] sm:$0xff] }
 0x96e   :  { %4279 = vperm.xlu2 %7663, %v12523_v17   ;;  %6046 = vmatpush.msrb.mxu0 %v4824_v37  ;;  %v4080_v37 = vpop.permute.xlu2 %4079 }
 0x96f   :  { %6018 = vmatpush.msra.mxu3 %v4813_v41  ;;  %6065 = vmatpush.msrb.mxu1 %v4844_v27  ;;  %v4866_v41 = vld [vmem:[%s16393_s5 + $0x2dd0] sm:$0xff]  ;;  %v4072_v27 = vmul.f32 %v12634_v53, %v12553_v20  ;;  %v4865_v53 = vld [vmem:[%s16393_s5 + $0x2dc8] sm:$0xff] }
 0x970   :  { %6123 = vmatpush.msra.mxu0 %v4903_v21  ;;  %6000 = vmatpush.msra.mxu2 %v4792_v58  ;;  %v4897_v21 = vld [vmem:[%s16393_s5 + $0x2ec8] sm:$0xff]  ;;  %v4886_v58 = vld [vmem:[%s16393_s5 + $0x2e70] sm:$0xff] }
 0x971   :  { %6019 = vmatpush.msra.mxu3 %v4812_v1  ;;  %6066 = vmatpush.msrb.mxu1 %v4843_v43  ;;  %v4083_v1 = vmul.f32 %v4080_v37, %v12802_v47  ;;  %v4896_v43 = vld [vmem:[%s16393_s5 + $0x2ec0] sm:$0xff] }
 0x972   :  { %6077 = vmatpush.msrb.mxu2 %v4871_v32  ;;  %6124 = vmatpush.msra.mxu0 %v4902_v36  ;;  %v4050_v32 = vpop.permute.xlu1 %4049  ;;  %v4885_v36 = vld [vmem:[%s16393_s5 + $0x2e68] sm:$0xff]  ;;  %v4880_v37 = vld [vmem:[%s16393_s5 + $0x2e40] sm:$0xff] }
 0x973   :  { %6001 = vmatmul.f32.vlgmr.msra.gmra.mxu2 %v4062_v34  ;;  %5935 = vmatmul.f32.gmra.mxu3 %v4033_v44  ;;  %v4916_v34 = vld [vmem:[%s16393_s5 + $0x2f60] sm:$0xff] }
 0x974   :  { %6020 = vmatpush.msra.mxu3 %v4811_v49  ;;  %6067 = vmatpush.msrb.mxu1 %v4842_v51  ;;  %v4864_v44 = vld [vmem:[%s16393_s5 + $0x2dc0] sm:$0xff]  ;;  %v4895_v49 = vld [vmem:[%s16393_s5 + $0x2eb8] sm:$0xff]  ;;  %v4053_v51 = vmul.f32 %v4050_v32, %v12802_v47  ;;  %v4878_v32 = vld [vmem:[%s16393_s5 + $0x2e30] sm:$0xff] }
 0x975   :  { %6078 = vmatpush.msrb.mxu2 %v4870_v55  ;;  %6125 = vmatpush.msra.mxu0 %v4901_v14  ;;  %v16704_v55 = vmov 54   ;;  %v4884_v14 = vld [vmem:[%s16393_s5 + $0x2e60] sm:$0xff] }
 0x976   :  { %6047 = vmatmul.f32.vlgmr.msrb.gmra.mxu0 %v4082_v3  ;;  %6021 = vmatpush.msra.mxu3 %v4810_v9  ;;  %v4915_v9 = vld [vmem:[%s16393_s5 + $0x2f58] sm:$0xff] }
 0x977   :  { %6068 = vmatpush.msrb.mxu1 %v4841_v11  ;;  %6079 = vmatpush.msrb.mxu2 %v4869_v8  ;;  %v4863_v3 = vld [vmem:[%s16393_s5 + $0x2db8] sm:$0xff]  ;;  %v13680_v11 = vpop.permute.xlu2 %4089 }
 0x978   :  { %6126 = vmatpush.msra.mxu0 %v4900_v38  ;;  %7662 = vset.pattern.permute.xlu1 %v16672_v18  ;;  %v4919_v18 = vld [vmem:[%s16393_s5 + $0x2f78] sm:$0xff]  ;;  %v4914_v38 = vld [vmem:[%s16393_s5 + $0x2f50] sm:$0xff] }
 0x979   :  { %7664 = vset.pattern.permute.xlu2 %v16652_v5  ;;  %4299 = vperm.xlu1 %7662, %v12523_v17   ;;  %v4867_v5 = vld [vmem:[%s16393_s5 + $0x2dd8] sm:$0xff] }
 0x97a   :  { %4289 = vperm.xlu2 %7664, %v12523_v17   ;;  %6069 = vmatpush.msrb.mxu1 %v4840_v42  ;;  %v4883_v8 = vld [vmem:[%s16393_s5 + $0x2e58] sm:$0xff]  ;;  %v4893_v42 = vld [vmem:[%s16393_s5 + $0x2ea8] sm:$0xff] }
 0x97b   :  { %6080 = vmatpush.msrb.mxu2 %v4868_v56  ;;  %6022 = vmatpush.msra.mxu3 %v4809_v40  ;;  %v4882_v56 = vld [vmem:[%s16393_s5 + $0x2e50] sm:$0xff]  ;;  %v4913_v40 = vld [vmem:[%s16393_s5 + $0x2f48] sm:$0xff] }
 0x97c   :  { %6127 = vmatpush.msra.mxu0 %v4899_v4  ;;  %6146 = vmatpush.msra.mxu1 %v4919_v18  ;;  %v4861_v4 = vld [vmem:[%s16393_s5 + $0x2da8] sm:$0xff]  ;;  %v4892_v18 = vld [vmem:[%s16393_s5 + $0x2ea0] sm:$0xff] }
 0x97d   :  { %6023 = vmatpush.msra.mxu3 %v4808_v35  ;;  %6081 = vmatpush.msrb.mxu2 %v4867_v5  ;;  %v4881_v35 = vld [vmem:[%s16393_s5 + $0x2e48] sm:$0xff]  ;;  %v4912_v5 = vld [vmem:[%s16393_s5 + $0x2f40] sm:$0xff] }
 0x97e   :  { %6128 = vmatpush.msra.mxu0 %v4898_v59  ;;  %6004 = vmatmul.f32.gmra.mxu2 %v4063_v45  ;;  %v4860_v59 = vld [vmem:[%s16393_s5 + $0x2da0] sm:$0xff]  ;;  %v4070_v45 = vpop.permute.xlu1 %4069 }
 0x97f   :  { %6100 = vmatpush.msrb.mxu3 %v4887_v28  ;;  %6147 = vmatpush.msra.mxu1 %v4918_v19  ;;  %v4891_v28 = vld [vmem:[%s16393_s5 + $0x2e98] sm:$0xff]  ;;  %v4092_v19 = vmul.f32 %v12645_v63, %v12553_v20 }
 0x980   :  { %6024 = vmatmul.f32.vlgmr.msra.gmra.mxu3 %v4072_v27  ;;  %6082 = vmatpush.msrb.mxu2 %v4866_v41  ;;  %v4911_v41 = vld [vmem:[%s16393_s5 + $0x2f38] sm:$0xff]  ;;  %v4073_v27 = vmul.f32 %v4070_v45, %v12802_v47  ;;  %v4873_v45 = vld [vmem:[%s16393_s5 + $0x2e08] sm:$0xff] }
 0x981   :  { %6129 = vmatpush.msra.mxu0 %v4897_v21  ;;  %6101 = vmatpush.msrb.mxu3 %v4886_v58  ;;  %v16705_v21 = vmov 53   ;;  %v13733_v58 = vpop.permute.xlu2 %4405  ;;  %v4859_v63 = vld [vmem:[%s16393_s5 + $0x2d98] sm:$0xff] }
 0x982   :  { %6050 = vmatmul.f32.gmra.mxu0 %v4083_v1  ;;  %6148 = vmatpush.msra.mxu1 %v4917_v6  ;;  %v4890_v6 = vld [vmem:[%s16393_s5 + $0x2e90] sm:$0xff]  ;;  %v4879_v1 = vld [vmem:[%s16393_s5 + $0x2e38] sm:$0xff] }
 0x983   :  { %6083 = vmatpush.msrb.mxu2 %v4865_v53  ;;  %6130 = vmatpush.msra.mxu0 %v4896_v43  ;;  %v4858_v53 = vld [vmem:[%s16393_s5 + $0x2d90] sm:$0xff]  ;;  %v4889_v43 = vld [vmem:[%s16393_s5 + $0x2e88] sm:$0xff] }
 0x984   :  { %6102 = vmatpush.msrb.mxu3 %v4885_v36  ;;  %6149 = vmatpush.msra.mxu1 %v4916_v34  ;;  %v4909_v36 = vld [vmem:[%s16393_s5 + $0x2f28] sm:$0xff] }
 0x985   :  { %7665 = vset.pattern.permute.xlu1 %v16671_v33  ;;  %7667 = vset.pattern.permute.xlu2 %v16704_v55  ;;  %v4894_v33 = vld [vmem:[%s16393_s5 + $0x2eb0] sm:$0xff]  ;;  %v4857_v34 = vld [vmem:[%s16393_s5 + $0x2d88] sm:$0xff] }
 0x986   :  { %6084 = vmatpush.msrb.mxu2 %v4864_v44  ;;  %6131 = vmatpush.msra.mxu0 %v4895_v49  ;;  %v13765_v44 = vpop.permute.xlu0 %4355  ;;  %v4888_v49 = vld [vmem:[%s16393_s5 + $0x2e80] sm:$0xff] }
 0x987   :  { %4309 = vperm.xlu1 %7665, %v12523_v17   ;;  %4445 = vperm.xlu2 %7667, %v12333_v29  }
 0x988   :  { %5981 = vmatmul.f32.gmra.mxu1 %v4053_v51  ;;  %6103 = vmatpush.msrb.mxu3 %v4884_v14  ;;  %v4877_v51 = vld [vmem:[%s16393_s5 + $0x2e28] sm:$0xff]  ;;  %v4908_v14 = vld [vmem:[%s16393_s5 + $0x2f20] sm:$0xff] }
 0x989   :  { %6150 = vmatpush.msra.mxu1 %v4915_v9  ;;  %6085 = vmatpush.msrb.mxu2 %v4863_v3  ;;  %v4122_v9 = vmul.f32 %v12720_v10, %v12553_v20  ;;  %v4967_v3 = vld [vmem:[%s16393_s5 + $0x30f8] sm:$0xff]  ;;  %v4876_v10 = vld [vmem:[%s16393_s5 + $0x2e20] sm:$0xff] }
 0x98a   :  { %6132 = vmatpush.msra.mxu0 %v4894_v33  ;;  %6104 = vmatpush.msrb.mxu3 %v4883_v8  ;;  %v4856_v33 = vld [vmem:[%s16393_s5 + $0x2d80] sm:$0xff]  ;;  %v4102_v8 = vmul.f32 %v12672_v52, %v12553_v20  ;;  %v4935_v52 = vld [vmem:[%s16393_s5 + $0x2ff8] sm:$0xff] }
 0x98b   :  { %6151 = vmatpush.msra.mxu1 %v4914_v38  ;;  %6086 = vmatpush.msrb.mxu2 %v4862_v62  ;;  %v4093_v38 = vmul.f32 %v13680_v11, %v12802_v47  ;;  %v4907_v62 = vld [vmem:[%s16393_s5 + $0x2f18] sm:$0xff]  ;;  %v4966_v11 = vld [vmem:[%s16393_s5 + $0x30f0] sm:$0xff] }
 0x98c   :  { %6133 = vmatpush.msra.mxu0 %v4893_v42  ;;  %6105 = vmatpush.msrb.mxu3 %v4882_v56  ;;  %v13794_v42 = vpop.permute.xlu2 %4425  ;;  %v4906_v56 = vld [vmem:[%s16393_s5 + $0x2f10] sm:$0xff] }
 0x98d   :  { %6152 = vmatpush.msra.mxu1 %v4913_v40  ;;  %6087 = vmatpush.msrb.mxu2 %v4861_v4  ;;  %v4875_v40 = vld [vmem:[%s16393_s5 + $0x2e18] sm:$0xff]  ;;  %v4934_v4 = vld [vmem:[%s16393_s5 + $0x2ff0] sm:$0xff] }
 0x98e   :  { %6134 = vmatpush.msra.mxu0 %v4892_v18  ;;  %6106 = vmatpush.msrb.mxu3 %v4881_v35  ;;  %v4965_v18 = vld [vmem:[%s16393_s5 + $0x30e8] sm:$0xff]  ;;  %v4120_v35 = vpop.permute.xlu0 %4119 }
 0x98f   :  { %6153 = vmatpush.msra.mxu1 %v4912_v5  ;;  %6088 = vmatpush.msrb.mxu2 %v4860_v59  ;;  %v4874_v5 = vld [vmem:[%s16393_s5 + $0x2e10] sm:$0xff]  ;;  %v4964_v59 = vld [vmem:[%s16393_s5 + $0x30e0] sm:$0xff] }
 0x990   :  { %6135 = vmatpush.msra.mxu0 %v4891_v28  ;;  %7666 = vset.pattern.permute.xlu1 %v16705_v21  ;;  %v4123_v28 = vmul.f32 %v4120_v35, %v12802_v47  ;;  %v4979_v35 = vld [vmem:[%s16393_s5 + $0x3158] sm:$0xff] }
 0x991   :  { %7669 = vset.pattern.permute.xlu2 %v16655_v13  ;;  %6070 = vmatmul.f32.vlgmr.msrb.gmra.mxu1 %v4092_v19  ;;  %v4910_v13 = vld [vmem:[%s16393_s5 + $0x2f30] sm:$0xff]  ;;  %v4100_v19 = vpop.permute.xlu1 %4099 }
 0x992   :  { %6107 = vmatpush.msrb.mxu3 %v4880_v37  ;;  %6154 = vmatpush.msra.mxu1 %v4911_v41  ;;  %v4904_v37 = vld [vmem:[%s16393_s5 + $0x2f00] sm:$0xff] }
 0x993   :  { %4435 = vperm.xlu1 %7666, %v12333_v29   ;;  %4339 = vperm.xlu2 %7669, %v12523_v17   ;;  %v4932_v41 = vld [vmem:[%s16393_s5 + $0x2fe0] sm:$0xff] }
 0x994   :  { %6089 = vmatpush.msrb.mxu2 %v4859_v63  ;;  %6027 = vmatmul.f32.gmra.mxu3 %v4073_v27  ;;  %v4963_v27 = vld [vmem:[%s16393_s5 + $0x30d8] sm:$0xff] }
 0x995   :  { %6136 = vmatpush.msra.mxu0 %v4890_v6  ;;  %6108 = vmatpush.msrb.mxu3 %v4879_v1  ;;  %v4983_v63 = vld [vmem:[%s16393_s5 + $0x3178] sm:$0xff]  ;;  %v13846_v6 = vpop.permute.xlu2 %4139  ;;  %v4872_v1 = vld [vmem:[%s16393_s5 + $0x2e00] sm:$0xff] }
 0x996   :  { %6155 = vmatpush.msra.mxu1 %v4910_v13  ;;  %6090 = vmatpush.msrb.mxu2 %v4858_v53  ;;  %v4103_v13 = vmul.f32 %v4100_v19, %v12802_v47  ;;  %v4931_v53 = vld [vmem:[%s16393_s5 + $0x2fd8] sm:$0xff]  ;;  %v4926_v19 = vld [vmem:[%s16393_s5 + $0x2fb0] sm:$0xff] }
 0x997   :  { %6137 = vmatpush.msra.mxu0 %v4889_v43  ;;  %6109 = vmatpush.msrb.mxu3 %v4878_v32  ;;  %v16706_v43 = vld [vmem:[#allocation29_spill] sm:$0xff] }
 0x998   :  { %6156 = vmatpush.msra.mxu1 %v4909_v36  ;;  %6091 = vmatpush.msrb.mxu2 %v4857_v34  ;;  %v4132_v32 = vmul.f32 %v16706_v43, %v12553_v20  ;;  %v4962_v36 = vld [vmem:[%s16393_s5 + $0x30d0] sm:$0xff]  ;;  %v16707_v34 = vld [vmem:[#allocation21_spill] sm:$0xff] }
 0x999   :  { %6138 = vmatpush.msra.mxu0 %v4888_v49  ;;  %6110 = vmatpush.msrb.mxu3 %v4877_v51  ;;  %v4112_v49 = vmul.f32 %v16707_v34, %v12553_v20  ;;  %v4951_v51 = vld [vmem:[%s16393_s5 + $0x3078] sm:$0xff]  ;;  %v4945_v43 = vld [vmem:[%s16393_s5 + $0x3048] sm:$0xff]  ;;  %v4944_v34 = vld [vmem:[%s16393_s5 + $0x3040] sm:$0xff] }
 0x99a   :  { %6139 = vmatmul.f32.vlgmr.msra.gmra.mxu0 %v4122_v9  ;;  %6157 = vmatpush.msra.mxu1 %v4908_v14  ;;  %v4982_v14 = vld [vmem:[%s16393_s5 + $0x3170] sm:$0xff] }
 0x99b   :  { %6215 = vmatpush.msrb.mxu0 %v4967_v3  ;;  %6092 = vmatpush.msrb.mxu2 %v4856_v33  ;;  %v4930_v9 = vld [vmem:[%s16393_s5 + $0x2fd0] sm:$0xff]  ;;  %v4961_v3 = vld [vmem:[%s16393_s5 + $0x30c8] sm:$0xff]  ;;  %v16708_v33 = vmov 44  }
 0x99c   :  { %6073 = vmatmul.f32.gmra.mxu1 %v4093_v38  ;;  %6093 = vmatmul.f32.vlgmr.msrb.gmra.mxu2 %v4102_v8  ;;  %v4981_v8 = vld [vmem:[%s16393_s5 + $0x3168] sm:$0xff]  ;;  %v4950_v38 = vld [vmem:[%s16393_s5 + $0x3070] sm:$0xff] }
 0x99d   :  { %6111 = vmatpush.msrb.mxu3 %v4876_v10  ;;  %6158 = vmatpush.msra.mxu1 %v4907_v62  ;;  %v4929_v10 = vld [vmem:[%s16393_s5 + $0x2fc8] sm:$0xff]  ;;  %v4110_v62 = vpop.permute.xlu1 %4109 }
 0x99e   :  { %6169 = vmatpush.msra.mxu2 %v4935_v52  ;;  %6216 = vmatpush.msrb.mxu0 %v4966_v11  ;;  %v4949_v52 = vld [vmem:[%s16393_s5 + $0x3068] sm:$0xff]  ;;  %v4980_v11 = vld [vmem:[%s16393_s5 + $0x3160] sm:$0xff] }
 0x99f   :  { %7674 = vset.pattern.permute.xlu1 %v16668_v12  ;;  %7671 = vset.pattern.permute.xlu2 %v16673_v22  ;;  %v4905_v22 = vld [vmem:[%s16393_s5 + $0x2f08] sm:$0xff] }
 0x9a0   :  { %4359 = vperm.xlu1 %7674, %v12523_v17   ;;  %4329 = vperm.xlu2 %7671, %v12523_v17   ;;  %v4933_v12 = vld [vmem:[%s16393_s5 + $0x2fe8] sm:$0xff] }
 0x9a1   :  { %6159 = vmatpush.msra.mxu1 %v4906_v56  ;;  %6112 = vmatpush.msrb.mxu3 %v4875_v40  ;;  %v4130_v56 = vpop.permute.xlu2 %4129  ;;  %v4928_v40 = vld [vmem:[%s16393_s5 + $0x2fc0] sm:$0xff] }
 0x9a2   :  { %6170 = vmatpush.msra.mxu2 %v4934_v4  ;;  %6217 = vmatpush.msrb.mxu0 %v4965_v18  ;;  %v4959_v4 = vld [vmem:[%s16393_s5 + $0x30b8] sm:$0xff]  ;;  %v4948_v18 = vld [vmem:[%s16393_s5 + $0x3060] sm:$0xff] }
 0x9a3   :  { %6113 = vmatpush.msrb.mxu3 %v4874_v5  ;;  %6160 = vmatpush.msra.mxu1 %v4905_v22  ;;  %v4927_v5 = vld [vmem:[%s16393_s5 + $0x2fb8] sm:$0xff]  ;;  %v4133_v22 = vmul.f32 %v4130_v56, %v12802_v47  ;;  %v4972_v56 = vld [vmem:[%s16393_s5 + $0x3120] sm:$0xff] }
 0x9a4   :  { %6171 = vmatpush.msra.mxu2 %v4933_v12  ;;  %6218 = vmatpush.msrb.mxu0 %v4964_v59  ;;  %v4958_v12 = vld [vmem:[%s16393_s5 + $0x30b0] sm:$0xff]  ;;  %v4113_v59 = vmul.f32 %v4110_v62, %v12802_v47  ;;  %v4952_v62 = vld [vmem:[%s16393_s5 + $0x3080] sm:$0xff] }
 0x9a5   :  { %6114 = vmatpush.msrb.mxu3 %v4873_v45  ;;  %6142 = vmatmul.f32.gmra.mxu0 %v4123_v28  ;;  %v4947_v45 = vld [vmem:[%s16393_s5 + $0x3058] sm:$0xff]  ;;  %v4978_v28 = vld [vmem:[%s16393_s5 + $0x3150] sm:$0xff] }
 0x9a6   :  { %6161 = vmatpush.msra.mxu1 %v4904_v37  ;;  %6172 = vmatpush.msra.mxu2 %v4932_v41  ;;  %v4957_v37 = vld [vmem:[%s16393_s5 + $0x30a8] sm:$0xff]  ;;  %v4946_v41 = vld [vmem:[%s16393_s5 + $0x3050] sm:$0xff] }
 0x9a7   :  { %6219 = vmatpush.msrb.mxu0 %v4963_v27  ;;  %6096 = vmatmul.f32.gmra.mxu2 %v4103_v13  ;;  %v4977_v27 = vld [vmem:[%s16393_s5 + $0x3148] sm:$0xff] }
 0x9a8   :  { %6238 = vmatpush.msrb.mxu1 %v4983_v63  ;;  %6115 = vmatpush.msrb.mxu3 %v4872_v1  ;;  %v13934_v63 = vpop.permute.xlu1 %4415  ;;  %v16709_v1 = vmov 47   ;;  %v4925_v13 = vld [vmem:[%s16393_s5 + $0x2fa8] sm:$0xff] }
 0x9a9   :  { %6162 = vmatmul.f32.vlgmr.msra.gmra.mxu1 %v4132_v32  ;;  %6173 = vmatpush.msra.mxu2 %v4931_v53  ;;  %v4956_v53 = vld [vmem:[%s16393_s5 + $0x30a0] sm:$0xff] }
 0x9aa   :  { %6220 = vmatpush.msrb.mxu0 %v4962_v36  ;;  %6116 = vmatmul.f32.vlgmr.msrb.gmra.mxu3 %v4112_v49  ;;  %v4924_v32 = vld [vmem:[%s16393_s5 + $0x2fa0] sm:$0xff]  ;;  %v4955_v36 = vld [vmem:[%s16393_s5 + $0x3098] sm:$0xff] }
 0x9ab   :  { %6192 = vmatpush.msra.mxu3 %v4951_v51  ;;  %6239 = vmatpush.msrb.mxu1 %v4982_v14  ;;  %v4975_v49 = vld [vmem:[%s16393_s5 + $0x3138] sm:$0xff]  ;;  %v4954_v14 = vld [vmem:[%s16393_s5 + $0x3090] sm:$0xff] }
 0x9ac   :  { %7680 = vset.pattern.permute.xlu1 %v16702_v48  ;;  %7672 = vset.pattern.permute.xlu2 %v16708_v33  ;;  %v4960_v48 = vld [vmem:[%s16393_s5 + $0x30c0] sm:$0xff]  ;;  %v4923_v51 = vld [vmem:[%s16393_s5 + $0x2f98] sm:$0xff]  ;;  %v4922_v33 = vld [vmem:[%s16393_s5 + $0x2f90] sm:$0xff] }
 0x9ad   :  { %6174 = vmatpush.msra.mxu2 %v4930_v9  ;;  %6221 = vmatpush.msrb.mxu0 %v4961_v3  ;;  %v4943_v9 = vld [vmem:[%s16393_s5 + $0x3038] sm:$0xff]  ;;  %v4974_v3 = vld [vmem:[%s16393_s5 + $0x3130] sm:$0xff] }
 0x9ae   :  { %4399 = vperm.xlu1 %7680, %v12523_v17   ;;  %4349 = vperm.xlu2 %7672, %v12523_v17  }
 0x9af   :  { %6240 = vmatpush.msrb.mxu1 %v4981_v8  ;;  %6193 = vmatpush.msra.mxu3 %v4950_v38  ;;  %v4953_v8 = vld [vmem:[%s16393_s5 + $0x3088] sm:$0xff]  ;;  %v4942_v38 = vld [vmem:[%s16393_s5 + $0x3030] sm:$0xff] }
 0x9b0   :  { %6175 = vmatpush.msra.mxu2 %v4929_v10  ;;  %6222 = vmatpush.msrb.mxu0 %v4960_v48  ;;  %v4973_v10 = vld [vmem:[%s16393_s5 + $0x3128] sm:$0xff] }
 0x9b1   :  { %6194 = vmatpush.msra.mxu3 %v4949_v52  ;;  %6241 = vmatpush.msrb.mxu1 %v4980_v11  ;;  %v4921_v48 = vld [vmem:[%s16393_s5 + $0x2f88] sm:$0xff]  ;;  %v13994_v52 = vpop.permute.xlu1 %4395  ;;  %v16710_v11 = vmov 60  }
 0x9b2   :  { %6176 = vmatpush.msra.mxu2 %v4928_v40  ;;  %6223 = vmatpush.msrb.mxu0 %v4959_v4  ;;  %v4941_v40 = vld [vmem:[%s16393_s5 + $0x3028] sm:$0xff]  ;;  %v4920_v4 = vld [vmem:[%s16393_s5 + $0x2f80] sm:$0xff] }
 0x9b3   :  { %6195 = vmatpush.msra.mxu3 %v4948_v18  ;;  %6242 = vmatpush.msrb.mxu1 %v4979_v35  ;;  %v16711_v18 = vld [vmem:[#allocation23_spill] sm:$0xff] }
 0x9b4   :  { %6165 = vmatmul.f32.gmra.mxu1 %v4133_v22  ;;  %6177 = vmatpush.msra.mxu2 %v4927_v5  ;;  %v4162_v35 = vmul.f32 %v16711_v18, %v12553_v20  ;;  %v16712_v5 = vld [vmem:[#allocation19_spill] sm:$0xff]  ;;  %v14111_v18 = vpop.f32.mrf.mxu0 }
 0x9b5   :  { %6224 = vmatpush.msrb.mxu0 %v4958_v12  ;;  %6119 = vmatmul.f32.gmra.mxu3 %v4113_v59  ;;  %v4142_v22 = vmul.f32 %v16712_v5, %v12553_v20  ;;  %v4940_v12 = vld [vmem:[%s16393_s5 + $0x3020] sm:$0xff]  ;;  %v4971_v59 = vld [vmem:[%s16393_s5 + $0x3118] sm:$0xff]  ;;  %v14119_v5 = vpop.f32.mrf.mxu3 }
 0x9b6   :  { %6196 = vmatpush.msra.mxu3 %v4947_v45  ;;  %6243 = vmatpush.msrb.mxu1 %v4978_v28  ;;  %v4999_v45 = vld [vmem:[%s16393_s5 + $0x31f8] sm:$0xff]  ;;  %v5030_v28 = vld [vmem:[%s16393_s5 + $0x32f0] sm:$0xff] }
 0x9b7   :  { %6178 = vmatpush.msra.mxu2 %v4926_v19  ;;  %6225 = vmatpush.msrb.mxu0 %v4957_v37  ;;  %v4939_v19 = vld [vmem:[%s16393_s5 + $0x3018] sm:$0xff]  ;;  %v4970_v37 = vld [vmem:[%s16393_s5 + $0x3110] sm:$0xff] }
 0x9b8   :  { %7681 = vset.pattern.permute.xlu1 %v16701_v60  ;;  %7673 = vset.pattern.permute.xlu2 %v16709_v1  ;;  %v4976_v60 = vld [vmem:[%s16393_s5 + $0x3140] sm:$0xff]  ;;  %v4938_v1 = vld [vmem:[%s16393_s5 + $0x3010] sm:$0xff] }
 0x9b9   :  { %6197 = vmatpush.msra.mxu3 %v4946_v41  ;;  %6244 = vmatpush.msrb.mxu1 %v4977_v27  ;;  %v4998_v41 = vld [vmem:[%s16393_s5 + $0x31f0] sm:$0xff]  ;;  %v5029_v27 = vld [vmem:[%s16393_s5 + $0x32e8] sm:$0xff] }
 0x9ba   :  { %4409 = vperm.xlu1 %7681, %v12523_v17   ;;  %4379 = vperm.xlu2 %7673, %v12523_v17  }
 0x9bb   :  { %6179 = vmatpush.msra.mxu2 %v4925_v13  ;;  %6226 = vmatpush.msrb.mxu0 %v4956_v53  ;;  %v4969_v13 = vld [vmem:[%s16393_s5 + $0x3108] sm:$0xff] }
 0x9bc   :  { %6198 = vmatpush.msra.mxu3 %v4945_v43  ;;  %6245 = vmatpush.msrb.mxu1 %v4976_v60  ;;  %v4997_v53 = vld [vmem:[%s16393_s5 + $0x31e8] sm:$0xff]  ;;  %v5028_v43 = vld [vmem:[%s16393_s5 + $0x32e0] sm:$0xff]  ;;  %v4160_v60 = vpop.permute.xlu1 %4159 }
 0x9bd   :  { %6180 = vmatpush.msra.mxu2 %v4924_v32  ;;  %6227 = vmatpush.msrb.mxu0 %v4955_v36  ;;  %v4937_v32 = vld [vmem:[%s16393_s5 + $0x3008] sm:$0xff]  ;;  %v4968_v36 = vld [vmem:[%s16393_s5 + $0x3100] sm:$0xff] }
 0x9be   :  { %6199 = vmatpush.msra.mxu3 %v4944_v34  ;;  %6246 = vmatpush.msrb.mxu1 %v4975_v49  ;;  %v4996_v34 = vld [vmem:[%s16393_s5 + $0x31e0] sm:$0xff]  ;;  %v5027_v49 = vld [vmem:[%s16393_s5 + $0x32d8] sm:$0xff] }
 0x9bf   :  { %6181 = vmatpush.msra.mxu2 %v4923_v51  ;;  %6228 = vmatpush.msrb.mxu0 %v4954_v14  ;;  %v4163_v51 = vmul.f32 %v4160_v60, %v12802_v47  ;;  %v16713_v14 = vmov 59   ;;  %v14152_v60 = vpop.f32.mrf.mxu0 }
 0x9c0   :  { %6200 = vmatpush.msra.mxu3 %v4943_v9  ;;  %6247 = vmatpush.msrb.mxu1 %v4974_v3  ;;  %v4172_v9 = vmul.f32 %v12870_v50, %v12553_v20  ;;  %v5047_v3 = vld [vmem:[%s16393_s5 + $0x3378] sm:$0xff] }
 0x9c1   :  { %6182 = vmatpush.msra.mxu2 %v4922_v33  ;;  %6229 = vmatpush.msrb.mxu0 %v4953_v8  ;;  %v4143_v33 = vmul.f32 %v13846_v6, %v12802_v47  ;;  %v4995_v50 = vld [vmem:[%s16393_s5 + $0x31d8] sm:$0xff]  ;;  %v5026_v8 = vld [vmem:[%s16393_s5 + $0x32d0] sm:$0xff]  ;;  %v4152_v6 = vmul.f32 %v12800_v0, %v12553_v20  ;;  %v5025_v0 = vld [vmem:[%s16393_s5 + $0x32c8] sm:$0xff] }
 0x9c2   :  { %6201 = vmatpush.msra.mxu3 %v4942_v38  ;;  %6248 = vmatpush.msrb.mxu1 %v4973_v10  ;;  %v5015_v38 = vld [vmem:[%s16393_s5 + $0x3278] sm:$0xff]  ;;  %v5046_v10 = vld [vmem:[%s16393_s5 + $0x3370] sm:$0xff] }
 0x9c3   :  { %7684 = vset.pattern.permute.xlu1 %v16710_v11  ;;  %7676 = vset.pattern.permute.xlu2 %v16694_v46  ;;  %v5031_v46 = vld [vmem:[%s16393_s5 + $0x32f8] sm:$0xff] }
 0x9c4   :  { %6183 = vmatpush.msra.mxu2 %v4921_v48  ;;  %6230 = vmatpush.msrb.mxu0 %v4952_v62  ;;  %v4994_v48 = vld [vmem:[%s16393_s5 + $0x31d0] sm:$0xff] }
 0x9c5   :  { %4505 = vperm.xlu1 %7684, %v12333_v29   ;;  %4389 = vperm.xlu2 %7676, %v12523_v17   ;;  %v5014_v62 = vld [vmem:[%s16393_s5 + $0x3270] sm:$0xff] }
 0x9c6   :  { %6249 = vmatpush.msrb.mxu1 %v4972_v56  ;;  %6202 = vmatpush.msra.mxu3 %v4941_v40  ;;  %v5045_v56 = vld [vmem:[%s16393_s5 + $0x3368] sm:$0xff] }
 0x9c7   :  { %6231 = vmatmul.f32.vlgmr.msrb.gmra.mxu0 %v4162_v35  ;;  %6184 = vmatpush.msra.mxu2 %v4920_v4  ;;  %v4993_v40 = vld [vmem:[%s16393_s5 + $0x31c8] sm:$0xff]  ;;  %v5024_v4 = vld [vmem:[%s16393_s5 + $0x32c0] sm:$0xff] }
 0x9c8   :  { %6307 = vmatpush.msra.mxu0 %v5031_v46  ;;  %6185 = vmatmul.f32.vlgmr.msra.gmra.mxu2 %v4142_v22  ;;  %v5013_v35 = vld [vmem:[%s16393_s5 + $0x3268] sm:$0xff]  ;;  %v5044_v46 = vld [vmem:[%s16393_s5 + $0x3360] sm:$0xff]  ;;  %v4170_v22 = vpop.permute.xlu0 %4169 }
 0x9c9   :  { %6203 = vmatpush.msra.mxu3 %v4940_v12  ;;  %6250 = vmatpush.msrb.mxu1 %v4971_v59  ;;  %v4992_v12 = vld [vmem:[%s16393_s5 + $0x31c0] sm:$0xff]  ;;  %v5023_v59 = vld [vmem:[%s16393_s5 + $0x32b8] sm:$0xff] }
 0x9ca   :  { %6261 = vmatpush.msrb.mxu2 %v4999_v45  ;;  %6308 = vmatpush.msra.mxu0 %v5030_v28  ;;  %v5012_v45 = vld [vmem:[%s16393_s5 + $0x3260] sm:$0xff]  ;;  %v4173_v28 = vmul.f32 %v4170_v22, %v12802_v47 }
 0x9cb   :  { %6204 = vmatpush.msra.mxu3 %v4939_v19  ;;  %6251 = vmatpush.msrb.mxu1 %v4970_v37  ;;  %v4150_v19 = vpop.permute.xlu2 %4149  ;;  %v5043_v37 = vld [vmem:[%s16393_s5 + $0x3358] sm:$0xff] }
 0x9cc   :  { %6262 = vmatpush.msrb.mxu2 %v4998_v41  ;;  %6309 = vmatpush.msra.mxu0 %v5029_v27  ;;  %v16714_v41 = vmov 57   ;;  %v4991_v27 = vld [vmem:[%s16393_s5 + $0x31b8] sm:$0xff] }
 0x9cd   :  { %6205 = vmatpush.msra.mxu3 %v4938_v1  ;;  %6252 = vmatpush.msrb.mxu1 %v4969_v13  ;;  %v5022_v1 = vld [vmem:[%s16393_s5 + $0x32b0] sm:$0xff]  ;;  %v14142_v13 = vpop.f32.mrf.mxu1 }
 0x9ce   :  { %6263 = vmatpush.msrb.mxu2 %v4997_v53  ;;  %6310 = vmatpush.msra.mxu0 %v5028_v43  ;;  %v4153_v53 = vmul.f32 %v4150_v19, %v12802_v47  ;;  %v5042_v43 = vld [vmem:[%s16393_s5 + $0x3350] sm:$0xff] }
 0x9cf   :  { %7686 = vset.pattern.permute.xlu1 %v16703_v23  ;;  %7677 = vset.pattern.permute.xlu2 %v16713_v14  ;;  %v4936_v23 = vld [vmem:[%s16393_s5 + $0x3000] sm:$0xff] }
 0x9d0   :  { %6206 = vmatpush.msra.mxu3 %v4937_v32  ;;  %6253 = vmatpush.msrb.mxu1 %v4968_v36  ;;  %v4990_v32 = vld [vmem:[%s16393_s5 + $0x31b0] sm:$0xff]  ;;  %v5021_v36 = vld [vmem:[%s16393_s5 + $0x32a8] sm:$0xff] }
 0x9d1   :  { %6264 = vmatpush.msrb.mxu2 %v4996_v34  ;;  %6311 = vmatpush.msra.mxu0 %v5027_v49  ;;  %v14161_v34 = vpop.f32.mrf.mxu3  ;;  %v5010_v49 = vld [vmem:[%s16393_s5 + $0x3250] sm:$0xff] }
 0x9d2   :  { %4459 = vperm.xlu1 %7686, %v12523_v17   ;;  %4495 = vperm.xlu2 %7677, %v12333_v29  }
 0x9d3   :  { %6254 = vmatmul.f32.vlgmr.msrb.gmra.mxu1 %v4172_v9  ;;  %6234 = vmatmul.f32.gmra.mxu0 %v4163_v51  ;;  %v5041_v51 = vld [vmem:[%s16393_s5 + $0x3348] sm:$0xff] }
 0x9d4   :  { %6330 = vmatpush.msra.mxu1 %v5047_v3  ;;  %6188 = vmatmul.f32.gmra.mxu2 %v4143_v33  ;;  %v4989_v9 = vld [vmem:[%s16393_s5 + $0x31a8] sm:$0xff]  ;;  %v5020_v3 = vld [vmem:[%s16393_s5 + $0x32a0] sm:$0xff] }
 0x9d5   :  { %6207 = vmatpush.msra.mxu3 %v4936_v23  ;;  %6265 = vmatpush.msrb.mxu2 %v4995_v50  ;;  %v5009_v33 = vld [vmem:[%s16393_s5 + $0x3248] sm:$0xff]  ;;  %v5040_v23 = vld [vmem:[%s16393_s5 + $0x3340] sm:$0xff]  ;;  %v14181_v50 = vpop.f32.mrf.mxu2 }
 0x9d6   :  { %6312 = vmatpush.msra.mxu0 %v5026_v8  ;;  %6208 = vmatmul.f32.vlgmr.msra.gmra.mxu3 %v4152_v6  ;;  %v4988_v8 = vld [vmem:[%s16393_s5 + $0x31a0] sm:$0xff]  ;;  %v5019_v6 = vld [vmem:[%s16393_s5 + $0x3298] sm:$0xff] }
 0x9d7   :  { %6284 = vmatpush.msrb.mxu3 %v5015_v38  ;;  %6331 = vmatpush.msra.mxu1 %v5046_v10  ;;  %v5008_v38 = vld [vmem:[%s16393_s5 + $0x3240] sm:$0xff]  ;;  %v5039_v10 = vld [vmem:[%s16393_s5 + $0x3338] sm:$0xff] }
 0x9d8   :  { %6266 = vmatpush.msrb.mxu2 %v4994_v48  ;;  %6313 = vmatpush.msra.mxu0 %v5025_v0  ;;  %v14195_v48 = vpop.f32.mrf.mxu1  ;;  %v4987_v0 = vld [vmem:[%s16393_s5 + $0x3198] sm:$0xff] }
 0x9d9   :  { %6285 = vmatpush.msrb.mxu3 %v5014_v62  ;;  %6332 = vmatpush.msra.mxu1 %v5045_v56  ;;  %v5018_v62 = vld [vmem:[%s16393_s5 + $0x3290] sm:$0xff]  ;;  %v16715_v56 = vmov 56   ;;  %v14219_v22 = vpop.f32.mrf.mxu3 }
 0x9da   :  { %6267 = vmatpush.msrb.mxu2 %v4993_v40  ;;  %6314 = vmatpush.msra.mxu0 %v5024_v4  ;;  %v5038_v40 = vld [vmem:[%s16393_s5 + $0x3330] sm:$0xff]  ;;  %v5007_v4 = vld [vmem:[%s16393_s5 + $0x3238] sm:$0xff] }
 0x9db   :  { %6286 = vmatpush.msrb.mxu3 %v5013_v35  ;;  %6333 = vmatpush.msra.mxu1 %v5044_v46  ;;  %v14211_v35 = vpop.f32.mrf.mxu0  ;;  %v4986_v46 = vld [vmem:[%s16393_s5 + $0x3190] sm:$0xff] }
 0x9dc   :  { %6268 = vmatpush.msrb.mxu2 %v4992_v12  ;;  %6315 = vmatpush.msra.mxu0 %v5023_v59  ;;  %v5006_v12 = vld [vmem:[%s16393_s5 + $0x3230] sm:$0xff]  ;;  %v5037_v59 = vld [vmem:[%s16393_s5 + $0x3328] sm:$0xff] }
 0x9dd   :  { %7688 = vset.pattern.permute.xlu1 %v16704_v55  ;;  %7678 = vset.pattern.permute.xlu2 %v16714_v41  ;;  %v5011_v55 = vld [vmem:[%s16393_s5 + $0x3258] sm:$0xff]  ;;  %v14235_v19 = vpop.f32.mrf.mxu2 }
 0x9de   :  { %6257 = vmatmul.f32.gmra.mxu1 %v4173_v28  ;;  %6287 = vmatpush.msrb.mxu3 %v5012_v45  ;;  %v4985_v45 = vld [vmem:[%s16393_s5 + $0x3188] sm:$0xff]  ;;  %v5016_v28 = vld [vmem:[%s16393_s5 + $0x3280] sm:$0xff] }
 0x9df   :  { %6334 = vmatpush.msra.mxu1 %v5043_v37  ;;  %4449 = vperm.xlu1 %7688, %v12523_v17   ;;  %v5005_v37 = vld [vmem:[%s16393_s5 + $0x3228] sm:$0xff] }
 0x9e0   :  { %4475 = vperm.xlu2 %7678, %v12333_v29   ;;  %6269 = vmatpush.msrb.mxu2 %v4991_v27  ;;  %v4202_v27 = vmul.f32 %v12965_v2, %v12553_v20  ;;  %v5004_v2 = vld [vmem:[%s16393_s5 + $0x3220] sm:$0xff] }
 0x9e1   :  { %6316 = vmatpush.msra.mxu0 %v5022_v1  ;;  %6211 = vmatmul.f32.gmra.mxu3 %v4153_v53  ;;  %v5036_v1 = vld [vmem:[%s16393_s5 + $0x3320] sm:$0xff]  ;;  %v5095_v53 = vld [vmem:[%s16393_s5 + $0x34f8] sm:$0xff] }
 0x9e2   :  { %6288 = vmatpush.msrb.mxu3 %v5011_v55  ;;  %6335 = vmatpush.msra.mxu1 %v5042_v43  ;;  %v4984_v55 = vld [vmem:[%s16393_s5 + $0x3180] sm:$0xff]  ;;  %v5035_v43 = vld [vmem:[%s16393_s5 + $0x3318] sm:$0xff] }
 0x9e3   :  { %6270 = vmatpush.msrb.mxu2 %v4990_v32  ;;  %6317 = vmatpush.msra.mxu0 %v5021_v36  ;;  %v4182_v32 = vmul.f32 %v12837_v26, %v12553_v20  ;;  %v14259_v36 = vpop.f32.mrf.mxu1  ;;  %v5003_v26 = vld [vmem:[%s16393_s5 + $0x3218] sm:$0xff] }
 0x9e4   :  { %6289 = vmatpush.msrb.mxu3 %v5010_v49  ;;  %6336 = vmatpush.msra.mxu1 %v5041_v51  ;;  %v5063_v49 = vld [vmem:[%s16393_s5 + $0x33f8] sm:$0xff]  ;;  %v5094_v51 = vld [vmem:[%s16393_s5 + $0x34f0] sm:$0xff] }
 0x9e5   :  { %6271 = vmatpush.msrb.mxu2 %v4989_v9  ;;  %6318 = vmatpush.msra.mxu0 %v5020_v3  ;;  %v5034_v9 = vld [vmem:[%s16393_s5 + $0x3310] sm:$0xff]  ;;  %v14273_v3 = vpop.f32.mrf.mxu3 }
 0x9e6   :  { %6290 = vmatpush.msrb.mxu3 %v5009_v33  ;;  %6337 = vmatpush.msra.mxu1 %v5040_v23  ;;  %v14275_v33 = vpop.f32.mrf.mxu0  ;;  %v5062_v23 = vld [vmem:[%s16393_s5 + $0x33f0] sm:$0xff] }
 0x9e7   :  { %6272 = vmatpush.msrb.mxu2 %v4988_v8  ;;  %6319 = vmatpush.msra.mxu0 %v5019_v6  ;;  %v5093_v8 = vld [vmem:[%s16393_s5 + $0x34e8] sm:$0xff]  ;;  %v4200_v6 = vpop.permute.xlu1 %4199 }
 0x9e8   :  { %6291 = vmatpush.msrb.mxu3 %v5008_v38  ;;  %6338 = vmatpush.msra.mxu1 %v5039_v10  ;;  %v5002_v38 = vld [vmem:[%s16393_s5 + $0x3210] sm:$0xff]  ;;  %v5033_v10 = vld [vmem:[%s16393_s5 + $0x3308] sm:$0xff] }
 0x9e9   :  { %7689 = vset.pattern.permute.xlu1 %v16715_v56  ;;  %7687 = vset.pattern.permute.xlu2 %v16705_v21  ;;  %v5017_v21 = vld [vmem:[%s16393_s5 + $0x3288] sm:$0xff]  ;;  %v4180_v56 = vpop.permute.xlu2 %4179 }
 0x9ea   :  { %6273 = vmatpush.msrb.mxu2 %v4987_v0  ;;  %6320 = vmatpush.msra.mxu0 %v5018_v62  ;;  %v14291_v0 = vpop.f32.mrf.mxu2  ;;  %v5001_v62 = vld [vmem:[%s16393_s5 + $0x3208] sm:$0xff] }
 0x9eb   :  { %4469 = vperm.xlu1 %7689, %v12523_v17   ;;  %4439 = vperm.xlu2 %7687, %v12523_v17  }
 0x9ec   :  { %6339 = vmatpush.msra.mxu1 %v5038_v40  ;;  %6292 = vmatpush.msrb.mxu3 %v5007_v4  ;;  %v4203_v40 = vmul.f32 %v4200_v6, %v12802_v47  ;;  %v5032_v4 = vld [vmem:[%s16393_s5 + $0x3300] sm:$0xff]  ;;  %v5057_v6 = vld [vmem:[%s16393_s5 + $0x33c8] sm:$0xff] }
 0x9ed   :  { %6274 = vmatpush.msrb.mxu2 %v4986_v46  ;;  %6321 = vmatpush.msra.mxu0 %v5017_v21  ;;  %v5060_v46 = vld [vmem:[%s16393_s5 + $0x33e0] sm:$0xff]  ;;  %v5091_v21 = vld [vmem:[%s16393_s5 + $0x34d8] sm:$0xff] }
 0x9ee   :  { %6293 = vmatpush.msrb.mxu3 %v5006_v12  ;;  %6340 = vmatpush.msra.mxu1 %v5037_v59  ;;  %v4212_v12 = vmul.f32 %v12788_v15, %v12553_v20  ;;  %v14316_v59 = vpop.f32.mrf.mxu1  ;;  %v5059_v15 = vld [vmem:[%s16393_s5 + $0x33d8] sm:$0xff] }
 0x9ef   :  { %6275 = vmatpush.msrb.mxu2 %v4985_v45  ;;  %6322 = vmatpush.msra.mxu0 %v5016_v28  ;;  %v5111_v45 = vld [vmem:[%s16393_s5 + $0x3578] sm:$0xff]  ;;  %v4183_v28 = vmul.f32 %v4180_v56, %v12802_v47  ;;  %v5056_v56 = vld [vmem:[%s16393_s5 + $0x33c0] sm:$0xff] }
 0x9f0   :  { %6294 = vmatpush.msrb.mxu3 %v5005_v37  ;;  %6323 = vmatmul.f32.vlgmr.msra.gmra.mxu0 %v4202_v27  ;;  %v5000_v37 = vld [vmem:[%s16393_s5 + $0x3200] sm:$0xff]  ;;  %v5090_v27 = vld [vmem:[%s16393_s5 + $0x34d0] sm:$0xff] }
 0x9f1   :  { %6341 = vmatpush.msra.mxu1 %v5036_v1  ;;  %6399 = vmatpush.msrb.mxu0 %v5095_v53  ;;  %v14331_v1 = vpop.f32.mrf.mxu3  ;;  %v16716_v53 = vld [vmem:[#allocation26_spill] sm:$0xff] }
 0x9f2   :  { %6276 = vmatpush.msrb.mxu2 %v4984_v55  ;;  %6295 = vmatpush.msrb.mxu3 %v5004_v2  ;;  %v4192_v55 = vmul.f32 %v16716_v53, %v12553_v20  ;;  %v14335_v2 = vpop.f32.mrf.mxu0  ;;  %v5106_v53 = vld [vmem:[%s16393_s5 + $0x3550] sm:$0xff] }
 0x9f3   :  { %6277 = vmatmul.f32.vlgmr.msrb.gmra.mxu2 %v4182_v32  ;;  %6342 = vmatpush.msra.mxu1 %v5035_v43  ;;  %v5079_v43 = vld [vmem:[%s16393_s5 + $0x3478] sm:$0xff]  ;;  %v5110_v32 = vld [vmem:[%s16393_s5 + $0x3570] sm:$0xff] }
 0x9f4   :  { %6353 = vmatpush.msra.mxu2 %v5063_v49  ;;  %6400 = vmatpush.msrb.mxu0 %v5094_v51  ;;  %v5058_v49 = vld [vmem:[%s16393_s5 + $0x33d0] sm:$0xff]  ;;  %v5089_v51 = vld [vmem:[%s16393_s5 + $0x34c8] sm:$0xff] }
 0x9f5   :  { %7690 = vset.pattern.permute.xlu1 %v16713_v14  ;;  %7691 = vset.pattern.permute.xlu2 %v16714_v41  ;;  %v5061_v14 = vld [vmem:[%s16393_s5 + $0x33e8] sm:$0xff]  ;;  %v5092_v41 = vld [vmem:[%s16393_s5 + $0x34e0] sm:$0xff] }
 0x9f6   :  { %6296 = vmatpush.msrb.mxu3 %v5003_v26  ;;  %6343 = vmatpush.msra.mxu1 %v5034_v9  ;;  %v14349_v26 = vpop.f32.mrf.mxu2  ;;  %v5078_v9 = vld [vmem:[%s16393_s5 + $0x3470] sm:$0xff] }
 0x9f7   :  { %6354 = vmatpush.msra.mxu2 %v5062_v23  ;;  %6401 = vmatpush.msrb.mxu0 %v5093_v8  ;;  %v5109_v23 = vld [vmem:[%s16393_s5 + $0x3568] sm:$0xff]  ;;  %v16717_v8 = vmov 58  }
 0x9f8   :  { %4499 = vperm.xlu1 %7690, %v12523_v17   ;;  %4479 = vperm.xlu2 %7691, %v12523_v17  }
 0x9f9   :  { %6297 = vmatpush.msrb.mxu3 %v5002_v38  ;;  %6344 = vmatpush.msra.mxu1 %v5033_v10  ;;  %v5088_v38 = vld [vmem:[%s16393_s5 + $0x34c0] sm:$0xff]  ;;  %v4210_v10 = vpop.permute.xlu1 %4209 }
 0x9fa   :  { %6355 = vmatpush.msra.mxu2 %v5061_v14  ;;  %6402 = vmatpush.msrb.mxu0 %v5092_v41  ;;  %v5077_v14 = vld [vmem:[%s16393_s5 + $0x3468] sm:$0xff]  ;;  %v5684_v41 = vadd.f32 %v14152_v60, %v14161_v34  ;;  %v5076_v60 = vld [vmem:[%s16393_s5 + $0x3460] sm:$0xff] }
 0x9fb   :  { %6298 = vmatpush.msrb.mxu3 %v5001_v62  ;;  %6326 = vmatmul.f32.gmra.mxu0 %v4203_v40  ;;  %v14373_v62 = vpop.f32.mrf.mxu1  ;;  %v5087_v40 = vld [vmem:[%s16393_s5 + $0x34b8] sm:$0xff] }
 0x9fc   :  { %6345 = vmatpush.msra.mxu1 %v5032_v4  ;;  %6356 = vmatpush.msra.mxu2 %v5060_v46  ;;  %v4190_v4 = vpop.permute.xlu2 %4189  ;;  %v14383_v46 = vpop.f32.mrf.mxu0  ;;  %v5707_v34 = vadd.f32 %v14195_v48, %v5684_v41  ;;  %v5086_v48 = vld [vmem:[%s16393_s5 + $0x34b0] sm:$0xff]  ;;  %v5083_v41 = vld [vmem:[%s16393_s5 + $0x3498] sm:$0xff] }
 0x9fd   :  { %6403 = vmatpush.msrb.mxu0 %v5091_v21  ;;  %6346 = vmatmul.f32.vlgmr.msra.gmra.mxu1 %v4212_v12  ;;  %v4213_v21 = vmul.f32 %v4210_v10, %v12802_v47  ;;  %v5107_v12 = vld [vmem:[%s16393_s5 + $0x3558] sm:$0xff]  ;;  %v5104_v10 = vld [vmem:[%s16393_s5 + $0x3540] sm:$0xff] }
 0x9fe   :  { %6422 = vmatpush.msrb.mxu1 %v5111_v45  ;;  %6280 = vmatmul.f32.gmra.mxu2 %v4183_v28  ;;  %v5055_v45 = vld [vmem:[%s16393_s5 + $0x33b8] sm:$0xff]  ;;  %v14396_v28 = vpop.f32.mrf.mxu3 }
 0x9ff   :  { %6299 = vmatpush.msrb.mxu3 %v5000_v37  ;;  %6357 = vmatpush.msra.mxu2 %v5059_v15  ;;  %v4193_v37 = vmul.f32 %v4190_v4, %v12802_v47  ;;  %v5730_v15 = vadd.f32 %v14235_v19, %v5707_v34  ;;  %v5085_v19 = vld [vmem:[%s16393_s5 + $0x34a8] sm:$0xff] }
 0xa00   :  { %6404 = vmatpush.msrb.mxu0 %v5090_v27  ;;  %6300 = vmatmul.f32.vlgmr.msrb.gmra.mxu3 %v4192_v55  ;;  %v5075_v27 = vld [vmem:[%s16393_s5 + $0x3458] sm:$0xff]  ;;  %v5054_v55 = vld [vmem:[%s16393_s5 + $0x33b0] sm:$0xff] }
 0xa01   :  { %6376 = vmatpush.msra.mxu3 %v5079_v43  ;;  %6423 = vmatpush.msrb.mxu1 %v5110_v32  ;;  %v14415_v43 = vpop.f32.mrf.mxu2  ;;  %v5753_v32 = vadd.f32 %v14273_v3, %v5730_v15  ;;  %v5053_v3 = vld [vmem:[%s16393_s5 + $0x33a8] sm:$0xff] }
 0xa02   :  { %6358 = vmatpush.msra.mxu2 %v5058_v49  ;;  %6405 = vmatpush.msrb.mxu0 %v5089_v51  ;;  %v5074_v49 = vld [vmem:[%s16393_s5 + $0x3450] sm:$0xff]  ;;  %v5105_v51 = vld [vmem:[%s16393_s5 + $0x3548] sm:$0xff] }
 0xa03   :  { %7694 = vset.pattern.permute.xlu1 %v16710_v11  ;;  %7692 = vset.pattern.permute.xlu2 %v16717_v8  ;;  %v5108_v11 = vld [vmem:[%s16393_s5 + $0x3560] sm:$0xff]  ;;  %v5776_v8 = vadd.f32 %v14275_v33, %v5753_v32  ;;  %v5101_v15 = vld [vmem:[%s16393_s5 + $0x3528] sm:$0xff] }
 0xa04   :  { %6377 = vmatpush.msra.mxu3 %v5078_v9  ;;  %6424 = vmatpush.msrb.mxu1 %v5109_v23  ;;  %v14424_v9 = vpop.f32.mrf.mxu1  ;;  %v5084_v23 = vld [vmem:[%s16393_s5 + $0x34a0] sm:$0xff] }
 0xa05   :  { %4509 = vperm.xlu1 %7694, %v12523_v17   ;;  %4489 = vperm.xlu2 %7692, %v12523_v17   ;;  %v5052_v33 = vld [vmem:[%s16393_s5 + $0x33a0] sm:$0xff]  ;;  %v5799_v34 = vadd.f32 %v14316_v59, %v5776_v8  ;;  %v5081_v59 = vld [vmem:[%s16393_s5 + $0x3488] sm:$0xff] }
 0xa06   :  { %6359 = vmatpush.msra.mxu2 %v5057_v6  ;;  %6406 = vmatpush.msrb.mxu0 %v5088_v38  ;;  %v16718_v6 = vmov 62   ;;  %v16719_v38 = vmov 61   ;;  %v14457_v4 = vpop.f32.mrf.mxu3 }
 0xa07   :  { %6378 = vmatpush.msra.mxu3 %v5077_v14  ;;  %6425 = vmatpush.msrb.mxu1 %v5108_v11  ;;  %v5073_v14 = vld [vmem:[%s16393_s5 + $0x3448] sm:$0xff]  ;;  %v14441_v11 = vpop.f32.mrf.mxu0 }
 0xa08   :  { %6360 = vmatpush.msra.mxu2 %v5056_v56  ;;  %6407 = vmatpush.msrb.mxu0 %v5087_v40  ;;  %v5072_v56 = vld [vmem:[%s16393_s5 + $0x3440] sm:$0xff]  ;;  %v5103_v40 = vld [vmem:[%s16393_s5 + $0x3538] sm:$0xff] }
 0xa09   :  { %6349 = vmatmul.f32.gmra.mxu1 %v4213_v21  ;;  %6379 = vmatpush.msra.mxu3 %v5076_v60  ;;  %v5051_v60 = vld [vmem:[%s16393_s5 + $0x3398] sm:$0xff] }
 0xa0a   :  { %6426 = vmatpush.msrb.mxu1 %v5107_v12  ;;  %6361 = vmatpush.msra.mxu2 %v5055_v45  ;;  %v5071_v21 = vld [vmem:[%s16393_s5 + $0x3438] sm:$0xff]  ;;  %v5102_v12 = vld [vmem:[%s16393_s5 + $0x3530] sm:$0xff] }
 0xa0b   :  { %6408 = vmatpush.msrb.mxu0 %v5086_v48  ;;  %6303 = vmatmul.f32.gmra.mxu3 %v4193_v37  ;;  %v5050_v45 = vld [vmem:[%s16393_s5 + $0x3390] sm:$0xff]  ;;  %v14478_v48 = vpop.f32.mrf.mxu2 }
 0xa0c   :  { %6380 = vmatpush.msra.mxu3 %v5075_v27  ;;  %6427 = vmatpush.msrb.mxu1 %v5106_v53  ;;  %v5070_v37 = vld [vmem:[%s16393_s5 + $0x3430] sm:$0xff]  ;;  %v14486_v27 = vpop.permute.xlu2 %4455  ;;  %v5049_v53 = vld [vmem:[%s16393_s5 + $0x3388] sm:$0xff]  ;;  %v14495_v32 = vpop.f32.mrf.mxu1 }
 0xa0d   :  { %6362 = vmatpush.msra.mxu2 %v5054_v55  ;;  %6409 = vmatpush.msrb.mxu0 %v5085_v19  ;;  %v5080_v55 = vld [vmem:[%s16393_s5 + $0x3480] sm:$0xff]  ;;  %v5822_v19 = vadd.f32 %v14349_v26, %v5799_v34 }
 0xa0e   :  { %6381 = vmatpush.msra.mxu3 %v5074_v49  ;;  %6428 = vmatpush.msrb.mxu1 %v5105_v51  ;;  %v5681_v49 = vadd.f32 %v14111_v18, %v14119_v5  ;;  %v5069_v51 = vld [vmem:[%s16393_s5 + $0x3428] sm:$0xff]  ;;  %v5100_v26 = vld [vmem:[%s16393_s5 + $0x3520] sm:$0xff]  ;;  %v5159_v18 = vld [vmem:[%s16393_s5 + $0x36f8] sm:$0xff] }
 0xa0f   :  { %7695 = vset.pattern.permute.xlu1 %v16718_v6  ;;  %7693 = vset.pattern.permute.xlu2 %v16719_v38  ;;  %v14512_v8 = vpop.f32.mrf.mxu0  ;;  %v14522_v6 = vpop.f32.mrf.mxu3 }
 0xa10   :  { %6363 = vmatpush.msra.mxu2 %v5053_v3  ;;  %6410 = vmatpush.msrb.mxu0 %v5084_v23  ;;  %v4242_v3 = vmul.f32 %v13023_v25, %v12553_v20  ;;  %v5845_v23 = vadd.f32 %v14396_v28, %v5822_v19  ;;  %v5704_v5 = vadd.f32 %v14142_v13, %v5681_v49  ;;  %v5048_v25 = vld [vmem:[%s16393_s5 + $0x3380] sm:$0xff] }
 0xa11   :  { %4525 = vperm.xlu1 %7695, %v12333_v29   ;;  %4515 = vperm.xlu2 %7693, %v12333_v29   ;;  %v5082_v29 = vld [vmem:[%s16393_s5 + $0x3490] sm:$0xff]  ;;  %v5068_v28 = vld [vmem:[%s16393_s5 + $0x3420] sm:$0xff] }
 0xa12   :  { %6429 = vmatpush.msrb.mxu1 %v5104_v10  ;;  %6382 = vmatpush.msra.mxu3 %v5073_v14  ;;  %v16720_v13 = vld [vmem:[#allocation32_spill] sm:$0xff]  ;;  %v5127_v10 = vld [vmem:[%s16393_s5 + $0x35f8] sm:$0xff]  ;;  %v5868_v14 = vadd.f32 %v14383_v46, %v5845_v23 }
 0xa13   :  { %6364 = vmatpush.msra.mxu2 %v5052_v33  ;;  %6411 = vmatpush.msrb.mxu0 %v5083_v41  ;;  %v4222_v38 = vmul.f32 %v16720_v13, %v12553_v20  ;;  %v5158_v33 = vld [vmem:[%s16393_s5 + $0x36f0] sm:$0xff]  ;;  %v5067_v41 = vld [vmem:[%s16393_s5 + $0x3418] sm:$0xff]  ;;  %v14547_v46 = vpop.f32.mrf.mxu2  ;;  %v5096_v19 = vld [vmem:[%s16393_s5 + $0x3500] sm:$0xff] }
 0xa14   :  { %6383 = vmatpush.msra.mxu3 %v5072_v56  ;;  %6430 = vmatpush.msrb.mxu1 %v5103_v40  ;;  %v5727_v56 = vadd.f32 %v14181_v50, %v5704_v5  ;;  %v5098_v40 = vld [vmem:[%s16393_s5 + $0x3510] sm:$0xff]  ;;  %v5124_v49 = vld [vmem:[%s16393_s5 + $0x35e0] sm:$0xff]  ;;  %v16721_v23 = vld [vmem:[#allocation27_spill] sm:$0xff] }
 0xa15   :  { %6365 = vmatpush.msra.mxu2 %v5051_v60  ;;  %6412 = vmatpush.msrb.mxu0 %v5082_v29  ;;  %v5157_v60 = vld [vmem:[%s16393_s5 + $0x36e8] sm:$0xff]  ;;  %v5066_v50 = vld [vmem:[%s16393_s5 + $0x3410] sm:$0xff]  ;;  %v14555_v29 = vpop.f32.mrf.mxu1 }
 0xa16   :  { %6384 = vmatpush.msra.mxu3 %v5071_v21  ;;  %6431 = vmatpush.msrb.mxu1 %v5102_v12  ;;  %v5750_v34 = vadd.f32 %v14219_v22, %v5727_v56  ;;  %v4240_v21 = vpop.permute.xlu2 %4239  ;;  %v5097_v12 = vld [vmem:[%s16393_s5 + $0x3508] sm:$0xff]  ;;  %v5156_v22 = vld [vmem:[%s16393_s5 + $0x36e0] sm:$0xff]  ;;  %v5122_v56 = vld [vmem:[%s16393_s5 + $0x35d0] sm:$0xff] }
 0xa17   :  { %6366 = vmatpush.msra.mxu2 %v5050_v45  ;;  %6413 = vmatpush.msrb.mxu0 %v5081_v59  ;;  %v5125_v45 = vld [vmem:[%s16393_s5 + $0x35e8] sm:$0xff]  ;;  %v14564_v59 = vpop.permute.xlu1 %4259 }
 0xa18   :  { %6385 = vmatpush.msra.mxu3 %v5070_v37  ;;  %6432 = vmatpush.msrb.mxu1 %v5101_v15  ;;  %v5891_v37 = vadd.f32 %v14424_v9, %v5868_v14  ;;  %v5065_v15 = vld [vmem:[%s16393_s5 + $0x3408] sm:$0xff]  ;;  %v4243_v9 = vmul.f32 %v4240_v21, %v12802_v47  ;;  %v5152_v21 = vld [vmem:[%s16393_s5 + $0x36c0] sm:$0xff] }
 0xa19   :  { %6367 = vmatpush.msra.mxu2 %v5049_v53  ;;  %6414 = vmatpush.msrb.mxu0 %v5080_v55  ;;  %v4220_v53 = vpop.permute.xlu0 %4219  ;;  %v5773_v55 = vadd.f32 %v14211_v35, %v5750_v34 }
 0xa1a   :  { %4529 = vperm.xlu1 %7695, %v12523_v17   ;;  %7696 = vset.pattern.permute.xlu2 %v16697_v31  ;;  %v5099_v31 = vld [vmem:[%s16393_s5 + $0x3518] sm:$0xff]  ;;  %v5914_v5 = vadd.f32 %v14478_v48, %v5891_v37 }
 0xa1b   :  { %6386 = vmatpush.msra.mxu3 %v5069_v51  ;;  %6415 = vmatmul.f32.vlgmr.msrb.gmra.mxu0 %v4242_v3  ;;  %v5155_v51 = vld [vmem:[%s16393_s5 + $0x36d8] sm:$0xff]  ;;  %v5796_v35 = vadd.f32 %v14259_v36, %v5773_v55  ;;  %v14585_v3 = vpop.f32.mrf.mxu0  ;;  %v5064_v36 = vld [vmem:[%s16393_s5 + $0x3400] sm:$0xff] }
 0xa1c   :  { %6433 = vmatpush.msrb.mxu1 %v5100_v26  ;;  %6491 = vmatpush.msra.mxu0 %v5159_v18  ;;  %v4252_v26 = vmul.f32 %v16721_v23, %v12553_v20  ;;  %v4223_v18 = vmul.f32 %v4220_v53, %v12802_v47  ;;  %v5123_v48 = vld [vmem:[%s16393_s5 + $0x35d8] sm:$0xff] }
 0xa1d   :  { %4539 = vperm.xlu2 %7696, %v12523_v17   ;;  %6368 = vmatpush.msra.mxu2 %v5048_v25  ;;  %v5126_v17 = vld [vmem:[%s16393_s5 + $0x35f0] sm:$0xff]  ;;  %v5175_v25 = vld [vmem:[%s16393_s5 + $0x3778] sm:$0xff]  ;;  %v5819_v13 = vadd.f32 %v14291_v0, %v5796_v35  ;;  %v16722_v0 = vld [vmem:[#allocation25_spill] sm:$0xff] }
 0xa1e   :  { %6369 = vmatmul.f32.vlgmr.msra.gmra.mxu2 %v4222_v38  ;;  %6387 = vmatpush.msra.mxu3 %v5068_v28  ;;  %v14597_v28 = vpop.f32.mrf.mxu3  ;;  %v5154_v38 = vld [vmem:[%s16393_s5 + $0x36d0] sm:$0xff]  ;;  %v4232_v14 = vmul.f32 %v16722_v0, %v12553_v20  ;;  %v5151_v53 = vld [vmem:[%s16393_s5 + $0x36b8] sm:$0xff] }
 0xa1f   :  { %6434 = vmatpush.msrb.mxu1 %v5099_v31  ;;  %6445 = vmatpush.msrb.mxu2 %v5127_v10  ;;  %v5937_v31 = vadd.f32 %v14522_v6, %v5914_v5  ;;  %v5174_v10 = vld [vmem:[%s16393_s5 + $0x3770] sm:$0xff]  ;;  %v6005_v6 = vpop.f32.mrf.mxu2  ;;  %v4250_v34 = vpop.permute.xlu1 %4249 }
 0xa20   :  { %6492 = vmatpush.msra.mxu0 %v5158_v33  ;;  %6388 = vmatpush.msra.mxu3 %v5067_v41  ;;  %v5842_v33 = vadd.f32 %v14331_v1, %v5819_v13  ;;  %v5143_v41 = vld [vmem:[%s16393_s5 + $0x3678] sm:$0xff]  ;;  %v5173_v1 = vld [vmem:[%s16393_s5 + $0x3768] sm:$0xff]  ;;  %v5150_v35 = vld [vmem:[%s16393_s5 + $0x36b0] sm:$0xff] }
 0xa21   :  { %6435 = vmatpush.msrb.mxu1 %v5098_v40  ;;  %6446 = vmatpush.msrb.mxu2 %v5126_v17  ;;  %v5153_v40 = vld [vmem:[%s16393_s5 + $0x36c8] sm:$0xff]  ;;  %v14625_v17 = vpop.f32.mrf.mxu1 }
 0xa22   :  { %6493 = vmatpush.msra.mxu0 %v5157_v60  ;;  %6389 = vmatpush.msra.mxu3 %v5066_v50  ;;  %v5142_v60 = vld [vmem:[%s16393_s5 + $0x3670] sm:$0xff]  ;;  %v5121_v50 = vld [vmem:[%s16393_s5 + $0x35c8] sm:$0xff]  ;;  %v5865_v37 = vadd.f32 %v14335_v2, %v5842_v33  ;;  %v4230_v2 = vpop.permute.xlu0 %4229  ;;  %v5148_v33 = vld [vmem:[%s16393_s5 + $0x36a0] sm:$0xff] }
 0xa23   :  { %6436 = vmatpush.msrb.mxu1 %v5097_v12  ;;  %6447 = vmatpush.msrb.mxu2 %v5125_v45  ;;  %v5172_v12 = vld [vmem:[%s16393_s5 + $0x3760] sm:$0xff]  ;;  %v5960_v45 = vadd.f32 %v14512_v8, %v5937_v31  ;;  %v4233_v5 = vmul.f32 %v4230_v2, %v12802_v47  ;;  %v5149_v13 = vld [vmem:[%s16393_s5 + $0x36a8] sm:$0xff]  ;;  %v5134_v2 = vld [vmem:[%s16393_s5 + $0x3630] sm:$0xff] }
 0xa24   :  { %6494 = vmatpush.msra.mxu0 %v5156_v22  ;;  %6390 = vmatpush.msra.mxu3 %v5065_v15  ;;  %v5141_v22 = vld [vmem:[%s16393_s5 + $0x3668] sm:$0xff]  ;;  %v5120_v15 = vld [vmem:[%s16393_s5 + $0x35c0] sm:$0xff]  ;;  %v5888_v23 = vadd.f32 %v14373_v62, %v5865_v37  ;;  %v5118_v62 = vld [vmem:[%s16393_s5 + $0x35b0] sm:$0xff] }
 0xa25   :  { %6418 = vmatmul.f32.gmra.mxu0 %v4243_v9  ;;  %6437 = vmatpush.msrb.mxu1 %v5096_v19  ;;  %v5983_v8 = vadd.f32 %v14555_v29, %v5960_v45  ;;  %v4253_v19 = vmul.f32 %v4250_v34, %v12802_v47  ;;  %v6051_v9 = vpop.f32.mrf.mxu0  ;;  %v5119_v29 = vld [vmem:[%s16393_s5 + $0x35b8] sm:$0xff]  ;;  %v5117_v31 = vld [vmem:[%s16393_s5 + $0x35a8] sm:$0xff]  ;;  %v5136_v34 = vld [vmem:[%s16393_s5 + $0x3640] sm:$0xff] }
 0xa26   :  { %6448 = vmatpush.msrb.mxu2 %v5124_v49  ;;  %6495 = vmatpush.msra.mxu0 %v5155_v51  ;;  %v6028_v55 = vpop.f32.mrf.mxu3  ;;  %v5140_v49 = vld [vmem:[%s16393_s5 + $0x3660] sm:$0xff]  ;;  %v5171_v51 = vld [vmem:[%s16393_s5 + $0x3758] sm:$0xff]  ;;  %v5166_v45 = vld [vmem:[%s16393_s5 + $0x3730] sm:$0xff] }
 0xa27   :  { %6438 = vmatmul.f32.vlgmr.msrb.gmra.mxu1 %v4252_v26  ;;  %6372 = vmatmul.f32.gmra.mxu2 %v4223_v18  ;;  %v5170_v26 = vld [vmem:[%s16393_s5 + $0x3750] sm:$0xff]  ;;  %v14668_v18 = vpop.f32.mrf.mxu2  ;;  %v5135_v37 = vld [vmem:[%s16393_s5 + $0x3638] sm:$0xff] }
 0xa28   :  { %6514 = vmatpush.msra.mxu1 %v5175_v25  ;;  %6391 = vmatpush.msra.mxu3 %v5064_v36  ;;  %v6006_v25 = vadd.f32 %v6005_v6, %v5983_v8  ;;  %v5139_v36 = vld [vmem:[%s16393_s5 + $0x3658] sm:$0xff]  ;;  %v5165_v8 = vld [vmem:[%s16393_s5 + $0x3728] sm:$0xff] }
 0xa29   :  { %6449 = vmatpush.msrb.mxu2 %v5123_v48  ;;  %6496 = vmatpush.msra.mxu0 %v5154_v38  ;;  %v5169_v48 = vld [vmem:[%s16393_s5 + $0x3748] sm:$0xff]  ;;  %v5138_v38 = vld [vmem:[%s16393_s5 + $0x3650] sm:$0xff]  ;;  %v6074_v0 = vpop.f32.mrf.mxu1 }
 0xa2a   :  { %6392 = vmatmul.f32.vlgmr.msra.gmra.mxu3 %v4232_v14  ;;  %6515 = vmatpush.msra.mxu1 %v5174_v10  ;;  %v6029_v10 = vadd.f32 %v6028_v55, %v6006_v25  ;;  %v5911_v14 = vadd.f32 %v14415_v43, %v5888_v23  ;;  %v5116_v43 = vld [vmem:[%s16393_s5 + $0x35a0] sm:$0xff]  ;;  %v4282_v23 = vmul.f32 %v12999_v16, %v12553_v20 }
 0xa2b   :  { %6468 = vmatpush.msrb.mxu3 %v5143_v41  ;;  %6450 = vmatpush.msrb.mxu2 %v5122_v56  ;;  %v5168_v41 = vld [vmem:[%s16393_s5 + $0x3740] sm:$0xff]  ;;  %v5137_v56 = vld [vmem:[%s16393_s5 + $0x3648] sm:$0xff] }
 0xa2c   :  { %6497 = vmatpush.msra.mxu0 %v5153_v40  ;;  %6516 = vmatpush.msra.mxu1 %v5173_v1  ;;  %v5934_v40 = vadd.f32 %v14457_v4, %v5911_v14  ;;  %v5147_v1 = vld [vmem:[%s16393_s5 + $0x3698] sm:$0xff]  ;;  %v5112_v25 = vld [vmem:[%s16393_s5 + $0x3580] sm:$0xff] }
 0xa2d   :  { %6469 = vmatpush.msrb.mxu3 %v5142_v60  ;;  %6451 = vmatpush.msrb.mxu2 %v5121_v50  ;;  %v5167_v60 = vld [vmem:[%s16393_s5 + $0x3738] sm:$0xff]  ;;  %v14711_v50 = vpop.f32.mrf.mxu0 }
 0xa2e   :  { %6498 = vmatpush.msra.mxu0 %v5152_v21  ;;  %6517 = vmatpush.msra.mxu1 %v5172_v12  ;;  %v14702_v6 = vpop.f32.mrf.mxu3  ;;  %v5115_v4 = vld [vmem:[%s16393_s5 + $0x3598] sm:$0xff]  ;;  %v6052_v21 = vadd.f32 %v6051_v9, %v6029_v10  ;;  %v5146_v12 = vld [vmem:[%s16393_s5 + $0x3690] sm:$0xff]  ;;  %v5144_v9 = vld [vmem:[%s16393_s5 + $0x3680] sm:$0xff] }
 0xa2f   :  { %6470 = vmatpush.msrb.mxu3 %v5141_v22  ;;  %6452 = vmatpush.msrb.mxu2 %v5120_v15  ;;  %v5114_v22 = vld [vmem:[%s16393_s5 + $0x3590] sm:$0xff]  ;;  %v5957_v15 = vadd.f32 %v14441_v11, %v5934_v40  ;;  %v6097_v55 = vpop.f32.mrf.mxu2  ;;  %v5113_v11 = vld [vmem:[%s16393_s5 + $0x3588] sm:$0xff]  ;;  %v4280_v40 = vpop.permute.xlu2 %4279 }
 0xa30   :  { %6499 = vmatpush.msra.mxu0 %v5151_v53  ;;  %6441 = vmatmul.f32.gmra.mxu1 %v4253_v19  ;;  %v5145_v53 = vld [vmem:[%s16393_s5 + $0x3688] sm:$0xff]  ;;  %v6075_v19 = vadd.f32 %v6074_v0, %v6052_v21  ;;  %v5222_v10 = vld [vmem:[%s16393_s5 + $0x38f0] sm:$0xff]  ;;  %v5131_v0 = vld [vmem:[%s16393_s5 + $0x3618] sm:$0xff] }
 0xa31   :  { %6471 = vmatpush.msrb.mxu3 %v5140_v49  ;;  %6518 = vmatpush.msra.mxu1 %v5171_v51  ;;  %v5164_v49 = vld [vmem:[%s16393_s5 + $0x3720] sm:$0xff]  ;;  %v5133_v51 = vld [vmem:[%s16393_s5 + $0x3628] sm:$0xff] }
 0xa32   :  { %6453 = vmatpush.msrb.mxu2 %v5119_v29  ;;  %6500 = vmatpush.msra.mxu0 %v5150_v35  ;;  %v14753_v29 = vpop.f32.mrf.mxu1  ;;  %v6098_v35 = vadd.f32 %v6097_v55, %v6075_v19  ;;  %v5160_v21 = vld [vmem:[%s16393_s5 + $0x3700] sm:$0xff] }
 0xa33   :  { %6395 = vmatmul.f32.gmra.mxu3 %v4233_v5  ;;  %6519 = vmatpush.msra.mxu1 %v5170_v26  ;;  %v5980_v26 = vadd.f32 %v14495_v32, %v5957_v15  ;;  %v5223_v5 = vld [vmem:[%s16393_s5 + $0x38f8] sm:$0xff] }
 0xa34   :  { %6472 = vmatpush.msrb.mxu3 %v5139_v36  ;;  %6454 = vmatpush.msrb.mxu2 %v5118_v62  ;;  %v5132_v62 = vld [vmem:[%s16393_s5 + $0x3620] sm:$0xff]  ;;  %v16723_v32 = vld [vmem:[#allocation31_spill] sm:$0xff] }
 0xa35   :  { %6501 = vmatpush.msra.mxu0 %v5149_v13  ;;  %6520 = vmatpush.msra.mxu1 %v5169_v48  ;;  %v4262_v13 = vmul.f32 %v16723_v32, %v12553_v20  ;;  %v5163_v48 = vld [vmem:[%s16393_s5 + $0x3718] sm:$0xff] }
 0xa36   :  { %6473 = vmatpush.msrb.mxu3 %v5138_v38  ;;  %6455 = vmatpush.msrb.mxu2 %v5117_v31  ;;  %v5191_v38 = vld [vmem:[%s16393_s5 + $0x37f8] sm:$0xff]  ;;  %v6143_v31 = vpop.f32.mrf.mxu0 }
 0xa37   :  { %6502 = vmatpush.msra.mxu0 %v5148_v33  ;;  %6521 = vmatpush.msra.mxu1 %v5168_v41  ;;  %v6003_v33 = vadd.f32 %v14547_v46, %v5980_v26  ;;  %v5162_v41 = vld [vmem:[%s16393_s5 + $0x3710] sm:$0xff]  ;;  %v4290_v32 = vpop.permute.xlu2 %4289 }
 0xa38   :  { %6474 = vmatpush.msrb.mxu3 %v5137_v56  ;;  %6456 = vmatpush.msrb.mxu2 %v5116_v43  ;;  %v6120_v36 = vpop.f32.mrf.mxu3  ;;  %v5190_v56 = vld [vmem:[%s16393_s5 + $0x37f0] sm:$0xff]  ;;  %v5221_v43 = vld [vmem:[%s16393_s5 + $0x38e8] sm:$0xff] }
 0xa39   :  { %6503 = vmatpush.msra.mxu0 %v5147_v1  ;;  %6522 = vmatpush.msra.mxu1 %v5167_v60  ;;  %v6121_v16 = vadd.f32 %v6120_v36, %v6098_v35  ;;  %v5130_v46 = vld [vmem:[%s16393_s5 + $0x3610] sm:$0xff]  ;;  %v6026_v1 = vadd.f32 %v14597_v28, %v6003_v33  ;;  %v5161_v60 = vld [vmem:[%s16393_s5 + $0x3708] sm:$0xff]  ;;  %v5235_v33 = vld [vmem:[%s16393_s5 + $0x3958] sm:$0xff] }
 0xa3a   :  { %6475 = vmatpush.msrb.mxu3 %v5136_v34  ;;  %6457 = vmatpush.msrb.mxu2 %v5115_v4  ;;  %v5189_v34 = vld [vmem:[%s16393_s5 + $0x37e8] sm:$0xff]  ;;  %v5220_v4 = vld [vmem:[%s16393_s5 + $0x38e0] sm:$0xff]  ;;  %v5186_v26 = vld [vmem:[%s16393_s5 + $0x37d0] sm:$0xff] }
 0xa3b   :  { %6504 = vmatpush.msra.mxu0 %v5146_v12  ;;  %6523 = vmatpush.msra.mxu1 %v5166_v45  ;;  %v6144_v14 = vadd.f32 %v6143_v31, %v6121_v16  ;;  %v5129_v28 = vld [vmem:[%s16393_s5 + $0x3608] sm:$0xff]  ;;  %v4283_v12 = vmul.f32 %v4280_v40, %v12802_v47  ;;  %v5188_v45 = vld [vmem:[%s16393_s5 + $0x37e0] sm:$0xff]  ;;  %v6049_v15 = vadd.f32 %v14585_v3, %v6026_v1  ;;  %v5215_v31 = vld [vmem:[%s16393_s5 + $0x38b8] sm:$0xff] }
 0xa3c   :  { %6476 = vmatpush.msrb.mxu3 %v5135_v37  ;;  %6458 = vmatpush.msrb.mxu2 %v5114_v22  ;;  %v5219_v37 = vld [vmem:[%s16393_s5 + $0x38d8] sm:$0xff]  ;;  %v6166_v22 = vpop.f32.mrf.mxu1  ;;  %v5128_v3 = vld [vmem:[%s16393_s5 + $0x3600] sm:$0xff]  ;;  %v5185_v36 = vld [vmem:[%s16393_s5 + $0x37c8] sm:$0xff] }
 0xa3d   :  { %6505 = vmatpush.msra.mxu0 %v5145_v53  ;;  %6524 = vmatpush.msra.mxu1 %v5165_v8  ;;  %v14818_v53 = vadd.f32 %v6166_v22, %v6144_v14  ;;  %v16724_v8 = vld [vmem:[#allocation24_spill] sm:$0xff]  ;;  %v6072_v19 = vadd.f32 %v14625_v17, %v6049_v15  ;;  %v5182_v1 = vld [vmem:[%s16393_s5 + $0x37b0] sm:$0xff]  ;;  %v5201_v22 = vld [vmem:[%s16393_s5 + $0x3848] sm:$0xff] }
 0xa3e   :  { %6477 = vmatpush.msrb.mxu3 %v5134_v2  ;;  %6459 = vmatpush.msrb.mxu2 %v5113_v11  ;;  %v4292_v55 = vmul.f32 %v16724_v8, %v12553_v20  ;;  %v4263_v2 = vmul.f32 %v14564_v59, %v12802_v47  ;;  %v5239_v11 = vld [vmem:[%s16393_s5 + $0x3978] sm:$0xff]  ;;  %v5218_v59 = vld [vmem:[%s16393_s5 + $0x38d0] sm:$0xff]  ;;  %v5204_v14 = vld [vmem:[%s16393_s5 + $0x3860] sm:$0xff] }
 0xa3f   :  { %6506 = vmatpush.msra.mxu0 %v5144_v9  ;;  %6525 = vmatpush.msra.mxu1 %v5164_v49  ;;  %v5187_v9 = vld [vmem:[%s16393_s5 + $0x37d8] sm:$0xff]  ;;  %v5238_v49 = vld [vmem:[%s16393_s5 + $0x3970] sm:$0xff]  ;;  %v6095_v17 = vadd.f32 %v14668_v18, %v6072_v19  ;;  %v5237_v18 = vld [vmem:[%s16393_s5 + $0x3968] sm:$0xff] }
 0xa40   :  { %6478 = vmatpush.msrb.mxu3 %v5133_v51  ;;  %6507 = vmatmul.f32.vlgmr.msra.gmra.mxu0 %v4282_v23  ;;  %v16725_v51 = vld [vmem:[#allocation20_spill] sm:$0xff]  ;;  %v5207_v23 = vld [vmem:[%s16393_s5 + $0x3878] sm:$0xff] }
 0xa41   :  { %6583 = vmatpush.msrb.mxu0 %v5223_v5  ;;  %6460 = vmatpush.msrb.mxu2 %v5112_v25  ;;  %v4272_v35 = vmul.f32 %v16725_v51, %v12553_v20  ;;  %v5217_v5 = vld [vmem:[%s16393_s5 + $0x38c8] sm:$0xff]  ;;  %v5206_v25 = vld [vmem:[%s16393_s5 + $0x3870] sm:$0xff]  ;;  %v5180_v15 = vld [vmem:[%s16393_s5 + $0x37a0] sm:$0xff] }
 0xa42   :  { %6461 = vmatmul.f32.vlgmr.msrb.gmra.mxu2 %v4262_v13  ;;  %6479 = vmatpush.msrb.mxu3 %v5132_v62  ;;  %v6118_v62 = vadd.f32 %v14702_v6, %v6095_v17  ;;  %v5216_v13 = vld [vmem:[%s16393_s5 + $0x38c0] sm:$0xff]  ;;  %v5178_v17 = vld [vmem:[%s16393_s5 + $0x3790] sm:$0xff] }
 0xa43   :  { %6526 = vmatpush.msra.mxu1 %v5163_v48  ;;  %6537 = vmatpush.msra.mxu2 %v5191_v38  ;;  %v5236_v48 = vld [vmem:[%s16393_s5 + $0x3960] sm:$0xff]  ;;  %v5205_v38 = vld [vmem:[%s16393_s5 + $0x3868] sm:$0xff] }
 0xa44   :  { %6584 = vmatpush.msrb.mxu0 %v5222_v10  ;;  %6480 = vmatpush.msrb.mxu3 %v5131_v0  ;;  %v5184_v6 = vld [vmem:[%s16393_s5 + $0x37c0] sm:$0xff]  ;;  %v4293_v10 = vmul.f32 %v4290_v32, %v12802_v47  ;;  %v4270_v0 = vpop.permute.xlu1 %4269  ;;  %v5197_v32 = vld [vmem:[%s16393_s5 + $0x3828] sm:$0xff] }
 0xa45   :  { %6527 = vmatpush.msra.mxu1 %v5162_v41  ;;  %6538 = vmatpush.msra.mxu2 %v5190_v56  ;;  %v6141_v41 = vadd.f32 %v14711_v50, %v6118_v62  ;;  %v5183_v56 = vld [vmem:[%s16393_s5 + $0x37b8] sm:$0xff]  ;;  %v4273_v40 = vmul.f32 %v4270_v0, %v12802_v47  ;;  %v5200_v19 = vld [vmem:[%s16393_s5 + $0x3840] sm:$0xff] }
 0xa46   :  { %6585 = vmatpush.msrb.mxu0 %v5221_v43  ;;  %6481 = vmatpush.msrb.mxu3 %v5130_v46  ;;  %v5214_v43 = vld [vmem:[%s16393_s5 + $0x38b0] sm:$0xff]  ;;  %v5203_v50 = vld [vmem:[%s16393_s5 + $0x3858] sm:$0xff]  ;;  %v5208_v62 = vld [vmem:[%s16393_s5 + $0x3880] sm:$0xff] }
 0xa47   :  { %6528 = vmatpush.msra.mxu1 %v5161_v60  ;;  %6539 = vmatpush.msra.mxu2 %v5189_v34  ;;  %v5234_v46 = vld [vmem:[%s16393_s5 + $0x3950] sm:$0xff]  ;;  %v5213_v60 = vld [vmem:[%s16393_s5 + $0x38a8] sm:$0xff] }
 0xa48   :  { %6586 = vmatpush.msrb.mxu0 %v5220_v4  ;;  %6482 = vmatpush.msrb.mxu3 %v5129_v28  ;;  %v5233_v34 = vld [vmem:[%s16393_s5 + $0x3948] sm:$0xff]  ;;  %v6164_v4 = vadd.f32 %v14753_v29, %v6141_v41  ;;  %v5202_v28 = vld [vmem:[%s16393_s5 + $0x3850] sm:$0xff]  ;;  %v5232_v29 = vld [vmem:[%s16393_s5 + $0x3940] sm:$0xff] }
 0xa49   :  { %6510 = vmatmul.f32.gmra.mxu0 %v4283_v12  ;;  %6529 = vmatpush.msra.mxu1 %v5160_v21  ;;  %v5181_v21 = vld [vmem:[%s16393_s5 + $0x37a8] sm:$0xff]  ;;  %v5212_v12 = vld [vmem:[%s16393_s5 + $0x38a0] sm:$0xff] }
 0xa4a   :  { %6540 = vmatpush.msra.mxu2 %v5188_v45  ;;  %6587 = vmatpush.msrb.mxu0 %v5219_v37 }
 0xa4b   :  { %6530 = vmatmul.f32.vlgmr.msra.gmra.mxu1 %v4292_v55  ;;  %6464 = vmatmul.f32.gmra.mxu2 %v4263_v2  ;;  %v6186_v16 = vpop.f32.mrf.mxu2  ;;  %v5211_v2 = vld [vmem:[%s16393_s5 + $0x3898] sm:$0xff] }
 0xa4c   :  { %6606 = vmatpush.msrb.mxu1 %v5239_v11  ;;  %6483 = vmatpush.msrb.mxu3 %v5128_v3  ;;  %v6187_v45 = vadd.f32 %v6186_v16, %v6164_v4  ;;  %v5231_v11 = vld [vmem:[%s16393_s5 + $0x3938] sm:$0xff]  ;;  %v5228_v16 = vld [vmem:[%s16393_s5 + $0x3920] sm:$0xff] }
 0xa4d   :  { %6541 = vmatpush.msra.mxu2 %v5187_v9  ;;  %6588 = vmatpush.msrb.mxu0 %v5218_v59  ;;  %v6232_v9 = vpop.f32.mrf.mxu0  ;;  %v5210_v59 = vld [vmem:[%s16393_s5 + $0x3890] sm:$0xff] }
 0xa4e   :  { %6484 = vmatmul.f32.vlgmr.msrb.gmra.mxu3 %v4272_v35  ;;  %6607 = vmatpush.msrb.mxu1 %v5238_v49  ;;  %v5230_v49 = vld [vmem:[%s16393_s5 + $0x3930] sm:$0xff]  ;;  %v5199_v35 = vld [vmem:[%s16393_s5 + $0x3838] sm:$0xff] }
 0xa4f   :  { %6560 = vmatpush.msra.mxu3 %v5207_v23  ;;  %6542 = vmatpush.msra.mxu2 %v5186_v26  ;;  %v14951_v23 = vpop.permute.xlu0 %4465  ;;  %v5209_v26 = vld [vmem:[%s16393_s5 + $0x3888] sm:$0xff] }
 0xa50   :  { %6589 = vmatpush.msrb.mxu0 %v5217_v5  ;;  %6608 = vmatpush.msrb.mxu1 %v5237_v18  ;;  %v5229_v5 = vld [vmem:[%s16393_s5 + $0x3928] sm:$0xff]  ;;  %v14959_v18 = vpop.permute.xlu2 %4445 }
 0xa51   :  { %6561 = vmatpush.msra.mxu3 %v5206_v25  ;;  %6543 = vmatpush.msra.mxu2 %v5185_v36  ;;  %v5198_v25 = vld [vmem:[%s16393_s5 + $0x3830] sm:$0xff]  ;;  %v5177_v36 = vld [vmem:[%s16393_s5 + $0x3788] sm:$0xff] }
 0xa52   :  { %6590 = vmatpush.msrb.mxu0 %v5216_v13  ;;  %6609 = vmatpush.msrb.mxu1 %v5236_v48  ;;  %v6255_v13 = vpop.f32.mrf.mxu1  ;;  %v4322_v48 = vmul.f32 %v13052_v24, %v12553_v20  ;;  %v16726_v24 = vld [vmem:[#allocation28_spill] sm:$0xff] }
 0xa53   :  { %6562 = vmatpush.msra.mxu3 %v5205_v38  ;;  %6544 = vmatpush.msra.mxu2 %v5184_v6  ;;  %v5287_v38 = vld [vmem:[%s16393_s5 + $0x3af8] sm:$0xff]  ;;  %v5176_v6 = vld [vmem:[%s16393_s5 + $0x3780] sm:$0xff]  ;;  %v4302_v0 = vmul.f32 %v16726_v24, %v12553_v20 }
 0xa54   :  { %6591 = vmatpush.msrb.mxu0 %v5215_v31  ;;  %6533 = vmatmul.f32.gmra.mxu1 %v4293_v10  ;;  %v5196_v10 = vld [vmem:[%s16393_s5 + $0x3820] sm:$0xff] }
 0xa55   :  { %6563 = vmatpush.msra.mxu3 %v5204_v14  ;;  %6610 = vmatpush.msrb.mxu1 %v5235_v33  ;;  %v5227_v14 = vld [vmem:[%s16393_s5 + $0x3918] sm:$0xff]  ;;  %v5268_v24 = vld [vmem:[%s16393_s5 + $0x3a60] sm:$0xff] }
 0xa56   :  { %6545 = vmatpush.msra.mxu2 %v5183_v56  ;;  %6592 = vmatpush.msrb.mxu0 %v5214_v43  ;;  %v5255_v33 = vld [vmem:[%s16393_s5 + $0x39f8] sm:$0xff]  ;;  %v5286_v56 = vld [vmem:[%s16393_s5 + $0x3af0] sm:$0xff] }
 0xa57   :  { %6487 = vmatmul.f32.gmra.mxu3 %v4273_v40  ;;  %6611 = vmatpush.msrb.mxu1 %v5234_v46  ;;  %v6189_v37 = vpop.f32.mrf.mxu2  ;;  %v5195_v43 = vld [vmem:[%s16393_s5 + $0x3818] sm:$0xff]  ;;  %v5226_v40 = vld [vmem:[%s16393_s5 + $0x3910] sm:$0xff] }
 0xa58   :  { %6564 = vmatpush.msra.mxu3 %v5203_v50  ;;  %6546 = vmatpush.msra.mxu2 %v5182_v1  ;;  %v6190_v8 = vadd.f32 %v6189_v37, %v14818_v53  ;;  %v5179_v53 = vld [vmem:[%s16393_s5 + $0x3798] sm:$0xff]  ;;  %v5254_v50 = vld [vmem:[%s16393_s5 + $0x39f0] sm:$0xff]  ;;  %v6235_v1 = vpop.f32.mrf.mxu0  ;;  %v5193_v37 = vld [vmem:[%s16393_s5 + $0x3808] sm:$0xff] }
 0xa59   :  { %6593 = vmatpush.msrb.mxu0 %v5213_v60  ;;  %6612 = vmatpush.msrb.mxu1 %v5233_v34  ;;  %v6209_v55 = vpop.f32.mrf.mxu3  ;;  %v5285_v60 = vld [vmem:[%s16393_s5 + $0x3ae8] sm:$0xff]  ;;  %v5194_v34 = vld [vmem:[%s16393_s5 + $0x3810] sm:$0xff] }
 0xa5a   :  { %6565 = vmatpush.msra.mxu3 %v5202_v28  ;;  %6547 = vmatpush.msra.mxu2 %v5181_v21  ;;  %v6210_v3 = vadd.f32 %v6209_v55, %v6187_v45  ;;  %v4320_v28 = vpop.permute.xlu0 %4319  ;;  %v5225_v21 = vld [vmem:[%s16393_s5 + $0x3908] sm:$0xff]  ;;  %v5284_v45 = vld [vmem:[%s16393_s5 + $0x3ae0] sm:$0xff] }
 0xa5b   :  { %6594 = vmatpush.msrb.mxu0 %v5212_v12  ;;  %6613 = vmatpush.msrb.mxu1 %v5232_v29  ;;  %v5253_v12 = vld [vmem:[%s16393_s5 + $0x39e8] sm:$0xff]  ;;  %v15021_v29 = vpop.permute.xlu2 %4339  ;;  %v5252_v55 = vld [vmem:[%s16393_s5 + $0x39e0] sm:$0xff] }
 0xa5c   :  { %6566 = vmatpush.msra.mxu3 %v5201_v22  ;;  %6548 = vmatpush.msra.mxu2 %v5180_v15  ;;  %v6233_v51 = vadd.f32 %v6232_v9, %v6210_v3  ;;  %v4300_v22 = vpop.permute.xlu1 %4299  ;;  %v5224_v15 = vld [vmem:[%s16393_s5 + $0x3900] sm:$0xff]  ;;  %v5303_v9 = vld [vmem:[%s16393_s5 + $0x3b78] sm:$0xff] }
 0xa5d   :  { %6595 = vmatpush.msrb.mxu0 %v5211_v2  ;;  %6614 = vmatpush.msrb.mxu1 %v5231_v11  ;;  %v5283_v2 = vld [vmem:[%s16393_s5 + $0x3ad8] sm:$0xff]  ;;  %v6258_v11 = vpop.f32.mrf.mxu1 }
 0xa5e   :  { %6567 = vmatpush.msra.mxu3 %v5200_v19  ;;  %6549 = vmatpush.msra.mxu2 %v5179_v53  ;;  %v14984_v31 = vadd.f32 %v6255_v13, %v6233_v51  ;;  %v4332_v19 = vmul.f32 %v13122_v54, %v12553_v20  ;;  %v4303_v53 = vmul.f32 %v4300_v22, %v12802_v47  ;;  %v5282_v54 = vld [vmem:[%s16393_s5 + $0x3ad0] sm:$0xff]  ;;  %v5269_v13 = vld [vmem:[%s16393_s5 + $0x3a68] sm:$0xff]  ;;  %v5264_v22 = vld [vmem:[%s16393_s5 + $0x3a40] sm:$0xff] }
 0xa5f   :  { %6596 = vmatpush.msrb.mxu0 %v5210_v59  ;;  %6615 = vmatpush.msrb.mxu1 %v5230_v49  ;;  %v5192_v59 = vld [vmem:[%s16393_s5 + $0x3800] sm:$0xff]  ;;  %v5251_v49 = vld [vmem:[%s16393_s5 + $0x39d8] sm:$0xff]  ;;  %v5302_v51 = vld [vmem:[%s16393_s5 + $0x3b70] sm:$0xff] }
 0xa60   :  { %6568 = vmatpush.msra.mxu3 %v5199_v35  ;;  %6550 = vmatpush.msra.mxu2 %v5178_v17  ;;  %v4312_v35 = vmul.f32 %v13073_v30, %v12553_v20  ;;  %v5271_v17 = vld [vmem:[%s16393_s5 + $0x3a78] sm:$0xff]  ;;  %v5301_v30 = vld [vmem:[%s16393_s5 + $0x3b68] sm:$0xff] }
 0xa61   :  { %6597 = vmatpush.msrb.mxu0 %v5209_v26  ;;  %6616 = vmatpush.msrb.mxu1 %v5229_v5  ;;  %v5250_v26 = vld [vmem:[%s16393_s5 + $0x39d0] sm:$0xff]  ;;  %v5281_v5 = vld [vmem:[%s16393_s5 + $0x3ac8] sm:$0xff] }
 0xa62   :  { %6569 = vmatpush.msra.mxu3 %v5198_v25  ;;  %6551 = vmatpush.msra.mxu2 %v5177_v36  ;;  %v5270_v25 = vld [vmem:[%s16393_s5 + $0x3a70] sm:$0xff]  ;;  %v5249_v36 = vld [vmem:[%s16393_s5 + $0x39c8] sm:$0xff] }
 0xa63   :  { %6598 = vmatpush.msrb.mxu0 %v5208_v62  ;;  %6617 = vmatpush.msrb.mxu1 %v5228_v16  ;;  %v4330_v62 = vpop.permute.xlu2 %4329  ;;  %v5280_v16 = vld [vmem:[%s16393_s5 + $0x3ac0] sm:$0xff] }
 0xa64   :  { %6570 = vmatpush.msra.mxu3 %v5197_v32  ;;  %6599 = vmatmul.f32.vlgmr.msrb.gmra.mxu0 %v4322_v48  ;;  %v6212_v41 = vpop.f32.mrf.mxu3  ;;  %v5300_v32 = vld [vmem:[%s16393_s5 + $0x3b60] sm:$0xff] }
 0xa65   :  { %6675 = vmatpush.msra.mxu0 %v5287_v38  ;;  %6552 = vmatpush.msra.mxu2 %v5176_v6  ;;  %v6213_v46 = vadd.f32 %v6212_v41, %v6190_v8  ;;  %v4323_v8 = vmul.f32 %v4320_v28, %v12802_v47  ;;  %v5248_v48 = vld [vmem:[%s16393_s5 + $0x39c0] sm:$0xff]  ;;  %v5279_v38 = vld [vmem:[%s16393_s5 + $0x3ab8] sm:$0xff]  ;;  %v4333_v6 = vmul.f32 %v4330_v62, %v12802_v47  ;;  %v5278_v41 = vld [vmem:[%s16393_s5 + $0x3ab0] sm:$0xff] }
 0xa66   :  { %6553 = vmatmul.f32.vlgmr.msra.gmra.mxu2 %v4302_v0  ;;  %6571 = vmatpush.msra.mxu3 %v5196_v10  ;;  %v4310_v10 = vpop.permute.xlu1 %4309  ;;  %v5299_v0 = vld [vmem:[%s16393_s5 + $0x3b58] sm:$0xff]  ;;  %v5296_v28 = vld [vmem:[%s16393_s5 + $0x3b40] sm:$0xff] }
 0xa67   :  { %6618 = vmatpush.msrb.mxu1 %v5227_v14  ;;  %6629 = vmatpush.msrb.mxu2 %v5255_v33  ;;  %v6236_v4 = vadd.f32 %v6235_v1, %v6213_v46  ;;  %v5247_v33 = vld [vmem:[%s16393_s5 + $0x39b8] sm:$0xff]  ;;  %v4313_v46 = vmul.f32 %v4310_v10, %v12802_v47  ;;  %v5297_v1 = vld [vmem:[%s16393_s5 + $0x3b48] sm:$0xff]  ;;  %v5240_v62 = vld [vmem:[%s16393_s5 + $0x3980] sm:$0xff] }
 0xa68   :  { %6676 = vmatpush.msra.mxu0 %v5286_v56  ;;  %6572 = vmatpush.msra.mxu3 %v5195_v43  ;;  %v5298_v43 = vld [vmem:[%s16393_s5 + $0x3b50] sm:$0xff] }
 0xa69   :  { %6619 = vmatpush.msrb.mxu1 %v5226_v40  ;;  %6630 = vmatpush.msrb.mxu2 %v5254_v50  ;;  %v15039_v3 = vadd.f32 %v6258_v11, %v6236_v4  ;;  %v5267_v40 = vld [vmem:[%s16393_s5 + $0x3a58] sm:$0xff]  ;;  %v5246_v50 = vld [vmem:[%s16393_s5 + $0x39b0] sm:$0xff]  ;;  %v5276_v4 = vld [vmem:[%s16393_s5 + $0x3aa0] sm:$0xff] }
 0xa6a   :  { %6677 = vmatpush.msra.mxu0 %v5285_v60  ;;  %6573 = vmatpush.msra.mxu3 %v5194_v34  ;;  %v5266_v60 = vld [vmem:[%s16393_s5 + $0x3a50] sm:$0xff]  ;;  %v5245_v34 = vld [vmem:[%s16393_s5 + $0x39a8] sm:$0xff] }
 0xa6b   :  { %6620 = vmatpush.msrb.mxu1 %v5225_v21  ;;  %6631 = vmatpush.msrb.mxu2 %v5253_v12  ;;  %v5265_v21 = vld [vmem:[%s16393_s5 + $0x3a48] sm:$0xff]  ;;  %v5244_v12 = vld [vmem:[%s16393_s5 + $0x39a0] sm:$0xff]  ;;  %v5242_v11 = vld [vmem:[%s16393_s5 + $0x3990] sm:$0xff] }
 0xa6c   :  { %6678 = vmatpush.msra.mxu0 %v5284_v45  ;;  %6574 = vmatpush.msra.mxu3 %v5193_v37  ;;  %v5275_v45 = vld [vmem:[%s16393_s5 + $0x3a98] sm:$0xff] }
 0xa6d   :  { %6602 = vmatmul.f32.gmra.mxu0 %v4323_v8  ;;  %6621 = vmatpush.msrb.mxu1 %v5224_v15  ;;  %v5295_v37 = vld [vmem:[%s16393_s5 + $0x3b38] sm:$0xff]  ;;  %v5274_v8 = vld [vmem:[%s16393_s5 + $0x3a90] sm:$0xff] }
 0xa6e   :  { %6632 = vmatpush.msrb.mxu2 %v5252_v55  ;;  %6679 = vmatpush.msra.mxu0 %v5283_v2  ;;  %v5243_v15 = vld [vmem:[%s16393_s5 + $0x3998] sm:$0xff]  ;;  %v5294_v55 = vld [vmem:[%s16393_s5 + $0x3b30] sm:$0xff] }
 0xa6f   :  { %6622 = vmatmul.f32.vlgmr.msrb.gmra.mxu1 %v4332_v19  ;;  %6556 = vmatmul.f32.gmra.mxu2 %v4303_v53  ;;  %v5263_v2 = vld [vmem:[%s16393_s5 + $0x3a38] sm:$0xff]  ;;  %v15166_v53 = vpop.permute.xlu1 %4435 }
 0xa70   :  { %6698 = vmatpush.msra.mxu1 %v5303_v9  ;;  %6575 = vmatpush.msra.mxu3 %v5192_v59  ;;  %v5273_v9 = vld [vmem:[%s16393_s5 + $0x3a88] sm:$0xff] }
 0xa71   :  { %6633 = vmatpush.msrb.mxu2 %v5251_v49  ;;  %6680 = vmatpush.msra.mxu0 %v5282_v54  ;;  %v5293_v59 = vld [vmem:[%s16393_s5 + $0x3b28] sm:$0xff]  ;;  %v5262_v54 = vld [vmem:[%s16393_s5 + $0x3a30] sm:$0xff] }
 0xa72   :  { %6576 = vmatmul.f32.vlgmr.msra.gmra.mxu3 %v4312_v35  ;;  %6699 = vmatpush.msra.mxu1 %v5302_v51  ;;  %v5241_v51 = vld [vmem:[%s16393_s5 + $0x3988] sm:$0xff] }
 0xa73   :  { %6652 = vmatpush.msrb.mxu3 %v5271_v17  ;;  %6634 = vmatpush.msrb.mxu2 %v5250_v26  ;;  %v5272_v17 = vld [vmem:[%s16393_s5 + $0x3a80] sm:$0xff] }
 0xa74   :  { %6681 = vmatpush.msra.mxu0 %v5281_v5  ;;  %6700 = vmatpush.msra.mxu1 %v5301_v30  ;;  %v5261_v5 = vld [vmem:[%s16393_s5 + $0x3a28] sm:$0xff]  ;;  %v6324_v30 = vpop.f32.mrf.mxu0 }
 0xa75   :  { %6653 = vmatpush.msrb.mxu3 %v5270_v25  ;;  %6635 = vmatpush.msrb.mxu2 %v5249_v36  ;;  %v4362_v25 = vmul.f32 %v13765_v44, %v12553_v20  ;;  %v5351_v36 = vld [vmem:[%s16393_s5 + $0x3cf8] sm:$0xff]  ;;  %v16727_v44 = vld [vmem:[#allocation22_spill] sm:$0xff] }
 0xa76   :  { %6682 = vmatpush.msra.mxu0 %v5280_v16  ;;  %6701 = vmatpush.msra.mxu1 %v5300_v32  ;;  %v6278_v14 = vpop.f32.mrf.mxu2  ;;  %v5260_v32 = vld [vmem:[%s16393_s5 + $0x3a20] sm:$0xff] }
 0xa77   :  { %6654 = vmatpush.msrb.mxu3 %v5269_v13  ;;  %6636 = vmatpush.msrb.mxu2 %v5248_v48  ;;  %v6279_v56 = vadd.f32 %v6278_v14, %v14984_v31  ;;  %v5277_v31 = vld [vmem:[%s16393_s5 + $0x3aa8] sm:$0xff]  ;;  %v4342_v48 = vmul.f32 %v16727_v44, %v12553_v20  ;;  %v5290_v14 = vld [vmem:[%s16393_s5 + $0x3b10] sm:$0xff] }
 0xa78   :  { %6683 = vmatpush.msra.mxu0 %v5279_v38  ;;  %6625 = vmatmul.f32.gmra.mxu1 %v4333_v6  ;;  %v5291_v38 = vld [vmem:[%s16393_s5 + $0x3b18] sm:$0xff]  ;;  %v5362_v44 = vld [vmem:[%s16393_s5 + $0x3d50] sm:$0xff] }
 0xa79   :  { %6655 = vmatpush.msrb.mxu3 %v5268_v24  ;;  %6702 = vmatpush.msra.mxu1 %v5299_v0  ;;  %v5319_v6 = vld [vmem:[%s16393_s5 + $0x3bf8] sm:$0xff]  ;;  %v5350_v24 = vld [vmem:[%s16393_s5 + $0x3cf0] sm:$0xff] }
 0xa7a   :  { %6637 = vmatpush.msrb.mxu2 %v5247_v33  ;;  %6684 = vmatpush.msra.mxu0 %v5278_v41  ;;  %v6347_v13 = vpop.f32.mrf.mxu1  ;;  %v5259_v0 = vld [vmem:[%s16393_s5 + $0x3a18] sm:$0xff]  ;;  %v5318_v33 = vld [vmem:[%s16393_s5 + $0x3bf0] sm:$0xff]  ;;  %v5349_v41 = vld [vmem:[%s16393_s5 + $0x3ce8] sm:$0xff] }
 0xa7b   :  { %6579 = vmatmul.f32.gmra.mxu3 %v4313_v46  ;;  %6703 = vmatpush.msra.mxu1 %v5298_v43  ;;  %v4360_v43 = vpop.permute.xlu1 %4359  ;;  %v5289_v46 = vld [vmem:[%s16393_s5 + $0x3b08] sm:$0xff] }
 0xa7c   :  { %6656 = vmatpush.msrb.mxu3 %v5267_v40  ;;  %6638 = vmatpush.msrb.mxu2 %v5246_v50  ;;  %v5317_v40 = vld [vmem:[%s16393_s5 + $0x3be8] sm:$0xff]  ;;  %v5348_v50 = vld [vmem:[%s16393_s5 + $0x3ce0] sm:$0xff] }
 0xa7d   :  { %6685 = vmatpush.msra.mxu0 %v5277_v31  ;;  %6704 = vmatpush.msra.mxu1 %v5297_v1  ;;  %v5257_v31 = vld [vmem:[%s16393_s5 + $0x3a08] sm:$0xff]  ;;  %v5288_v1 = vld [vmem:[%s16393_s5 + $0x3b00] sm:$0xff] }
 0xa7e   :  { %6657 = vmatpush.msrb.mxu3 %v5266_v60  ;;  %6639 = vmatpush.msrb.mxu2 %v5245_v34  ;;  %v4363_v34 = vmul.f32 %v4360_v43, %v12802_v47  ;;  %v5329_v43 = vld [vmem:[%s16393_s5 + $0x3c48] sm:$0xff] }
 0xa7f   :  { %6686 = vmatpush.msra.mxu0 %v5276_v4  ;;  %6705 = vmatpush.msra.mxu1 %v5296_v28  ;;  %v5316_v4 = vld [vmem:[%s16393_s5 + $0x3be0] sm:$0xff]  ;;  %v5347_v28 = vld [vmem:[%s16393_s5 + $0x3cd8] sm:$0xff] }
 0xa80   :  { %6658 = vmatpush.msrb.mxu3 %v5265_v21  ;;  %6640 = vmatpush.msrb.mxu2 %v5244_v12  ;;  %v6327_v12 = vpop.f32.mrf.mxu0 }
 0xa81   :  { %6687 = vmatpush.msra.mxu0 %v5275_v45  ;;  %6706 = vmatpush.msra.mxu1 %v5295_v37  ;;  %v6281_v19 = vpop.f32.mrf.mxu2  ;;  %v4372_v45 = vmul.f32 %v13549_v57, %v12553_v20  ;;  %v4343_v37 = vmul.f32 %v15021_v29, %v12802_v47  ;;  %v5315_v57 = vld [vmem:[%s16393_s5 + $0x3bd8] sm:$0xff]  ;;  %v5346_v29 = vld [vmem:[%s16393_s5 + $0x3cd0] sm:$0xff] }
 0xa82   :  { %6659 = vmatpush.msrb.mxu3 %v5264_v22  ;;  %6641 = vmatpush.msrb.mxu2 %v5243_v15  ;;  %v6282_v49 = vadd.f32 %v6281_v19, %v15039_v3  ;;  %v5292_v3 = vld [vmem:[%s16393_s5 + $0x3b20] sm:$0xff]  ;;  %v5367_v22 = vld [vmem:[%s16393_s5 + $0x3d78] sm:$0xff]  ;;  %v4352_v19 = vmul.f32 %v13159_v39, %v12553_v20  ;;  %v5365_v39 = vld [vmem:[%s16393_s5 + $0x3d68] sm:$0xff] }
 0xa83   :  { %6688 = vmatpush.msra.mxu0 %v5274_v8  ;;  %6707 = vmatpush.msra.mxu1 %v5294_v55  ;;  %v6301_v35 = vpop.f32.mrf.mxu3  ;;  %v5256_v15 = vld [vmem:[%s16393_s5 + $0x3a00] sm:$0xff] }
 0xa84   :  { %6660 = vmatpush.msrb.mxu3 %v5263_v2  ;;  %6642 = vmatpush.msrb.mxu2 %v5242_v11  ;;  %v6302_v26 = vadd.f32 %v6301_v35, %v6279_v56  ;;  %v5258_v56 = vld [vmem:[%s16393_s5 + $0x3a10] sm:$0xff]  ;;  %v4370_v35 = vpop.permute.xlu0 %4369 }
 0xa85   :  { %6689 = vmatpush.msra.mxu0 %v5273_v9  ;;  %6708 = vmatpush.msra.mxu1 %v5293_v59  ;;  %v5366_v2 = vld [vmem:[%s16393_s5 + $0x3d70] sm:$0xff]  ;;  %v5335_v9 = vld [vmem:[%s16393_s5 + $0x3c78] sm:$0xff] }
 0xa86   :  { %6661 = vmatpush.msrb.mxu3 %v5262_v54  ;;  %6643 = vmatpush.msrb.mxu2 %v5241_v51  ;;  %v6325_v16 = vadd.f32 %v6324_v30, %v6302_v26  ;;  %v6350_v55 = vpop.f32.mrf.mxu1  ;;  %v5314_v59 = vld [vmem:[%s16393_s5 + $0x3bd0] sm:$0xff]  ;;  %v5313_v51 = vld [vmem:[%s16393_s5 + $0x3bc8] sm:$0xff]  ;;  %v5343_v30 = vld [vmem:[%s16393_s5 + $0x3cb8] sm:$0xff] }
 0xa87   :  { %6690 = vmatpush.msra.mxu0 %v5272_v17  ;;  %6709 = vmatpush.msra.mxu1 %v5292_v3  ;;  %v5334_v54 = vld [vmem:[%s16393_s5 + $0x3c70] sm:$0xff]  ;;  %v5344_v17 = vld [vmem:[%s16393_s5 + $0x3cc0] sm:$0xff]  ;;  %v5333_v26 = vld [vmem:[%s16393_s5 + $0x3c68] sm:$0xff] }
 0xa88   :  { %6662 = vmatpush.msrb.mxu3 %v5261_v5  ;;  %6691 = vmatmul.f32.vlgmr.msra.gmra.mxu0 %v4362_v25  ;;  %v15209_v10 = vadd.f32 %v6347_v13, %v6325_v16  ;;  %v5364_v3 = vld [vmem:[%s16393_s5 + $0x3d60] sm:$0xff]  ;;  %v4373_v25 = vmul.f32 %v4370_v35, %v12802_v47  ;;  %v5363_v16 = vld [vmem:[%s16393_s5 + $0x3d58] sm:$0xff]  ;;  %v5342_v13 = vld [vmem:[%s16393_s5 + $0x3cb0] sm:$0xff] }
 0xa89   :  { %6767 = vmatpush.msrb.mxu0 %v5351_v36  ;;  %6644 = vmatpush.msrb.mxu2 %v5240_v62  ;;  %v5312_v5 = vld [vmem:[%s16393_s5 + $0x3bc0] sm:$0xff]  ;;  %v4350_v36 = vpop.permute.xlu2 %4349 }
 0xa8a   :  { %6645 = vmatmul.f32.vlgmr.msrb.gmra.mxu2 %v4342_v48  ;;  %6663 = vmatpush.msrb.mxu3 %v5260_v32  ;;  %v5332_v62 = vld [vmem:[%s16393_s5 + $0x3c60] sm:$0xff]  ;;  %v5311_v32 = vld [vmem:[%s16393_s5 + $0x3bb8] sm:$0xff]  ;;  %v4353_v48 = vmul.f32 %v4350_v36, %v12802_v47  ;;  %v5353_v36 = vld [vmem:[%s16393_s5 + $0x3d08] sm:$0xff] }
 0xa8b   :  { %6710 = vmatpush.msra.mxu1 %v5291_v38  ;;  %6721 = vmatpush.msra.mxu2 %v5319_v6  ;;  %v5331_v38 = vld [vmem:[%s16393_s5 + $0x3c58] sm:$0xff]  ;;  %v5310_v6 = vld [vmem:[%s16393_s5 + $0x3bb0] sm:$0xff] }
 0xa8c   :  { %6768 = vmatpush.msrb.mxu0 %v5350_v24  ;;  %6664 = vmatpush.msrb.mxu3 %v5259_v0  ;;  %v5341_v24 = vld [vmem:[%s16393_s5 + $0x3ca8] sm:$0xff] }
 0xa8d   :  { %6711 = vmatpush.msra.mxu1 %v5290_v14  ;;  %6722 = vmatpush.msra.mxu2 %v5318_v33  ;;  %v5361_v0 = vld [vmem:[%s16393_s5 + $0x3d48] sm:$0xff]  ;;  %v5330_v14 = vld [vmem:[%s16393_s5 + $0x3c50] sm:$0xff] }
 0xa8e   :  { %6769 = vmatpush.msrb.mxu0 %v5349_v41  ;;  %6665 = vmatpush.msrb.mxu3 %v5258_v56  ;;  %v6304_v60 = vpop.f32.mrf.mxu3  ;;  %v5309_v33 = vld [vmem:[%s16393_s5 + $0x3ba8] sm:$0xff]  ;;  %v5340_v41 = vld [vmem:[%s16393_s5 + $0x3ca0] sm:$0xff] }
 0xa8f   :  { %6712 = vmatpush.msra.mxu1 %v5289_v46  ;;  %6723 = vmatpush.msra.mxu2 %v5317_v40  ;;  %v6305_v21 = vadd.f32 %v6304_v60, %v6282_v49  ;;  %v5345_v49 = vld [vmem:[%s16393_s5 + $0x3cc8] sm:$0xff]  ;;  %v5360_v56 = vld [vmem:[%s16393_s5 + $0x3d40] sm:$0xff] }
 0xa90   :  { %6770 = vmatpush.msrb.mxu0 %v5348_v50  ;;  %6666 = vmatpush.msrb.mxu3 %v5257_v31  ;;  %v5308_v46 = vld [vmem:[%s16393_s5 + $0x3ba0] sm:$0xff]  ;;  %v5339_v50 = vld [vmem:[%s16393_s5 + $0x3c98] sm:$0xff] }
 0xa91   :  { %6694 = vmatmul.f32.gmra.mxu0 %v4363_v34  ;;  %6713 = vmatpush.msra.mxu1 %v5288_v1  ;;  %v6328_v8 = vadd.f32 %v6327_v12, %v6305_v21  ;;  %v5359_v31 = vld [vmem:[%s16393_s5 + $0x3d38] sm:$0xff]  ;;  %v5328_v60 = vld [vmem:[%s16393_s5 + $0x3c40] sm:$0xff]  ;;  %v5306_v21 = vld [vmem:[%s16393_s5 + $0x3b90] sm:$0xff] }
 0xa92   :  { %6724 = vmatpush.msra.mxu2 %v5316_v4  ;;  %6771 = vmatpush.msrb.mxu0 %v5347_v28  ;;  %v5307_v34 = vld [vmem:[%s16393_s5 + $0x3b98] sm:$0xff]  ;;  %v5338_v4 = vld [vmem:[%s16393_s5 + $0x3c90] sm:$0xff]  ;;  %v5337_v12 = vld [vmem:[%s16393_s5 + $0x3c88] sm:$0xff] }
 0xa93   :  { %6714 = vmatmul.f32.vlgmr.msra.gmra.mxu1 %v4372_v45  ;;  %6648 = vmatmul.f32.gmra.mxu2 %v4343_v37  ;;  %v15270_v11 = vadd.f32 %v6350_v55, %v6328_v8  ;;  %v5327_v28 = vld [vmem:[%s16393_s5 + $0x3c38] sm:$0xff]  ;;  %v5357_v45 = vld [vmem:[%s16393_s5 + $0x3d28] sm:$0xff]  ;;  %v5326_v37 = vld [vmem:[%s16393_s5 + $0x3c30] sm:$0xff] }
 0xa94   :  { %6790 = vmatpush.msrb.mxu1 %v5367_v22  ;;  %6667 = vmatpush.msrb.mxu3 %v5256_v15  ;;  %v5305_v22 = vld [vmem:[%s16393_s5 + $0x3b88] sm:$0xff]  ;;  %v5336_v15 = vld [vmem:[%s16393_s5 + $0x3c80] sm:$0xff]  ;;  %v5415_v55 = vld [vmem:[%s16393_s5 + $0x3ef8] sm:$0xff] }
 0xa95   :  { %6725 = vmatpush.msra.mxu2 %v5315_v57  ;;  %6772 = vmatpush.msrb.mxu0 %v5346_v29  ;;  %v5356_v8 = vld [vmem:[%s16393_s5 + $0x3d20] sm:$0xff]  ;;  %v5325_v57 = vld [vmem:[%s16393_s5 + $0x3c28] sm:$0xff]  ;;  %v4402_v29 = vmul.f32 %v13994_v52, %v12553_v20  ;;  %v4382_v52 = vmul.f32 %v13210_v7, %v12553_v20  ;;  %v5323_v7 = vld [vmem:[%s16393_s5 + $0x3c18] sm:$0xff] }
 0xa96   :  { %6668 = vmatmul.f32.vlgmr.msrb.gmra.mxu3 %v4352_v19  ;;  %6791 = vmatpush.msrb.mxu1 %v5366_v2  ;;  %v5304_v2 = vld [vmem:[%s16393_s5 + $0x3b80] sm:$0xff] }
 0xa97   :  { %6744 = vmatpush.msra.mxu3 %v5335_v9  ;;  %6726 = vmatpush.msra.mxu2 %v5314_v59  ;;  %v5324_v9 = vld [vmem:[%s16393_s5 + $0x3c20] sm:$0xff] }
 0xa98   :  { %6773 = vmatpush.msrb.mxu0 %v5345_v49  ;;  %6792 = vmatpush.msrb.mxu1 %v5365_v39  ;;  %v4380_v49 = vpop.permute.xlu2 %4379  ;;  %v5355_v39 = vld [vmem:[%s16393_s5 + $0x3d18] sm:$0xff]  ;;  %v6416_v35 = vpop.f32.mrf.mxu0 }
 0xa99   :  { %6745 = vmatpush.msra.mxu3 %v5334_v54  ;;  %6727 = vmatpush.msra.mxu2 %v5313_v51  ;;  %v5383_v54 = vld [vmem:[%s16393_s5 + $0x3df8] sm:$0xff] }
 0xa9a   :  { %6774 = vmatpush.msrb.mxu0 %v5344_v17  ;;  %6793 = vmatpush.msrb.mxu1 %v5364_v3  ;;  %v5354_v17 = vld [vmem:[%s16393_s5 + $0x3d10] sm:$0xff] }
 0xa9b   :  { %6746 = vmatpush.msra.mxu3 %v5333_v26  ;;  %6728 = vmatpush.msra.mxu2 %v5312_v5  ;;  %v5382_v3 = vld [vmem:[%s16393_s5 + $0x3df0] sm:$0xff]  ;;  %v5413_v5 = vld [vmem:[%s16393_s5 + $0x3ee8] sm:$0xff] }
 0xa9c   :  { %6775 = vmatpush.msrb.mxu0 %v5343_v30  ;;  %6717 = vmatmul.f32.gmra.mxu1 %v4373_v25  ;;  %v5322_v30 = vld [vmem:[%s16393_s5 + $0x3c10] sm:$0xff]  ;;  %v4400_v25 = vpop.permute.xlu1 %4399 }
 0xa9d   :  { %6747 = vmatpush.msra.mxu3 %v5332_v62  ;;  %6794 = vmatpush.msrb.mxu1 %v5363_v16  ;;  %v5381_v62 = vld [vmem:[%s16393_s5 + $0x3de8] sm:$0xff] }
 0xa9e   :  { %6729 = vmatpush.msra.mxu2 %v5311_v32  ;;  %6776 = vmatpush.msrb.mxu0 %v5342_v13  ;;  %v5412_v13 = vld [vmem:[%s16393_s5 + $0x3ee0] sm:$0xff] }
 0xa9f   :  { %6671 = vmatmul.f32.gmra.mxu3 %v4353_v48  ;;  %6795 = vmatpush.msrb.mxu1 %v5362_v44  ;;  %v5321_v44 = vld [vmem:[%s16393_s5 + $0x3c08] sm:$0xff]  ;;  %v5352_v48 = vld [vmem:[%s16393_s5 + $0x3d00] sm:$0xff] }
 0xaa0   :  { %6748 = vmatpush.msra.mxu3 %v5331_v38  ;;  %6730 = vmatpush.msra.mxu2 %v5310_v6  ;;  %v4403_v6 = vmul.f32 %v4400_v25, %v12802_v47  ;;  %v5372_v25 = vld [vmem:[%s16393_s5 + $0x3da0] sm:$0xff] }
 0xaa1   :  { %6777 = vmatpush.msrb.mxu0 %v5341_v24  ;;  %6796 = vmatpush.msrb.mxu1 %v5361_v0  ;;  %v6370_v40 = vpop.f32.mrf.mxu2  ;;  %v5380_v24 = vld [vmem:[%s16393_s5 + $0x3de0] sm:$0xff]  ;;  %v5411_v0 = vld [vmem:[%s16393_s5 + $0x3ed8] sm:$0xff] }
 0xaa2   :  { %6749 = vmatpush.msra.mxu3 %v5330_v14  ;;  %6731 = vmatpush.msra.mxu2 %v5309_v33  ;;  %v6371_v1 = vadd.f32 %v6370_v40, %v15209_v10  ;;  %v5358_v10 = vld [vmem:[%s16393_s5 + $0x3d30] sm:$0xff]  ;;  %v4412_v14 = vmul.f32 %v13733_v58, %v12553_v20  ;;  %v4383_v33 = vmul.f32 %v4380_v49, %v12802_v47 }
 0xaa3   :  { %6778 = vmatpush.msrb.mxu0 %v5340_v41  ;;  %6797 = vmatpush.msrb.mxu1 %v5360_v56  ;;  %v5431_v41 = vld [vmem:[%s16393_s5 + $0x3f78] sm:$0xff]  ;;  %v5320_v56 = vld [vmem:[%s16393_s5 + $0x3c00] sm:$0xff]  ;;  %v5410_v58 = vld [vmem:[%s16393_s5 + $0x3ed0] sm:$0xff] }
 0xaa4   :  { %6750 = vmatpush.msra.mxu3 %v5329_v43  ;;  %6732 = vmatpush.msra.mxu2 %v5308_v46  ;;  %v6439_v16 = vpop.f32.mrf.mxu1  ;;  %v4390_v43 = vpop.permute.xlu2 %4389  ;;  %v5379_v46 = vld [vmem:[%s16393_s5 + $0x3dd8] sm:$0xff] }
 0xaa5   :  { %6779 = vmatpush.msrb.mxu0 %v5339_v50  ;;  %6798 = vmatpush.msrb.mxu1 %v5359_v31  ;;  %v5430_v50 = vld [vmem:[%s16393_s5 + $0x3f70] sm:$0xff] }
 0xaa6   :  { %6751 = vmatpush.msra.mxu3 %v5328_v60  ;;  %6733 = vmatpush.msra.mxu2 %v5307_v34  ;;  %v6419_v60 = vpop.f32.mrf.mxu0  ;;  %v5399_v34 = vld [vmem:[%s16393_s5 + $0x3e78] sm:$0xff] }
 0xaa7   :  { %6780 = vmatpush.msrb.mxu0 %v5338_v4  ;;  %6799 = vmatpush.msrb.mxu1 %v5358_v10  ;;  %v5378_v4 = vld [vmem:[%s16393_s5 + $0x3dd0] sm:$0xff]  ;;  %v5409_v10 = vld [vmem:[%s16393_s5 + $0x3ec8] sm:$0xff] }
 0xaa8   :  { %6752 = vmatpush.msra.mxu3 %v5327_v28  ;;  %6734 = vmatpush.msra.mxu2 %v5306_v21  ;;  %v5398_v21 = vld [vmem:[%s16393_s5 + $0x3e70] sm:$0xff] }
 0xaa9   :  { %6781 = vmatpush.msrb.mxu0 %v5337_v12  ;;  %6800 = vmatpush.msrb.mxu1 %v5357_v45  ;;  %v5377_v12 = vld [vmem:[%s16393_s5 + $0x3dc8] sm:$0xff] }
 0xaaa   :  { %6753 = vmatpush.msra.mxu3 %v5326_v37  ;;  %6735 = vmatpush.msra.mxu2 %v5305_v22  ;;  %v6373_v19 = vpop.f32.mrf.mxu2  ;;  %v4410_v37 = vpop.permute.xlu1 %4409  ;;  %v5408_v22 = vld [vmem:[%s16393_s5 + $0x3ec0] sm:$0xff] }
 0xaab   :  { %6782 = vmatpush.msrb.mxu0 %v5336_v15  ;;  %6801 = vmatpush.msrb.mxu1 %v5356_v8  ;;  %v6374_v59 = vadd.f32 %v6373_v19, %v15270_v11  ;;  %v5414_v11 = vld [vmem:[%s16393_s5 + $0x3ef0] sm:$0xff]  ;;  %v5428_v15 = vld [vmem:[%s16393_s5 + $0x3f60] sm:$0xff] }
 0xaac   :  { %6754 = vmatpush.msra.mxu3 %v5325_v57  ;;  %6783 = vmatmul.f32.vlgmr.msrb.gmra.mxu0 %v4402_v29  ;;  %v5397_v57 = vld [vmem:[%s16393_s5 + $0x3e68] sm:$0xff]  ;;  %v5376_v29 = vld [vmem:[%s16393_s5 + $0x3dc0] sm:$0xff]  ;;  %v15530_v49 = vpop.permute.xlu2 %4495 }
 0xaad   :  { %6859 = vmatpush.msra.mxu0 %v5415_v55  ;;  %6736 = vmatpush.msra.mxu2 %v5304_v2  ;;  %v6393_v51 = vpop.f32.mrf.mxu3  ;;  %v6442_v45 = vpop.f32.mrf.mxu1  ;;  %v5407_v55 = vld [vmem:[%s16393_s5 + $0x3eb8] sm:$0xff]  ;;  %v4413_v2 = vmul.f32 %v4410_v37, %v12802_v47  ;;  %v5396_v19 = vld [vmem:[%s16393_s5 + $0x3e60] sm:$0xff] }
 0xaae   :  { %6737 = vmatmul.f32.vlgmr.msra.gmra.mxu2 %v4382_v52  ;;  %6755 = vmatpush.msra.mxu3 %v5324_v9  ;;  %v6394_v26 = vadd.f32 %v6393_v51, %v6371_v1  ;;  %v4392_v1 = vmul.f32 %v13460_v61, %v12553_v20  ;;  %v5429_v61 = vld [vmem:[%s16393_s5 + $0x3f68] sm:$0xff]  ;;  %v5427_v9 = vld [vmem:[%s16393_s5 + $0x3f58] sm:$0xff]  ;;  %v5406_v52 = vld [vmem:[%s16393_s5 + $0x3eb0] sm:$0xff] }
 0xaaf   :  { %6802 = vmatpush.msrb.mxu1 %v5355_v39  ;;  %6813 = vmatpush.msrb.mxu2 %v5383_v54  ;;  %v5426_v39 = vld [vmem:[%s16393_s5 + $0x3f50] sm:$0xff]  ;;  %v4393_v54 = vmul.f32 %v4390_v43, %v12802_v47  ;;  %v5405_v51 = vld [vmem:[%s16393_s5 + $0x3ea8] sm:$0xff] }
 0xab0   :  { %6860 = vmatpush.msra.mxu0 %v5414_v11  ;;  %6756 = vmatpush.msra.mxu3 %v5323_v7  ;;  %v6417_v32 = vadd.f32 %v6416_v35, %v6394_v26  ;;  %v5395_v11 = vld [vmem:[%s16393_s5 + $0x3e58] sm:$0xff]  ;;  %v5374_v7 = vld [vmem:[%s16393_s5 + $0x3db0] sm:$0xff]  ;;  %v5425_v35 = vld [vmem:[%s16393_s5 + $0x3f48] sm:$0xff] }
 0xab1   :  { %6803 = vmatpush.msrb.mxu1 %v5354_v17  ;;  %6814 = vmatpush.msrb.mxu2 %v5382_v3  ;;  %v5394_v17 = vld [vmem:[%s16393_s5 + $0x3e50] sm:$0xff]  ;;  %v5373_v3 = vld [vmem:[%s16393_s5 + $0x3da8] sm:$0xff]  ;;  %v5404_v26 = vld [vmem:[%s16393_s5 + $0x3ea0] sm:$0xff] }
 0xab2   :  { %6861 = vmatpush.msra.mxu0 %v5413_v5  ;;  %6757 = vmatpush.msra.mxu3 %v5322_v30  ;;  %v15453_v38 = vadd.f32 %v6439_v16, %v6417_v32  ;;  %v5424_v5 = vld [vmem:[%s16393_s5 + $0x3f40] sm:$0xff]  ;;  %v5393_v30 = vld [vmem:[%s16393_s5 + $0x3e48] sm:$0xff]  ;;  %v5423_v16 = vld [vmem:[%s16393_s5 + $0x3f38] sm:$0xff] }
 0xab3   :  { %6804 = vmatpush.msrb.mxu1 %v5353_v36  ;;  %6815 = vmatpush.msrb.mxu2 %v5381_v62  ;;  %v5403_v62 = vld [vmem:[%s16393_s5 + $0x3e98] sm:$0xff]  ;;  %v5369_v43 = vld [vmem:[%s16393_s5 + $0x3d88] sm:$0xff] }
 0xab4   :  { %6862 = vmatpush.msra.mxu0 %v5412_v13  ;;  %6758 = vmatpush.msra.mxu3 %v5321_v44  ;;  %v5392_v13 = vld [vmem:[%s16393_s5 + $0x3e40] sm:$0xff]  ;;  %v5371_v44 = vld [vmem:[%s16393_s5 + $0x3d98] sm:$0xff] }
 0xab5   :  { %6786 = vmatmul.f32.gmra.mxu0 %v4403_v6  ;;  %6805 = vmatpush.msrb.mxu1 %v5352_v48  ;;  %v5402_v48 = vld [vmem:[%s16393_s5 + $0x3e90] sm:$0xff]  ;;  %v5391_v6 = vld [vmem:[%s16393_s5 + $0x3e38] sm:$0xff] }
 0xab6   :  { %6816 = vmatpush.msrb.mxu2 %v5380_v24  ;;  %6863 = vmatpush.msra.mxu0 %v5411_v0  ;;  %v6396_v40 = vpop.f32.mrf.mxu3  ;;  %v5370_v24 = vld [vmem:[%s16393_s5 + $0x3d90] sm:$0xff]  ;;  %v15591_v0 = vpop.permute.xlu2 %4475 }
 0xab7   :  { %6806 = vmatmul.f32.vlgmr.msrb.gmra.mxu1 %v4412_v14  ;;  %6740 = vmatmul.f32.gmra.mxu2 %v4383_v33  ;;  %v6397_v31 = vadd.f32 %v6396_v40, %v6374_v59  ;;  %v5375_v59 = vld [vmem:[%s16393_s5 + $0x3db8] sm:$0xff]  ;;  %v5401_v14 = vld [vmem:[%s16393_s5 + $0x3e88] sm:$0xff] }
 0xab8   :  { %6882 = vmatpush.msra.mxu1 %v5431_v41  ;;  %6759 = vmatpush.msra.mxu3 %v5320_v56  ;;  %v5421_v33 = vld [vmem:[%s16393_s5 + $0x3f28] sm:$0xff]  ;;  %v15599_v41 = vpop.permute.xlu1 %4505  ;;  %v5390_v56 = vld [vmem:[%s16393_s5 + $0x3e30] sm:$0xff] }
 0xab9   :  { %6817 = vmatpush.msrb.mxu2 %v5379_v46  ;;  %6864 = vmatpush.msra.mxu0 %v5410_v58  ;;  %v6420_v28 = vadd.f32 %v6419_v60, %v6397_v31  ;;  %v5400_v46 = vld [vmem:[%s16393_s5 + $0x3e80] sm:$0xff]  ;;  %v5389_v40 = vld [vmem:[%s16393_s5 + $0x3e28] sm:$0xff]  ;;  %v5479_v31 = vld [vmem:[%s16393_s5 + $0x40f8] sm:$0xff] }
 0xaba   :  { %6760 = vmatmul.f32.vlgmr.msra.gmra.mxu3 %v4392_v1  ;;  %6883 = vmatpush.msra.mxu1 %v5430_v50  ;;  %v5420_v58 = vld [vmem:[%s16393_s5 + $0x3f20] sm:$0xff]  ;;  %v4442_v50 = vmul.f32 %v15166_v53, %v12553_v20  ;;  %v4422_v53 = vmul.f32 %v13934_v63, %v12553_v20  ;;  %v5387_v63 = vld [vmem:[%s16393_s5 + $0x3e18] sm:$0xff] }
 0xabb   :  { %6836 = vmatpush.msrb.mxu3 %v5399_v34  ;;  %6818 = vmatpush.msrb.mxu2 %v5378_v4  ;;  %v15506_v8 = vadd.f32 %v6442_v45, %v6420_v28  ;;  %v5368_v1 = vld [vmem:[%s16393_s5 + $0x3d80] sm:$0xff]  ;;  %v5478_v28 = vld [vmem:[%s16393_s5 + $0x40f0] sm:$0xff] }
 0xabc   :  { %6865 = vmatpush.msra.mxu0 %v5409_v10  ;;  %6884 = vmatpush.msra.mxu1 %v5429_v61  ;;  %v5388_v34 = vld [vmem:[%s16393_s5 + $0x3e20] sm:$0xff]  ;;  %v5419_v10 = vld [vmem:[%s16393_s5 + $0x3f18] sm:$0xff]  ;;  %v5446_v45 = vld [vmem:[%s16393_s5 + $0x3ff0] sm:$0xff] }
 0xabd   :  { %6837 = vmatpush.msrb.mxu3 %v5398_v21  ;;  %6819 = vmatpush.msrb.mxu2 %v5377_v12  ;;  %v5447_v61 = vld [vmem:[%s16393_s5 + $0x3ff8] sm:$0xff]  ;;  %v5418_v12 = vld [vmem:[%s16393_s5 + $0x3f10] sm:$0xff] }
 0xabe   :  { %6866 = vmatpush.msra.mxu0 %v5408_v22  ;;  %6885 = vmatpush.msra.mxu1 %v5428_v15  ;;  %v6508_v22 = vpop.f32.mrf.mxu0  ;;  %v5477_v15 = vld [vmem:[%s16393_s5 + $0x40e8] sm:$0xff] }
 0xabf   :  { %6838 = vmatpush.msrb.mxu3 %v5397_v57  ;;  %6820 = vmatpush.msrb.mxu2 %v5376_v29  ;;  %v4440_v57 = vpop.permute.xlu2 %4439  ;;  %v5417_v29 = vld [vmem:[%s16393_s5 + $0x3f08] sm:$0xff] }
 0xac0   :  { %6867 = vmatpush.msra.mxu0 %v5407_v55  ;;  %6809 = vmatmul.f32.gmra.mxu1 %v4413_v2  ;;  %v5445_v55 = vld [vmem:[%s16393_s5 + $0x3fe8] sm:$0xff] }
 0xac1   :  { %6839 = vmatpush.msrb.mxu3 %v5396_v19  ;;  %6886 = vmatpush.msra.mxu1 %v5427_v9  ;;  %v15662_v19 = vpop.permute.xlu1 %4459  ;;  %v5476_v9 = vld [vmem:[%s16393_s5 + $0x40e0] sm:$0xff] }
 0xac2   :  { %6821 = vmatpush.msrb.mxu2 %v5375_v59  ;;  %6868 = vmatpush.msra.mxu0 %v5406_v52  ;;  %v5385_v59 = vld [vmem:[%s16393_s5 + $0x3e08] sm:$0xff] }
 0xac3   :  { %6763 = vmatmul.f32.gmra.mxu3 %v4393_v54  ;;  %6887 = vmatpush.msra.mxu1 %v5426_v39  ;;  %v4420_v39 = vpop.permute.xlu0 %4419  ;;  %v5416_v54 = vld [vmem:[%s16393_s5 + $0x3f00] sm:$0xff] }
 0xac4   :  { %6840 = vmatpush.msrb.mxu3 %v5395_v11  ;;  %6822 = vmatpush.msrb.mxu2 %v5374_v7  ;;  %v4443_v7 = vmul.f32 %v4440_v57, %v12802_v47  ;;  %v5456_v57 = vld [vmem:[%s16393_s5 + $0x4040] sm:$0xff] }
 0xac5   :  { %6869 = vmatpush.msra.mxu0 %v5405_v51  ;;  %6888 = vmatpush.msra.mxu1 %v5425_v35  ;;  %v6462_v36 = vpop.f32.mrf.mxu2  ;;  %v5444_v51 = vld [vmem:[%s16393_s5 + $0x3fe0] sm:$0xff]  ;;  %v5475_v35 = vld [vmem:[%s16393_s5 + $0x40d8] sm:$0xff] }
 0xac6   :  { %6841 = vmatpush.msrb.mxu3 %v5394_v17  ;;  %6823 = vmatpush.msrb.mxu2 %v5373_v3  ;;  %v6463_v32 = vadd.f32 %v6462_v36, %v15453_v38  ;;  %v5422_v38 = vld [vmem:[%s16393_s5 + $0x3f30] sm:$0xff]  ;;  %v4423_v17 = vmul.f32 %v4420_v39, %v12802_v47  ;;  %v4452_v3 = vmul.f32 %v14959_v18, %v12553_v20  ;;  %v5485_v39 = vld [vmem:[%s16393_s5 + $0x4128] sm:$0xff] }
 0xac7   :  { %6870 = vmatpush.msra.mxu0 %v5404_v26  ;;  %6889 = vmatpush.msra.mxu1 %v5424_v5  ;;  %v5495_v26 = vld [vmem:[%s16393_s5 + $0x4178] sm:$0xff]  ;;  %v5384_v5 = vld [vmem:[%s16393_s5 + $0x3e00] sm:$0xff]  ;;  %v5474_v18 = vld [vmem:[%s16393_s5 + $0x40d0] sm:$0xff]  ;;  %v4432_v36 = vmul.f32 %v13794_v42, %v12553_v20 }
 0xac8   :  { %6842 = vmatpush.msrb.mxu3 %v5393_v30  ;;  %6824 = vmatpush.msrb.mxu2 %v5372_v25  ;;  %v6531_v52 = vpop.f32.mrf.mxu1  ;;  %v5443_v30 = vld [vmem:[%s16393_s5 + $0x3fd8] sm:$0xff]  ;;  %v5494_v25 = vld [vmem:[%s16393_s5 + $0x4170] sm:$0xff]  ;;  %v5493_v42 = vld [vmem:[%s16393_s5 + $0x4168] sm:$0xff] }
 0xac9   :  { %6871 = vmatpush.msra.mxu0 %v5403_v62  ;;  %6890 = vmatpush.msra.mxu1 %v5423_v16  ;;  %v5463_v62 = vld [vmem:[%s16393_s5 + $0x4078] sm:$0xff]  ;;  %v5442_v16 = vld [vmem:[%s16393_s5 + $0x3fd0] sm:$0xff] }
 0xaca   :  { %6843 = vmatpush.msrb.mxu3 %v5392_v13  ;;  %6825 = vmatpush.msrb.mxu2 %v5371_v44  ;;  %v5462_v13 = vld [vmem:[%s16393_s5 + $0x4070] sm:$0xff]  ;;  %v5441_v44 = vld [vmem:[%s16393_s5 + $0x3fc8] sm:$0xff] }
 0xacb   :  { %6872 = vmatpush.msra.mxu0 %v5402_v48  ;;  %6891 = vmatpush.msra.mxu1 %v5422_v38  ;;  %v4450_v48 = vpop.permute.xlu1 %4449  ;;  %v5472_v38 = vld [vmem:[%s16393_s5 + $0x40c0] sm:$0xff] }
 0xacc   :  { %6844 = vmatpush.msrb.mxu3 %v5391_v6  ;;  %6826 = vmatpush.msrb.mxu2 %v5370_v24  ;;  %v5492_v6 = vld [vmem:[%s16393_s5 + $0x4160] sm:$0xff]  ;;  %v5461_v24 = vld [vmem:[%s16393_s5 + $0x4068] sm:$0xff] }
 0xacd   :  { %6873 = vmatpush.msra.mxu0 %v5401_v14  ;;  %6892 = vmatpush.msra.mxu1 %v5421_v33  ;;  %v5440_v14 = vld [vmem:[%s16393_s5 + $0x3fc0] sm:$0xff]  ;;  %v5471_v33 = vld [vmem:[%s16393_s5 + $0x40b8] sm:$0xff] }
 0xace   :  { %6845 = vmatpush.msrb.mxu3 %v5390_v56  ;;  %6827 = vmatpush.msrb.mxu2 %v5369_v43  ;;  %v6465_v60 = vpop.f32.mrf.mxu2  ;;  %v4430_v56 = vpop.permute.xlu0 %4429  ;;  %v4453_v43 = vmul.f32 %v4450_v48, %v12802_v47  ;;  %v5540_v48 = vld [vmem:[%s16393_s5 + $0x42e0] sm:$0xff] }
 0xacf   :  { %6874 = vmatpush.msra.mxu0 %v5400_v46  ;;  %6893 = vmatpush.msra.mxu1 %v5420_v58  ;;  %v15628_v4 = vadd.f32 %v6465_v60, %v15506_v8  ;;  %v5386_v8 = vld [vmem:[%s16393_s5 + $0x3e10] sm:$0xff]  ;;  %v5460_v46 = vld [vmem:[%s16393_s5 + $0x4060] sm:$0xff]  ;;  %v5491_v58 = vld [vmem:[%s16393_s5 + $0x4158] sm:$0xff] }
 0xad0   :  { %6846 = vmatpush.msrb.mxu3 %v5389_v40  ;;  %6875 = vmatmul.f32.vlgmr.msra.gmra.mxu0 %v4442_v50  ;;  %v5439_v40 = vld [vmem:[%s16393_s5 + $0x3fb8] sm:$0xff]  ;;  %v5470_v50 = vld [vmem:[%s16393_s5 + $0x40b0] sm:$0xff] }
 0xad1   :  { %6951 = vmatpush.msrb.mxu0 %v5479_v31  ;;  %6828 = vmatpush.msrb.mxu2 %v5368_v1  ;;  %v6485_v21 = vpop.f32.mrf.mxu3  ;;  %v5490_v31 = vld [vmem:[%s16393_s5 + $0x4150] sm:$0xff]  ;;  %v4433_v1 = vmul.f32 %v4430_v56, %v12802_v47  ;;  %v5459_v60 = vld [vmem:[%s16393_s5 + $0x4058] sm:$0xff] }
 0xad2   :  { %6829 = vmatmul.f32.vlgmr.msrb.gmra.mxu2 %v4422_v53  ;;  %6847 = vmatpush.msrb.mxu3 %v5388_v34  ;;  %v6486_v37 = vadd.f32 %v6485_v21, %v6463_v32  ;;  %v5473_v32 = vld [vmem:[%s16393_s5 + $0x40c8] sm:$0xff]  ;;  %v5438_v34 = vld [vmem:[%s16393_s5 + $0x3fb0] sm:$0xff]  ;;  %v5488_v21 = vld [vmem:[%s16393_s5 + $0x4140] sm:$0xff] }
 0xad3   :  { %6894 = vmatpush.msra.mxu1 %v5419_v10  ;;  %6905 = vmatpush.msra.mxu2 %v5447_v61  ;;  %v5469_v53 = vld [vmem:[%s16393_s5 + $0x40a8] sm:$0xff]  ;;  %v5458_v61 = vld [vmem:[%s16393_s5 + $0x4050] sm:$0xff]  ;;  %v5539_v56 = vld [vmem:[%s16393_s5 + $0x42d8] sm:$0xff] }
 0xad4   :  { %6952 = vmatpush.msrb.mxu0 %v5478_v28  ;;  %6848 = vmatpush.msrb.mxu3 %v5387_v63  ;;  %v6509_v2 = vadd.f32 %v6508_v22, %v6486_v37  ;;  %v5489_v10 = vld [vmem:[%s16393_s5 + $0x4148] sm:$0xff]  ;;  %v5468_v63 = vld [vmem:[%s16393_s5 + $0x40a0] sm:$0xff]  ;;  %v5467_v22 = vld [vmem:[%s16393_s5 + $0x4098] sm:$0xff] }
 0xad5   :  { %6895 = vmatpush.msra.mxu1 %v5418_v12  ;;  %6906 = vmatpush.msra.mxu2 %v5446_v45  ;;  %v5437_v28 = vld [vmem:[%s16393_s5 + $0x3fa8] sm:$0xff]  ;;  %v5436_v45 = vld [vmem:[%s16393_s5 + $0x3fa0] sm:$0xff] }
 0xad6   :  { %6953 = vmatpush.msrb.mxu0 %v5477_v15  ;;  %6849 = vmatpush.msrb.mxu3 %v5386_v8  ;;  %v15673_v11 = vadd.f32 %v6531_v52, %v6509_v2  ;;  %v5457_v12 = vld [vmem:[%s16393_s5 + $0x4048] sm:$0xff]  ;;  %v5487_v15 = vld [vmem:[%s16393_s5 + $0x4138] sm:$0xff]  ;;  %v5486_v2 = vld [vmem:[%s16393_s5 + $0x4130] sm:$0xff] }
 0xad7   :  { %6896 = vmatpush.msra.mxu1 %v5417_v29  ;;  %6907 = vmatpush.msra.mxu2 %v5445_v55  ;;  %v5435_v29 = vld [vmem:[%s16393_s5 + $0x3f98] sm:$0xff]  ;;  %v5466_v55 = vld [vmem:[%s16393_s5 + $0x4090] sm:$0xff]  ;;  %v5465_v52 = vld [vmem:[%s16393_s5 + $0x4088] sm:$0xff] }
 0xad8   :  { %6954 = vmatpush.msrb.mxu0 %v5476_v9  ;;  %6850 = vmatpush.msrb.mxu3 %v5385_v59  ;;  %v5455_v9 = vld [vmem:[%s16393_s5 + $0x4038] sm:$0xff]  ;;  %v5434_v59 = vld [vmem:[%s16393_s5 + $0x3f90] sm:$0xff] }
 0xad9   :  { %6878 = vmatmul.f32.gmra.mxu0 %v4443_v7  ;;  %6897 = vmatpush.msra.mxu1 %v5416_v54  ;;  %v5454_v54 = vld [vmem:[%s16393_s5 + $0x4030] sm:$0xff]  ;;  %v5464_v7 = vld [vmem:[%s16393_s5 + $0x4080] sm:$0xff] }
 0xada   :  { %6908 = vmatpush.msra.mxu2 %v5444_v51  ;;  %6955 = vmatpush.msrb.mxu0 %v5475_v35  ;;  %v5484_v51 = vld [vmem:[%s16393_s5 + $0x4120] sm:$0xff]  ;;  %v5453_v35 = vld [vmem:[%s16393_s5 + $0x4028] sm:$0xff] }
 0xadb   :  { %6898 = vmatmul.f32.vlgmr.msra.gmra.mxu1 %v4452_v3  ;;  %6832 = vmatmul.f32.gmra.mxu2 %v4423_v17  ;;  %v4482_v17 = vmul.f32 %v15591_v0, %v12553_v20  ;;  %v5543_v3 = vld [vmem:[%s16393_s5 + $0x42f8] sm:$0xff] }
 0xadc   :  { %6974 = vmatpush.msrb.mxu1 %v5495_v26  ;;  %6851 = vmatpush.msrb.mxu3 %v5384_v5  ;;  %v5432_v26 = vld [vmem:[%s16393_s5 + $0x3f80] sm:$0xff]  ;;  %v5483_v0 = vld [vmem:[%s16393_s5 + $0x4118] sm:$0xff] }
 0xadd   :  { %6909 = vmatpush.msra.mxu2 %v5443_v30  ;;  %6956 = vmatpush.msrb.mxu0 %v5474_v18  ;;  %v5452_v5 = vld [vmem:[%s16393_s5 + $0x4020] sm:$0xff]  ;;  %v4462_v30 = vmul.f32 %v14486_v27, %v12553_v20  ;;  %v5511_v18 = vld [vmem:[%s16393_s5 + $0x41f8] sm:$0xff] }
 0xade   :  { %6852 = vmatmul.f32.vlgmr.msrb.gmra.mxu3 %v4432_v36  ;;  %6975 = vmatpush.msrb.mxu1 %v5494_v25  ;;  %v5542_v25 = vld [vmem:[%s16393_s5 + $0x42f0] sm:$0xff]  ;;  %v5451_v27 = vld [vmem:[%s16393_s5 + $0x4018] sm:$0xff] }
 0xadf   :  { %6928 = vmatpush.msra.mxu3 %v5463_v62  ;;  %6910 = vmatpush.msra.mxu2 %v5442_v16  ;;  %v5482_v36 = vld [vmem:[%s16393_s5 + $0x4110] sm:$0xff]  ;;  %v5541_v16 = vld [vmem:[%s16393_s5 + $0x42e8] sm:$0xff] }
 0xae0   :  { %6957 = vmatpush.msrb.mxu0 %v5473_v32  ;;  %6976 = vmatpush.msrb.mxu1 %v5493_v42  ;;  %v5510_v62 = vld [vmem:[%s16393_s5 + $0x41f0] sm:$0xff]  ;;  %v4480_v42 = vpop.permute.xlu2 %4479 }
 0xae1   :  { %6929 = vmatpush.msra.mxu3 %v5462_v13  ;;  %6911 = vmatpush.msra.mxu2 %v5441_v44  ;;  %v5450_v32 = vld [vmem:[%s16393_s5 + $0x4010] sm:$0xff]  ;;  %v5481_v13 = vld [vmem:[%s16393_s5 + $0x4108] sm:$0xff] }
 0xae2   :  { %6958 = vmatpush.msrb.mxu0 %v5472_v38  ;;  %6977 = vmatpush.msrb.mxu1 %v5492_v6  ;;  %v5509_v44 = vld [vmem:[%s16393_s5 + $0x41e8] sm:$0xff]  ;;  %v4486_v6 = vpop.permute.xlu0 %4485 }
 0xae3   :  { %6930 = vmatpush.msra.mxu3 %v5461_v24  ;;  %6912 = vmatpush.msra.mxu2 %v5440_v14  ;;  %v5449_v38 = vld [vmem:[%s16393_s5 + $0x4008] sm:$0xff]  ;;  %v5480_v24 = vld [vmem:[%s16393_s5 + $0x4100] sm:$0xff]  ;;  %v4483_v14 = vmul.f32 %v4480_v42, %v12802_v47 }
 0xae4   :  { %6959 = vmatpush.msrb.mxu0 %v5471_v33  ;;  %6901 = vmatmul.f32.gmra.mxu1 %v4453_v43  ;;  %v5508_v33 = vld [vmem:[%s16393_s5 + $0x41e0] sm:$0xff]  ;;  %v4492_v43 = vmul.f32 %v4486_v6, %v12553_v20  ;;  %v5529_v42 = vld [vmem:[%s16393_s5 + $0x4288] sm:$0xff] }
 0xae5   :  { %6931 = vmatpush.msra.mxu3 %v5460_v46  ;;  %6978 = vmatpush.msrb.mxu1 %v5491_v58  ;;  %v4463_v46 = vmul.f32 %v15662_v19, %v12802_v47  ;;  %v5559_v58 = vld [vmem:[%s16393_s5 + $0x4378] sm:$0xff]  ;;  %v5538_v19 = vld [vmem:[%s16393_s5 + $0x42d0] sm:$0xff]  ;;  %v5497_v6 = vld [vmem:[%s16393_s5 + $0x4188] sm:$0xff] }
 0xae6   :  { %6913 = vmatpush.msra.mxu2 %v5439_v40  ;;  %6960 = vmatpush.msrb.mxu0 %v5470_v50  ;;  %v5448_v40 = vld [vmem:[%s16393_s5 + $0x4000] sm:$0xff]  ;;  %v5507_v50 = vld [vmem:[%s16393_s5 + $0x41d8] sm:$0xff] }
 0xae7   :  { %6855 = vmatmul.f32.gmra.mxu3 %v4433_v1  ;;  %6979 = vmatpush.msrb.mxu1 %v5490_v31  ;;  %v4470_v31 = vpop.permute.xlu1 %4469  ;;  %v5558_v1 = vld [vmem:[%s16393_s5 + $0x4370] sm:$0xff] }
 0xae8   :  { %6932 = vmatpush.msra.mxu3 %v5459_v60  ;;  %6914 = vmatpush.msra.mxu2 %v5438_v34  ;;  %v4472_v60 = vmul.f32 %v14951_v23, %v12553_v20  ;;  %v5527_v34 = vld [vmem:[%s16393_s5 + $0x4278] sm:$0xff]  ;;  %v5557_v23 = vld [vmem:[%s16393_s5 + $0x4368] sm:$0xff] }
 0xae9   :  { %6961 = vmatpush.msrb.mxu0 %v5469_v53  ;;  %6980 = vmatpush.msrb.mxu1 %v5489_v10  ;;  %v6554_v37 = vpop.f32.mrf.mxu2  ;;  %v5506_v53 = vld [vmem:[%s16393_s5 + $0x41d0] sm:$0xff]  ;;  %v5537_v10 = vld [vmem:[%s16393_s5 + $0x42c8] sm:$0xff] }
 0xaea   :  { %6933 = vmatpush.msra.mxu3 %v5458_v61  ;;  %6915 = vmatpush.msra.mxu2 %v5437_v28  ;;  %v15789_v8 = vadd.f32 %v6554_v37, %v15673_v11  ;;  %v5433_v11 = vld [vmem:[%s16393_s5 + $0x3f88] sm:$0xff]  ;;  %v5526_v61 = vld [vmem:[%s16393_s5 + $0x4270] sm:$0xff]  ;;  %v5504_v37 = vld [vmem:[%s16393_s5 + $0x41c0] sm:$0xff] }
 0xaeb   :  { %6962 = vmatpush.msrb.mxu0 %v5468_v63  ;;  %6981 = vmatpush.msrb.mxu1 %v5488_v21  ;;  %v5505_v28 = vld [vmem:[%s16393_s5 + $0x41c8] sm:$0xff]  ;;  %v4490_v63 = vpop.permute.xlu2 %4489  ;;  %v5536_v21 = vld [vmem:[%s16393_s5 + $0x42c0] sm:$0xff] }
 0xaec   :  { %6934 = vmatpush.msra.mxu3 %v5457_v12  ;;  %6916 = vmatpush.msra.mxu2 %v5436_v45  ;;  %v5556_v12 = vld [vmem:[%s16393_s5 + $0x4360] sm:$0xff]  ;;  %v5525_v45 = vld [vmem:[%s16393_s5 + $0x4268] sm:$0xff] }
 0xaed   :  { %6963 = vmatpush.msrb.mxu0 %v5467_v22  ;;  %6982 = vmatpush.msrb.mxu1 %v5487_v15  ;;  %v5535_v22 = vld [vmem:[%s16393_s5 + $0x42b8] sm:$0xff]  ;;  %v4493_v15 = vmul.f32 %v4490_v63, %v12802_v47  ;;  %v5604_v63 = vld [vmem:[%s16393_s5 + $0x44e0] sm:$0xff] }
 0xaee   :  { %6935 = vmatpush.msra.mxu3 %v5456_v57  ;;  %6917 = vmatpush.msra.mxu2 %v5435_v29  ;;  %v5524_v57 = vld [vmem:[%s16393_s5 + $0x4260] sm:$0xff]  ;;  %v5555_v29 = vld [vmem:[%s16393_s5 + $0x4358] sm:$0xff] }
 0xaef   :  { %6964 = vmatpush.msrb.mxu0 %v5466_v55  ;;  %6983 = vmatpush.msrb.mxu1 %v5486_v2  ;;  %v5503_v55 = vld [vmem:[%s16393_s5 + $0x41b8] sm:$0xff]  ;;  %v5534_v2 = vld [vmem:[%s16393_s5 + $0x42b0] sm:$0xff] }
 0xaf0   :  { %6936 = vmatpush.msra.mxu3 %v5455_v9  ;;  %6918 = vmatpush.msra.mxu2 %v5434_v59  ;;  %v5554_v9 = vld [vmem:[%s16393_s5 + $0x4350] sm:$0xff]  ;;  %v4473_v59 = vmul.f32 %v4470_v31, %v12802_v47 }
 0xaf1   :  { %6965 = vmatpush.msrb.mxu0 %v5465_v52  ;;  %6984 = vmatpush.msrb.mxu1 %v5485_v39  ;;  %v15959_v52 = vpop.permute.xlu1 %4499  ;;  %v5523_v39 = vld [vmem:[%s16393_s5 + $0x4258] sm:$0xff]  ;;  %v5606_v31 = vld [vmem:[%s16393_s5 + $0x44f0] sm:$0xff] }
 0xaf2   :  { %6937 = vmatpush.msra.mxu3 %v5454_v54  ;;  %6919 = vmatpush.msra.mxu2 %v5433_v11  ;;  %v5502_v54 = vld [vmem:[%s16393_s5 + $0x41b0] sm:$0xff]  ;;  %v5533_v11 = vld [vmem:[%s16393_s5 + $0x42a8] sm:$0xff] }
 0xaf3   :  { %6966 = vmatpush.msrb.mxu0 %v5464_v7  ;;  %6985 = vmatpush.msrb.mxu1 %v5484_v51  ;;  %v5553_v7 = vld [vmem:[%s16393_s5 + $0x4348] sm:$0xff]  ;;  %v5522_v51 = vld [vmem:[%s16393_s5 + $0x4250] sm:$0xff] }
 0xaf4   :  { %6938 = vmatpush.msra.mxu3 %v5453_v35  ;;  %6967 = vmatmul.f32.vlgmr.msrb.gmra.mxu0 %v4482_v17  ;;  %v5501_v35 = vld [vmem:[%s16393_s5 + $0x41a8] sm:$0xff]  ;;  %v5532_v17 = vld [vmem:[%s16393_s5 + $0x42a0] sm:$0xff] }
 0xaf5   :  { %7043 = vmatpush.msra.mxu0 %v5543_v3  ;;  %6920 = vmatpush.msra.mxu2 %v5432_v26  ;;  %v5552_v3 = vld [vmem:[%s16393_s5 + $0x4340] sm:$0xff]  ;;  %v5521_v26 = vld [vmem:[%s16393_s5 + $0x4248] sm:$0xff] }
 0xaf6   :  { %6921 = vmatmul.f32.vlgmr.msra.gmra.mxu2 %v4462_v30  ;;  %6939 = vmatpush.msra.mxu3 %v5452_v5  ;;  %v5500_v5 = vld [vmem:[%s16393_s5 + $0x41a0] sm:$0xff]  ;;  %v5531_v30 = vld [vmem:[%s16393_s5 + $0x4298] sm:$0xff] }
 0xaf7   :  { %6986 = vmatpush.msrb.mxu1 %v5483_v0  ;;  %6997 = vmatpush.msrb.mxu2 %v5511_v18  ;;  %v5551_v0 = vld [vmem:[%s16393_s5 + $0x4338] sm:$0xff]  ;;  %v5520_v18 = vld [vmem:[%s16393_s5 + $0x4240] sm:$0xff] }
 0xaf8   :  { %7044 = vmatpush.msra.mxu0 %v5542_v25  ;;  %6940 = vmatpush.msra.mxu3 %v5451_v27  ;;  %v5499_v25 = vld [vmem:[%s16393_s5 + $0x4198] sm:$0xff]  ;;  %v5530_v27 = vld [vmem:[%s16393_s5 + $0x4290] sm:$0xff] }
 0xaf9   :  { %6987 = vmatpush.msrb.mxu1 %v5482_v36  ;;  %6998 = vmatpush.msrb.mxu2 %v5510_v62  ;;  %v5550_v36 = vld [vmem:[%s16393_s5 + $0x4330] sm:$0xff]  ;;  %v5519_v62 = vld [vmem:[%s16393_s5 + $0x4238] sm:$0xff] }
 0xafa   :  { %7045 = vmatpush.msra.mxu0 %v5541_v16  ;;  %6941 = vmatpush.msra.mxu3 %v5450_v32  ;;  %v5498_v16 = vld [vmem:[%s16393_s5 + $0x4190] sm:$0xff]  ;;  %v16015_v32 = vpop.permute.xlu0 %4535 }
 0xafb   :  { %6988 = vmatpush.msrb.mxu1 %v5481_v13  ;;  %6999 = vmatpush.msrb.mxu2 %v5509_v44  ;;  %v5549_v13 = vld [vmem:[%s16393_s5 + $0x4328] sm:$0xff]  ;;  %v4516_v44 = vpop.permute.xlu2 %4515 }
 0xafc   :  { %7046 = vmatpush.msra.mxu0 %v5540_v48  ;;  %6942 = vmatpush.msra.mxu3 %v5449_v38  ;;  %v16023_v48 = vpop.permute.xlu1 %4509  ;;  %v5518_v38 = vld [vmem:[%s16393_s5 + $0x4230] sm:$0xff] }
 0xafd   :  { %6970 = vmatmul.f32.gmra.mxu0 %v4483_v14  ;;  %6989 = vmatpush.msrb.mxu1 %v5480_v24  ;;  %v5528_v24 = vld [vmem:[%s16393_s5 + $0x4280] sm:$0xff] }
 0xafe   :  { %7000 = vmatpush.msrb.mxu2 %v5508_v33  ;;  %7047 = vmatpush.msra.mxu0 %v5539_v56  ;;  %v5548_v14 = vld [vmem:[%s16393_s5 + $0x4320] sm:$0xff]  ;;  %v5517_v33 = vld [vmem:[%s16393_s5 + $0x4228] sm:$0xff]  ;;  %v4522_v56 = vmul.f32 %v4516_v44, %v12553_v20 }
 0xaff   :  { %6990 = vmatmul.f32.vlgmr.msrb.gmra.mxu1 %v4492_v43  ;;  %6924 = vmatmul.f32.gmra.mxu2 %v4463_v46  ;;  %v5607_v43 = vld [vmem:[%s16393_s5 + $0x44f8] sm:$0xff]  ;;  %v5496_v46 = vld [vmem:[%s16393_s5 + $0x4180] sm:$0xff]  ;;  %v5597_v44 = vld [vmem:[%s16393_s5 + $0x44a8] sm:$0xff] }
 0xb00   :  { %7066 = vmatpush.msra.mxu1 %v5559_v58  ;;  %6943 = vmatpush.msra.mxu3 %v5448_v40  ;;  %v5516_v58 = vld [vmem:[%s16393_s5 + $0x4220] sm:$0xff]  ;;  %v4502_v40 = vmul.f32 %v15530_v49, %v12553_v20  ;;  %v5515_v49 = vld [vmem:[%s16393_s5 + $0x4218] sm:$0xff] }
 0xb01   :  { %7001 = vmatpush.msrb.mxu2 %v5507_v50  ;;  %7048 = vmatpush.msra.mxu0 %v5538_v19  ;;  %v5547_v50 = vld [vmem:[%s16393_s5 + $0x4318] sm:$0xff] }
 0xb02   :  { %6944 = vmatmul.f32.vlgmr.msra.gmra.mxu3 %v4472_v60  ;;  %7067 = vmatpush.msra.mxu1 %v5558_v1  ;;  %v5575_v19 = vld [vmem:[%s16393_s5 + $0x43f8] sm:$0xff]  ;;  %v5546_v1 = vld [vmem:[%s16393_s5 + $0x4310] sm:$0xff] }
 0xb03   :  { %7020 = vmatpush.msrb.mxu3 %v5527_v34  ;;  %7002 = vmatpush.msrb.mxu2 %v5506_v53  ;;  %v5574_v60 = vld [vmem:[%s16393_s5 + $0x43f0] sm:$0xff]  ;;  %v5605_v34 = vld [vmem:[%s16393_s5 + $0x44e8] sm:$0xff] }
 0xb04   :  { %7049 = vmatpush.msra.mxu0 %v5537_v10  ;;  %7068 = vmatpush.msra.mxu1 %v5557_v23  ;;  %v5514_v53 = vld [vmem:[%s16393_s5 + $0x4210] sm:$0xff]  ;;  %v4520_v10 = vpop.permute.xlu0 %4519  ;;  %v5545_v23 = vld [vmem:[%s16393_s5 + $0x4308] sm:$0xff] }
 0xb05   :  { %7021 = vmatpush.msrb.mxu3 %v5526_v61  ;;  %7003 = vmatpush.msrb.mxu2 %v5505_v28  ;;  %v5573_v61 = vld [vmem:[%s16393_s5 + $0x43e8] sm:$0xff]  ;;  %v4526_v28 = vpop.permute.xlu1 %4525 }
 0xb06   :  { %7050 = vmatpush.msra.mxu0 %v5536_v21  ;;  %7069 = vmatpush.msra.mxu1 %v5556_v12  ;;  %v5513_v21 = vld [vmem:[%s16393_s5 + $0x4208] sm:$0xff]  ;;  %v5544_v12 = vld [vmem:[%s16393_s5 + $0x4300] sm:$0xff] }
 0xb07   :  { %7022 = vmatpush.msrb.mxu3 %v5525_v45  ;;  %7004 = vmatpush.msrb.mxu2 %v5504_v37  ;;  %v4523_v45 = vmul.f32 %v4520_v10, %v12802_v47  ;;  %v5572_v37 = vld [vmem:[%s16393_s5 + $0x43e0] sm:$0xff] }
 0xb08   :  { %7051 = vmatpush.msra.mxu0 %v5535_v22  ;;  %6993 = vmatmul.f32.gmra.mxu1 %v4493_v15  ;;  %v5603_v22 = vld [vmem:[%s16393_s5 + $0x44d8] sm:$0xff]  ;;  %v4503_v15 = vmul.f32 %v15959_v52, %v12802_v47  ;;  %v4512_v52 = vmul.f32 %v15599_v41, %v12553_v20  ;;  %v5621_v41 = vld [vmem:[%s16393_s5 + $0x4568] sm:$0xff]  ;;  %v5592_v10 = vld [vmem:[%s16393_s5 + $0x4480] sm:$0xff] }
 0xb09   :  { %7023 = vmatpush.msrb.mxu3 %v5524_v57  ;;  %7070 = vmatpush.msra.mxu1 %v5555_v29  ;;  %v4532_v57 = vmul.f32 %v4526_v28, %v12553_v20  ;;  %v5623_v29 = vld [vmem:[%s16393_s5 + $0x4578] sm:$0xff]  ;;  %v16728_v28 = vld [vmem:[#allocation13_spill] sm:$0xff] }
 0xb0a   :  { %7005 = vmatpush.msrb.mxu2 %v5503_v55  ;;  %7052 = vmatpush.msra.mxu0 %v5534_v2  ;;  %v5512_v55 = vld [vmem:[%s16393_s5 + $0x4200] sm:$0xff]  ;;  %v5571_v2 = vld [vmem:[%s16393_s5 + $0x43d8] sm:$0xff] }
 0xb0b   :  { %6947 = vmatmul.f32.gmra.mxu3 %v4473_v59  ;;  %7071 = vmatpush.msra.mxu1 %v5554_v9  ;;  %v5602_v9 = vld [vmem:[%s16393_s5 + $0x44d0] sm:$0xff] }
 0xb0c   :  { %7024 = vmatpush.msrb.mxu3 %v5523_v39  ;;  %7006 = vmatpush.msrb.mxu2 %v5502_v54  ;;  %v5622_v59 = vld [vmem:[%s16393_s5 + $0x4570] sm:$0xff]  ;;  %v5591_v39 = vld [vmem:[%s16393_s5 + $0x4478] sm:$0xff] }
 0xb0d   :  { %7053 = vmatpush.msra.mxu0 %v5533_v11  ;;  %7072 = vmatpush.msra.mxu1 %v5553_v7  ;;  %v5570_v54 = vld [vmem:[%s16393_s5 + $0x43d0] sm:$0xff]  ;;  %v5601_v11 = vld [vmem:[%s16393_s5 + $0x44c8] sm:$0xff] }
 0xb0e   :  { %7025 = vmatpush.msrb.mxu3 %v5522_v51  ;;  %7007 = vmatpush.msrb.mxu2 %v5501_v35  ;;  %v5590_v7 = vld [vmem:[%s16393_s5 + $0x4470] sm:$0xff]  ;;  %v5569_v51 = vld [vmem:[%s16393_s5 + $0x43c8] sm:$0xff]  ;;  %v4530_v35 = vpop.permute.xlu1 %4529 }
 0xb0f   :  { %7054 = vmatpush.msra.mxu0 %v5532_v17  ;;  %7073 = vmatpush.msra.mxu1 %v5552_v3  ;;  %v5600_v17 = vld [vmem:[%s16393_s5 + $0x44c0] sm:$0xff] }
 0xb10   :  { %7026 = vmatpush.msrb.mxu3 %v5521_v26  ;;  %7008 = vmatpush.msrb.mxu2 %v5500_v5  ;;  %v5620_v3 = vld [vmem:[%s16393_s5 + $0x4560] sm:$0xff]  ;;  %v5589_v26 = vld [vmem:[%s16393_s5 + $0x4468] sm:$0xff] }
 0xb11   :  { %7055 = vmatpush.msra.mxu0 %v5531_v30  ;;  %7074 = vmatpush.msra.mxu1 %v5551_v0  ;;  %v5568_v5 = vld [vmem:[%s16393_s5 + $0x43c0] sm:$0xff]  ;;  %v5599_v30 = vld [vmem:[%s16393_s5 + $0x44b8] sm:$0xff]  ;;  %v4533_v0 = vmul.f32 %v4530_v35, %v12802_v47 }
 0xb12   :  { %7027 = vmatpush.msrb.mxu3 %v5520_v18  ;;  %7009 = vmatpush.msrb.mxu2 %v5499_v25  ;;  %v5588_v18 = vld [vmem:[%s16393_s5 + $0x4460] sm:$0xff]  ;;  %v5619_v25 = vld [vmem:[%s16393_s5 + $0x4558] sm:$0xff] }
 0xb13   :  { %7056 = vmatpush.msra.mxu0 %v5530_v27  ;;  %7075 = vmatpush.msra.mxu1 %v5550_v36  ;;  %v5567_v27 = vld [vmem:[%s16393_s5 + $0x43b8] sm:$0xff]  ;;  %v5598_v36 = vld [vmem:[%s16393_s5 + $0x44b0] sm:$0xff]  ;;  %v5636_v35 = vld [vmem:[%s16393_s5 + $0x45e0] sm:$0xff] }
 0xb14   :  { %7028 = vmatpush.msrb.mxu3 %v5519_v62  ;;  %7010 = vmatpush.msrb.mxu2 %v5498_v16  ;;  %v5618_v62 = vld [vmem:[%s16393_s5 + $0x4550] sm:$0xff]  ;;  %v4513_v16 = vmul.f32 %v16023_v48, %v12802_v47  ;;  %v5617_v48 = vld [vmem:[%s16393_s5 + $0x4548] sm:$0xff] }
 0xb15   :  { %7057 = vmatpush.msra.mxu0 %v5529_v42  ;;  %7076 = vmatpush.msra.mxu1 %v5549_v13  ;;  %v5587_v42 = vld [vmem:[%s16393_s5 + $0x4458] sm:$0xff]  ;;  %v5566_v13 = vld [vmem:[%s16393_s5 + $0x43b0] sm:$0xff] }
 0xb16   :  { %7029 = vmatpush.msrb.mxu3 %v5518_v38  ;;  %7011 = vmatpush.msrb.mxu2 %v5497_v6  ;;  %v5586_v38 = vld [vmem:[%s16393_s5 + $0x4450] sm:$0xff]  ;;  %v5565_v6 = vld [vmem:[%s16393_s5 + $0x43a8] sm:$0xff] }
 0xb17   :  { %7058 = vmatpush.msra.mxu0 %v5528_v24  ;;  %7077 = vmatpush.msra.mxu1 %v5548_v14  ;;  %v5596_v24 = vld [vmem:[%s16393_s5 + $0x44a0] sm:$0xff] }
 0xb18   :  { %7030 = vmatpush.msrb.mxu3 %v5517_v33  ;;  %7059 = vmatmul.f32.vlgmr.msra.gmra.mxu0 %v4522_v56  ;;  %v5616_v14 = vld [vmem:[%s16393_s5 + $0x4540] sm:$0xff]  ;;  %v5585_v33 = vld [vmem:[%s16393_s5 + $0x4448] sm:$0xff] }
 0xb19   :  { %7135 = vmatpush.msrb.mxu0 %v5607_v43  ;;  %7012 = vmatpush.msrb.mxu2 %v5496_v46  ;;  %v5564_v56 = vld [vmem:[%s16393_s5 + $0x43a0] sm:$0xff]  ;;  %v5595_v43 = vld [vmem:[%s16393_s5 + $0x4498] sm:$0xff] }
 0xb1a   :  { %7013 = vmatmul.f32.vlgmr.msrb.gmra.mxu2 %v4502_v40  ;;  %7031 = vmatpush.msrb.mxu3 %v5516_v58  ;;  %v5615_v46 = vld [vmem:[%s16393_s5 + $0x4538] sm:$0xff]  ;;  %v5584_v58 = vld [vmem:[%s16393_s5 + $0x4440] sm:$0xff] }
 0xb1b   :  { %7078 = vmatpush.msra.mxu1 %v5547_v50  ;;  %7089 = vmatpush.msra.mxu2 %v5575_v19  ;;  %v5563_v40 = vld [vmem:[%s16393_s5 + $0x4398] sm:$0xff]  ;;  %v5594_v50 = vld [vmem:[%s16393_s5 + $0x4490] sm:$0xff] }
 0xb1c   :  { %7136 = vmatpush.msrb.mxu0 %v5606_v31  ;;  %7032 = vmatpush.msrb.mxu3 %v5515_v49  ;;  %v5614_v19 = vld [vmem:[%s16393_s5 + $0x4530] sm:$0xff]  ;;  %v5583_v31 = vld [vmem:[%s16393_s5 + $0x4438] sm:$0xff] }
 0xb1d   :  { %7079 = vmatpush.msra.mxu1 %v5546_v1  ;;  %7090 = vmatpush.msra.mxu2 %v5574_v60  ;;  %v5562_v49 = vld [vmem:[%s16393_s5 + $0x4390] sm:$0xff]  ;;  %v5593_v1 = vld [vmem:[%s16393_s5 + $0x4488] sm:$0xff] }
 0xb1e   :  { %7137 = vmatpush.msrb.mxu0 %v5605_v34  ;;  %7033 = vmatpush.msrb.mxu3 %v5514_v53  ;;  %v5613_v60 = vld [vmem:[%s16393_s5 + $0x4528] sm:$0xff]  ;;  %v5582_v34 = vld [vmem:[%s16393_s5 + $0x4430] sm:$0xff] }
 0xb1f   :  { %7080 = vmatpush.msra.mxu1 %v5545_v23  ;;  %7091 = vmatpush.msra.mxu2 %v5573_v61  ;;  %v5561_v53 = vld [vmem:[%s16393_s5 + $0x4388] sm:$0xff]  ;;  %v5612_v23 = vld [vmem:[%s16393_s5 + $0x4520] sm:$0xff] }
 0xb20   :  { %7138 = vmatpush.msrb.mxu0 %v5604_v63  ;;  %7034 = vmatpush.msrb.mxu3 %v5513_v21  ;;  %v5581_v61 = vld [vmem:[%s16393_s5 + $0x4428] sm:$0xff]  ;;  %v4546_v63 = vmul.f32 %v12553_v20, %v16728_v28  ;;  %v5560_v21 = vld [vmem:[%s16393_s5 + $0x4380] sm:$0xff] }
 0xb21   :  { %7062 = vmatmul.f32.gmra.mxu0 %v4523_v45  ;;  %7081 = vmatpush.msra.mxu1 %v5544_v12  ;;  %v7232_v12 = vld [vmem:[%s16394_s6 + $0x88] sm:$0xff]  ;;  %v5580_v45 = vld [vmem:[%s16393_s5 + $0x4420] sm:$0xff] }
 0xb22   :  { %7092 = vmatpush.msra.mxu2 %v5572_v37  ;;  %7139 = vmatpush.msrb.mxu0 %v5603_v22  ;;  %v4542_v37 = vmul.f32 %v16015_v32, %v12553_v20  ;;  %v5611_v22 = vld [vmem:[%s16393_s5 + $0x4518] sm:$0xff] }
 0xb23   :  { %7082 = vmatmul.f32.vlgmr.msra.gmra.mxu1 %v4532_v57  ;;  %7016 = vmatmul.f32.gmra.mxu2 %v4503_v15  ;;  %v5639_v15 = vld [vmem:[%s16393_s5 + $0x45f8] sm:$0xff]  ;;  %v7231_v57 = vld [vmem:[%s16394_s6 + $0x80] sm:$0xff] }
 0xb24   :  { %7158 = vmatpush.msrb.mxu1 %v5623_v29  ;;  %7035 = vmatpush.msrb.mxu3 %v5512_v55  ;;  %v5579_v32 = vld [vmem:[%s16393_s5 + $0x4418] sm:$0xff]  ;;  %v5610_v29 = vld [vmem:[%s16393_s5 + $0x4510] sm:$0xff] }
 0xb25   :  { %7093 = vmatpush.msra.mxu2 %v5571_v2  ;;  %7140 = vmatpush.msrb.mxu0 %v5602_v9  ;;  %v5638_v55 = vld [vmem:[%s16393_s5 + $0x45f0] sm:$0xff]  ;;  %v7230_v2 = vld [vmem:[%s16394_s6 + $0x78] sm:$0xff] }
 0xb26   :  { %7036 = vmatmul.f32.vlgmr.msrb.gmra.mxu3 %v4512_v52  ;;  %7159 = vmatpush.msrb.mxu1 %v5622_v59  ;;  %v5578_v9 = vld [vmem:[%s16393_s5 + $0x4410] sm:$0xff]  ;;  %v5609_v59 = vld [vmem:[%s16393_s5 + $0x4508] sm:$0xff] }
 0xb27   :  { %7112 = vmatpush.msra.mxu3 %v5591_v39  ;;  %7094 = vmatpush.msra.mxu2 %v5570_v54  ;;  %v5637_v52 = vld [vmem:[%s16393_s5 + $0x45e8] sm:$0xff]  ;;  %v7229_v39 = vld [vmem:[%s16394_s6 + $0x70] sm:$0xff] }
 0xb28   :  { %7141 = vmatpush.msrb.mxu0 %v5601_v11  ;;  %7160 = vmatpush.msrb.mxu1 %v5621_v41  ;;  %v5577_v54 = vld [vmem:[%s16393_s5 + $0x4408] sm:$0xff]  ;;  %v4540_v11 = vpop.permute.xlu2 %4539  ;;  %v5608_v41 = vld [vmem:[%s16393_s5 + $0x4500] sm:$0xff] }
 0xb29   :  { %7113 = vmatpush.msra.mxu3 %v5590_v7  ;;  %7095 = vmatpush.msra.mxu2 %v5569_v51  ;;  %v16729_v7 = vld [vmem:[#allocation9_spill] sm:$0xff] }
 0xb2a   :  { %7142 = vmatpush.msrb.mxu0 %v5600_v17  ;;  %7161 = vmatpush.msrb.mxu1 %v5620_v3  ;;  %v4547_v51 = vmul.f32 %v12802_v47, %v16729_v7  ;;  %v16730_v17 = vld [vmem:[#allocation10_spill] sm:$0xff] }
 0xb2b   :  { %7114 = vmatpush.msra.mxu3 %v5589_v26  ;;  %7096 = vmatpush.msra.mxu2 %v5568_v5  ;;  %v4548_v3 = vmul.f32 %v12553_v20, %v16730_v17  ;;  %v7228_v26 = vld [vmem:[%s16394_s6 + $0x68] sm:$0xff]  ;;  %v4543_v5 = vmul.f32 %v4540_v11, %v12802_v47 }
 0xb2c   :  { %7143 = vmatpush.msrb.mxu0 %v5599_v30  ;;  %7085 = vmatmul.f32.gmra.mxu1 %v4533_v0  ;;  %v5576_v30 = vld [vmem:[%s16393_s5 + $0x4400] sm:$0xff]  ;;  %v5635_v0 = vld [vmem:[%s16393_s5 + $0x45d8] sm:$0xff] }
 0xb2d   :  { %7115 = vmatpush.msra.mxu3 %v5588_v18  ;;  %7162 = vmatpush.msrb.mxu1 %v5619_v25  ;;  %v7227_v18 = vld [vmem:[%s16394_s6 + $0x60] sm:$0xff]  ;;  %v16731_v25 = vld [vmem:[#allocation11_spill] sm:$0xff] }
 0xb2e   :  { %7097 = vmatpush.msra.mxu2 %v5567_v27  ;;  %7144 = vmatpush.msrb.mxu0 %v5598_v36  ;;  %v4544_v27 = vmul.f32 %v12553_v20, %v16731_v25  ;;  %v5634_v36 = vld [vmem:[%s16393_s5 + $0x45d0] sm:$0xff] }
 0xb2f   :  { %7039 = vmatmul.f32.gmra.mxu3 %v4513_v16  ;;  %7163 = vmatpush.msrb.mxu1 %v5618_v62  ;;  %v7226_v62 = vld [vmem:[%s16394_s6 + $0x58] sm:$0xff]  ;;  %v5633_v16 = vld [vmem:[%s16393_s5 + $0x45c8] sm:$0xff] }
 0xb30   :  { %7116 = vmatpush.msra.mxu3 %v5587_v42  ;;  %7098 = vmatpush.msra.mxu2 %v5566_v13  ;;  %v7225_v42 = vld [vmem:[%s16394_s6 + $0x50] sm:$0xff]  ;;  %v5632_v13 = vld [vmem:[%s16393_s5 + $0x45c0] sm:$0xff] }
 0xb31   :  { %7145 = vmatpush.msrb.mxu0 %v5597_v44  ;;  %7164 = vmatpush.msrb.mxu1 %v5617_v48  ;;  %v16732_v44 = vld [vmem:[#allocation12_spill] sm:$0xff] }
 0xb32   :  { %7117 = vmatpush.msra.mxu3 %v5586_v38  ;;  %7099 = vmatpush.msra.mxu2 %v5565_v6  ;;  %v4549_v48 = vmul.f32 %v12802_v47, %v16732_v44  ;;  %v5631_v38 = vld [vmem:[%s16393_s5 + $0x45b8] sm:$0xff]  ;;  %v16733_v6 = vld [vmem:[#allocation18_spill] sm:$0xff] }
 0xb33   :  { %7146 = vmatpush.msrb.mxu0 %v5596_v24  ;;  %7165 = vmatpush.msrb.mxu1 %v5616_v14  ;;  %v16734_v24 = vld [vmem:[#allocation8_spill] sm:$0xff] }
 0xb34   :  { %7118 = vmatpush.msra.mxu3 %v5585_v33  ;;  %7100 = vmatpush.msra.mxu2 %v5564_v56  ;;  %v4545_v14 = vmul.f32 %v12802_v47, %v16734_v24  ;;  %v5630_v33 = vld [vmem:[%s16393_s5 + $0x45b0] sm:$0xff]  ;;  %v5629_v56 = vld [vmem:[%s16393_s5 + $0x45a8] sm:$0xff] }
 0xb35   :  { %7147 = vmatpush.msrb.mxu0 %v5595_v43  ;;  %7166 = vmatpush.msrb.mxu1 %v5615_v46  ;;  %v5628_v43 = vld [vmem:[%s16393_s5 + $0x45a0] sm:$0xff]  ;;  %v5627_v46 = vld [vmem:[%s16393_s5 + $0x4598] sm:$0xff] }
 0xb36   :  { %7119 = vmatpush.msra.mxu3 %v5584_v58  ;;  %7101 = vmatpush.msra.mxu2 %v5563_v40  ;;  %v5626_v58 = vld [vmem:[%s16393_s5 + $0x4590] sm:$0xff]  ;;  %v5625_v40 = vld [vmem:[%s16393_s5 + $0x4588] sm:$0xff] }
 0xb37   :  { %7148 = vmatpush.msrb.mxu0 %v5594_v50  ;;  %7167 = vmatpush.msrb.mxu1 %v5614_v19  ;;  %v5624_v50 = vld [vmem:[%s16393_s5 + $0x4580] sm:$0xff]  ;;  %v16735_v19 = vld [vmem:[#allocation14_spill] sm:$0xff] }
 0xb38   :  { %7120 = vmatpush.msra.mxu3 %v5583_v31  ;;  %7102 = vmatpush.msra.mxu2 %v5562_v49  ;;  %v4550_v31 = vmul.f32 %v12553_v20, %v16735_v19  ;;  %v6488_v49 = vpop.f32.mrf.mxu3 }
 0xb39   :  { %7149 = vmatpush.msrb.mxu0 %v5593_v1  ;;  %7168 = vmatpush.msrb.mxu1 %v5613_v60  ;;  %v16736_v1 = vld [vmem:[#allocation15_spill] sm:$0xff] }
 0xb3a   :  { %7121 = vmatpush.msra.mxu3 %v5582_v34  ;;  %7103 = vmatpush.msra.mxu2 %v5561_v53  ;;  %v4551_v60 = vmul.f32 %v12802_v47, %v16736_v1  ;;  %v6511_v34 = vpop.f32.mrf.mxu0  ;;  %v6489_v47 = vadd.f32 %v6488_v49, %v15628_v4 }
 0xb3b   :  { %7150 = vmatpush.msrb.mxu0 %v5592_v10  ;;  %7169 = vmatpush.msrb.mxu1 %v5612_v23  ;;  %v6534_v10 = vpop.f32.mrf.mxu1 }
 0xb3c   :  { %7122 = vmatpush.msra.mxu3 %v5581_v61  ;;  %7151 = vmatmul.f32.vlgmr.msrb.gmra.mxu0 %v4546_v63  ;;  %v6557_v61 = vpop.f32.mrf.mxu2 }
 0xb3d   :  { %7104 = vmatpush.msra.mxu2 %v5560_v21  ;;  %7247 = vmatpush.msra.mxu0 %v7232_v12 }
 0xb3e   :  { %7105 = vmatmul.f32.vlgmr.msra.gmra.mxu2 %v4542_v37  ;;  %7123 = vmatpush.msra.mxu3 %v5580_v45 }
 0xb3f   :  { %7170 = vmatpush.msrb.mxu1 %v5611_v22  ;;  %7181 = vmatpush.msrb.mxu2 %v5639_v15 }
 0xb40   :  { %7248 = vmatpush.msra.mxu0 %v7231_v57  ;;  %7124 = vmatpush.msra.mxu3 %v5579_v32  ;;  %v6577_v53 = vpop.f32.mrf.mxu3 }
 0xb41   :  { %7171 = vmatpush.msrb.mxu1 %v5610_v29  ;;  %7182 = vmatpush.msrb.mxu2 %v5638_v55 }
 0xb42   :  { %7249 = vmatpush.msra.mxu0 %v7230_v2  ;;  %7125 = vmatpush.msra.mxu3 %v5578_v9  ;;  %v6600_v23 = vpop.f32.mrf.mxu0  ;;  %v6512_v9 = vadd.f32 %v6511_v34, %v6489_v47 }
 0xb43   :  { %7172 = vmatpush.msrb.mxu1 %v5609_v59  ;;  %7183 = vmatpush.msrb.mxu2 %v5637_v52  ;;  %v6623_v28 = vpop.f32.mrf.mxu1 }
 0xb44   :  { %7250 = vmatpush.msra.mxu0 %v7229_v39  ;;  %7126 = vmatpush.msra.mxu3 %v5577_v54  ;;  %v6646_v21 = vpop.f32.mrf.mxu2  ;;  %v6535_v39 = vadd.f32 %v6534_v10, %v6512_v9 }
 0xb45   :  { %7154 = vmatmul.f32.gmra.mxu0 %v4547_v51  ;;  %7173 = vmatpush.msrb.mxu1 %v5608_v41 }
 0xb46   :  { %7184 = vmatpush.msrb.mxu2 %v5636_v35  ;;  %7174 = vmatmul.f32.vlgmr.msrb.gmra.mxu1 %v4548_v3  ;;  %v6558_v41 = vadd.f32 %v6557_v61, %v6535_v39  ;;  %v6578_v35 = vadd.f32 %v6577_v53, %v15789_v8 }
 0xb47   :  { %7251 = vmatpush.msra.mxu0 %v7228_v26  ;;  %7108 = vmatmul.f32.gmra.mxu2 %v4543_v5 }
 0xb48   :  { %7127 = vmatpush.msra.mxu3 %v5576_v30  ;;  %7185 = vmatpush.msrb.mxu2 %v5635_v0  ;;  %v6580_v63 = vpop.f32.mrf.mxu3  ;;  %v6601_v5 = vadd.f32 %v6600_v23, %v6578_v35 }
 0xb49   :  { %7128 = vmatmul.f32.vlgmr.msra.gmra.mxu3 %v4544_v27  ;;  %7252 = vmatpush.msra.mxu0 %v7227_v18  ;;  %v6581_v7 = vadd.f32 %v6580_v63, %v6558_v41  ;;  %v7233_v41 = vld [vmem:[%s16394_s6 + $0x90] sm:$0xff]  ;;  %s7802_s6 = smov [#allocation2]  }
 0xb4a   :  { %7186 = vmatpush.msrb.mxu2 %v5634_v36  ;;  %v6603_v12 = vpop.f32.mrf.mxu0  ;;  %v6624_v18 = vadd.f32 %v6623_v28, %v6601_v5  ;;  %7366 = vmatpush.msk.msra.mxu1 %vm374_vm9, %v7233_v41  ;;  %s7328_s10 = sshll.u32 %s7802_s6, 4  ;;  %s7329_s10 = int_to_ptr.vmem [resolvable:$true] %s7328_s10 }
 0xb4b   :  { %7253 = vmatpush.msra.mxu0 %v7226_v62  ;;  %v6626_v37 = vpop.f32.mrf.mxu1  ;;  %v6604_v3 = vadd.f32 %v6603_v12, %v6581_v7 }
 0xb4c   :  { %7187 = vmatpush.msrb.mxu2 %v5633_v16  ;;  %v6649_v20 = vpop.f32.mrf.mxu2  ;;  %v6647_v36 = vadd.f32 %v6646_v21, %v6624_v18 }
 0xb4d   :  { %7254 = vmatpush.msra.mxu0 %v7225_v42  ;;  %v6627_v0 = vadd.f32 %v6626_v37, %v6604_v3 }
 0xb4e   :  { %7188 = vmatpush.msrb.mxu2 %v5632_v13  ;;  %7365 = vmatmul.msk.f32.vlgmr.msra.gmra.mxu0 %vm3793_vm5, %v16733_v6 }
 0xb4f   :  { %7177 = vmatmul.f32.gmra.mxu1 %v4549_v48  ;;  %v6650_v4 = vadd.f32 %v6649_v20, %v6627_v0  ;;  %v7709_v20 = vld [vmem:[%s16391_s3] sm:$0xff]  ;;  %s7801_s3 = smov 124  }
 0xb50   :  { %7189 = vmatpush.msrb.mxu2 %v5631_v38  ;;  %v6669_v45 = vpop.f32.mrf.mxu3  ;;  %7702 = vlog2.f32 %v7709_v20 }
 0xb51   :  { %7131 = vmatmul.f32.gmra.mxu3 %v4545_v14  ;;  %v6670_v16 = vadd.f32 %v6669_v45, %v6647_v36 }
 0xb52   :  { %7190 = vmatpush.msrb.mxu2 %v5630_v33  ;;  %v6692_v22 = vpop.f32.mrf.mxu0 }
 0xb53   :  { %v6715_v15 = vpop.f32.mrf.mxu1  ;;  %v6693_v48 = vadd.f32 %v6692_v22, %v6670_v16 }
 0xb54   :  { %7191 = vmatpush.msrb.mxu2 %v5629_v56  ;;  %v6738_v32 = vpop.f32.mrf.mxu2 }
 0xb55   :  { %v6716_v24 = vadd.f32 %v6715_v15, %v6693_v48 }
 0xb56   :  { %7192 = vmatpush.msrb.mxu2 %v5628_v43 }
 0xb57   :  { %v6739_v56 = vadd.f32 %v6738_v32, %v6716_v24  ;;  %7367 = vmatmul.msk.f32.vlgmr.msra.gmra.mxu1 %vm370_vm10, %v7709_v20 }
 0xb58   :  { %7193 = vmatpush.msrb.mxu2 %v5627_v46  ;;  %v6672_v57 = vpop.f32.mrf.mxu3 }
 0xb59   :  { %v6673_v62 = vadd.f32 %v6672_v57, %v6650_v4 }
 0xb5a   :  { %7194 = vmatpush.msrb.mxu2 %v5626_v58  ;;  %v6695_v29 = vpop.f32.mrf.mxu0 }
 0xb5b   :  { %v6718_v2 = vpop.f32.mrf.mxu1  ;;  %v6696_v44 = vadd.f32 %v6695_v29, %v6673_v62 }
 0xb5c   :  { %7195 = vmatpush.msrb.mxu2 %v5625_v40  ;;  %v6741_v52 = vpop.f32.mrf.mxu2 }
 0xb5d   :  { %v6719_v6 = vadd.f32 %v6718_v2, %v6696_v44 }
 0xb5e   :  { %7196 = vmatpush.msrb.mxu2 %v5624_v50 }
 0xb5f   :  { %7197 = vmatmul.f32.vlgmr.msrb.gmra.mxu2 %v4550_v31  ;;  %v6742_v14 = vadd.f32 %v6741_v52, %v6719_v6  ;;  %v7703_v52 = vpop.eup %7702 }
 0xb60   :  { %v6761_v55 = vpop.f32.mrf.mxu3  ;;  %v7288_v7 = vmul.f32 0.6931472, %v7703_v52 }
 0xb61   :  { %v6762_v58 = vadd.f32 %v6761_v55, %v6739_v56 }
 0xb62   :  { %v6784_v59 = vpop.f32.mrf.mxu0 }
 0xb63   :  { %v6807_v54 = vpop.f32.mrf.mxu1  ;;  %v6785_v31 = vadd.f32 %v6784_v59, %v6762_v58 }
 0xb64   :  { %v6830_v51 = vpop.f32.mrf.mxu2 }
 0xb65   :  { %v6808_v34 = vadd.f32 %v6807_v54, %v6785_v31 }
 0xb67   :  { %7200 = vmatmul.f32.gmra.mxu2 %v4551_v60  ;;  %v6831_v10 = vadd.f32 %v6830_v51, %v6808_v34  ;;  %v7234_v34 = vperm.slane %v7233_v41, 4 }
 0xb68   :  { %v6764_v11 = vpop.f32.mrf.mxu3 }
 0xb69   :  { %v6765_v43 = vadd.f32 %v6764_v11, %v6742_v14 }
 0xb6a   :  { %v6787_v17 = vpop.f32.mrf.mxu0 }
 0xb6b   :  { %v6810_v30 = vpop.f32.mrf.mxu1  ;;  %v6788_v40 = vadd.f32 %v6787_v17, %v6765_v43  ;;  %v7289_v17 = vsub.f32 0.0, %v7288_v7 }
 0xb6c   :  { %v6833_v27 = vpop.f32.mrf.mxu2 }
 0xb6d   :  { %v6811_v49 = vadd.f32 %v6810_v30, %v6788_v40  ;;  %7704 = vlog2.f32 %v7289_v17  ;;  %v16740_v17 = vmov 0.0  }
 0xb6f   :  { %v6834_v53 = vadd.f32 %v6833_v27, %v6811_v49 }
 0xb70   :  { %v6853_v26 = vpop.f32.mrf.mxu3 }
 0xb71   :  { %v6854_v28 = vadd.f32 %v6853_v26, %v6831_v10  ;;  %v16738_v10 = vld [vmem:[#allocation17_spill] sm:$0xff] }
 0xb72   :  { %v6876_v25 = vpop.f32.mrf.mxu0 }
 0xb73   :  { %v6899_v42 = vpop.f32.mrf.mxu1  ;;  %v6877_v45 = vadd.f32 %v6876_v25, %v6854_v28  ;;  %v7705_v27 = vpop.eup %7704 }
 0xb75   :  { %v6900_v15 = vadd.f32 %v6899_v42, %v6877_v45  ;;  %v7291_v42 = vmul.f32 0.6931472, %v7705_v27 }
 0xb77   :  { %v7292_v44 = vsub.f32 0.0, %v7291_v42 }
 0xb78   :  { %v6856_v13 = vpop.f32.mrf.mxu3 }
 0xb79   :  { %v6922_v38 = vpop.f32.mrf.mxu2  ;;  %v6857_v23 = vadd.f32 %v6856_v13, %v6834_v53  ;;  %7294 = vrot.lane.b32.xlu2 %v7292_v44, %s7801_s3 }
 0xb7a   :  { %v6879_v8 = vpop.f32.mrf.mxu0  ;;  %v6923_v55 = vadd.f32 %v6922_v38, %v6900_v15 }
 0xb7b   :  { %v6902_v46 = vpop.f32.mrf.mxu1  ;;  %v6880_v21 = vadd.f32 %v6879_v8, %v6857_v23 }
 0xb7d   :  { %v6903_v22 = vadd.f32 %v6902_v46, %v6880_v21 }
 0xb82   :  { %v6968_v50 = vpop.f32.mrf.mxu0  ;;  %v6925_v19 = vpop.f32.mrf.mxu2 }
 0xb83   :  { %v6991_v1 = vpop.f32.mrf.mxu1  ;;  %v6926_v57 = vadd.f32 %v6925_v19, %v6903_v22 }
 0xb85   :  { %v6945_v33 = vpop.f32.mrf.mxu3 }
 0xb86   :  { %v6946_v2 = vadd.f32 %v6945_v33, %v6923_v55 }
 0xb88   :  { %v6969_v54 = vadd.f32 %v6968_v50, %v6946_v2 }
 0xb8a   :  { %v6971_v63 = vpop.f32.mrf.mxu0  ;;  %v6992_v3 = vadd.f32 %v6991_v1, %v6969_v54 }
 0xb8b   :  { %v6994_v37 = vpop.f32.mrf.mxu1 }
 0xb8e   :  { %v6948_v60 = vpop.f32.mrf.mxu3 }
 0xb8f   :  { %v6949_v47 = vadd.f32 %v6948_v60, %v6926_v57  ;;  %v16737_v60 = vld [vmem:[#allocation16_spill] sm:$0xff] }
 0xb91   :  { %v6972_v39 = vadd.f32 %v6971_v63, %v6949_v47 }
 0xb93   :  { %v6995_v51 = vadd.f32 %v6994_v37, %v6972_v39 }
 0xb95   :  { %v7060_v32 = vpop.f32.mrf.mxu0 }
 0xb9d   :  { %v7014_v61 = vpop.f32.mrf.mxu2 }
 0xb9e   :  { %v7063_v35 = vpop.f32.mrf.mxu0  ;;  %v7015_v30 = vadd.f32 %v7014_v61, %v6992_v3 }
 0xba0   :  { %v7083_v9 = vpop.f32.mrf.mxu1 }
 0xba6   :  { %v7017_v29 = vpop.f32.mrf.mxu2 }
 0xba7   :  { %v7018_v26 = vadd.f32 %v7017_v29, %v6995_v51  ;;  %v16739_v29 = vld [vmem:[#allocation5_spill] sm:$0xff] }
 0xba9   :  { %v7037_v12 = vpop.f32.mrf.mxu3  ;;  %v7086_v18 = vpop.f32.mrf.mxu1 }
 0xbaa   :  { %v7038_v4 = vadd.f32 %v7037_v12, %v7015_v30 }
 0xbac   :  { %v7061_v16 = vadd.f32 %v7060_v32, %v7038_v4 }
 0xbae   :  { %v7084_v6 = vadd.f32 %v7083_v9, %v7061_v16 }
 0xbb2   :  { %v7040_v59 = vpop.f32.mrf.mxu3 }
 0xbb3   :  { %v7041_v0 = vadd.f32 %v7040_v59, %v7018_v26 }
 0xbb5   :  { %v7064_v25 = vadd.f32 %v7063_v35, %v7041_v0 }
 0xbb7   :  { %v7087_v13 = vadd.f32 %v7086_v18, %v7064_v25 }
 0xbb9   :  { %v7152_v36 = vpop.f32.mrf.mxu0 }
 0xbc1   :  { %v7106_v11 = vpop.f32.mrf.mxu2 }
 0xbc2   :  { %v7107_v24 = vadd.f32 %v7106_v11, %v7084_v6  ;;  %v7155_v43 = vpop.f32.mrf.mxu0 }
 0xbc3   :  { %v7175_v48 = vpop.f32.mrf.mxu1 }
 0xbca   :  { %v7109_v62 = vpop.f32.mrf.mxu2 }
 0xbcb   :  { %v7110_v8 = vadd.f32 %v7109_v62, %v7087_v13  ;;  %v7256_v28 = vpop.f32.mrf.mxu0 }
 0xbcc   :  { %v7129_v5 = vpop.f32.mrf.mxu3  ;;  %v7178_v40 = vpop.f32.mrf.mxu1 }
 0xbcd   :  { %v7130_v56 = vadd.f32 %v7129_v5, %v7107_v24 }
 0xbcf   :  { %v7153_v58 = vadd.f32 %v7152_v36, %v7130_v56 }
 0xbd1   :  { %v7176_v31 = vadd.f32 %v7175_v48, %v7153_v58 }
 0xbd3   :  { %v7295_v37 = vpop.permute.xlu2 %7294 }
 0xbd4   :  { %v7132_v38 = vpop.f32.mrf.mxu3  ;;  %v7280_v63 = vpop.f32.mrf.mxu1 }
 0xbd5   :  { %v7133_v14 = vadd.f32 %v7132_v38, %v7110_v8 }
 0xbd7   :  { %v7156_v46 = vadd.f32 %v7155_v43, %v7133_v14 }
 0xbd9   :  { %v7179_v50 = vadd.f32 %v7178_v40, %v7156_v46 }
 0xbe2   :  { %v7198_v33 = vpop.f32.mrf.mxu2 }
 0xbe3   :  { %v7199_v1 = vadd.f32 %v7198_v33, %v7176_v31 }
 0xbea   :  { %v7201_v19 = vpop.f32.mrf.mxu2 }
 0xbeb   :  { %v7202_v49 = vadd.f32 %v7201_v19, %v7179_v50 }
 0xbed   :  { %7218 = vmatpush.msrb.mxu3 %v7202_v49 }
 0xbef   :  { %7219 = vmatpush.msrb.mxu3 %v7199_v1 }
 0xbf0   :  { %7364 = vmatmul.msk.f32.vlgmr.msrb.gmra.mxu3 %vm53_vm8, %v16737_v60 }
 0xc73   :  { %v7221_v53 = vpop.f32.mrf.mxu3 }
 0xc74   :  { %v7224_v23 = vmul.f32 %v7221_v53, %v16738_v10 }
 0xc76   :  { %v7235_v61 = vadd.f32 %v7234_v34, %v7224_v23 }
 0xc78   :  { %v7259_v21 = vadd.f32 %v7256_v28, %v7235_v61 }
 0xc7a   :  { %v7283_v12 = vadd.f32 %v7280_v63, %v7259_v21 }
 0xc7c   :  { %v7285_v45 = vmul.f32 0.01, %v7283_v12  ;;  %vm7284_vm6 = vcmp.gt.f32.partialorder %v7283_v12, 0.0 }
 0xc7e   :  { %v7286_v22 = vsel %vm7284_vm6, %v7283_v12, %v7285_v45 }
 0xc7f   :  { %v7297_v20 = vadd.f32 %v7295_v37, %v7286_v22 }
 0xc81   :  { %v7298_v15 = vsub.f32 0.0, %v7297_v20 }
 0xc83   :  { %v7299_v57 = vsel %vm370_vm10, %v7298_v15, -inf }
 0xc84   :  { %7300 = vmax.xlane.f32.xlu1 %v7299_v57 }
 0xcf7   :  { %v7301_v32 = vpop.xlane.xlu1 %7300 }
 0xcf8   :  { %vm7302_vm7 = vcmp.eq.f32.partialorder %v7298_v15, %v7301_v32 }
 0xcf9   :  { %v7303_v55 = vsel %vm7302_vm7, %v16739_v29, 4 }
 0xcfa   :  { %v7304_v47 = vsel %vm370_vm10, %v7303_v55, 2147483647 }
 0xcfb   :  { %v7306_v2 = vshra.s32 %v7304_v47, 16  ;;  %v7305_v59 = vand.u32 65535, %v7304_v47 }
 0xcfd   :  { %v7308_v9 = vcvt.s32.f32 %v7306_v2  ;;  %v7307_v39 = vcvt.s32.f32 %v7305_v59 }
 0xcff   :  { %7309 = vmin.xlane.f32.xlu2 %v7308_v9 }
 0xd72   :  { %v7310_v52 = vpop.xlane.xlu2 %7309 }
 0xd73   :  { %vm7311_vm8 = vcmp.eq.f32.partialorder %v7308_v9, %v7310_v52  ;;  %v7316_v11 = vcvt.f32.s32 %v7310_v52 }
 0xd74   :  { %v7312_v54 = vsel %vm7311_vm8, %v7307_v39, inf }
 0xd75   :  { %7313 = vmin.xlane.f32.xlu0 %v7312_v54  ;;  %v7317_v7 = vshll.u32 %v7316_v11, 16 }
 0xde8   :  { %v7314_v41 = vpop.xlane.xlu0 %7313 }
 0xde9   :  { %v7315_v51 = vcvt.f32.s32 %v7314_v41 }
 0xdeb   :  { %v7318_v35 = vadd.s32 %v7317_v7, %v7315_v51 }
 0xded   :  { %vm7319_vm9 = vcmp.eq.s32.totalorder %v16739_v29, %v7318_v35 }
 0xdee   :  { %v7368_v3 = vsel %vm7319_vm9, 1.0, %v16740_v17 }
 0xdef   :  { %7322 = vst [vmem:[#allocation2] sm:$0xff] %v7368_v3 }
 0xdf0   :  { %7333 = dma.vmem_to_hbm [thread:$0]  %s7329_s10, 128, %s7331_s12, [#allocation3]  }
 0xdf1   :  { %7734 = dma.done.wait [#allocation3], 128  }
 0xdf2   :  { %7735 = vsyncadd [#allocation3], 4294967168 }
 0xdf3   :  { %7338 = vsyncpa [#allocation3], 1 }

</bundles_post_ra>
